<compile_context>
chip_gen: v5e
topology: v5e:2x2
jax: 0.10.0
libtpu: 0.0.40
codegen_flags: <defaults>
</compile_context>

<pallas_src>
import functools

import jax
import jax.numpy as jnp
from jax.experimental import pallas as pl
from jax.experimental.pallas import tpu as pltpu


def _cbam_kernel(x_ref, w1t_ref, w2t_ref, wconv_ref, bconv_ref, o_ref, slab_ref,
                 *, H, W, C, K, Bt, PADL):
    """Fused CBAM forward for Bt batch elements.

    x_ref     : (Bt, C, HW) f32 VMEM        -- input block, native NCHW layout (HW on lanes)
    w1t_ref   : (C, Cr)     f32 VMEM        -- SE conv1 weight, transposed
    w2t_ref   : (Cr, C)     f32 VMEM        -- SE conv2 weight, transposed
    wconv_ref : (2*K*K,)    f32 SMEM        -- 7x7 spatial conv weight, flat [c, ky, kx]
    bconv_ref : (1,)        f32 SMEM        -- spatial conv bias
    o_ref     : (Bt, C, HW) f32 VMEM        -- output block
    slab_ref  : (2, Bt, HW + 2*PADL) f32 VMEM -- lane-padded [max, avg] maps (zero borders)
    """
    HW = H * W
    P = K // 2

    x = x_ref[...]                                        # (Bt, C, HW)

    # ---------------- Channel attention ----------------
    # Global max / avg pool over the spatial lanes -> (Bt, C).
    mx = jnp.max(x, axis=2)
    av = jnp.sum(x, axis=2) * (1.0 / HW)

    w1t = w1t_ref[...]                                    # (C, Cr)
    w2t = w2t_ref[...]                                    # (Cr, C)

    # Fused SE: relu(mx@W1)@W2 + relu(av@W1)@W2 == (relu(mx@W1) + relu(av@W1)) @ W2,
    # so the second (wide) projection is done once.
    h = (jnp.maximum(jnp.dot(mx, w1t, preferred_element_type=jnp.float32), 0.0)
         + jnp.maximum(jnp.dot(av, w1t, preferred_element_type=jnp.float32), 0.0))
    ca = jax.nn.sigmoid(jnp.dot(h, w2t, preferred_element_type=jnp.float32))   # (Bt, C)

    out1 = x * ca[:, :, None]                             # broadcast over HW lanes

    # ---------------- Spatial attention ----------------
    cmax = jnp.max(out1, axis=1)                          # (Bt, HW) max over channels
    cavg = jnp.sum(out1, axis=1) * (1.0 / C)              # (Bt, HW) mean over channels
    maps = jnp.stack([cmax, cavg], axis=0)                # (2, Bt, HW); ch0=max, ch1=avg

    # Zero-bordered, lane-aligned slab: borders and interior are written with stores whose
    # lane offsets/sizes are multiples of 128 (no masked partial stores).
    slab_ref[:, :, :PADL] = jnp.zeros((2, Bt, PADL), jnp.float32)
    slab_ref[:, :, PADL + HW:] = jnp.zeros((2, Bt, PADL), jnp.float32)
    slab_ref[:, :, PADL:PADL + HW] = maps

    # Direct KxK "same" conv on the flat maps: for output p = y*W + x the tap (ky, kx) reads
    # flat index p + (dy*W + dx).  Reads that fall off the top/bottom rows hit the zero
    # borders of the slab; reads that wrap across a row are killed by a per-dx column mask.
    col = jax.lax.broadcasted_iota(jnp.int32, (1, 1, HW), 2) % W
    acc = jnp.full((Bt, HW), bconv_ref[0], dtype=jnp.float32)
    for kx in range(K):
        dx = kx - P
        if dx > 0:
            keep = col < (W - dx)
        elif dx < 0:
            keep = col >= (-dx)
        else:
            keep = None
        for ky in range(K):
            dy = ky - P
            s = dy * W + dx
            win = slab_ref[:, :, PADL + s:PADL + s + HW]  # (2, Bt, HW), shared by both channels
            if keep is not None:
                win = jnp.where(keep, win, 0.0)
            acc = (acc
                   + wconv_ref[ky * K + kx] * win[0]
                   + wconv_ref[K * K + ky * K + kx] * win[1])

    sa = jax.nn.sigmoid(acc)                              # (Bt, HW)

    # ---------------- Combine + residual ----------------
    o_ref[...] = (out1 * sa[:, None, :] + x).astype(o_ref.dtype)


def cbam_pallas(x_nchw, w1, w2, wconv, bconv, *, block_bytes_budget=2 << 20):
    """CBAMBlock forward. x_nchw: (B, C, H, W). Returns (B, C, H, W) of the input dtype."""
    B, C, H, W = x_nchw.shape
    Cr = w1.shape[0]
    K = wconv.shape[-1]
    P = K // 2
    HW = H * W

    in_dtype = x_nchw.dtype
    x = x_nchw.reshape(B, C, HW).astype(jnp.float32)      # free view of NCHW, no transpose
    w1t = jnp.asarray(w1, jnp.float32).T                  # (C, Cr)
    w2t = jnp.asarray(w2, jnp.float32).T                  # (Cr, C)
    wflat = jnp.asarray(wconv, jnp.float32).reshape(-1)   # (2*K*K,)
    b = jnp.asarray(bconv, jnp.float32).reshape(-1)       # (1,)

    # Batch tile: biggest divisor of B whose per-block footprint fits a conservative budget
    # (keeps double-buffered in+out blocks well inside v7x's 64 MiB VMEM as well).
    per_img_bytes = C * HW * 4
    bt = max(1, min(B, block_bytes_budget // max(per_img_bytes, 1)))
    while B % bt:
        bt -= 1

    # Lane padding for the conv slab: >= max flat shift, rounded up to a multiple of 128 so
    # border/interior stores stay aligned.
    PADL = max(128, -(-(P * W + P) // 128) * 128)

    kernel = functools.partial(_cbam_kernel, H=H, W=W, C=C, K=K, Bt=bt, PADL=PADL)

    out = pl.pallas_call(
        kernel,
        out_shape=jax.ShapeDtypeStruct((B, C, HW), jnp.float32),
        grid_spec=pltpu.PrefetchScalarGridSpec(
            num_scalar_prefetch=0,
            grid=(B // bt,),
            in_specs=[
                pl.BlockSpec((bt, C, HW), lambda i: (i, 0, 0)),
                pl.BlockSpec((C, Cr), lambda i: (0, 0)),
                pl.BlockSpec((Cr, C), lambda i: (0, 0)),
                pl.BlockSpec(memory_space=pltpu.MemorySpace.SMEM),
                pl.BlockSpec(memory_space=pltpu.MemorySpace.SMEM),
            ],
            out_specs=pl.BlockSpec((bt, C, HW), lambda i: (i, 0, 0)),
            scratch_shapes=[pltpu.VMEM((2, bt, HW + 2 * PADL), jnp.float32)],
        ),
        compiler_params=pltpu.CompilerParams(
            dimension_semantics=("parallel",),      # batch steps are independent -> megacore/v7x
            vmem_limit_bytes=32 * 1024 * 1024,
        ),
    )(x, w1t, w2t, wflat, b)

    return out.reshape(B, C, H, W).astype(in_dtype)


def _cbam_ref(x, w1, w2, wconv, bconv):
    """Pure-JAX NCHW reference matching the PyTorch module semantics."""
    mx = jnp.max(x, axis=(2, 3))                           # (B, C)
    av = jnp.mean(x, axis=(2, 3))                          # (B, C)

    def se(p):
        return jnp.maximum(p @ w1.T, 0.0) @ w2.T

    ca = jax.nn.sigmoid(se(mx) + se(av))                   # (B, C)
    out = x * ca[:, :, None, None]

    cmax = jnp.max(out, axis=1, keepdims=True)
    cavg = jnp.mean(out, axis=1, keepdims=True)
    cc = jnp.concatenate([cmax, cavg], axis=1)             # (B, 2, H, W)
    P = wconv.shape[-1] // 2
    conv = jax.lax.conv_general_dilated(
        cc, wconv, (1, 1), [(P, P), (P, P)],
        dimension_numbers=("NCHW", "OIHW", "NCHW")) + bconv[None, :, None, None]
    sa = jax.nn.sigmoid(conv)
    return out * sa + x


if __name__ == "__main__":
    B, C, H, W = 2, 32, 16, 16
    reduction, K = 16, 7
    Cr = C // reduction

    key = jax.random.PRNGKey(0)
    kx_, k1, k2, k3, k4 = jax.random.split(key, 5)

    x = jax.random.normal(kx_, (B, C, H, W), jnp.float32)

    # Deterministic kaiming_normal(mode='fan_out')-style init for the convs.
    w1 = jax.random.normal(k1, (Cr, C), jnp.float32) * (2.0 / Cr) ** 0.5     # se conv1 (1x1, no bias)
    w2 = jax.random.normal(k2, (C, Cr), jnp.float32) * (2.0 / C) ** 0.5      # se conv2 (1x1, no bias)
    wconv = jax.random.normal(k3, (1, 2, K, K), jnp.float32) * (2.0 / (K * K)) ** 0.5
    bconv = jax.random.normal(k4, (1,), jnp.float32) * 0.1

    out = jax.block_until_ready(cbam_pallas(x, w1, w2, wconv, bconv))

    ref = _cbam_ref(x, w1, w2, wconv, bconv)
    assert out.shape == x.shape and out.dtype == x.dtype
    err = float(jnp.max(jnp.abs(out - ref)))
    assert jnp.allclose(out, ref, atol=1e-4, rtol=1e-4), f"max abs err {err}"
    print("KERNEL_OK")
</pallas_src>

<mosaic_0001>
module attributes {stable_mosaic.version = 11 : i64} {
  func.func @_cbam_kernel(%arg0: i32, %arg1: memref<2x32x256xf32, #tpu.memory_space<vmem>>, %arg2: memref<32x2xf32, #tpu.memory_space<vmem>>, %arg3: memref<2x32xf32, #tpu.memory_space<vmem>>, %arg4: memref<98xf32, #tpu.memory_space<smem>>, %arg5: memref<1xf32, #tpu.memory_space<smem>>, %arg6: memref<2x32x256xf32, #tpu.memory_space<vmem>>, %arg7: memref<2x2x512xf32, #tpu.memory_space<vmem>>) attributes {dimension_semantics = [#tpu.dimension_semantics<parallel>], iteration_bounds = array<i64: 1>, scalar_prefetch = 0 : i64, scratch_operands = 1 : i64, tpu.core_type = #tpu.core_type<tc>, window_params = [{transform_indices = @transform_0, window_bounds = array<i64: 2, 32, 256>}, {pipeline_mode = #tpu.pipeline_mode<synchronous>, transform_indices = @transform_1, window_bounds = array<i64: 32, 2>}, {pipeline_mode = #tpu.pipeline_mode<synchronous>, transform_indices = @transform_2, window_bounds = array<i64: 2, 32>}, {transform_indices = @transform_3, window_bounds = array<i64: 98>}, {transform_indices = @transform_4, window_bounds = array<i64: 1>}, {transform_indices = @transform_5, window_bounds = array<i64: 2, 32, 256>}]} {
    %c0 = arith.constant 0 : index
    %c0_0 = arith.constant 0 : index
    %c0_1 = arith.constant 0 : index
    %0 = vector.load %arg1[%c0, %c0_0, %c0_1] : memref<2x32x256xf32, #tpu.memory_space<vmem>>, vector<2x32x256xf32>
    %cst = arith.constant dense<0xFF800000> : vector<2x32xf32>
    %1 = vector.multi_reduction <maximumf>, %0, %cst [2] : vector<2x32x256xf32> to vector<2x32xf32>
    %cst_2 = arith.constant dense<0.000000e+00> : vector<2x32xf32>
    %2 = vector.multi_reduction <add>, %0, %cst_2 [2] : vector<2x32x256xf32> to vector<2x32xf32>
    %cst_3 = arith.constant 3.906250e-03 : f32
    %3 = vector.broadcast %cst_3 : f32 to vector<2x32xf32>
    %4 = arith.mulf %2, %3 : vector<2x32xf32>
    %c0_4 = arith.constant 0 : index
    %c0_5 = arith.constant 0 : index
    %5 = vector.load %arg2[%c0_4, %c0_5] : memref<32x2xf32, #tpu.memory_space<vmem>>, vector<32x2xf32>
    %c0_6 = arith.constant 0 : index
    %c0_7 = arith.constant 0 : index
    %6 = vector.load %arg3[%c0_6, %c0_7] : memref<2x32xf32, #tpu.memory_space<vmem>>, vector<2x32xf32>
    %cst_8 = arith.constant dense<0.000000e+00> : vector<2x2xf32>
    %7 = tpu.matmul %1, %5, %cst_8 {dimension_numbers = #tpu.dot_dimension_numbers<[1], [0], [0], [1], [0, 0, 1, 1], [], []>} : vector<2x32xf32>, vector<32x2xf32>, vector<2x2xf32> -> vector<2x2xf32>
    %cst_9 = arith.constant 0.000000e+00 : f32
    %8 = vector.broadcast %cst_9 : f32 to vector<2x2xf32>
    %9 = arith.maximumf %7, %8 : vector<2x2xf32>
    %cst_10 = arith.constant dense<0.000000e+00> : vector<2x2xf32>
    %10 = tpu.matmul %4, %5, %cst_10 {dimension_numbers = #tpu.dot_dimension_numbers<[1], [0], [0], [1], [0, 0, 1, 1], [], []>} : vector<2x32xf32>, vector<32x2xf32>, vector<2x2xf32> -> vector<2x2xf32>
    %cst_11 = arith.constant 0.000000e+00 : f32
    %11 = vector.broadcast %cst_11 : f32 to vector<2x2xf32>
    %12 = arith.maximumf %10, %11 : vector<2x2xf32>
    %13 = arith.addf %9, %12 : vector<2x2xf32>
    %cst_12 = arith.constant dense<0.000000e+00> : vector<2x32xf32>
    %14 = tpu.matmul %13, %6, %cst_12 {dimension_numbers = #tpu.dot_dimension_numbers<[1], [0], [0], [1], [0, 0, 1, 1], [], []>} : vector<2x2xf32>, vector<2x32xf32>, vector<2x32xf32> -> vector<2x32xf32>
    %15 = arith.negf %14 : vector<2x32xf32>
    %16 = math.exp %15 : vector<2x32xf32>
    %cst_13 = arith.constant 1.000000e+00 : f32
    %17 = vector.broadcast %cst_13 : f32 to vector<2x32xf32>
    %18 = arith.addf %17, %16 : vector<2x32xf32>
    %19 = arith.divf %17, %18 : vector<2x32xf32>
    %20 = vector.shape_cast %19 : vector<2x32xf32> to vector<2x32x1xf32>
    %21 = vector.broadcast %20 : vector<2x32x1xf32> to vector<2x32x256xf32>
    %22 = arith.mulf %0, %21 : vector<2x32x256xf32>
    %cst_14 = arith.constant dense<0xFF800000> : vector<2x256xf32>
    %23 = vector.multi_reduction <maximumf>, %22, %cst_14 [1] : vector<2x32x256xf32> to vector<2x256xf32>
    %cst_15 = arith.constant dense<0.000000e+00> : vector<2x256xf32>
    %24 = vector.multi_reduction <add>, %22, %cst_15 [1] : vector<2x32x256xf32> to vector<2x256xf32>
    %cst_16 = arith.constant 3.125000e-02 : f32
    %25 = vector.broadcast %cst_16 : f32 to vector<2x256xf32>
    %26 = arith.mulf %24, %25 : vector<2x256xf32>
    %27 = vector.shape_cast %23 : vector<2x256xf32> to vector<1x2x256xf32>
    %28 = vector.shape_cast %26 : vector<2x256xf32> to vector<1x2x256xf32>
    %29 = tpu.concatenate %27, %28 in 0 : vector<1x2x256xf32>, vector<1x2x256xf32> -> vector<2x2x256xf32>
    %cst_17 = arith.constant 0.000000e+00 : f32
    %30 = vector.broadcast %cst_17 : f32 to vector<2x2x128xf32>
    %c0_18 = arith.constant 0 : index
    %c0_19 = arith.constant 0 : index
    %c0_20 = arith.constant 0 : index
    %31 = vector.load %arg7[%c0_18, %c0_19, %c0_20] : memref<2x2x512xf32, #tpu.memory_space<vmem>>, vector<2x2x128xf32>
    tpu.vector_store %arg7[%c0_18, %c0_19, %c0_20], %30 {strides = array<i32>} : memref<2x2x512xf32, #tpu.memory_space<vmem>>, vector<2x2x128xf32>,
    %cst_21 = arith.constant 0.000000e+00 : f32
    %32 = vector.broadcast %cst_21 : f32 to vector<2x2x128xf32>
    %c0_22 = arith.constant 0 : index
    %c0_23 = arith.constant 0 : index
    %c384 = arith.constant 384 : index
    %33 = vector.load %arg7[%c0_22, %c0_23, %c384] : memref<2x2x512xf32, #tpu.memory_space<vmem>>, vector<2x2x128xf32>
    tpu.vector_store %arg7[%c0_22, %c0_23, %c384], %32 {strides = array<i32>} : memref<2x2x512xf32, #tpu.memory_space<vmem>>, vector<2x2x128xf32>,
    %c0_24 = arith.constant 0 : index
    %c0_25 = arith.constant 0 : index
    %c128 = arith.constant 128 : index
    %34 = vector.load %arg7[%c0_24, %c0_25, %c128] : memref<2x2x512xf32, #tpu.memory_space<vmem>>, vector<2x2x256xf32>
    tpu.vector_store %arg7[%c0_24, %c0_25, %c128], %29 {strides = array<i32>} : memref<2x2x512xf32, #tpu.memory_space<vmem>>, vector<2x2x256xf32>,
    %35 = tpu.iota {dimensions = array<i32: 2>} : vector<1x1x256xi32>
    %c16_i32 = arith.constant 16 : i32
    %c0_i32 = arith.constant 0 : i32
    %36 = arith.cmpi eq, %c16_i32, %c0_i32 : i32
    %c1_i32 = arith.constant 1 : i32
    %37 = arith.select %36, %c1_i32, %c16_i32 : i32
    %38 = vector.broadcast %37 : i32 to vector<1x1x256xi32>
    %39 = arith.remsi %35, %38 : vector<1x1x256xi32>
    %c0_i32_26 = arith.constant 0 : i32
    %40 = vector.broadcast %c0_i32_26 : i32 to vector<1x1x256xi32>
    %41 = arith.cmpi ne, %39, %40 : vector<1x1x256xi32>
    %c0_i32_27 = arith.constant 0 : i32
    %42 = vector.broadcast %c0_i32_27 : i32 to vector<1x1x256xi32>
    %43 = arith.cmpi slt, %39, %42 : vector<1x1x256xi32>
    %c0_i32_28 = arith.constant 0 : i32
    %44 = arith.cmpi slt, %37, %c0_i32_28 : i32
    %45 = vector.broadcast %44 : i1 to vector<1x1x256xi1>
    %46 = vector.broadcast %45 : vector<1x1x256xi1> to vector<1x1x256xi1>
    %47 = arith.xori %43, %46 : vector<1x1x256xi1>
    %48 = arith.andi %47, %41 : vector<1x1x256xi1>
    %49 = vector.broadcast %37 : i32 to vector<1x1x256xi32>
    %50 = arith.addi %39, %49 : vector<1x1x256xi32>
    %51 = arith.select %48, %50, %39 : vector<1x1x256xi1>, vector<1x1x256xi32>
    %c0_29 = arith.constant 0 : index
    %52 = memref.load %arg5[%c0_29] : memref<1xf32, #tpu.memory_space<smem>>
    %53 = vector.broadcast %52 : f32 to vector<2x256xf32>
    %c3_i32 = arith.constant 3 : i32
    %54 = vector.broadcast %c3_i32 : i32 to vector<1x1x256xi32>
    %55 = arith.cmpi sge, %51, %54 : vector<1x1x256xi32>
    %c0_30 = arith.constant 0 : index
    %c0_31 = arith.constant 0 : index
    %c77 = arith.constant 77 : index
    %56 = vector.load %arg7[%c0_30, %c0_31, %c77] : memref<2x2x512xf32, #tpu.memory_space<vmem>>, vector<2x2x256xf32>
    %cst_32 = arith.constant 0.000000e+00 : f32
    %57 = vector.shape_cast %55 : vector<1x1x256xi1> to vector<1x1x256xi1>
    %58 = vector.broadcast %57 : vector<1x1x256xi1> to vector<2x2x256xi1>
    %59 = vector.broadcast %cst_32 : f32 to vector<2x2x256xf32>
    %60 = arith.select %58, %56, %59 : vector<2x2x256xi1>, vector<2x2x256xf32>
    %c0_33 = arith.constant 0 : index
    %61 = memref.load %arg4[%c0_33] : memref<98xf32, #tpu.memory_space<smem>>
    %62 = vector.extract_strided_slice %60 {offsets = [0, 0, 0], sizes = [1, 2, 256], strides = [1, 1, 1]} : vector<2x2x256xf32> to vector<1x2x256xf32>
    %63 = vector.shape_cast %62 : vector<1x2x256xf32> to vector<2x256xf32>
    %64 = vector.broadcast %61 : f32 to vector<2x256xf32>
    %65 = arith.mulf %64, %63 : vector<2x256xf32>
    %66 = arith.addf %53, %65 : vector<2x256xf32>
    %c49 = arith.constant 49 : index
    %67 = memref.load %arg4[%c49] : memref<98xf32, #tpu.memory_space<smem>>
    %68 = vector.extract_strided_slice %60 {offsets = [1, 0, 0], sizes = [1, 2, 256], strides = [1, 1, 1]} : vector<2x2x256xf32> to vector<1x2x256xf32>
    %69 = vector.shape_cast %68 : vector<1x2x256xf32> to vector<2x256xf32>
    %70 = vector.broadcast %67 : f32 to vector<2x256xf32>
    %71 = arith.mulf %70, %69 : vector<2x256xf32>
    %72 = arith.addf %66, %71 : vector<2x256xf32>
    %c0_34 = arith.constant 0 : index
    %c0_35 = arith.constant 0 : index
    %c93 = arith.constant 93 : index
    %73 = vector.load %arg7[%c0_34, %c0_35, %c93] : memref<2x2x512xf32, #tpu.memory_space<vmem>>, vector<2x2x256xf32>
    %cst_36 = arith.constant 0.000000e+00 : f32
    %74 = vector.shape_cast %55 : vector<1x1x256xi1> to vector<1x1x256xi1>
    %75 = vector.broadcast %74 : vector<1x1x256xi1> to vector<2x2x256xi1>
    %76 = vector.broadcast %cst_36 : f32 to vector<2x2x256xf32>
    %77 = arith.select %75, %73, %76 : vector<2x2x256xi1>, vector<2x2x256xf32>
    %c7 = arith.constant 7 : index
    %78 = memref.load %arg4[%c7] : memref<98xf32, #tpu.memory_space<smem>>
    %79 = vector.extract_strided_slice %77 {offsets = [0, 0, 0], sizes = [1, 2, 256], strides = [1, 1, 1]} : vector<2x2x256xf32> to vector<1x2x256xf32>
    %80 = vector.shape_cast %79 : vector<1x2x256xf32> to vector<2x256xf32>
    %81 = vector.broadcast %78 : f32 to vector<2x256xf32>
    %82 = arith.mulf %81, %80 : vector<2x256xf32>
    %83 = arith.addf %72, %82 : vector<2x256xf32>
    %c56 = arith.constant 56 : index
    %84 = memref.load %arg4[%c56] : memref<98xf32, #tpu.memory_space<smem>>
    %85 = vector.extract_strided_slice %77 {offsets = [1, 0, 0], sizes = [1, 2, 256], strides = [1, 1, 1]} : vector<2x2x256xf32> to vector<1x2x256xf32>
    %86 = vector.shape_cast %85 : vector<1x2x256xf32> to vector<2x256xf32>
    %87 = vector.broadcast %84 : f32 to vector<2x256xf32>
    %88 = arith.mulf %87, %86 : vector<2x256xf32>
    %89 = arith.addf %83, %88 : vector<2x256xf32>
    %c0_37 = arith.constant 0 : index
    %c0_38 = arith.constant 0 : index
    %c109 = arith.constant 109 : index
    %90 = vector.load %arg7[%c0_37, %c0_38, %c109] : memref<2x2x512xf32, #tpu.memory_space<vmem>>, vector<2x2x256xf32>
    %cst_39 = arith.constant 0.000000e+00 : f32
    %91 = vector.shape_cast %55 : vector<1x1x256xi1> to vector<1x1x256xi1>
    %92 = vector.broadcast %91 : vector<1x1x256xi1> to vector<2x2x256xi1>
    %93 = vector.broadcast %cst_39 : f32 to vector<2x2x256xf32>
    %94 = arith.select %92, %90, %93 : vector<2x2x256xi1>, vector<2x2x256xf32>
    %c14 = arith.constant 14 : index
    %95 = memref.load %arg4[%c14] : memref<98xf32, #tpu.memory_space<smem>>
    %96 = vector.extract_strided_slice %94 {offsets = [0, 0, 0], sizes = [1, 2, 256], strides = [1, 1, 1]} : vector<2x2x256xf32> to vector<1x2x256xf32>
    %97 = vector.shape_cast %96 : vector<1x2x256xf32> to vector<2x256xf32>
    %98 = vector.broadcast %95 : f32 to vector<2x256xf32>
    %99 = arith.mulf %98, %97 : vector<2x256xf32>
    %100 = arith.addf %89, %99 : vector<2x256xf32>
    %c63 = arith.constant 63 : index
    %101 = memref.load %arg4[%c63] : memref<98xf32, #tpu.memory_space<smem>>
    %102 = vector.extract_strided_slice %94 {offsets = [1, 0, 0], sizes = [1, 2, 256], strides = [1, 1, 1]} : vector<2x2x256xf32> to vector<1x2x256xf32>
    %103 = vector.shape_cast %102 : vector<1x2x256xf32> to vector<2x256xf32>
    %104 = vector.broadcast %101 : f32 to vector<2x256xf32>
    %105 = arith.mulf %104, %103 : vector<2x256xf32>
    %106 = arith.addf %100, %105 : vector<2x256xf32>
    %c0_40 = arith.constant 0 : index
    %c0_41 = arith.constant 0 : index
    %c125 = arith.constant 125 : index
    %107 = vector.load %arg7[%c0_40, %c0_41, %c125] : memref<2x2x512xf32, #tpu.memory_space<vmem>>, vector<2x2x256xf32>
    %cst_42 = arith.constant 0.000000e+00 : f32
    %108 = vector.shape_cast %55 : vector<1x1x256xi1> to vector<1x1x256xi1>
    %109 = vector.broadcast %108 : vector<1x1x256xi1> to vector<2x2x256xi1>
    %110 = vector.broadcast %cst_42 : f32 to vector<2x2x256xf32>
    %111 = arith.select %109, %107, %110 : vector<2x2x256xi1>, vector<2x2x256xf32>
    %c21 = arith.constant 21 : index
    %112 = memref.load %arg4[%c21] : memref<98xf32, #tpu.memory_space<smem>>
    %113 = vector.extract_strided_slice %111 {offsets = [0, 0, 0], sizes = [1, 2, 256], strides = [1, 1, 1]} : vector<2x2x256xf32> to vector<1x2x256xf32>
    %114 = vector.shape_cast %113 : vector<1x2x256xf32> to vector<2x256xf32>
    %115 = vector.broadcast %112 : f32 to vector<2x256xf32>
    %116 = arith.mulf %115, %114 : vector<2x256xf32>
    %117 = arith.addf %106, %116 : vector<2x256xf32>
    %c70 = arith.constant 70 : index
    %118 = memref.load %arg4[%c70] : memref<98xf32, #tpu.memory_space<smem>>
    %119 = vector.extract_strided_slice %111 {offsets = [1, 0, 0], sizes = [1, 2, 256], strides = [1, 1, 1]} : vector<2x2x256xf32> to vector<1x2x256xf32>
    %120 = vector.shape_cast %119 : vector<1x2x256xf32> to vector<2x256xf32>
    %121 = vector.broadcast %118 : f32 to vector<2x256xf32>
    %122 = arith.mulf %121, %120 : vector<2x256xf32>
    %123 = arith.addf %117, %122 : vector<2x256xf32>
    %c0_43 = arith.constant 0 : index
    %c0_44 = arith.constant 0 : index
    %c141 = arith.constant 141 : index
    %124 = vector.load %arg7[%c0_43, %c0_44, %c141] : memref<2x2x512xf32, #tpu.memory_space<vmem>>, vector<2x2x256xf32>
    %cst_45 = arith.constant 0.000000e+00 : f32
    %125 = vector.shape_cast %55 : vector<1x1x256xi1> to vector<1x1x256xi1>
    %126 = vector.broadcast %125 : vector<1x1x256xi1> to vector<2x2x256xi1>
    %127 = vector.broadcast %cst_45 : f32 to vector<2x2x256xf32>
    %128 = arith.select %126, %124, %127 : vector<2x2x256xi1>, vector<2x2x256xf32>
    %c28 = arith.constant 28 : index
    %129 = memref.load %arg4[%c28] : memref<98xf32, #tpu.memory_space<smem>>
    %130 = vector.extract_strided_slice %128 {offsets = [0, 0, 0], sizes = [1, 2, 256], strides = [1, 1, 1]} : vector<2x2x256xf32> to vector<1x2x256xf32>
    %131 = vector.shape_cast %130 : vector<1x2x256xf32> to vector<2x256xf32>
    %132 = vector.broadcast %129 : f32 to vector<2x256xf32>
    %133 = arith.mulf %132, %131 : vector<2x256xf32>
    %134 = arith.addf %123, %133 : vector<2x256xf32>
    %c77_46 = arith.constant 77 : index
    %135 = memref.load %arg4[%c77_46] : memref<98xf32, #tpu.memory_space<smem>>
    %136 = vector.extract_strided_slice %128 {offsets = [1, 0, 0], sizes = [1, 2, 256], strides = [1, 1, 1]} : vector<2x2x256xf32> to vector<1x2x256xf32>
    %137 = vector.shape_cast %136 : vector<1x2x256xf32> to vector<2x256xf32>
    %138 = vector.broadcast %135 : f32 to vector<2x256xf32>
    %139 = arith.mulf %138, %137 : vector<2x256xf32>
    %140 = arith.addf %134, %139 : vector<2x256xf32>
    %c0_47 = arith.constant 0 : index
    %c0_48 = arith.constant 0 : index
    %c157 = arith.constant 157 : index
    %141 = vector.load %arg7[%c0_47, %c0_48, %c157] : memref<2x2x512xf32, #tpu.memory_space<vmem>>, vector<2x2x256xf32>
    %cst_49 = arith.constant 0.000000e+00 : f32
    %142 = vector.shape_cast %55 : vector<1x1x256xi1> to vector<1x1x256xi1>
    %143 = vector.broadcast %142 : vector<1x1x256xi1> to vector<2x2x256xi1>
    %144 = vector.broadcast %cst_49 : f32 to vector<2x2x256xf32>
    %145 = arith.select %143, %141, %144 : vector<2x2x256xi1>, vector<2x2x256xf32>
    %c35 = arith.constant 35 : index
    %146 = memref.load %arg4[%c35] : memref<98xf32, #tpu.memory_space<smem>>
    %147 = vector.extract_strided_slice %145 {offsets = [0, 0, 0], sizes = [1, 2, 256], strides = [1, 1, 1]} : vector<2x2x256xf32> to vector<1x2x256xf32>
    %148 = vector.shape_cast %147 : vector<1x2x256xf32> to vector<2x256xf32>
    %149 = vector.broadcast %146 : f32 to vector<2x256xf32>
    %150 = arith.mulf %149, %148 : vector<2x256xf32>
    %151 = arith.addf %140, %150 : vector<2x256xf32>
    %c84 = arith.constant 84 : index
    %152 = memref.load %arg4[%c84] : memref<98xf32, #tpu.memory_space<smem>>
    %153 = vector.extract_strided_slice %145 {offsets = [1, 0, 0], sizes = [1, 2, 256], strides = [1, 1, 1]} : vector<2x2x256xf32> to vector<1x2x256xf32>
    %154 = vector.shape_cast %153 : vector<1x2x256xf32> to vector<2x256xf32>
    %155 = vector.broadcast %152 : f32 to vector<2x256xf32>
    %156 = arith.mulf %155, %154 : vector<2x256xf32>
    %157 = arith.addf %151, %156 : vector<2x256xf32>
    %c0_50 = arith.constant 0 : index
    %c0_51 = arith.constant 0 : index
    %c173 = arith.constant 173 : index
    %158 = vector.load %arg7[%c0_50, %c0_51, %c173] : memref<2x2x512xf32, #tpu.memory_space<vmem>>, vector<2x2x256xf32>
    %cst_52 = arith.constant 0.000000e+00 : f32
    %159 = vector.shape_cast %55 : vector<1x1x256xi1> to vector<1x1x256xi1>
    %160 = vector.broadcast %159 : vector<1x1x256xi1> to vector<2x2x256xi1>
    %161 = vector.broadcast %cst_52 : f32 to vector<2x2x256xf32>
    %162 = arith.select %160, %158, %161 : vector<2x2x256xi1>, vector<2x2x256xf32>
    %c42 = arith.constant 42 : index
    %163 = memref.load %arg4[%c42] : memref<98xf32, #tpu.memory_space<smem>>
    %164 = vector.extract_strided_slice %162 {offsets = [0, 0, 0], sizes = [1, 2, 256], strides = [1, 1, 1]} : vector<2x2x256xf32> to vector<1x2x256xf32>
    %165 = vector.shape_cast %164 : vector<1x2x256xf32> to vector<2x256xf32>
    %166 = vector.broadcast %163 : f32 to vector<2x256xf32>
    %167 = arith.mulf %166, %165 : vector<2x256xf32>
    %168 = arith.addf %157, %167 : vector<2x256xf32>
    %c91 = arith.constant 91 : index
    %169 = memref.load %arg4[%c91] : memref<98xf32, #tpu.memory_space<smem>>
    %170 = vector.extract_strided_slice %162 {offsets = [1, 0, 0], sizes = [1, 2, 256], strides = [1, 1, 1]} : vector<2x2x256xf32> to vector<1x2x256xf32>
    %171 = vector.shape_cast %170 : vector<1x2x256xf32> to vector<2x256xf32>
    %172 = vector.broadcast %169 : f32 to vector<2x256xf32>
    %173 = arith.mulf %172, %171 : vector<2x256xf32>
    %174 = arith.addf %168, %173 : vector<2x256xf32>
    %c2_i32 = arith.constant 2 : i32
    %175 = vector.broadcast %c2_i32 : i32 to vector<1x1x256xi32>
    %176 = arith.cmpi sge, %51, %175 : vector<1x1x256xi32>
    %c0_53 = arith.constant 0 : index
    %c0_54 = arith.constant 0 : index
    %c78 = arith.constant 78 : index
    %177 = vector.load %arg7[%c0_53, %c0_54, %c78] : memref<2x2x512xf32, #tpu.memory_space<vmem>>, vector<2x2x256xf32>
    %cst_55 = arith.constant 0.000000e+00 : f32
    %178 = vector.shape_cast %176 : vector<1x1x256xi1> to vector<1x1x256xi1>
    %179 = vector.broadcast %178 : vector<1x1x256xi1> to vector<2x2x256xi1>
    %180 = vector.broadcast %cst_55 : f32 to vector<2x2x256xf32>
    %181 = arith.select %179, %177, %180 : vector<2x2x256xi1>, vector<2x2x256xf32>
    %c1 = arith.constant 1 : index
    %182 = memref.load %arg4[%c1] : memref<98xf32, #tpu.memory_space<smem>>
    %183 = vector.extract_strided_slice %181 {offsets = [0, 0, 0], sizes = [1, 2, 256], strides = [1, 1, 1]} : vector<2x2x256xf32> to vector<1x2x256xf32>
    %184 = vector.shape_cast %183 : vector<1x2x256xf32> to vector<2x256xf32>
    %185 = vector.broadcast %182 : f32 to vector<2x256xf32>
    %186 = arith.mulf %185, %184 : vector<2x256xf32>
    %187 = arith.addf %174, %186 : vector<2x256xf32>
    %c50 = arith.constant 50 : index
    %188 = memref.load %arg4[%c50] : memref<98xf32, #tpu.memory_space<smem>>
    %189 = vector.extract_strided_slice %181 {offsets = [1, 0, 0], sizes = [1, 2, 256], strides = [1, 1, 1]} : vector<2x2x256xf32> to vector<1x2x256xf32>
    %190 = vector.shape_cast %189 : vector<1x2x256xf32> to vector<2x256xf32>
    %191 = vector.broadcast %188 : f32 to vector<2x256xf32>
    %192 = arith.mulf %191, %190 : vector<2x256xf32>
    %193 = arith.addf %187, %192 : vector<2x256xf32>
    %c0_56 = arith.constant 0 : index
    %c0_57 = arith.constant 0 : index
    %c94 = arith.constant 94 : index
    %194 = vector.load %arg7[%c0_56, %c0_57, %c94] : memref<2x2x512xf32, #tpu.memory_space<vmem>>, vector<2x2x256xf32>
    %cst_58 = arith.constant 0.000000e+00 : f32
    %195 = vector.shape_cast %176 : vector<1x1x256xi1> to vector<1x1x256xi1>
    %196 = vector.broadcast %195 : vector<1x1x256xi1> to vector<2x2x256xi1>
    %197 = vector.broadcast %cst_58 : f32 to vector<2x2x256xf32>
    %198 = arith.select %196, %194, %197 : vector<2x2x256xi1>, vector<2x2x256xf32>
    %c8 = arith.constant 8 : index
    %199 = memref.load %arg4[%c8] : memref<98xf32, #tpu.memory_space<smem>>
    %200 = vector.extract_strided_slice %198 {offsets = [0, 0, 0], sizes = [1, 2, 256], strides = [1, 1, 1]} : vector<2x2x256xf32> to vector<1x2x256xf32>
    %201 = vector.shape_cast %200 : vector<1x2x256xf32> to vector<2x256xf32>
    %202 = vector.broadcast %199 : f32 to vector<2x256xf32>
    %203 = arith.mulf %202, %201 : vector<2x256xf32>
    %204 = arith.addf %193, %203 : vector<2x256xf32>
    %c57 = arith.constant 57 : index
    %205 = memref.load %arg4[%c57] : memref<98xf32, #tpu.memory_space<smem>>
    %206 = vector.extract_strided_slice %198 {offsets = [1, 0, 0], sizes = [1, 2, 256], strides = [1, 1, 1]} : vector<2x2x256xf32> to vector<1x2x256xf32>
    %207 = vector.shape_cast %206 : vector<1x2x256xf32> to vector<2x256xf32>
    %208 = vector.broadcast %205 : f32 to vector<2x256xf32>
    %209 = arith.mulf %208, %207 : vector<2x256xf32>
    %210 = arith.addf %204, %209 : vector<2x256xf32>
    %c0_59 = arith.constant 0 : index
    %c0_60 = arith.constant 0 : index
    %c110 = arith.constant 110 : index
    %211 = vector.load %arg7[%c0_59, %c0_60, %c110] : memref<2x2x512xf32, #tpu.memory_space<vmem>>, vector<2x2x256xf32>
    %cst_61 = arith.constant 0.000000e+00 : f32
    %212 = vector.shape_cast %176 : vector<1x1x256xi1> to vector<1x1x256xi1>
    %213 = vector.broadcast %212 : vector<1x1x256xi1> to vector<2x2x256xi1>
    %214 = vector.broadcast %cst_61 : f32 to vector<2x2x256xf32>
    %215 = arith.select %213, %211, %214 : vector<2x2x256xi1>, vector<2x2x256xf32>
    %c15 = arith.constant 15 : index
    %216 = memref.load %arg4[%c15] : memref<98xf32, #tpu.memory_space<smem>>
    %217 = vector.extract_strided_slice %215 {offsets = [0, 0, 0], sizes = [1, 2, 256], strides = [1, 1, 1]} : vector<2x2x256xf32> to vector<1x2x256xf32>
    %218 = vector.shape_cast %217 : vector<1x2x256xf32> to vector<2x256xf32>
    %219 = vector.broadcast %216 : f32 to vector<2x256xf32>
    %220 = arith.mulf %219, %218 : vector<2x256xf32>
    %221 = arith.addf %210, %220 : vector<2x256xf32>
    %c64 = arith.constant 64 : index
    %222 = memref.load %arg4[%c64] : memref<98xf32, #tpu.memory_space<smem>>
    %223 = vector.extract_strided_slice %215 {offsets = [1, 0, 0], sizes = [1, 2, 256], strides = [1, 1, 1]} : vector<2x2x256xf32> to vector<1x2x256xf32>
    %224 = vector.shape_cast %223 : vector<1x2x256xf32> to vector<2x256xf32>
    %225 = vector.broadcast %222 : f32 to vector<2x256xf32>
    %226 = arith.mulf %225, %224 : vector<2x256xf32>
    %227 = arith.addf %221, %226 : vector<2x256xf32>
    %c0_62 = arith.constant 0 : index
    %c0_63 = arith.constant 0 : index
    %c126 = arith.constant 126 : index
    %228 = vector.load %arg7[%c0_62, %c0_63, %c126] : memref<2x2x512xf32, #tpu.memory_space<vmem>>, vector<2x2x256xf32>
    %cst_64 = arith.constant 0.000000e+00 : f32
    %229 = vector.shape_cast %176 : vector<1x1x256xi1> to vector<1x1x256xi1>
    %230 = vector.broadcast %229 : vector<1x1x256xi1> to vector<2x2x256xi1>
    %231 = vector.broadcast %cst_64 : f32 to vector<2x2x256xf32>
    %232 = arith.select %230, %228, %231 : vector<2x2x256xi1>, vector<2x2x256xf32>
    %c22 = arith.constant 22 : index
    %233 = memref.load %arg4[%c22] : memref<98xf32, #tpu.memory_space<smem>>
    %234 = vector.extract_strided_slice %232 {offsets = [0, 0, 0], sizes = [1, 2, 256], strides = [1, 1, 1]} : vector<2x2x256xf32> to vector<1x2x256xf32>
    %235 = vector.shape_cast %234 : vector<1x2x256xf32> to vector<2x256xf32>
    %236 = vector.broadcast %233 : f32 to vector<2x256xf32>
    %237 = arith.mulf %236, %235 : vector<2x256xf32>
    %238 = arith.addf %227, %237 : vector<2x256xf32>
    %c71 = arith.constant 71 : index
    %239 = memref.load %arg4[%c71] : memref<98xf32, #tpu.memory_space<smem>>
    %240 = vector.extract_strided_slice %232 {offsets = [1, 0, 0], sizes = [1, 2, 256], strides = [1, 1, 1]} : vector<2x2x256xf32> to vector<1x2x256xf32>
    %241 = vector.shape_cast %240 : vector<1x2x256xf32> to vector<2x256xf32>
    %242 = vector.broadcast %239 : f32 to vector<2x256xf32>
    %243 = arith.mulf %242, %241 : vector<2x256xf32>
    %244 = arith.addf %238, %243 : vector<2x256xf32>
    %c0_65 = arith.constant 0 : index
    %c0_66 = arith.constant 0 : index
    %c142 = arith.constant 142 : index
    %245 = vector.load %arg7[%c0_65, %c0_66, %c142] : memref<2x2x512xf32, #tpu.memory_space<vmem>>, vector<2x2x256xf32>
    %cst_67 = arith.constant 0.000000e+00 : f32
    %246 = vector.shape_cast %176 : vector<1x1x256xi1> to vector<1x1x256xi1>
    %247 = vector.broadcast %246 : vector<1x1x256xi1> to vector<2x2x256xi1>
    %248 = vector.broadcast %cst_67 : f32 to vector<2x2x256xf32>
    %249 = arith.select %247, %245, %248 : vector<2x2x256xi1>, vector<2x2x256xf32>
    %c29 = arith.constant 29 : index
    %250 = memref.load %arg4[%c29] : memref<98xf32, #tpu.memory_space<smem>>
    %251 = vector.extract_strided_slice %249 {offsets = [0, 0, 0], sizes = [1, 2, 256], strides = [1, 1, 1]} : vector<2x2x256xf32> to vector<1x2x256xf32>
    %252 = vector.shape_cast %251 : vector<1x2x256xf32> to vector<2x256xf32>
    %253 = vector.broadcast %250 : f32 to vector<2x256xf32>
    %254 = arith.mulf %253, %252 : vector<2x256xf32>
    %255 = arith.addf %244, %254 : vector<2x256xf32>
    %c78_68 = arith.constant 78 : index
    %256 = memref.load %arg4[%c78_68] : memref<98xf32, #tpu.memory_space<smem>>
    %257 = vector.extract_strided_slice %249 {offsets = [1, 0, 0], sizes = [1, 2, 256], strides = [1, 1, 1]} : vector<2x2x256xf32> to vector<1x2x256xf32>
    %258 = vector.shape_cast %257 : vector<1x2x256xf32> to vector<2x256xf32>
    %259 = vector.broadcast %256 : f32 to vector<2x256xf32>
    %260 = arith.mulf %259, %258 : vector<2x256xf32>
    %261 = arith.addf %255, %260 : vector<2x256xf32>
    %c0_69 = arith.constant 0 : index
    %c0_70 = arith.constant 0 : index
    %c158 = arith.constant 158 : index
    %262 = vector.load %arg7[%c0_69, %c0_70, %c158] : memref<2x2x512xf32, #tpu.memory_space<vmem>>, vector<2x2x256xf32>
    %cst_71 = arith.constant 0.000000e+00 : f32
    %263 = vector.shape_cast %176 : vector<1x1x256xi1> to vector<1x1x256xi1>
    %264 = vector.broadcast %263 : vector<1x1x256xi1> to vector<2x2x256xi1>
    %265 = vector.broadcast %cst_71 : f32 to vector<2x2x256xf32>
    %266 = arith.select %264, %262, %265 : vector<2x2x256xi1>, vector<2x2x256xf32>
    %c36 = arith.constant 36 : index
    %267 = memref.load %arg4[%c36] : memref<98xf32, #tpu.memory_space<smem>>
    %268 = vector.extract_strided_slice %266 {offsets = [0, 0, 0], sizes = [1, 2, 256], strides = [1, 1, 1]} : vector<2x2x256xf32> to vector<1x2x256xf32>
    %269 = vector.shape_cast %268 : vector<1x2x256xf32> to vector<2x256xf32>
    %270 = vector.broadcast %267 : f32 to vector<2x256xf32>
    %271 = arith.mulf %270, %269 : vector<2x256xf32>
    %272 = arith.addf %261, %271 : vector<2x256xf32>
    %c85 = arith.constant 85 : index
    %273 = memref.load %arg4[%c85] : memref<98xf32, #tpu.memory_space<smem>>
    %274 = vector.extract_strided_slice %266 {offsets = [1, 0, 0], sizes = [1, 2, 256], strides = [1, 1, 1]} : vector<2x2x256xf32> to vector<1x2x256xf32>
    %275 = vector.shape_cast %274 : vector<1x2x256xf32> to vector<2x256xf32>
    %276 = vector.broadcast %273 : f32 to vector<2x256xf32>
    %277 = arith.mulf %276, %275 : vector<2x256xf32>
    %278 = arith.addf %272, %277 : vector<2x256xf32>
    %c0_72 = arith.constant 0 : index
    %c0_73 = arith.constant 0 : index
    %c174 = arith.constant 174 : index
    %279 = vector.load %arg7[%c0_72, %c0_73, %c174] : memref<2x2x512xf32, #tpu.memory_space<vmem>>, vector<2x2x256xf32>
    %cst_74 = arith.constant 0.000000e+00 : f32
    %280 = vector.shape_cast %176 : vector<1x1x256xi1> to vector<1x1x256xi1>
    %281 = vector.broadcast %280 : vector<1x1x256xi1> to vector<2x2x256xi1>
    %282 = vector.broadcast %cst_74 : f32 to vector<2x2x256xf32>
    %283 = arith.select %281, %279, %282 : vector<2x2x256xi1>, vector<2x2x256xf32>
    %c43 = arith.constant 43 : index
    %284 = memref.load %arg4[%c43] : memref<98xf32, #tpu.memory_space<smem>>
    %285 = vector.extract_strided_slice %283 {offsets = [0, 0, 0], sizes = [1, 2, 256], strides = [1, 1, 1]} : vector<2x2x256xf32> to vector<1x2x256xf32>
    %286 = vector.shape_cast %285 : vector<1x2x256xf32> to vector<2x256xf32>
    %287 = vector.broadcast %284 : f32 to vector<2x256xf32>
    %288 = arith.mulf %287, %286 : vector<2x256xf32>
    %289 = arith.addf %278, %288 : vector<2x256xf32>
    %c92 = arith.constant 92 : index
    %290 = memref.load %arg4[%c92] : memref<98xf32, #tpu.memory_space<smem>>
    %291 = vector.extract_strided_slice %283 {offsets = [1, 0, 0], sizes = [1, 2, 256], strides = [1, 1, 1]} : vector<2x2x256xf32> to vector<1x2x256xf32>
    %292 = vector.shape_cast %291 : vector<1x2x256xf32> to vector<2x256xf32>
    %293 = vector.broadcast %290 : f32 to vector<2x256xf32>
    %294 = arith.mulf %293, %292 : vector<2x256xf32>
    %295 = arith.addf %289, %294 : vector<2x256xf32>
    %c1_i32_75 = arith.constant 1 : i32
    %296 = vector.broadcast %c1_i32_75 : i32 to vector<1x1x256xi32>
    %297 = arith.cmpi sge, %51, %296 : vector<1x1x256xi32>
    %c0_76 = arith.constant 0 : index
    %c0_77 = arith.constant 0 : index
    %c79 = arith.constant 79 : index
    %298 = vector.load %arg7[%c0_76, %c0_77, %c79] : memref<2x2x512xf32, #tpu.memory_space<vmem>>, vector<2x2x256xf32>
    %cst_78 = arith.constant 0.000000e+00 : f32
    %299 = vector.shape_cast %297 : vector<1x1x256xi1> to vector<1x1x256xi1>
    %300 = vector.broadcast %299 : vector<1x1x256xi1> to vector<2x2x256xi1>
    %301 = vector.broadcast %cst_78 : f32 to vector<2x2x256xf32>
    %302 = arith.select %300, %298, %301 : vector<2x2x256xi1>, vector<2x2x256xf32>
    %c2 = arith.constant 2 : index
    %303 = memref.load %arg4[%c2] : memref<98xf32, #tpu.memory_space<smem>>
    %304 = vector.extract_strided_slice %302 {offsets = [0, 0, 0], sizes = [1, 2, 256], strides = [1, 1, 1]} : vector<2x2x256xf32> to vector<1x2x256xf32>
    %305 = vector.shape_cast %304 : vector<1x2x256xf32> to vector<2x256xf32>
    %306 = vector.broadcast %303 : f32 to vector<2x256xf32>
    %307 = arith.mulf %306, %305 : vector<2x256xf32>
    %308 = arith.addf %295, %307 : vector<2x256xf32>
    %c51 = arith.constant 51 : index
    %309 = memref.load %arg4[%c51] : memref<98xf32, #tpu.memory_space<smem>>
    %310 = vector.extract_strided_slice %302 {offsets = [1, 0, 0], sizes = [1, 2, 256], strides = [1, 1, 1]} : vector<2x2x256xf32> to vector<1x2x256xf32>
    %311 = vector.shape_cast %310 : vector<1x2x256xf32> to vector<2x256xf32>
    %312 = vector.broadcast %309 : f32 to vector<2x256xf32>
    %313 = arith.mulf %312, %311 : vector<2x256xf32>
    %314 = arith.addf %308, %313 : vector<2x256xf32>
    %c0_79 = arith.constant 0 : index
    %c0_80 = arith.constant 0 : index
    %c95 = arith.constant 95 : index
    %315 = vector.load %arg7[%c0_79, %c0_80, %c95] : memref<2x2x512xf32, #tpu.memory_space<vmem>>, vector<2x2x256xf32>
    %cst_81 = arith.constant 0.000000e+00 : f32
    %316 = vector.shape_cast %297 : vector<1x1x256xi1> to vector<1x1x256xi1>
    %317 = vector.broadcast %316 : vector<1x1x256xi1> to vector<2x2x256xi1>
    %318 = vector.broadcast %cst_81 : f32 to vector<2x2x256xf32>
    %319 = arith.select %317, %315, %318 : vector<2x2x256xi1>, vector<2x2x256xf32>
    %c9 = arith.constant 9 : index
    %320 = memref.load %arg4[%c9] : memref<98xf32, #tpu.memory_space<smem>>
    %321 = vector.extract_strided_slice %319 {offsets = [0, 0, 0], sizes = [1, 2, 256], strides = [1, 1, 1]} : vector<2x2x256xf32> to vector<1x2x256xf32>
    %322 = vector.shape_cast %321 : vector<1x2x256xf32> to vector<2x256xf32>
    %323 = vector.broadcast %320 : f32 to vector<2x256xf32>
    %324 = arith.mulf %323, %322 : vector<2x256xf32>
    %325 = arith.addf %314, %324 : vector<2x256xf32>
    %c58 = arith.constant 58 : index
    %326 = memref.load %arg4[%c58] : memref<98xf32, #tpu.memory_space<smem>>
    %327 = vector.extract_strided_slice %319 {offsets = [1, 0, 0], sizes = [1, 2, 256], strides = [1, 1, 1]} : vector<2x2x256xf32> to vector<1x2x256xf32>
    %328 = vector.shape_cast %327 : vector<1x2x256xf32> to vector<2x256xf32>
    %329 = vector.broadcast %326 : f32 to vector<2x256xf32>
    %330 = arith.mulf %329, %328 : vector<2x256xf32>
    %331 = arith.addf %325, %330 : vector<2x256xf32>
    %c0_82 = arith.constant 0 : index
    %c0_83 = arith.constant 0 : index
    %c111 = arith.constant 111 : index
    %332 = vector.load %arg7[%c0_82, %c0_83, %c111] : memref<2x2x512xf32, #tpu.memory_space<vmem>>, vector<2x2x256xf32>
    %cst_84 = arith.constant 0.000000e+00 : f32
    %333 = vector.shape_cast %297 : vector<1x1x256xi1> to vector<1x1x256xi1>
    %334 = vector.broadcast %333 : vector<1x1x256xi1> to vector<2x2x256xi1>
    %335 = vector.broadcast %cst_84 : f32 to vector<2x2x256xf32>
    %336 = arith.select %334, %332, %335 : vector<2x2x256xi1>, vector<2x2x256xf32>
    %c16 = arith.constant 16 : index
    %337 = memref.load %arg4[%c16] : memref<98xf32, #tpu.memory_space<smem>>
    %338 = vector.extract_strided_slice %336 {offsets = [0, 0, 0], sizes = [1, 2, 256], strides = [1, 1, 1]} : vector<2x2x256xf32> to vector<1x2x256xf32>
    %339 = vector.shape_cast %338 : vector<1x2x256xf32> to vector<2x256xf32>
    %340 = vector.broadcast %337 : f32 to vector<2x256xf32>
    %341 = arith.mulf %340, %339 : vector<2x256xf32>
    %342 = arith.addf %331, %341 : vector<2x256xf32>
    %c65 = arith.constant 65 : index
    %343 = memref.load %arg4[%c65] : memref<98xf32, #tpu.memory_space<smem>>
    %344 = vector.extract_strided_slice %336 {offsets = [1, 0, 0], sizes = [1, 2, 256], strides = [1, 1, 1]} : vector<2x2x256xf32> to vector<1x2x256xf32>
    %345 = vector.shape_cast %344 : vector<1x2x256xf32> to vector<2x256xf32>
    %346 = vector.broadcast %343 : f32 to vector<2x256xf32>
    %347 = arith.mulf %346, %345 : vector<2x256xf32>
    %348 = arith.addf %342, %347 : vector<2x256xf32>
    %c0_85 = arith.constant 0 : index
    %c0_86 = arith.constant 0 : index
    %c127 = arith.constant 127 : index
    %349 = vector.load %arg7[%c0_85, %c0_86, %c127] : memref<2x2x512xf32, #tpu.memory_space<vmem>>, vector<2x2x256xf32>
    %cst_87 = arith.constant 0.000000e+00 : f32
    %350 = vector.shape_cast %297 : vector<1x1x256xi1> to vector<1x1x256xi1>
    %351 = vector.broadcast %350 : vector<1x1x256xi1> to vector<2x2x256xi1>
    %352 = vector.broadcast %cst_87 : f32 to vector<2x2x256xf32>
    %353 = arith.select %351, %349, %352 : vector<2x2x256xi1>, vector<2x2x256xf32>
    %c23 = arith.constant 23 : index
    %354 = memref.load %arg4[%c23] : memref<98xf32, #tpu.memory_space<smem>>
    %355 = vector.extract_strided_slice %353 {offsets = [0, 0, 0], sizes = [1, 2, 256], strides = [1, 1, 1]} : vector<2x2x256xf32> to vector<1x2x256xf32>
    %356 = vector.shape_cast %355 : vector<1x2x256xf32> to vector<2x256xf32>
    %357 = vector.broadcast %354 : f32 to vector<2x256xf32>
    %358 = arith.mulf %357, %356 : vector<2x256xf32>
    %359 = arith.addf %348, %358 : vector<2x256xf32>
    %c72 = arith.constant 72 : index
    %360 = memref.load %arg4[%c72] : memref<98xf32, #tpu.memory_space<smem>>
    %361 = vector.extract_strided_slice %353 {offsets = [1, 0, 0], sizes = [1, 2, 256], strides = [1, 1, 1]} : vector<2x2x256xf32> to vector<1x2x256xf32>
    %362 = vector.shape_cast %361 : vector<1x2x256xf32> to vector<2x256xf32>
    %363 = vector.broadcast %360 : f32 to vector<2x256xf32>
    %364 = arith.mulf %363, %362 : vector<2x256xf32>
    %365 = arith.addf %359, %364 : vector<2x256xf32>
    %c0_88 = arith.constant 0 : index
    %c0_89 = arith.constant 0 : index
    %c143 = arith.constant 143 : index
    %366 = vector.load %arg7[%c0_88, %c0_89, %c143] : memref<2x2x512xf32, #tpu.memory_space<vmem>>, vector<2x2x256xf32>
    %cst_90 = arith.constant 0.000000e+00 : f32
    %367 = vector.shape_cast %297 : vector<1x1x256xi1> to vector<1x1x256xi1>
    %368 = vector.broadcast %367 : vector<1x1x256xi1> to vector<2x2x256xi1>
    %369 = vector.broadcast %cst_90 : f32 to vector<2x2x256xf32>
    %370 = arith.select %368, %366, %369 : vector<2x2x256xi1>, vector<2x2x256xf32>
    %c30 = arith.constant 30 : index
    %371 = memref.load %arg4[%c30] : memref<98xf32, #tpu.memory_space<smem>>
    %372 = vector.extract_strided_slice %370 {offsets = [0, 0, 0], sizes = [1, 2, 256], strides = [1, 1, 1]} : vector<2x2x256xf32> to vector<1x2x256xf32>
    %373 = vector.shape_cast %372 : vector<1x2x256xf32> to vector<2x256xf32>
    %374 = vector.broadcast %371 : f32 to vector<2x256xf32>
    %375 = arith.mulf %374, %373 : vector<2x256xf32>
    %376 = arith.addf %365, %375 : vector<2x256xf32>
    %c79_91 = arith.constant 79 : index
    %377 = memref.load %arg4[%c79_91] : memref<98xf32, #tpu.memory_space<smem>>
    %378 = vector.extract_strided_slice %370 {offsets = [1, 0, 0], sizes = [1, 2, 256], strides = [1, 1, 1]} : vector<2x2x256xf32> to vector<1x2x256xf32>
    %379 = vector.shape_cast %378 : vector<1x2x256xf32> to vector<2x256xf32>
    %380 = vector.broadcast %377 : f32 to vector<2x256xf32>
    %381 = arith.mulf %380, %379 : vector<2x256xf32>
    %382 = arith.addf %376, %381 : vector<2x256xf32>
    %c0_92 = arith.constant 0 : index
    %c0_93 = arith.constant 0 : index
    %c159 = arith.constant 159 : index
    %383 = vector.load %arg7[%c0_92, %c0_93, %c159] : memref<2x2x512xf32, #tpu.memory_space<vmem>>, vector<2x2x256xf32>
    %cst_94 = arith.constant 0.000000e+00 : f32
    %384 = vector.shape_cast %297 : vector<1x1x256xi1> to vector<1x1x256xi1>
    %385 = vector.broadcast %384 : vector<1x1x256xi1> to vector<2x2x256xi1>
    %386 = vector.broadcast %cst_94 : f32 to vector<2x2x256xf32>
    %387 = arith.select %385, %383, %386 : vector<2x2x256xi1>, vector<2x2x256xf32>
    %c37 = arith.constant 37 : index
    %388 = memref.load %arg4[%c37] : memref<98xf32, #tpu.memory_space<smem>>
    %389 = vector.extract_strided_slice %387 {offsets = [0, 0, 0], sizes = [1, 2, 256], strides = [1, 1, 1]} : vector<2x2x256xf32> to vector<1x2x256xf32>
    %390 = vector.shape_cast %389 : vector<1x2x256xf32> to vector<2x256xf32>
    %391 = vector.broadcast %388 : f32 to vector<2x256xf32>
    %392 = arith.mulf %391, %390 : vector<2x256xf32>
    %393 = arith.addf %382, %392 : vector<2x256xf32>
    %c86 = arith.constant 86 : index
    %394 = memref.load %arg4[%c86] : memref<98xf32, #tpu.memory_space<smem>>
    %395 = vector.extract_strided_slice %387 {offsets = [1, 0, 0], sizes = [1, 2, 256], strides = [1, 1, 1]} : vector<2x2x256xf32> to vector<1x2x256xf32>
    %396 = vector.shape_cast %395 : vector<1x2x256xf32> to vector<2x256xf32>
    %397 = vector.broadcast %394 : f32 to vector<2x256xf32>
    %398 = arith.mulf %397, %396 : vector<2x256xf32>
    %399 = arith.addf %393, %398 : vector<2x256xf32>
    %c0_95 = arith.constant 0 : index
    %c0_96 = arith.constant 0 : index
    %c175 = arith.constant 175 : index
    %400 = vector.load %arg7[%c0_95, %c0_96, %c175] : memref<2x2x512xf32, #tpu.memory_space<vmem>>, vector<2x2x256xf32>
    %cst_97 = arith.constant 0.000000e+00 : f32
    %401 = vector.shape_cast %297 : vector<1x1x256xi1> to vector<1x1x256xi1>
    %402 = vector.broadcast %401 : vector<1x1x256xi1> to vector<2x2x256xi1>
    %403 = vector.broadcast %cst_97 : f32 to vector<2x2x256xf32>
    %404 = arith.select %402, %400, %403 : vector<2x2x256xi1>, vector<2x2x256xf32>
    %c44 = arith.constant 44 : index
    %405 = memref.load %arg4[%c44] : memref<98xf32, #tpu.memory_space<smem>>
    %406 = vector.extract_strided_slice %404 {offsets = [0, 0, 0], sizes = [1, 2, 256], strides = [1, 1, 1]} : vector<2x2x256xf32> to vector<1x2x256xf32>
    %407 = vector.shape_cast %406 : vector<1x2x256xf32> to vector<2x256xf32>
    %408 = vector.broadcast %405 : f32 to vector<2x256xf32>
    %409 = arith.mulf %408, %407 : vector<2x256xf32>
    %410 = arith.addf %399, %409 : vector<2x256xf32>
    %c93_98 = arith.constant 93 : index
    %411 = memref.load %arg4[%c93_98] : memref<98xf32, #tpu.memory_space<smem>>
    %412 = vector.extract_strided_slice %404 {offsets = [1, 0, 0], sizes = [1, 2, 256], strides = [1, 1, 1]} : vector<2x2x256xf32> to vector<1x2x256xf32>
    %413 = vector.shape_cast %412 : vector<1x2x256xf32> to vector<2x256xf32>
    %414 = vector.broadcast %411 : f32 to vector<2x256xf32>
    %415 = arith.mulf %414, %413 : vector<2x256xf32>
    %416 = arith.addf %410, %415 : vector<2x256xf32>
    %c0_99 = arith.constant 0 : index
    %c0_100 = arith.constant 0 : index
    %c80 = arith.constant 80 : index
    %417 = vector.load %arg7[%c0_99, %c0_100, %c80] : memref<2x2x512xf32, #tpu.memory_space<vmem>>, vector<2x2x256xf32>
    %c3 = arith.constant 3 : index
    %418 = memref.load %arg4[%c3] : memref<98xf32, #tpu.memory_space<smem>>
    %419 = vector.extract_strided_slice %417 {offsets = [0, 0, 0], sizes = [1, 2, 256], strides = [1, 1, 1]} : vector<2x2x256xf32> to vector<1x2x256xf32>
    %420 = vector.shape_cast %419 : vector<1x2x256xf32> to vector<2x256xf32>
    %421 = vector.broadcast %418 : f32 to vector<2x256xf32>
    %422 = arith.mulf %421, %420 : vector<2x256xf32>
    %423 = arith.addf %416, %422 : vector<2x256xf32>
    %c52 = arith.constant 52 : index
    %424 = memref.load %arg4[%c52] : memref<98xf32, #tpu.memory_space<smem>>
    %425 = vector.extract_strided_slice %417 {offsets = [1, 0, 0], sizes = [1, 2, 256], strides = [1, 1, 1]} : vector<2x2x256xf32> to vector<1x2x256xf32>
    %426 = vector.shape_cast %425 : vector<1x2x256xf32> to vector<2x256xf32>
    %427 = vector.broadcast %424 : f32 to vector<2x256xf32>
    %428 = arith.mulf %427, %426 : vector<2x256xf32>
    %429 = arith.addf %423, %428 : vector<2x256xf32>
    %c0_101 = arith.constant 0 : index
    %c0_102 = arith.constant 0 : index
    %c96 = arith.constant 96 : index
    %430 = vector.load %arg7[%c0_101, %c0_102, %c96] : memref<2x2x512xf32, #tpu.memory_space<vmem>>, vector<2x2x256xf32>
    %c10 = arith.constant 10 : index
    %431 = memref.load %arg4[%c10] : memref<98xf32, #tpu.memory_space<smem>>
    %432 = vector.extract_strided_slice %430 {offsets = [0, 0, 0], sizes = [1, 2, 256], strides = [1, 1, 1]} : vector<2x2x256xf32> to vector<1x2x256xf32>
    %433 = vector.shape_cast %432 : vector<1x2x256xf32> to vector<2x256xf32>
    %434 = vector.broadcast %431 : f32 to vector<2x256xf32>
    %435 = arith.mulf %434, %433 : vector<2x256xf32>
    %436 = arith.addf %429, %435 : vector<2x256xf32>
    %c59 = arith.constant 59 : index
    %437 = memref.load %arg4[%c59] : memref<98xf32, #tpu.memory_space<smem>>
    %438 = vector.extract_strided_slice %430 {offsets = [1, 0, 0], sizes = [1, 2, 256], strides = [1, 1, 1]} : vector<2x2x256xf32> to vector<1x2x256xf32>
    %439 = vector.shape_cast %438 : vector<1x2x256xf32> to vector<2x256xf32>
    %440 = vector.broadcast %437 : f32 to vector<2x256xf32>
    %441 = arith.mulf %440, %439 : vector<2x256xf32>
    %442 = arith.addf %436, %441 : vector<2x256xf32>
    %c0_103 = arith.constant 0 : index
    %c0_104 = arith.constant 0 : index
    %c112 = arith.constant 112 : index
    %443 = vector.load %arg7[%c0_103, %c0_104, %c112] : memref<2x2x512xf32, #tpu.memory_space<vmem>>, vector<2x2x256xf32>
    %c17 = arith.constant 17 : index
    %444 = memref.load %arg4[%c17] : memref<98xf32, #tpu.memory_space<smem>>
    %445 = vector.extract_strided_slice %443 {offsets = [0, 0, 0], sizes = [1, 2, 256], strides = [1, 1, 1]} : vector<2x2x256xf32> to vector<1x2x256xf32>
    %446 = vector.shape_cast %445 : vector<1x2x256xf32> to vector<2x256xf32>
    %447 = vector.broadcast %444 : f32 to vector<2x256xf32>
    %448 = arith.mulf %447, %446 : vector<2x256xf32>
    %449 = arith.addf %442, %448 : vector<2x256xf32>
    %c66 = arith.constant 66 : index
    %450 = memref.load %arg4[%c66] : memref<98xf32, #tpu.memory_space<smem>>
    %451 = vector.extract_strided_slice %443 {offsets = [1, 0, 0], sizes = [1, 2, 256], strides = [1, 1, 1]} : vector<2x2x256xf32> to vector<1x2x256xf32>
    %452 = vector.shape_cast %451 : vector<1x2x256xf32> to vector<2x256xf32>
    %453 = vector.broadcast %450 : f32 to vector<2x256xf32>
    %454 = arith.mulf %453, %452 : vector<2x256xf32>
    %455 = arith.addf %449, %454 : vector<2x256xf32>
    %c0_105 = arith.constant 0 : index
    %c0_106 = arith.constant 0 : index
    %c128_107 = arith.constant 128 : index
    %456 = vector.load %arg7[%c0_105, %c0_106, %c128_107] : memref<2x2x512xf32, #tpu.memory_space<vmem>>, vector<2x2x256xf32>
    %c24 = arith.constant 24 : index
    %457 = memref.load %arg4[%c24] : memref<98xf32, #tpu.memory_space<smem>>
    %458 = vector.extract_strided_slice %456 {offsets = [0, 0, 0], sizes = [1, 2, 256], strides = [1, 1, 1]} : vector<2x2x256xf32> to vector<1x2x256xf32>
    %459 = vector.shape_cast %458 : vector<1x2x256xf32> to vector<2x256xf32>
    %460 = vector.broadcast %457 : f32 to vector<2x256xf32>
    %461 = arith.mulf %460, %459 : vector<2x256xf32>
    %462 = arith.addf %455, %461 : vector<2x256xf32>
    %c73 = arith.constant 73 : index
    %463 = memref.load %arg4[%c73] : memref<98xf32, #tpu.memory_space<smem>>
    %464 = vector.extract_strided_slice %456 {offsets = [1, 0, 0], sizes = [1, 2, 256], strides = [1, 1, 1]} : vector<2x2x256xf32> to vector<1x2x256xf32>
    %465 = vector.shape_cast %464 : vector<1x2x256xf32> to vector<2x256xf32>
    %466 = vector.broadcast %463 : f32 to vector<2x256xf32>
    %467 = arith.mulf %466, %465 : vector<2x256xf32>
    %468 = arith.addf %462, %467 : vector<2x256xf32>
    %c0_108 = arith.constant 0 : index
    %c0_109 = arith.constant 0 : index
    %c144 = arith.constant 144 : index
    %469 = vector.load %arg7[%c0_108, %c0_109, %c144] : memref<2x2x512xf32, #tpu.memory_space<vmem>>, vector<2x2x256xf32>
    %c31 = arith.constant 31 : index
    %470 = memref.load %arg4[%c31] : memref<98xf32, #tpu.memory_space<smem>>
    %471 = vector.extract_strided_slice %469 {offsets = [0, 0, 0], sizes = [1, 2, 256], strides = [1, 1, 1]} : vector<2x2x256xf32> to vector<1x2x256xf32>
    %472 = vector.shape_cast %471 : vector<1x2x256xf32> to vector<2x256xf32>
    %473 = vector.broadcast %470 : f32 to vector<2x256xf32>
    %474 = arith.mulf %473, %472 : vector<2x256xf32>
    %475 = arith.addf %468, %474 : vector<2x256xf32>
    %c80_110 = arith.constant 80 : index
    %476 = memref.load %arg4[%c80_110] : memref<98xf32, #tpu.memory_space<smem>>
    %477 = vector.extract_strided_slice %469 {offsets = [1, 0, 0], sizes = [1, 2, 256], strides = [1, 1, 1]} : vector<2x2x256xf32> to vector<1x2x256xf32>
    %478 = vector.shape_cast %477 : vector<1x2x256xf32> to vector<2x256xf32>
    %479 = vector.broadcast %476 : f32 to vector<2x256xf32>
    %480 = arith.mulf %479, %478 : vector<2x256xf32>
    %481 = arith.addf %475, %480 : vector<2x256xf32>
    %c0_111 = arith.constant 0 : index
    %c0_112 = arith.constant 0 : index
    %c160 = arith.constant 160 : index
    %482 = vector.load %arg7[%c0_111, %c0_112, %c160] : memref<2x2x512xf32, #tpu.memory_space<vmem>>, vector<2x2x256xf32>
    %c38 = arith.constant 38 : index
    %483 = memref.load %arg4[%c38] : memref<98xf32, #tpu.memory_space<smem>>
    %484 = vector.extract_strided_slice %482 {offsets = [0, 0, 0], sizes = [1, 2, 256], strides = [1, 1, 1]} : vector<2x2x256xf32> to vector<1x2x256xf32>
    %485 = vector.shape_cast %484 : vector<1x2x256xf32> to vector<2x256xf32>
    %486 = vector.broadcast %483 : f32 to vector<2x256xf32>
    %487 = arith.mulf %486, %485 : vector<2x256xf32>
    %488 = arith.addf %481, %487 : vector<2x256xf32>
    %c87 = arith.constant 87 : index
    %489 = memref.load %arg4[%c87] : memref<98xf32, #tpu.memory_space<smem>>
    %490 = vector.extract_strided_slice %482 {offsets = [1, 0, 0], sizes = [1, 2, 256], strides = [1, 1, 1]} : vector<2x2x256xf32> to vector<1x2x256xf32>
    %491 = vector.shape_cast %490 : vector<1x2x256xf32> to vector<2x256xf32>
    %492 = vector.broadcast %489 : f32 to vector<2x256xf32>
    %493 = arith.mulf %492, %491 : vector<2x256xf32>
    %494 = arith.addf %488, %493 : vector<2x256xf32>
    %c0_113 = arith.constant 0 : index
    %c0_114 = arith.constant 0 : index
    %c176 = arith.constant 176 : index
    %495 = vector.load %arg7[%c0_113, %c0_114, %c176] : memref<2x2x512xf32, #tpu.memory_space<vmem>>, vector<2x2x256xf32>
    %c45 = arith.constant 45 : index
    %496 = memref.load %arg4[%c45] : memref<98xf32, #tpu.memory_space<smem>>
    %497 = vector.extract_strided_slice %495 {offsets = [0, 0, 0], sizes = [1, 2, 256], strides = [1, 1, 1]} : vector<2x2x256xf32> to vector<1x2x256xf32>
    %498 = vector.shape_cast %497 : vector<1x2x256xf32> to vector<2x256xf32>
    %499 = vector.broadcast %496 : f32 to vector<2x256xf32>
    %500 = arith.mulf %499, %498 : vector<2x256xf32>
    %501 = arith.addf %494, %500 : vector<2x256xf32>
    %c94_115 = arith.constant 94 : index
    %502 = memref.load %arg4[%c94_115] : memref<98xf32, #tpu.memory_space<smem>>
    %503 = vector.extract_strided_slice %495 {offsets = [1, 0, 0], sizes = [1, 2, 256], strides = [1, 1, 1]} : vector<2x2x256xf32> to vector<1x2x256xf32>
    %504 = vector.shape_cast %503 : vector<1x2x256xf32> to vector<2x256xf32>
    %505 = vector.broadcast %502 : f32 to vector<2x256xf32>
    %506 = arith.mulf %505, %504 : vector<2x256xf32>
    %507 = arith.addf %501, %506 : vector<2x256xf32>
    %c15_i32 = arith.constant 15 : i32
    %508 = vector.broadcast %c15_i32 : i32 to vector<1x1x256xi32>
    %509 = arith.cmpi slt, %51, %508 : vector<1x1x256xi32>
    %c0_116 = arith.constant 0 : index
    %c0_117 = arith.constant 0 : index
    %c81 = arith.constant 81 : index
    %510 = vector.load %arg7[%c0_116, %c0_117, %c81] : memref<2x2x512xf32, #tpu.memory_space<vmem>>, vector<2x2x256xf32>
    %cst_118 = arith.constant 0.000000e+00 : f32
    %511 = vector.shape_cast %509 : vector<1x1x256xi1> to vector<1x1x256xi1>
    %512 = vector.broadcast %511 : vector<1x1x256xi1> to vector<2x2x256xi1>
    %513 = vector.broadcast %cst_118 : f32 to vector<2x2x256xf32>
    %514 = arith.select %512, %510, %513 : vector<2x2x256xi1>, vector<2x2x256xf32>
    %c4 = arith.constant 4 : index
    %515 = memref.load %arg4[%c4] : memref<98xf32, #tpu.memory_space<smem>>
    %516 = vector.extract_strided_slice %514 {offsets = [0, 0, 0], sizes = [1, 2, 256], strides = [1, 1, 1]} : vector<2x2x256xf32> to vector<1x2x256xf32>
    %517 = vector.shape_cast %516 : vector<1x2x256xf32> to vector<2x256xf32>
    %518 = vector.broadcast %515 : f32 to vector<2x256xf32>
    %519 = arith.mulf %518, %517 : vector<2x256xf32>
    %520 = arith.addf %507, %519 : vector<2x256xf32>
    %c53 = arith.constant 53 : index
    %521 = memref.load %arg4[%c53] : memref<98xf32, #tpu.memory_space<smem>>
    %522 = vector.extract_strided_slice %514 {offsets = [1, 0, 0], sizes = [1, 2, 256], strides = [1, 1, 1]} : vector<2x2x256xf32> to vector<1x2x256xf32>
    %523 = vector.shape_cast %522 : vector<1x2x256xf32> to vector<2x256xf32>
    %524 = vector.broadcast %521 : f32 to vector<2x256xf32>
    %525 = arith.mulf %524, %523 : vector<2x256xf32>
    %526 = arith.addf %520, %525 : vector<2x256xf32>
    %c0_119 = arith.constant 0 : index
    %c0_120 = arith.constant 0 : index
    %c97 = arith.constant 97 : index
    %527 = vector.load %arg7[%c0_119, %c0_120, %c97] : memref<2x2x512xf32, #tpu.memory_space<vmem>>, vector<2x2x256xf32>
    %cst_121 = arith.constant 0.000000e+00 : f32
    %528 = vector.shape_cast %509 : vector<1x1x256xi1> to vector<1x1x256xi1>
    %529 = vector.broadcast %528 : vector<1x1x256xi1> to vector<2x2x256xi1>
    %530 = vector.broadcast %cst_121 : f32 to vector<2x2x256xf32>
    %531 = arith.select %529, %527, %530 : vector<2x2x256xi1>, vector<2x2x256xf32>
    %c11 = arith.constant 11 : index
    %532 = memref.load %arg4[%c11] : memref<98xf32, #tpu.memory_space<smem>>
    %533 = vector.extract_strided_slice %531 {offsets = [0, 0, 0], sizes = [1, 2, 256], strides = [1, 1, 1]} : vector<2x2x256xf32> to vector<1x2x256xf32>
    %534 = vector.shape_cast %533 : vector<1x2x256xf32> to vector<2x256xf32>
    %535 = vector.broadcast %532 : f32 to vector<2x256xf32>
    %536 = arith.mulf %535, %534 : vector<2x256xf32>
    %537 = arith.addf %526, %536 : vector<2x256xf32>
    %c60 = arith.constant 60 : index
    %538 = memref.load %arg4[%c60] : memref<98xf32, #tpu.memory_space<smem>>
    %539 = vector.extract_strided_slice %531 {offsets = [1, 0, 0], sizes = [1, 2, 256], strides = [1, 1, 1]} : vector<2x2x256xf32> to vector<1x2x256xf32>
    %540 = vector.shape_cast %539 : vector<1x2x256xf32> to vector<2x256xf32>
    %541 = vector.broadcast %538 : f32 to vector<2x256xf32>
    %542 = arith.mulf %541, %540 : vector<2x256xf32>
    %543 = arith.addf %537, %542 : vector<2x256xf32>
    %c0_122 = arith.constant 0 : index
    %c0_123 = arith.constant 0 : index
    %c113 = arith.constant 113 : index
    %544 = vector.load %arg7[%c0_122, %c0_123, %c113] : memref<2x2x512xf32, #tpu.memory_space<vmem>>, vector<2x2x256xf32>
    %cst_124 = arith.constant 0.000000e+00 : f32
    %545 = vector.shape_cast %509 : vector<1x1x256xi1> to vector<1x1x256xi1>
    %546 = vector.broadcast %545 : vector<1x1x256xi1> to vector<2x2x256xi1>
    %547 = vector.broadcast %cst_124 : f32 to vector<2x2x256xf32>
    %548 = arith.select %546, %544, %547 : vector<2x2x256xi1>, vector<2x2x256xf32>
    %c18 = arith.constant 18 : index
    %549 = memref.load %arg4[%c18] : memref<98xf32, #tpu.memory_space<smem>>
    %550 = vector.extract_strided_slice %548 {offsets = [0, 0, 0], sizes = [1, 2, 256], strides = [1, 1, 1]} : vector<2x2x256xf32> to vector<1x2x256xf32>
    %551 = vector.shape_cast %550 : vector<1x2x256xf32> to vector<2x256xf32>
    %552 = vector.broadcast %549 : f32 to vector<2x256xf32>
    %553 = arith.mulf %552, %551 : vector<2x256xf32>
    %554 = arith.addf %543, %553 : vector<2x256xf32>
    %c67 = arith.constant 67 : index
    %555 = memref.load %arg4[%c67] : memref<98xf32, #tpu.memory_space<smem>>
    %556 = vector.extract_strided_slice %548 {offsets = [1, 0, 0], sizes = [1, 2, 256], strides = [1, 1, 1]} : vector<2x2x256xf32> to vector<1x2x256xf32>
    %557 = vector.shape_cast %556 : vector<1x2x256xf32> to vector<2x256xf32>
    %558 = vector.broadcast %555 : f32 to vector<2x256xf32>
    %559 = arith.mulf %558, %557 : vector<2x256xf32>
    %560 = arith.addf %554, %559 : vector<2x256xf32>
    %c0_125 = arith.constant 0 : index
    %c0_126 = arith.constant 0 : index
    %c129 = arith.constant 129 : index
    %561 = vector.load %arg7[%c0_125, %c0_126, %c129] : memref<2x2x512xf32, #tpu.memory_space<vmem>>, vector<2x2x256xf32>
    %cst_127 = arith.constant 0.000000e+00 : f32
    %562 = vector.shape_cast %509 : vector<1x1x256xi1> to vector<1x1x256xi1>
    %563 = vector.broadcast %562 : vector<1x1x256xi1> to vector<2x2x256xi1>
    %564 = vector.broadcast %cst_127 : f32 to vector<2x2x256xf32>
    %565 = arith.select %563, %561, %564 : vector<2x2x256xi1>, vector<2x2x256xf32>
    %c25 = arith.constant 25 : index
    %566 = memref.load %arg4[%c25] : memref<98xf32, #tpu.memory_space<smem>>
    %567 = vector.extract_strided_slice %565 {offsets = [0, 0, 0], sizes = [1, 2, 256], strides = [1, 1, 1]} : vector<2x2x256xf32> to vector<1x2x256xf32>
    %568 = vector.shape_cast %567 : vector<1x2x256xf32> to vector<2x256xf32>
    %569 = vector.broadcast %566 : f32 to vector<2x256xf32>
    %570 = arith.mulf %569, %568 : vector<2x256xf32>
    %571 = arith.addf %560, %570 : vector<2x256xf32>
    %c74 = arith.constant 74 : index
    %572 = memref.load %arg4[%c74] : memref<98xf32, #tpu.memory_space<smem>>
    %573 = vector.extract_strided_slice %565 {offsets = [1, 0, 0], sizes = [1, 2, 256], strides = [1, 1, 1]} : vector<2x2x256xf32> to vector<1x2x256xf32>
    %574 = vector.shape_cast %573 : vector<1x2x256xf32> to vector<2x256xf32>
    %575 = vector.broadcast %572 : f32 to vector<2x256xf32>
    %576 = arith.mulf %575, %574 : vector<2x256xf32>
    %577 = arith.addf %571, %576 : vector<2x256xf32>
    %c0_128 = arith.constant 0 : index
    %c0_129 = arith.constant 0 : index
    %c145 = arith.constant 145 : index
    %578 = vector.load %arg7[%c0_128, %c0_129, %c145] : memref<2x2x512xf32, #tpu.memory_space<vmem>>, vector<2x2x256xf32>
    %cst_130 = arith.constant 0.000000e+00 : f32
    %579 = vector.shape_cast %509 : vector<1x1x256xi1> to vector<1x1x256xi1>
    %580 = vector.broadcast %579 : vector<1x1x256xi1> to vector<2x2x256xi1>
    %581 = vector.broadcast %cst_130 : f32 to vector<2x2x256xf32>
    %582 = arith.select %580, %578, %581 : vector<2x2x256xi1>, vector<2x2x256xf32>
    %c32 = arith.constant 32 : index
    %583 = memref.load %arg4[%c32] : memref<98xf32, #tpu.memory_space<smem>>
    %584 = vector.extract_strided_slice %582 {offsets = [0, 0, 0], sizes = [1, 2, 256], strides = [1, 1, 1]} : vector<2x2x256xf32> to vector<1x2x256xf32>
    %585 = vector.shape_cast %584 : vector<1x2x256xf32> to vector<2x256xf32>
    %586 = vector.broadcast %583 : f32 to vector<2x256xf32>
    %587 = arith.mulf %586, %585 : vector<2x256xf32>
    %588 = arith.addf %577, %587 : vector<2x256xf32>
    %c81_131 = arith.constant 81 : index
    %589 = memref.load %arg4[%c81_131] : memref<98xf32, #tpu.memory_space<smem>>
    %590 = vector.extract_strided_slice %582 {offsets = [1, 0, 0], sizes = [1, 2, 256], strides = [1, 1, 1]} : vector<2x2x256xf32> to vector<1x2x256xf32>
    %591 = vector.shape_cast %590 : vector<1x2x256xf32> to vector<2x256xf32>
    %592 = vector.broadcast %589 : f32 to vector<2x256xf32>
    %593 = arith.mulf %592, %591 : vector<2x256xf32>
    %594 = arith.addf %588, %593 : vector<2x256xf32>
    %c0_132 = arith.constant 0 : index
    %c0_133 = arith.constant 0 : index
    %c161 = arith.constant 161 : index
    %595 = vector.load %arg7[%c0_132, %c0_133, %c161] : memref<2x2x512xf32, #tpu.memory_space<vmem>>, vector<2x2x256xf32>
    %cst_134 = arith.constant 0.000000e+00 : f32
    %596 = vector.shape_cast %509 : vector<1x1x256xi1> to vector<1x1x256xi1>
    %597 = vector.broadcast %596 : vector<1x1x256xi1> to vector<2x2x256xi1>
    %598 = vector.broadcast %cst_134 : f32 to vector<2x2x256xf32>
    %599 = arith.select %597, %595, %598 : vector<2x2x256xi1>, vector<2x2x256xf32>
    %c39 = arith.constant 39 : index
    %600 = memref.load %arg4[%c39] : memref<98xf32, #tpu.memory_space<smem>>
    %601 = vector.extract_strided_slice %599 {offsets = [0, 0, 0], sizes = [1, 2, 256], strides = [1, 1, 1]} : vector<2x2x256xf32> to vector<1x2x256xf32>
    %602 = vector.shape_cast %601 : vector<1x2x256xf32> to vector<2x256xf32>
    %603 = vector.broadcast %600 : f32 to vector<2x256xf32>
    %604 = arith.mulf %603, %602 : vector<2x256xf32>
    %605 = arith.addf %594, %604 : vector<2x256xf32>
    %c88 = arith.constant 88 : index
    %606 = memref.load %arg4[%c88] : memref<98xf32, #tpu.memory_space<smem>>
    %607 = vector.extract_strided_slice %599 {offsets = [1, 0, 0], sizes = [1, 2, 256], strides = [1, 1, 1]} : vector<2x2x256xf32> to vector<1x2x256xf32>
    %608 = vector.shape_cast %607 : vector<1x2x256xf32> to vector<2x256xf32>
    %609 = vector.broadcast %606 : f32 to vector<2x256xf32>
    %610 = arith.mulf %609, %608 : vector<2x256xf32>
    %611 = arith.addf %605, %610 : vector<2x256xf32>
    %c0_135 = arith.constant 0 : index
    %c0_136 = arith.constant 0 : index
    %c177 = arith.constant 177 : index
    %612 = vector.load %arg7[%c0_135, %c0_136, %c177] : memref<2x2x512xf32, #tpu.memory_space<vmem>>, vector<2x2x256xf32>
    %cst_137 = arith.constant 0.000000e+00 : f32
    %613 = vector.shape_cast %509 : vector<1x1x256xi1> to vector<1x1x256xi1>
    %614 = vector.broadcast %613 : vector<1x1x256xi1> to vector<2x2x256xi1>
    %615 = vector.broadcast %cst_137 : f32 to vector<2x2x256xf32>
    %616 = arith.select %614, %612, %615 : vector<2x2x256xi1>, vector<2x2x256xf32>
    %c46 = arith.constant 46 : index
    %617 = memref.load %arg4[%c46] : memref<98xf32, #tpu.memory_space<smem>>
    %618 = vector.extract_strided_slice %616 {offsets = [0, 0, 0], sizes = [1, 2, 256], strides = [1, 1, 1]} : vector<2x2x256xf32> to vector<1x2x256xf32>
    %619 = vector.shape_cast %618 : vector<1x2x256xf32> to vector<2x256xf32>
    %620 = vector.broadcast %617 : f32 to vector<2x256xf32>
    %621 = arith.mulf %620, %619 : vector<2x256xf32>
    %622 = arith.addf %611, %621 : vector<2x256xf32>
    %c95_138 = arith.constant 95 : index
    %623 = memref.load %arg4[%c95_138] : memref<98xf32, #tpu.memory_space<smem>>
    %624 = vector.extract_strided_slice %616 {offsets = [1, 0, 0], sizes = [1, 2, 256], strides = [1, 1, 1]} : vector<2x2x256xf32> to vector<1x2x256xf32>
    %625 = vector.shape_cast %624 : vector<1x2x256xf32> to vector<2x256xf32>
    %626 = vector.broadcast %623 : f32 to vector<2x256xf32>
    %627 = arith.mulf %626, %625 : vector<2x256xf32>
    %628 = arith.addf %622, %627 : vector<2x256xf32>
    %c14_i32 = arith.constant 14 : i32
    %629 = vector.broadcast %c14_i32 : i32 to vector<1x1x256xi32>
    %630 = arith.cmpi slt, %51, %629 : vector<1x1x256xi32>
    %c0_139 = arith.constant 0 : index
    %c0_140 = arith.constant 0 : index
    %c82 = arith.constant 82 : index
    %631 = vector.load %arg7[%c0_139, %c0_140, %c82] : memref<2x2x512xf32, #tpu.memory_space<vmem>>, vector<2x2x256xf32>
    %cst_141 = arith.constant 0.000000e+00 : f32
    %632 = vector.shape_cast %630 : vector<1x1x256xi1> to vector<1x1x256xi1>
    %633 = vector.broadcast %632 : vector<1x1x256xi1> to vector<2x2x256xi1>
    %634 = vector.broadcast %cst_141 : f32 to vector<2x2x256xf32>
    %635 = arith.select %633, %631, %634 : vector<2x2x256xi1>, vector<2x2x256xf32>
    %c5 = arith.constant 5 : index
    %636 = memref.load %arg4[%c5] : memref<98xf32, #tpu.memory_space<smem>>
    %637 = vector.extract_strided_slice %635 {offsets = [0, 0, 0], sizes = [1, 2, 256], strides = [1, 1, 1]} : vector<2x2x256xf32> to vector<1x2x256xf32>
    %638 = vector.shape_cast %637 : vector<1x2x256xf32> to vector<2x256xf32>
    %639 = vector.broadcast %636 : f32 to vector<2x256xf32>
    %640 = arith.mulf %639, %638 : vector<2x256xf32>
    %641 = arith.addf %628, %640 : vector<2x256xf32>
    %c54 = arith.constant 54 : index
    %642 = memref.load %arg4[%c54] : memref<98xf32, #tpu.memory_space<smem>>
    %643 = vector.extract_strided_slice %635 {offsets = [1, 0, 0], sizes = [1, 2, 256], strides = [1, 1, 1]} : vector<2x2x256xf32> to vector<1x2x256xf32>
    %644 = vector.shape_cast %643 : vector<1x2x256xf32> to vector<2x256xf32>
    %645 = vector.broadcast %642 : f32 to vector<2x256xf32>
    %646 = arith.mulf %645, %644 : vector<2x256xf32>
    %647 = arith.addf %641, %646 : vector<2x256xf32>
    %c0_142 = arith.constant 0 : index
    %c0_143 = arith.constant 0 : index
    %c98 = arith.constant 98 : index
    %648 = vector.load %arg7[%c0_142, %c0_143, %c98] : memref<2x2x512xf32, #tpu.memory_space<vmem>>, vector<2x2x256xf32>
    %cst_144 = arith.constant 0.000000e+00 : f32
    %649 = vector.shape_cast %630 : vector<1x1x256xi1> to vector<1x1x256xi1>
    %650 = vector.broadcast %649 : vector<1x1x256xi1> to vector<2x2x256xi1>
    %651 = vector.broadcast %cst_144 : f32 to vector<2x2x256xf32>
    %652 = arith.select %650, %648, %651 : vector<2x2x256xi1>, vector<2x2x256xf32>
    %c12 = arith.constant 12 : index
    %653 = memref.load %arg4[%c12] : memref<98xf32, #tpu.memory_space<smem>>
    %654 = vector.extract_strided_slice %652 {offsets = [0, 0, 0], sizes = [1, 2, 256], strides = [1, 1, 1]} : vector<2x2x256xf32> to vector<1x2x256xf32>
    %655 = vector.shape_cast %654 : vector<1x2x256xf32> to vector<2x256xf32>
    %656 = vector.broadcast %653 : f32 to vector<2x256xf32>
    %657 = arith.mulf %656, %655 : vector<2x256xf32>
    %658 = arith.addf %647, %657 : vector<2x256xf32>
    %c61 = arith.constant 61 : index
    %659 = memref.load %arg4[%c61] : memref<98xf32, #tpu.memory_space<smem>>
    %660 = vector.extract_strided_slice %652 {offsets = [1, 0, 0], sizes = [1, 2, 256], strides = [1, 1, 1]} : vector<2x2x256xf32> to vector<1x2x256xf32>
    %661 = vector.shape_cast %660 : vector<1x2x256xf32> to vector<2x256xf32>
    %662 = vector.broadcast %659 : f32 to vector<2x256xf32>
    %663 = arith.mulf %662, %661 : vector<2x256xf32>
    %664 = arith.addf %658, %663 : vector<2x256xf32>
    %c0_145 = arith.constant 0 : index
    %c0_146 = arith.constant 0 : index
    %c114 = arith.constant 114 : index
    %665 = vector.load %arg7[%c0_145, %c0_146, %c114] : memref<2x2x512xf32, #tpu.memory_space<vmem>>, vector<2x2x256xf32>
    %cst_147 = arith.constant 0.000000e+00 : f32
    %666 = vector.shape_cast %630 : vector<1x1x256xi1> to vector<1x1x256xi1>
    %667 = vector.broadcast %666 : vector<1x1x256xi1> to vector<2x2x256xi1>
    %668 = vector.broadcast %cst_147 : f32 to vector<2x2x256xf32>
    %669 = arith.select %667, %665, %668 : vector<2x2x256xi1>, vector<2x2x256xf32>
    %c19 = arith.constant 19 : index
    %670 = memref.load %arg4[%c19] : memref<98xf32, #tpu.memory_space<smem>>
    %671 = vector.extract_strided_slice %669 {offsets = [0, 0, 0], sizes = [1, 2, 256], strides = [1, 1, 1]} : vector<2x2x256xf32> to vector<1x2x256xf32>
    %672 = vector.shape_cast %671 : vector<1x2x256xf32> to vector<2x256xf32>
    %673 = vector.broadcast %670 : f32 to vector<2x256xf32>
    %674 = arith.mulf %673, %672 : vector<2x256xf32>
    %675 = arith.addf %664, %674 : vector<2x256xf32>
    %c68 = arith.constant 68 : index
    %676 = memref.load %arg4[%c68] : memref<98xf32, #tpu.memory_space<smem>>
    %677 = vector.extract_strided_slice %669 {offsets = [1, 0, 0], sizes = [1, 2, 256], strides = [1, 1, 1]} : vector<2x2x256xf32> to vector<1x2x256xf32>
    %678 = vector.shape_cast %677 : vector<1x2x256xf32> to vector<2x256xf32>
    %679 = vector.broadcast %676 : f32 to vector<2x256xf32>
    %680 = arith.mulf %679, %678 : vector<2x256xf32>
    %681 = arith.addf %675, %680 : vector<2x256xf32>
    %c0_148 = arith.constant 0 : index
    %c0_149 = arith.constant 0 : index
    %c130 = arith.constant 130 : index
    %682 = vector.load %arg7[%c0_148, %c0_149, %c130] : memref<2x2x512xf32, #tpu.memory_space<vmem>>, vector<2x2x256xf32>
    %cst_150 = arith.constant 0.000000e+00 : f32
    %683 = vector.shape_cast %630 : vector<1x1x256xi1> to vector<1x1x256xi1>
    %684 = vector.broadcast %683 : vector<1x1x256xi1> to vector<2x2x256xi1>
    %685 = vector.broadcast %cst_150 : f32 to vector<2x2x256xf32>
    %686 = arith.select %684, %682, %685 : vector<2x2x256xi1>, vector<2x2x256xf32>
    %c26 = arith.constant 26 : index
    %687 = memref.load %arg4[%c26] : memref<98xf32, #tpu.memory_space<smem>>
    %688 = vector.extract_strided_slice %686 {offsets = [0, 0, 0], sizes = [1, 2, 256], strides = [1, 1, 1]} : vector<2x2x256xf32> to vector<1x2x256xf32>
    %689 = vector.shape_cast %688 : vector<1x2x256xf32> to vector<2x256xf32>
    %690 = vector.broadcast %687 : f32 to vector<2x256xf32>
    %691 = arith.mulf %690, %689 : vector<2x256xf32>
    %692 = arith.addf %681, %691 : vector<2x256xf32>
    %c75 = arith.constant 75 : index
    %693 = memref.load %arg4[%c75] : memref<98xf32, #tpu.memory_space<smem>>
    %694 = vector.extract_strided_slice %686 {offsets = [1, 0, 0], sizes = [1, 2, 256], strides = [1, 1, 1]} : vector<2x2x256xf32> to vector<1x2x256xf32>
    %695 = vector.shape_cast %694 : vector<1x2x256xf32> to vector<2x256xf32>
    %696 = vector.broadcast %693 : f32 to vector<2x256xf32>
    %697 = arith.mulf %696, %695 : vector<2x256xf32>
    %698 = arith.addf %692, %697 : vector<2x256xf32>
    %c0_151 = arith.constant 0 : index
    %c0_152 = arith.constant 0 : index
    %c146 = arith.constant 146 : index
    %699 = vector.load %arg7[%c0_151, %c0_152, %c146] : memref<2x2x512xf32, #tpu.memory_space<vmem>>, vector<2x2x256xf32>
    %cst_153 = arith.constant 0.000000e+00 : f32
    %700 = vector.shape_cast %630 : vector<1x1x256xi1> to vector<1x1x256xi1>
    %701 = vector.broadcast %700 : vector<1x1x256xi1> to vector<2x2x256xi1>
    %702 = vector.broadcast %cst_153 : f32 to vector<2x2x256xf32>
    %703 = arith.select %701, %699, %702 : vector<2x2x256xi1>, vector<2x2x256xf32>
    %c33 = arith.constant 33 : index
    %704 = memref.load %arg4[%c33] : memref<98xf32, #tpu.memory_space<smem>>
    %705 = vector.extract_strided_slice %703 {offsets = [0, 0, 0], sizes = [1, 2, 256], strides = [1, 1, 1]} : vector<2x2x256xf32> to vector<1x2x256xf32>
    %706 = vector.shape_cast %705 : vector<1x2x256xf32> to vector<2x256xf32>
    %707 = vector.broadcast %704 : f32 to vector<2x256xf32>
    %708 = arith.mulf %707, %706 : vector<2x256xf32>
    %709 = arith.addf %698, %708 : vector<2x256xf32>
    %c82_154 = arith.constant 82 : index
    %710 = memref.load %arg4[%c82_154] : memref<98xf32, #tpu.memory_space<smem>>
    %711 = vector.extract_strided_slice %703 {offsets = [1, 0, 0], sizes = [1, 2, 256], strides = [1, 1, 1]} : vector<2x2x256xf32> to vector<1x2x256xf32>
    %712 = vector.shape_cast %711 : vector<1x2x256xf32> to vector<2x256xf32>
    %713 = vector.broadcast %710 : f32 to vector<2x256xf32>
    %714 = arith.mulf %713, %712 : vector<2x256xf32>
    %715 = arith.addf %709, %714 : vector<2x256xf32>
    %c0_155 = arith.constant 0 : index
    %c0_156 = arith.constant 0 : index
    %c162 = arith.constant 162 : index
    %716 = vector.load %arg7[%c0_155, %c0_156, %c162] : memref<2x2x512xf32, #tpu.memory_space<vmem>>, vector<2x2x256xf32>
    %cst_157 = arith.constant 0.000000e+00 : f32
    %717 = vector.shape_cast %630 : vector<1x1x256xi1> to vector<1x1x256xi1>
    %718 = vector.broadcast %717 : vector<1x1x256xi1> to vector<2x2x256xi1>
    %719 = vector.broadcast %cst_157 : f32 to vector<2x2x256xf32>
    %720 = arith.select %718, %716, %719 : vector<2x2x256xi1>, vector<2x2x256xf32>
    %c40 = arith.constant 40 : index
    %721 = memref.load %arg4[%c40] : memref<98xf32, #tpu.memory_space<smem>>
    %722 = vector.extract_strided_slice %720 {offsets = [0, 0, 0], sizes = [1, 2, 256], strides = [1, 1, 1]} : vector<2x2x256xf32> to vector<1x2x256xf32>
    %723 = vector.shape_cast %722 : vector<1x2x256xf32> to vector<2x256xf32>
    %724 = vector.broadcast %721 : f32 to vector<2x256xf32>
    %725 = arith.mulf %724, %723 : vector<2x256xf32>
    %726 = arith.addf %715, %725 : vector<2x256xf32>
    %c89 = arith.constant 89 : index
    %727 = memref.load %arg4[%c89] : memref<98xf32, #tpu.memory_space<smem>>
    %728 = vector.extract_strided_slice %720 {offsets = [1, 0, 0], sizes = [1, 2, 256], strides = [1, 1, 1]} : vector<2x2x256xf32> to vector<1x2x256xf32>
    %729 = vector.shape_cast %728 : vector<1x2x256xf32> to vector<2x256xf32>
    %730 = vector.broadcast %727 : f32 to vector<2x256xf32>
    %731 = arith.mulf %730, %729 : vector<2x256xf32>
    %732 = arith.addf %726, %731 : vector<2x256xf32>
    %c0_158 = arith.constant 0 : index
    %c0_159 = arith.constant 0 : index
    %c178 = arith.constant 178 : index
    %733 = vector.load %arg7[%c0_158, %c0_159, %c178] : memref<2x2x512xf32, #tpu.memory_space<vmem>>, vector<2x2x256xf32>
    %cst_160 = arith.constant 0.000000e+00 : f32
    %734 = vector.shape_cast %630 : vector<1x1x256xi1> to vector<1x1x256xi1>
    %735 = vector.broadcast %734 : vector<1x1x256xi1> to vector<2x2x256xi1>
    %736 = vector.broadcast %cst_160 : f32 to vector<2x2x256xf32>
    %737 = arith.select %735, %733, %736 : vector<2x2x256xi1>, vector<2x2x256xf32>
    %c47 = arith.constant 47 : index
    %738 = memref.load %arg4[%c47] : memref<98xf32, #tpu.memory_space<smem>>
    %739 = vector.extract_strided_slice %737 {offsets = [0, 0, 0], sizes = [1, 2, 256], strides = [1, 1, 1]} : vector<2x2x256xf32> to vector<1x2x256xf32>
    %740 = vector.shape_cast %739 : vector<1x2x256xf32> to vector<2x256xf32>
    %741 = vector.broadcast %738 : f32 to vector<2x256xf32>
    %742 = arith.mulf %741, %740 : vector<2x256xf32>
    %743 = arith.addf %732, %742 : vector<2x256xf32>
    %c96_161 = arith.constant 96 : index
    %744 = memref.load %arg4[%c96_161] : memref<98xf32, #tpu.memory_space<smem>>
    %745 = vector.extract_strided_slice %737 {offsets = [1, 0, 0], sizes = [1, 2, 256], strides = [1, 1, 1]} : vector<2x2x256xf32> to vector<1x2x256xf32>
    %746 = vector.shape_cast %745 : vector<1x2x256xf32> to vector<2x256xf32>
    %747 = vector.broadcast %744 : f32 to vector<2x256xf32>
    %748 = arith.mulf %747, %746 : vector<2x256xf32>
    %749 = arith.addf %743, %748 : vector<2x256xf32>
    %c13_i32 = arith.constant 13 : i32
    %750 = vector.broadcast %c13_i32 : i32 to vector<1x1x256xi32>
    %751 = arith.cmpi slt, %51, %750 : vector<1x1x256xi32>
    %c0_162 = arith.constant 0 : index
    %c0_163 = arith.constant 0 : index
    %c83 = arith.constant 83 : index
    %752 = vector.load %arg7[%c0_162, %c0_163, %c83] : memref<2x2x512xf32, #tpu.memory_space<vmem>>, vector<2x2x256xf32>
    %cst_164 = arith.constant 0.000000e+00 : f32
    %753 = vector.shape_cast %751 : vector<1x1x256xi1> to vector<1x1x256xi1>
    %754 = vector.broadcast %753 : vector<1x1x256xi1> to vector<2x2x256xi1>
    %755 = vector.broadcast %cst_164 : f32 to vector<2x2x256xf32>
    %756 = arith.select %754, %752, %755 : vector<2x2x256xi1>, vector<2x2x256xf32>
    %c6 = arith.constant 6 : index
    %757 = memref.load %arg4[%c6] : memref<98xf32, #tpu.memory_space<smem>>
    %758 = vector.extract_strided_slice %756 {offsets = [0, 0, 0], sizes = [1, 2, 256], strides = [1, 1, 1]} : vector<2x2x256xf32> to vector<1x2x256xf32>
    %759 = vector.shape_cast %758 : vector<1x2x256xf32> to vector<2x256xf32>
    %760 = vector.broadcast %757 : f32 to vector<2x256xf32>
    %761 = arith.mulf %760, %759 : vector<2x256xf32>
    %762 = arith.addf %749, %761 : vector<2x256xf32>
    %c55 = arith.constant 55 : index
    %763 = memref.load %arg4[%c55] : memref<98xf32, #tpu.memory_space<smem>>
    %764 = vector.extract_strided_slice %756 {offsets = [1, 0, 0], sizes = [1, 2, 256], strides = [1, 1, 1]} : vector<2x2x256xf32> to vector<1x2x256xf32>
    %765 = vector.shape_cast %764 : vector<1x2x256xf32> to vector<2x256xf32>
    %766 = vector.broadcast %763 : f32 to vector<2x256xf32>
    %767 = arith.mulf %766, %765 : vector<2x256xf32>
    %768 = arith.addf %762, %767 : vector<2x256xf32>
    %c0_165 = arith.constant 0 : index
    %c0_166 = arith.constant 0 : index
    %c99 = arith.constant 99 : index
    %769 = vector.load %arg7[%c0_165, %c0_166, %c99] : memref<2x2x512xf32, #tpu.memory_space<vmem>>, vector<2x2x256xf32>
    %cst_167 = arith.constant 0.000000e+00 : f32
    %770 = vector.shape_cast %751 : vector<1x1x256xi1> to vector<1x1x256xi1>
    %771 = vector.broadcast %770 : vector<1x1x256xi1> to vector<2x2x256xi1>
    %772 = vector.broadcast %cst_167 : f32 to vector<2x2x256xf32>
    %773 = arith.select %771, %769, %772 : vector<2x2x256xi1>, vector<2x2x256xf32>
    %c13 = arith.constant 13 : index
    %774 = memref.load %arg4[%c13] : memref<98xf32, #tpu.memory_space<smem>>
    %775 = vector.extract_strided_slice %773 {offsets = [0, 0, 0], sizes = [1, 2, 256], strides = [1, 1, 1]} : vector<2x2x256xf32> to vector<1x2x256xf32>
    %776 = vector.shape_cast %775 : vector<1x2x256xf32> to vector<2x256xf32>
    %777 = vector.broadcast %774 : f32 to vector<2x256xf32>
    %778 = arith.mulf %777, %776 : vector<2x256xf32>
    %779 = arith.addf %768, %778 : vector<2x256xf32>
    %c62 = arith.constant 62 : index
    %780 = memref.load %arg4[%c62] : memref<98xf32, #tpu.memory_space<smem>>
    %781 = vector.extract_strided_slice %773 {offsets = [1, 0, 0], sizes = [1, 2, 256], strides = [1, 1, 1]} : vector<2x2x256xf32> to vector<1x2x256xf32>
    %782 = vector.shape_cast %781 : vector<1x2x256xf32> to vector<2x256xf32>
    %783 = vector.broadcast %780 : f32 to vector<2x256xf32>
    %784 = arith.mulf %783, %782 : vector<2x256xf32>
    %785 = arith.addf %779, %784 : vector<2x256xf32>
    %c0_168 = arith.constant 0 : index
    %c0_169 = arith.constant 0 : index
    %c115 = arith.constant 115 : index
    %786 = vector.load %arg7[%c0_168, %c0_169, %c115] : memref<2x2x512xf32, #tpu.memory_space<vmem>>, vector<2x2x256xf32>
    %cst_170 = arith.constant 0.000000e+00 : f32
    %787 = vector.shape_cast %751 : vector<1x1x256xi1> to vector<1x1x256xi1>
    %788 = vector.broadcast %787 : vector<1x1x256xi1> to vector<2x2x256xi1>
    %789 = vector.broadcast %cst_170 : f32 to vector<2x2x256xf32>
    %790 = arith.select %788, %786, %789 : vector<2x2x256xi1>, vector<2x2x256xf32>
    %c20 = arith.constant 20 : index
    %791 = memref.load %arg4[%c20] : memref<98xf32, #tpu.memory_space<smem>>
    %792 = vector.extract_strided_slice %790 {offsets = [0, 0, 0], sizes = [1, 2, 256], strides = [1, 1, 1]} : vector<2x2x256xf32> to vector<1x2x256xf32>
    %793 = vector.shape_cast %792 : vector<1x2x256xf32> to vector<2x256xf32>
    %794 = vector.broadcast %791 : f32 to vector<2x256xf32>
    %795 = arith.mulf %794, %793 : vector<2x256xf32>
    %796 = arith.addf %785, %795 : vector<2x256xf32>
    %c69 = arith.constant 69 : index
    %797 = memref.load %arg4[%c69] : memref<98xf32, #tpu.memory_space<smem>>
    %798 = vector.extract_strided_slice %790 {offsets = [1, 0, 0], sizes = [1, 2, 256], strides = [1, 1, 1]} : vector<2x2x256xf32> to vector<1x2x256xf32>
    %799 = vector.shape_cast %798 : vector<1x2x256xf32> to vector<2x256xf32>
    %800 = vector.broadcast %797 : f32 to vector<2x256xf32>
    %801 = arith.mulf %800, %799 : vector<2x256xf32>
    %802 = arith.addf %796, %801 : vector<2x256xf32>
    %c0_171 = arith.constant 0 : index
    %c0_172 = arith.constant 0 : index
    %c131 = arith.constant 131 : index
    %803 = vector.load %arg7[%c0_171, %c0_172, %c131] : memref<2x2x512xf32, #tpu.memory_space<vmem>>, vector<2x2x256xf32>
    %cst_173 = arith.constant 0.000000e+00 : f32
    %804 = vector.shape_cast %751 : vector<1x1x256xi1> to vector<1x1x256xi1>
    %805 = vector.broadcast %804 : vector<1x1x256xi1> to vector<2x2x256xi1>
    %806 = vector.broadcast %cst_173 : f32 to vector<2x2x256xf32>
    %807 = arith.select %805, %803, %806 : vector<2x2x256xi1>, vector<2x2x256xf32>
    %c27 = arith.constant 27 : index
    %808 = memref.load %arg4[%c27] : memref<98xf32, #tpu.memory_space<smem>>
    %809 = vector.extract_strided_slice %807 {offsets = [0, 0, 0], sizes = [1, 2, 256], strides = [1, 1, 1]} : vector<2x2x256xf32> to vector<1x2x256xf32>
    %810 = vector.shape_cast %809 : vector<1x2x256xf32> to vector<2x256xf32>
    %811 = vector.broadcast %808 : f32 to vector<2x256xf32>
    %812 = arith.mulf %811, %810 : vector<2x256xf32>
    %813 = arith.addf %802, %812 : vector<2x256xf32>
    %c76 = arith.constant 76 : index
    %814 = memref.load %arg4[%c76] : memref<98xf32, #tpu.memory_space<smem>>
    %815 = vector.extract_strided_slice %807 {offsets = [1, 0, 0], sizes = [1, 2, 256], strides = [1, 1, 1]} : vector<2x2x256xf32> to vector<1x2x256xf32>
    %816 = vector.shape_cast %815 : vector<1x2x256xf32> to vector<2x256xf32>
    %817 = vector.broadcast %814 : f32 to vector<2x256xf32>
    %818 = arith.mulf %817, %816 : vector<2x256xf32>
    %819 = arith.addf %813, %818 : vector<2x256xf32>
    %c0_174 = arith.constant 0 : index
    %c0_175 = arith.constant 0 : index
    %c147 = arith.constant 147 : index
    %820 = vector.load %arg7[%c0_174, %c0_175, %c147] : memref<2x2x512xf32, #tpu.memory_space<vmem>>, vector<2x2x256xf32>
    %cst_176 = arith.constant 0.000000e+00 : f32
    %821 = vector.shape_cast %751 : vector<1x1x256xi1> to vector<1x1x256xi1>
    %822 = vector.broadcast %821 : vector<1x1x256xi1> to vector<2x2x256xi1>
    %823 = vector.broadcast %cst_176 : f32 to vector<2x2x256xf32>
    %824 = arith.select %822, %820, %823 : vector<2x2x256xi1>, vector<2x2x256xf32>
    %c34 = arith.constant 34 : index
    %825 = memref.load %arg4[%c34] : memref<98xf32, #tpu.memory_space<smem>>
    %826 = vector.extract_strided_slice %824 {offsets = [0, 0, 0], sizes = [1, 2, 256], strides = [1, 1, 1]} : vector<2x2x256xf32> to vector<1x2x256xf32>
    %827 = vector.shape_cast %826 : vector<1x2x256xf32> to vector<2x256xf32>
    %828 = vector.broadcast %825 : f32 to vector<2x256xf32>
    %829 = arith.mulf %828, %827 : vector<2x256xf32>
    %830 = arith.addf %819, %829 : vector<2x256xf32>
    %c83_177 = arith.constant 83 : index
    %831 = memref.load %arg4[%c83_177] : memref<98xf32, #tpu.memory_space<smem>>
    %832 = vector.extract_strided_slice %824 {offsets = [1, 0, 0], sizes = [1, 2, 256], strides = [1, 1, 1]} : vector<2x2x256xf32> to vector<1x2x256xf32>
    %833 = vector.shape_cast %832 : vector<1x2x256xf32> to vector<2x256xf32>
    %834 = vector.broadcast %831 : f32 to vector<2x256xf32>
    %835 = arith.mulf %834, %833 : vector<2x256xf32>
    %836 = arith.addf %830, %835 : vector<2x256xf32>
    %c0_178 = arith.constant 0 : index
    %c0_179 = arith.constant 0 : index
    %c163 = arith.constant 163 : index
    %837 = vector.load %arg7[%c0_178, %c0_179, %c163] : memref<2x2x512xf32, #tpu.memory_space<vmem>>, vector<2x2x256xf32>
    %cst_180 = arith.constant 0.000000e+00 : f32
    %838 = vector.shape_cast %751 : vector<1x1x256xi1> to vector<1x1x256xi1>
    %839 = vector.broadcast %838 : vector<1x1x256xi1> to vector<2x2x256xi1>
    %840 = vector.broadcast %cst_180 : f32 to vector<2x2x256xf32>
    %841 = arith.select %839, %837, %840 : vector<2x2x256xi1>, vector<2x2x256xf32>
    %c41 = arith.constant 41 : index
    %842 = memref.load %arg4[%c41] : memref<98xf32, #tpu.memory_space<smem>>
    %843 = vector.extract_strided_slice %841 {offsets = [0, 0, 0], sizes = [1, 2, 256], strides = [1, 1, 1]} : vector<2x2x256xf32> to vector<1x2x256xf32>
    %844 = vector.shape_cast %843 : vector<1x2x256xf32> to vector<2x256xf32>
    %845 = vector.broadcast %842 : f32 to vector<2x256xf32>
    %846 = arith.mulf %845, %844 : vector<2x256xf32>
    %847 = arith.addf %836, %846 : vector<2x256xf32>
    %c90 = arith.constant 90 : index
    %848 = memref.load %arg4[%c90] : memref<98xf32, #tpu.memory_space<smem>>
    %849 = vector.extract_strided_slice %841 {offsets = [1, 0, 0], sizes = [1, 2, 256], strides = [1, 1, 1]} : vector<2x2x256xf32> to vector<1x2x256xf32>
    %850 = vector.shape_cast %849 : vector<1x2x256xf32> to vector<2x256xf32>
    %851 = vector.broadcast %848 : f32 to vector<2x256xf32>
    %852 = arith.mulf %851, %850 : vector<2x256xf32>
    %853 = arith.addf %847, %852 : vector<2x256xf32>
    %c0_181 = arith.constant 0 : index
    %c0_182 = arith.constant 0 : index
    %c179 = arith.constant 179 : index
    %854 = vector.load %arg7[%c0_181, %c0_182, %c179] : memref<2x2x512xf32, #tpu.memory_space<vmem>>, vector<2x2x256xf32>
    %cst_183 = arith.constant 0.000000e+00 : f32
    %855 = vector.shape_cast %751 : vector<1x1x256xi1> to vector<1x1x256xi1>
    %856 = vector.broadcast %855 : vector<1x1x256xi1> to vector<2x2x256xi1>
    %857 = vector.broadcast %cst_183 : f32 to vector<2x2x256xf32>
    %858 = arith.select %856, %854, %857 : vector<2x2x256xi1>, vector<2x2x256xf32>
    %c48 = arith.constant 48 : index
    %859 = memref.load %arg4[%c48] : memref<98xf32, #tpu.memory_space<smem>>
    %860 = vector.extract_strided_slice %858 {offsets = [0, 0, 0], sizes = [1, 2, 256], strides = [1, 1, 1]} : vector<2x2x256xf32> to vector<1x2x256xf32>
    %861 = vector.shape_cast %860 : vector<1x2x256xf32> to vector<2x256xf32>
    %862 = vector.broadcast %859 : f32 to vector<2x256xf32>
    %863 = arith.mulf %862, %861 : vector<2x256xf32>
    %864 = arith.addf %853, %863 : vector<2x256xf32>
    %c97_184 = arith.constant 97 : index
    %865 = memref.load %arg4[%c97_184] : memref<98xf32, #tpu.memory_space<smem>>
    %866 = vector.extract_strided_slice %858 {offsets = [1, 0, 0], sizes = [1, 2, 256], strides = [1, 1, 1]} : vector<2x2x256xf32> to vector<1x2x256xf32>
    %867 = vector.shape_cast %866 : vector<1x2x256xf32> to vector<2x256xf32>
    %868 = vector.broadcast %865 : f32 to vector<2x256xf32>
    %869 = arith.mulf %868, %867 : vector<2x256xf32>
    %870 = arith.addf %864, %869 : vector<2x256xf32>
    %871 = arith.negf %870 : vector<2x256xf32>
    %872 = math.exp %871 : vector<2x256xf32>
    %cst_185 = arith.constant 1.000000e+00 : f32
    %873 = vector.broadcast %cst_185 : f32 to vector<2x256xf32>
    %874 = arith.addf %873, %872 : vector<2x256xf32>
    %875 = arith.divf %873, %874 : vector<2x256xf32>
    %876 = vector.shape_cast %875 : vector<2x256xf32> to vector<2x1x256xf32>
    %877 = vector.broadcast %876 : vector<2x1x256xf32> to vector<2x32x256xf32>
    %878 = arith.mulf %22, %877 : vector<2x32x256xf32>
    %879 = arith.addf %878, %0 : vector<2x32x256xf32>
    %c0_186 = arith.constant 0 : index
    %c0_187 = arith.constant 0 : index
    %c0_188 = arith.constant 0 : index
    %880 = vector.load %arg6[%c0_186, %c0_187, %c0_188] : memref<2x32x256xf32, #tpu.memory_space<vmem>>, vector<2x32x256xf32>
    tpu.vector_store %arg6[%c0_186, %c0_187, %c0_188], %879 {strides = array<i32>} : memref<2x32x256xf32, #tpu.memory_space<vmem>>, vector<2x32x256xf32>,
    return
  }
  func.func @transform_0(%arg0: i32) -> (i32, i32, i32) {
    %c0_i32 = arith.constant 0 : i32
    %c0_i32_0 = arith.constant 0 : i32
    %c0_i32_1 = arith.constant 0 : i32
    return %arg0, %c0_i32, %c0_i32_0 : i32, i32, i32
  }
  func.func @transform_1(%arg0: i32) -> (i32, i32) {
    %c0_i32 = arith.constant 0 : i32
    %c0_i32_0 = arith.constant 0 : i32
    %c0_i32_1 = arith.constant 0 : i32
    return %c0_i32, %c0_i32_0 : i32, i32
  }
  func.func @transform_2(%arg0: i32) -> (i32, i32) {
    %c0_i32 = arith.constant 0 : i32
    %c0_i32_0 = arith.constant 0 : i32
    %c0_i32_1 = arith.constant 0 : i32
    return %c0_i32, %c0_i32_0 : i32, i32
  }
  func.func @transform_3(%arg0: i32) -> i32 {
    %c0_i32 = arith.constant 0 : i32
    %c0_i32_0 = arith.constant 0 : i32
    return %c0_i32 : i32
  }
  func.func @transform_4(%arg0: i32) -> i32 {
    %c0_i32 = arith.constant 0 : i32
    %c0_i32_0 = arith.constant 0 : i32
    return %c0_i32 : i32
  }
  func.func @transform_5(%arg0: i32) -> (i32, i32, i32) {
    %c0_i32 = arith.constant 0 : i32
    %c0_i32_0 = arith.constant 0 : i32
    %c0_i32_1 = arith.constant 0 : i32
    return %arg0, %c0_i32, %c0_i32_0 : i32, i32, i32
  }
}

</mosaic_0001>

<bundles_post_ra>
// kernel: tpu_custom_call.1
= control target key start
LH: loop header
LB: loop body
LE: loop exit
PB: predicated region body
PF: predicated region fallthrough
CT: control target
= control target key end

     0   :  { %11 = vsyncpa [#allocation5], 0  ;;  %s5814_s0 = inlined_call_operand.hbm [shape: f32[2,32,256], index: 0, kind: input, shape index: {}]   ;;  %s5815_s1 = inlined_call_operand.vmem [shape: f32[32,2], index: 1, kind: input, shape index: {}]   ;;  %s5816_s2 = inlined_call_operand.vmem [shape: f32[2,32], index: 2, kind: input, shape index: {}]   ;;  %s5817_s3 = inlined_call_operand.vmem [shape: f32[98], index: 3, kind: input, shape index: {}]   ;;  %s5818_s4 = inlined_call_operand.<no memory space> [shape: f32[1], index: 4, kind: input, shape index: {}]   ;;  %s5819_s5 = inlined_call_operand.hbm [shape: f32[2,32,256], index: 5, kind: output, shape index: {}]  }
   0x1   :  { %12 = vsyncpa [#allocation7], 0 }
   0x2   :  { %13 = vsyncpa [#allocation6], 0  ;;  %s18_s20 = sshll.u32 %s5814_s0, 4  ;;  %s3286_s21 = smov [#allocation4]   ;;  %s19_s20 = int_to_ptr.hbm [resolvable:$true] %s18_s20 }
   0x3   :  { %s20_s22 = sshll.u32 %s3286_s21, 4  ;;  %s36_s25 = sshll.u32 %s5817_s3, 4  ;;  %s21_s22 = int_to_ptr.vmem [resolvable:$true] %s20_s22  ;;  %s37_s25 = int_to_ptr.vmem [resolvable:$true] %s36_s25 }
   0x4   :  { %s3287_s26 = smov 256   ;;  %s3288_s27 = smov 16  }
   0x5   :  { %26 = dma.hbm_to_vmem [thread:$0]  %s19_s20, 2048, %s21_s22, [#allocation5], %s3287_s26, %s3287_s26, %s3288_s27  }
   0x6   :  { %s3289_s28 = smov [#allocation8]  }
   0x7   :  { %39 = dma.vmem_to_smem %s37_s25, 16, %s3289_s28, [#allocation7]  }
   0x8   :  { %3280 = dma.done.wait [#allocation5], 2048  }
   0x9   :  { %3281 = vsyncadd [#allocation5], 4294965248 }
   0xa   :  { %3282 = dma.done.wait [#allocation7], 16  }
   0xb   :  { %3283 = vsyncadd [#allocation7], 4294967280 }
   0xc   :  { %50 = sfence }
   0xd   :  { %v3378_v0 = vld [vmem:[#allocation4 + $0x40] sm:$0xff]  ;;  %v3380_v1 = vld [vmem:[#allocation4 + $0x48] sm:$0xff]  ;;  %v3396_v9 = vld [vmem:[#allocation4 + $0x50] sm:$0xff]  ;;  %v136_v45 = vlaneseq  ;;  %vm141_vm0 = vcmask 130112   ;;  %vm145_vm1 = vcmask 195712   ;;  %vm149_vm2 = vcmask 261312  }
   0xe   :  { %v3382_v2 = vld [vmem:[#allocation4 + $0x20] sm:$0xff]  ;;  %v79_v3 = vmax.f32 %v3378_v0, %v3380_v1  ;;  %v3386_v4 = vld [vmem:[#allocation4 + $0x28] sm:$0xff]  ;;  %v3398_v10 = vld [vmem:[#allocation4 + $0x58] sm:$0xff]  ;;  %v103_v18 = vadd.f32 %v3380_v1, %v3378_v0  ;;  %vm5866_vm3 = vcmask 1041409   ;;  %vm160_vm4 = vcmask 261120   ;;  %s3292_s11 = smov 35  }
   0xf   :  { %v3388_v5 = vld [vmem:[#allocation4] sm:$0xff]  ;;  %v3390_v6 = vld [vmem:[#allocation4 + $0x8] sm:$0xff]  ;;  %v73_v7 = vmax.f32 %v3382_v2, %v3386_v4  ;;  %v3400_v11 = vld [vmem:[#allocation4 + $0x30] sm:$0xff]  ;;  %v82_v15 = vmax.f32 %v3396_v9, %v3398_v10  ;;  %v97_v24 = vadd.f32 %v3386_v4, %v3382_v2  ;;  %v106_v25 = vadd.f32 %v3398_v10, %v3396_v9  ;;  %s3293_s12 = smov 19   ;;  %s3294_s13 = smov 3  }
  0x10   :  { %v67_v8 = vmax.f32 %v3388_v5, %v3390_v6  ;;  %80 = vmax.xlane.f32.xlu2 %v79_v3  ;;  %v3402_v12 = vld [vmem:[#allocation4 + $0x38] sm:$0xff]  ;;  %v3404_v13 = vld [vmem:[#allocation4 + $0x10] sm:$0xff]  ;;  %v91_v20 = vadd.f32 %v3390_v6, %v3388_v5  ;;  %v3420_v21 = vld [vmem:[#allocation4 + $0x60] sm:$0xff]  ;;  %v3459_v48 = vand.u32 127, %v136_v45  ;;  %vm235_vm5 = vcmask 1041408   ;;  %s3295_s14 = smov 115  }
  0x11   :  { %74 = vmax.xlane.f32.xlu1 %v73_v7  ;;  %v3406_v14 = vld [vmem:[#allocation4 + $0x18] sm:$0xff]  ;;  %v76_v16 = vmax.f32 %v3400_v11, %v3402_v12  ;;  %v3422_v22 = vld [vmem:[#allocation4 + $0x68] sm:$0xff]  ;;  %v3430_v26 = vld [vmem:[#allocation4 + $0x70] sm:$0xff]  ;;  %v100_v30 = vadd.f32 %v3402_v12, %v3400_v11  ;;  %vm231_vm6 = vcmask 15360   ;;  %vm446_vm11 = vcmask 1043459   ;;  %s3296_s15 = smov 99  }
  0x12   :  { %68 = vmax.xlane.f32.xlu0 %v67_v8  ;;  %v70_v17 = vmax.f32 %v3404_v13, %v3406_v14  ;;  %v94_v19 = vadd.f32 %v3406_v14, %v3404_v13  ;;  %v109_v23 = vadd.f32 %v3422_v22, %v3420_v21  ;;  %v3432_v27 = vld [vmem:[#allocation4 + $0x78] sm:$0xff]  ;;  %v85_v28 = vmax.f32 %v3420_v21, %v3422_v22  ;;  %v126_v32 = vld [vmem:[%s5815_s1 + $0x18] sm:$0xff]  ;;  %v124_v37 = vld [vmem:[%s5815_s1 + $0x8] sm:$0xff]  ;;  %s3297_s16 = smov 83   ;;  %s3298_s17 = smov 50  }
  0x13   :  { %v112_v29 = vadd.f32 %v3432_v27, %v3430_v26  ;;  %v88_v31 = vmax.f32 %v3430_v26, %v3432_v27  ;;  %221 = vmatpush.msra.mxu1 %v126_v32  ;;  %175 = vmatpush.msra.mxu0 %v126_v32  ;;  %v125_v36 = vld [vmem:[%s5815_s1 + $0x10] sm:$0xff]  ;;  %v123_v38 = vld [vmem:[%s5815_s1] sm:$0xff]  ;;  %5868 = vst [vmem:[#allocation13_spill] sm:$0xff] %v3459_v48  ;;  %v139_v52 = vadd.s32 4294967288, %v3459_v48  ;;  %v143_v59 = vadd.s32 4294967280, %v3459_v48  ;;  %s3299_s18 = smov 34  }
  0x14   :  { %v147_v62 = vadd.s32 4294967272, %v3459_v48  ;;  %vm448_vm12 = vcmask 1045509   ;;  %vm450_vm13 = vcmask 1047559   ;;  %s3300_s19 = smov 18   ;;  %s3301_s20 = smov 2   ;;  %vm521_vm14 = vcmask 416768  }
  0x15   :  { %222 = vmatpush.msra.mxu1 %v125_v36  ;;  %176 = vmatpush.msra.mxu0 %v125_v36  ;;  %s3302_s21 = smov 114   ;;  %s3073_s22 = sld [smem:[#allocation8 + $0x3]] }
  0x16   :  { %s3303_s23 = smov 98   ;;  %s3074_s24 = sld [smem:[#allocation8 + $0x34]] }
  0x17   :  { %223 = vmatpush.msra.mxu1 %v124_v37  ;;  %177 = vmatpush.msra.mxu0 %v124_v37  ;;  %s3075_s25 = sld [smem:[#allocation8 + $0xa]]  ;;  %s3304_s28 = smov 82  }
  0x18   :  { %83 = vmax.xlane.f32.xlu2 %v82_v15  ;;  %s3076_s0 = sld [smem:[#allocation8 + $0x3b]]  ;;  %s3305_s29 = smov 49  }
  0x19   :  { %77 = vmax.xlane.f32.xlu1 %v76_v16  ;;  %224 = vmatpush.msra.mxu1 %v123_v38  ;;  %s3077_s3 = sld [smem:[#allocation8 + $0x11]]  ;;  %s3306_s7 = smov 33  }
  0x1a   :  { %71 = vmax.xlane.f32.xlu0 %v70_v17  ;;  %178 = vmatpush.msra.mxu0 %v123_v38  ;;  %s3078_s30 = sld [smem:[#allocation8 + $0x42]]  ;;  %s3307_s1 = smov 17  }
  0x1b   :  { %s3079_s6 = sld [smem:[#allocation8 + $0x18]] }
  0x1c   :  { %s3080_s8 = sld [smem:[#allocation8 + $0x49]] }
  0x1d   :  { %s3081_s9 = sld [smem:[#allocation8 + $0x1f]] }
  0x1e   :  { %s3990_s10 = sld [smem:[#allocation8 + $0x50]] }
  0x20   :  { %104 = vadd.xlane.f32.xlu2 %v103_v18 }
  0x21   :  { %95 = vadd.xlane.f32.xlu1 %v94_v19 }
  0x22   :  { %92 = vadd.xlane.f32.xlu0 %v91_v20 }
  0x28   :  { %110 = vadd.xlane.f32.xlu2 %v109_v23 }
  0x29   :  { %98 = vadd.xlane.f32.xlu1 %v97_v24 }
  0x2a   :  { %107 = vadd.xlane.f32.xlu0 %v106_v25 }
  0x30   :  { %86 = vmax.xlane.f32.xlu2 %v85_v28 }
  0x31   :  { %113 = vadd.xlane.f32.xlu1 %v112_v29 }
  0x32   :  { %101 = vadd.xlane.f32.xlu0 %v100_v30 }
  0x3a   :  { %89 = vmax.xlane.f32.xlu0 %v88_v31 }
  0x83   :  { %v3445_v33 = vpop.xlane.xlu2 %80 }
  0x84   :  { %v3447_v34 = vpop.xlane.xlu1 %74  ;;  %v151_v28 = vperm.slane %v3445_v33, %v3459_v48 }
  0x85   :  { %v69_v35 = vpop.xlane.xlu0 %68  ;;  %v144_v37 = vperm.slane %v3447_v34, %v143_v59 }
  0x86   :  { %v138_v19 = vperm.slane %v69_v35, %v3459_v48 }
  0x8b   :  { %v84_v39 = vpop.xlane.xlu2 %83 }
  0x8c   :  { %v78_v40 = vpop.xlane.xlu1 %77  ;;  %v152_v31 = vperm.slane %v84_v39, %v139_v52 }
  0x8d   :  { %v72_v41 = vpop.xlane.xlu0 %71 }
  0x8e   :  { %v140_v15 = vperm.slane %v72_v41, %v139_v52 }
  0x90   :  { %v142_v32 = vsel %vm141_vm0, %v140_v15, %v138_v19 }
  0x93   :  { %v105_v42 = vpop.xlane.xlu2 %104 }
  0x94   :  { %v96_v43 = vpop.xlane.xlu1 %95  ;;  %v119_v49 = vmul.f32 0.00390625, %v105_v42  ;;  %v148_v42 = vperm.slane %v78_v40, %v147_v62  ;;  %v127_v40 = vld [vmem:[%s5816_s2] sm:$0x3]  ;;  %s3291_s2 = smov 51  }
  0x95   :  { %v93_v44 = vpop.xlane.xlu0 %92  ;;  %v116_v53 = vmul.f32 0.00390625, %v96_v43  ;;  %v146_v43 = vsel %vm145_vm1, %v144_v37, %v142_v32  ;;  %3029 = vmatpush.msk.msra.mxu2 %vm235_vm5, %v127_v40 }
  0x96   :  { %v115_v54 = vmul.f32 0.00390625, %v93_v44  ;;  %v199_v57 = vperm.slane %v119_v49, %v3459_v48  ;;  %v153_v44 = vsel %vm141_vm0, %v152_v31, %v151_v28 }
  0x97   :  { %v193_v60 = vperm.slane %v116_v53, %v139_v52 }
  0x98   :  { %v192_v61 = vperm.slane %v115_v54, %v3459_v48 }
  0x9a   :  { %v194_v20 = vsel %vm141_vm0, %v193_v60, %v192_v61 }
  0x9b   :  { %v111_v50 = vpop.xlane.xlu2 %110 }
  0x9c   :  { %v99_v46 = vpop.xlane.xlu1 %98  ;;  %v121_v55 = vmul.f32 0.00390625, %v111_v50 }
  0x9d   :  { %v108_v47 = vpop.xlane.xlu0 %107  ;;  %v117_v56 = vmul.f32 0.00390625, %v99_v46 }
  0x9e   :  { %v120_v51 = vmul.f32 0.00390625, %v108_v47  ;;  %v202_v63 = vperm.slane %v121_v55, %v143_v59  ;;  %v150_v47 = vsel %vm149_vm2, %v148_v42, %v146_v43  ;;  %v280_v55 = vshrl.u32 %v136_v45, 7 }
  0x9f   :  { %v195_v3 = vperm.slane %v117_v56, %v143_v59 }
  0xa0   :  { %v200_v58 = vperm.slane %v120_v51, %v139_v52  ;;  %3184 = vset.pattern.permute.xlu1 %v280_v55  ;;  %v293_v56 = vadd.s32 16, %v280_v55 }
  0xa1   :  { %v196_v29 = vsel %vm145_vm1, %v195_v3, %v194_v20  ;;  %v299_v20 = vadd.s32 24, %v280_v55 }
  0xa2   :  { %v201_v16 = vsel %vm141_vm0, %v200_v58, %v199_v57  ;;  %v287_v57 = vadd.s32 8, %v280_v55  ;;  %3186 = vset.pattern.permute.xlu0 %v293_v56 }
  0xa3   :  { %v87_v23 = vpop.xlane.xlu2 %86  ;;  %v203_v30 = vsel %vm145_vm1, %v202_v63, %v201_v16 }
  0xa4   :  { %v114_v7 = vpop.xlane.xlu1 %113  ;;  %v154_v38 = vperm.slane %v87_v23, %v143_v59  ;;  %3185 = vset.pattern.permute.xlu2 %v287_v57 }
  0xa5   :  { %v102_v8 = vpop.xlane.xlu0 %101  ;;  %v122_v17 = vmul.f32 0.00390625, %v114_v7 }
  0xa6   :  { %v118_v18 = vmul.f32 0.00390625, %v102_v8  ;;  %v155_v46 = vsel %vm145_vm1, %v154_v38, %v153_v44  ;;  %vm571_vm1 = vcmask 285696  }
  0xa7   :  { %v204_v24 = vperm.slane %v122_v17, %v147_v62 }
  0xa8   :  { %v197_v25 = vperm.slane %v118_v18, %v147_v62 }
  0xa9   :  { %v205_v36 = vsel %vm149_vm2, %v204_v24, %v203_v30 }
  0xaa   :  { %v198_v35 = vsel %vm149_vm2, %v197_v25, %v196_v29 }
  0xab   :  { %v206_v41 = vsel %vm5866_vm3, %v205_v36, %v198_v35 }
  0xac   :  { %3028 = vmatmul.msk.f32.vlgmr.msra.gmra.mxu1 %vm160_vm4, %v206_v41 }
  0xad   :  { %v90_v33 = vpop.xlane.xlu0 %89 }
  0xae   :  { %v156_v39 = vperm.slane %v90_v33, %v147_v62 }
  0xb0   :  { %v157_v49 = vsel %vm149_vm2, %v156_v39, %v155_v46  ;;  %vm621_vm2 = vcmask 154624  }
  0xb1   :  { %v159_v34 = vsel %vm5866_vm3, %v157_v49, %v150_v47 }
  0xb2   :  { %3027 = vmatmul.msk.f32.vlgmr.msra.gmra.mxu0 %vm160_vm4, %v159_v34 }
 0x129   :  { %v226_v50 = vpop.f32.mrf.mxu1 }
 0x12a   :  { %v229_v52 = vmax.f32 %v226_v50, 0.0 }
 0x12f   :  { %v180_v51 = vpop.f32.mrf.mxu0 }
 0x130   :  { %v183_v53 = vmax.f32 %v180_v51, 0.0 }
 0x132   :  { %v230_v54 = vadd.f32 %v229_v52, %v183_v53  ;;  %v3290_v53 = vmov 0.0  }
 0x133   :  { %420 = vst [vmem:[#allocation2] sm:$0x3] %v3290_v53 }
 0x134   :  { %3030 = vmatmul.msk.f32.vlgmr.msra.gmra.mxu2 %vm231_vm6, %v230_v54  ;;  %421 = vst [vmem:[#allocation2 + $0x8] sm:$0x3] %v3290_v53 }
 0x135   :  { %422 = vst [vmem:[#allocation2 + $0x6] sm:$0x3] %v3290_v53 }
 0x136   :  { %423 = vst [vmem:[#allocation2 + $0xe] sm:$0x3] %v3290_v53 }
 0x1b7   :  { %v256_v58 = vpop.f32.mrf.mxu2 }
 0x1b8   :  { %v3031_v59 = vmul.f32 -1.442695, %v256_v58 }
 0x1ba   :  { %3192 = vpow2.f32 %v3031_v59 }
 0x1c0   :  { %v3193_v60 = vpop.eup %3192 }
 0x1c1   :  { %v262_v61 = vadd.f32 1.0, %v3193_v60 }
 0x1c3   :  { %3194 = vrcp.f32 %v262_v61  ;;  %v274_v7 = vand.u32 2147483648, %v262_v61  ;;  %v272_v15 = vand.u32 2147483647, %v262_v61  ;;  %vm268_vm8 = vweird.f32 %v262_v61 }
 0x1c5   :  { %v275_v45 = vor.u32 1.1754944e-38, %v274_v7  ;;  %vm273_vm10 = vcmp.eq.f32.partialorder %v272_v15, 8.507059e+37 }
 0x1c9   :  { %v3195_v62 = vpop.eup %3194 }
 0x1ca   :  { %v264_v63 = vmul.f32 %v3195_v62, %v262_v61  ;;  %vm269_vm7 = vweird.f32 %v3195_v62 }
 0x1cb   :  { %vm270_vm9 = vmor %vm268_vm8, %vm269_vm7  ;;  %vm721_vm7 = vcmask 941056   ;;  %vm771_vm8 = vcmask 809984  }
 0x1cc   :  { %v265_v3 = vsub.f32 1.0, %v264_v63 }
 0x1ce   :  { %v266_v8 = vmul.f32 %v3195_v62, %v265_v3 }
 0x1d0   :  { %v267_v16 = vadd.f32 %v3195_v62, %v266_v8 }
 0x1d2   :  { %v271_v17 = vsel %vm270_vm9, %v3195_v62, %v267_v16  ;;  %vm821_vm9 = vcmask 678912  }
 0x1d3   :  { %v276_v18 = vsel %vm273_vm10, %v275_v45, %v271_v17  ;;  %vm877_vm10 = vcmask 408576  }
 0x1d4   :  { %v278_v19 = vperm.slane %v276_v18, 0  ;;  %v303_v23 = vperm.slane %v276_v18, 1 }
 0x1d6   :  { %295 = vperm.xlu0 %3186, %v278_v19   ;;  %289 = vperm.xlu2 %3185, %v278_v19  }
 0x1d7   :  { %283 = vperm.xlu1 %3184, %v278_v19  }
 0x1de   :  { %3187 = vset.pattern.permute.xlu2 %v299_v20  ;;  %3191 = vset.pattern.permute.xlu0 %v299_v20 }
 0x1df   :  { %308 = vperm.xlu1 %3184, %v303_v23  }
 0x1e6   :  { %301 = vperm.xlu2 %3187, %v278_v19  }
 0x1e7   :  { %3189 = vset.pattern.permute.xlu1 %v293_v56 }
 0x1ee   :  { %3188 = vset.pattern.permute.xlu2 %v287_v57 }
 0x1ef   :  { %320 = vperm.xlu1 %3189, %v303_v23  }
 0x1f6   :  { %314 = vperm.xlu2 %3188, %v303_v23  }
 0x1fe   :  { %3190 = vset.pattern.permute.xlu2 %v299_v20 }
 0x206   :  { %326 = vperm.xlu2 %3190, %v303_v23  }
 0x230   :  { %v290_v24 = vpop.permute.xlu2 %289 }
 0x231   :  { %v3496_v29 = vmul.f32 %v290_v24, %v3406_v14 }
 0x233   :  { %5870 = vst [vmem:[#allocation15_spill] sm:$0xff] %v3496_v29 }
 0x240   :  { %v302_v37 = vpop.permute.xlu2 %301 }
 0x241   :  { %v3513_v38 = vmul.f32 %v302_v37, %v3402_v12  ;;  %v3528_v39 = vmul.f32 %v302_v37, %v3400_v11 }
 0x243   :  { %5874 = vst [vmem:[#allocation19_spill] sm:$0xff] %v3513_v38 }
 0x244   :  { %5876 = vst [vmem:[#allocation21_spill] sm:$0xff] %v3528_v39 }
 0x248   :  { %v296_v30 = vpop.permute.xlu0 %295 }
 0x249   :  { %v284_v25 = vpop.permute.xlu1 %283  ;;  %v3501_v32 = vmul.f32 %v296_v30, %v3386_v4  ;;  %v3521_v42 = vmul.f32 %v296_v30, %v3382_v2 }
 0x24a   :  { %v3493_v28 = vmul.f32 %v284_v25, %v3390_v6  ;;  %v3504_v35 = vmul.f32 %v284_v25, %v3388_v5  ;;  %v3509_v6 = vmul.f32 %v290_v24, %v3404_v13 }
 0x24b   :  { %5871 = vst [vmem:[#allocation16_spill] sm:$0xff] %v3501_v32 }
 0x24c   :  { %5869 = vst [vmem:[#allocation14_spill] sm:$0xff] %v3493_v28  ;;  %v389_v31 = vadd.f32 %v3496_v29, %v3493_v28  ;;  %v353_v36 = vmax.f32 %v3493_v28, %v3496_v29  ;;  %v380_v4 = vadd.f32 %v3509_v6, %v3504_v35  ;;  %v344_v5 = vmax.f32 %v3504_v35, %v3509_v6 }
 0x24d   :  { %5872 = vst [vmem:[#allocation17_spill] sm:$0xff] %v3504_v35 }
 0x24e   :  { %5873 = vst [vmem:[#allocation18_spill] sm:$0xff] %v3509_v6  ;;  %v390_v14 = vadd.f32 %v389_v31, %v3501_v32  ;;  %v354_v41 = vmax.f32 %v353_v36, %v3501_v32  ;;  %v381_v43 = vadd.f32 %v380_v4, %v3521_v42  ;;  %v345_v12 = vmax.f32 %v344_v5, %v3521_v42 }
 0x24f   :  { %5875 = vst [vmem:[#allocation20_spill] sm:$0xff] %v3521_v42 }
 0x250   :  { %v391_v33 = vadd.f32 %v390_v14, %v3513_v38  ;;  %v355_v13 = vmax.f32 %v354_v41, %v3513_v38  ;;  %v315_v44 = vpop.permute.xlu2 %314  ;;  %v382_v34 = vadd.f32 %v381_v43, %v3528_v39  ;;  %v346_v2 = vmax.f32 %v345_v12, %v3528_v39 }
 0x251   :  { %v309_v47 = vpop.permute.xlu1 %308  ;;  %v3533_v40 = vmul.f32 %v315_v44, %v3396_v9  ;;  %v3536_v50 = vmul.f32 %v315_v44, %v3398_v10 }
 0x252   :  { %v392_v46 = vrot.slane %v391_v33, 4  ;;  %v356_v49 = vrot.slane %v355_v13, 4  ;;  %v3539_v52 = vmul.f32 %v309_v47, %v3378_v0  ;;  %v3542_v11 = vmul.f32 %v309_v47, %v3380_v1 }
 0x253   :  { %5877 = vst [vmem:[#allocation22_spill] sm:$0xff] %v3533_v40  ;;  %v383_v55 = vrot.slane %v382_v34, 4  ;;  %v347_v57 = vrot.slane %v346_v2, 4 }
 0x254   :  { %5878 = vst [vmem:[#allocation23_spill] sm:$0xff] %v3536_v50  ;;  %v393_v51 = vadd.f32 %v392_v46, %v391_v33  ;;  %v357_v54 = vmax.f32 %v355_v13, %v356_v49  ;;  %v362_v10 = vmax.f32 %v3539_v52, %v3533_v40  ;;  %v371_v58 = vmax.f32 %v3542_v11, %v3536_v50 }
 0x255   :  { %5879 = vst [vmem:[#allocation24_spill] sm:$0xff] %v3539_v52  ;;  %v398_v1 = vadd.f32 %v3533_v40, %v3539_v52  ;;  %v407_v59 = vadd.f32 %v3536_v50, %v3542_v11  ;;  %v384_v63 = vadd.f32 %v383_v55, %v382_v34  ;;  %v348_v45 = vmax.f32 %v346_v2, %v347_v57 }
 0x256   :  { %5880 = vst [vmem:[#allocation25_spill] sm:$0xff] %v3542_v11  ;;  %v394_v9 = vrot.slane %v393_v51, 2  ;;  %v358_v62 = vrot.slane %v357_v54, 2 }
 0x257   :  { %v385_v20 = vrot.slane %v384_v63, 2  ;;  %v349_v31 = vrot.slane %v348_v45, 2 }
 0x258   :  { %v395_v17 = vadd.f32 %v394_v9, %v393_v51 }
 0x259   :  { %v386_v33 = vadd.f32 %v385_v20, %v384_v63  ;;  %v350_v46 = vmax.f32 %v348_v45, %v349_v31 }
 0x25a   :  { %v396_v36 = vrot.slane %v395_v17, 1 }
 0x25c   :  { %v397_v47 = vadd.f32 %v396_v36, %v395_v17 }
 0x260   :  { %v327_v56 = vpop.permute.xlu2 %326 }
 0x261   :  { %v321_v0 = vpop.permute.xlu1 %320  ;;  %v3559_v3 = vmul.f32 %v327_v56, %v3430_v26  ;;  %v3562_v7 = vmul.f32 %v327_v56, %v3432_v27  ;;  %v359_v27 = vmax.f32 %v357_v54, %v358_v62  ;;  %v387_v54 = vrot.slane %v386_v33, 1 }
 0x262   :  { %v3553_v60 = vmul.f32 %v321_v0, %v3420_v21  ;;  %v3556_v61 = vmul.f32 %v321_v0, %v3422_v22 }
 0x263   :  { %5883 = vst [vmem:[#allocation28_spill] sm:$0xff] %v3559_v3  ;;  %v360_v5 = vrot.slane %v359_v27, 1  ;;  %v388_v62 = vadd.f32 %v387_v54, %v386_v33 }
 0x264   :  { %5881 = vst [vmem:[#allocation26_spill] sm:$0xff] %v3553_v60  ;;  %v363_v8 = vmax.f32 %v362_v10, %v3553_v60  ;;  %v372_v15 = vmax.f32 %v371_v58, %v3556_v61  ;;  %v399_v16 = vadd.f32 %v398_v1, %v3553_v60  ;;  %v408_v21 = vadd.f32 %v407_v59, %v3556_v61 }
 0x265   :  { %5882 = vst [vmem:[#allocation27_spill] sm:$0xff] %v3556_v61  ;;  %v361_v53 = vmax.f32 %v359_v27, %v360_v5  ;;  %v351_v10 = vrot.slane %v350_v46, 1  ;;  %v417_v58 = vmul.f32 0.03125, %v397_v47 }
 0x266   :  { %5884 = vst [vmem:[#allocation29_spill] sm:$0xff] %v3562_v7  ;;  %v364_v22 = vmax.f32 %v363_v8, %v3559_v3  ;;  %v373_v18 = vmax.f32 %v372_v15, %v3562_v7  ;;  %v400_v26 = vadd.f32 %v399_v16, %v3559_v3  ;;  %v409_v19 = vadd.f32 %v408_v21, %v3562_v7 }
 0x267   :  { %v432_v63 = vrot.slane %v361_v53, 6  ;;  %v352_v21 = vmax.f32 %v350_v46, %v351_v10  ;;  %v434_v45 = vrot.slane %v417_v58, 6 }
 0x268   :  { %v365_v23 = vrot.slane %v364_v22, 4  ;;  %v374_v24 = vrot.slane %v373_v18, 4  ;;  %v401_v25 = vrot.slane %v400_v26, 4  ;;  %v410_v30 = vrot.slane %v409_v19, 4 }
 0x269   :  { %v436_v27 = vsel %vm235_vm5, %v352_v21, %v432_v63 }
 0x26a   :  { %v366_v37 = vmax.f32 %v364_v22, %v365_v23  ;;  %v375_v14 = vmax.f32 %v373_v18, %v374_v24  ;;  %v402_v41 = vadd.f32 %v401_v25, %v400_v26  ;;  %v411_v4 = vadd.f32 %v410_v30, %v409_v19 }
 0x26b   :  { %v416_v19 = vmul.f32 0.03125, %v388_v62 }
 0x26c   :  { %v367_v13 = vrot.slane %v366_v37, 2  ;;  %v376_v43 = vrot.slane %v375_v14, 2  ;;  %v403_v12 = vrot.slane %v402_v41, 2  ;;  %v412_v44 = vrot.slane %v411_v4, 2 }
 0x26d   :  { %v438_v25 = vsel %vm235_vm5, %v416_v19, %v434_v45 }
 0x26e   :  { %v368_v49 = vmax.f32 %v366_v37, %v367_v13  ;;  %v377_v34 = vmax.f32 %v375_v14, %v376_v43  ;;  %v404_v2 = vadd.f32 %v403_v12, %v402_v41  ;;  %v413_v51 = vadd.f32 %v412_v44, %v411_v4 }
 0x270   :  { %v369_v55 = vrot.slane %v368_v49, 1  ;;  %v378_v56 = vrot.slane %v377_v34, 1  ;;  %v405_v57 = vrot.slane %v404_v2, 1  ;;  %v414_v9 = vrot.slane %v413_v51, 1 }
 0x272   :  { %v379_v0 = vmax.f32 %v377_v34, %v378_v56  ;;  %v406_v1 = vadd.f32 %v405_v57, %v404_v2  ;;  %v415_v59 = vadd.f32 %v414_v9, %v413_v51  ;;  %v370_v8 = vmax.f32 %v368_v49, %v369_v55 }
 0x274   :  { %v419_v15 = vmul.f32 0.03125, %v415_v59  ;;  %v433_v16 = vrot.slane %v379_v0, 6  ;;  %v418_v17 = vmul.f32 0.03125, %v406_v1 }
 0x276   :  { %v435_v22 = vrot.slane %v419_v15, 6  ;;  %v437_v18 = vsel %vm235_vm5, %v370_v8, %v433_v16 }
 0x277   :  { %v444_v26 = vrot.slane %v437_v18, 7 }
 0x278   :  { %v439_v20 = vsel %vm235_vm5, %v418_v17, %v435_v22  ;;  %vm671_vm5 = vcmask 23552  }
 0x279   :  { %v445_v23 = vsel %vm5866_vm3, %v444_v26, %v436_v27  ;;  %v454_v24 = vrot.slane %v439_v20, 7 }
 0x27a   :  { %v447_v30 = vsel %vm446_vm11, %v444_v26, %v445_v23 }
 0x27b   :  { %v449_v31 = vsel %vm448_vm12, %v444_v26, %v447_v30  ;;  %v455_v36 = vsel %vm5866_vm3, %v454_v24, %v438_v25  ;;  %vm5867_vm3 = vcmask 367616  }
 0x27c   :  { %v451_v37 = vsel %vm450_vm13, %v444_v26, %v449_v31  ;;  %v456_v14 = vsel %vm446_vm11, %v454_v24, %v455_v36 }
 0x27d   :  { %v457_v41 = vsel %vm448_vm12, %v454_v24, %v456_v14  ;;  %461 = vst [vmem:[#allocation2 + $0x2] sm:$0xf] %v451_v37 }
 0x27e   :  { %v458_v4 = vsel %vm450_vm13, %v454_v24, %v457_v41  ;;  %vm927_vm13 = vcmask 277504  }
 0x27f   :  { %462 = vst [vmem:[#allocation2 + $0xa] sm:$0xf] %v458_v4 }
 0x284   :  { %v492_v5 = vld [vmem:[#allocation2] sm:$0x3f] }
 0x285   :  { %500 = vst [vmem:[#allocation1] ss:$4 sm:$0xff] %v492_v5  ;;  %v546_v49 = vld [vmem:[#allocation2] sm:$0x3f] }
 0x286   :  { %v493_v33 = vld [vmem:[#allocation2 + $0x8] sm:$0x3f]  ;;  %v596_v53 = vld [vmem:[#allocation2] sm:$0x3f] }
 0x287   :  { %505 = vst [vmem:[#allocation1 + $0x20] ss:$4 sm:$0xff] %v493_v33  ;;  %v547_v34 = vld [vmem:[#allocation2 + $0x8] sm:$0x3f]  ;;  %v646_v0 = vld [vmem:[#allocation2] sm:$0x3f] }
 0x288   :  { %v597_v9 = vld [vmem:[#allocation2 + $0x8] sm:$0x3f]  ;;  %v696_v21 = vld [vmem:[#allocation2 + $0x2] sm:$0x3f] }
 0x289   :  { %v647_v8 = vld [vmem:[#allocation2 + $0x8] sm:$0x3f]  ;;  %v746_v20 = vld [vmem:[#allocation2 + $0x2] sm:$0x3f] }
 0x28a   :  { %v697_v26 = vld [vmem:[#allocation2 + $0xa] sm:$0x3f]  ;;  %v796_v14 = vld [vmem:[#allocation2 + $0x2] sm:$0x3f] }
 0x28b   :  { %v747_v31 = vld [vmem:[#allocation2 + $0xa] sm:$0x3f]  ;;  %v1257_v60 = vld [vmem:[#allocation2] sm:$0x3f] }
 0x28c   :  { %v503_v13 = vld.sshfl [vmem:[#allocation1 + $0x10] sm:$0xff pattern:$0x73625140]  ;;  %v502_v43 = vld.sshfl [vmem:[#allocation1 + $0x8] sm:$0xff pattern:$0x73625140] }
 0x28d   :  { %513 = vrot.lane.b32.xlu2 %v503_v13, %s3291_s2  ;;  %511 = vrot.lane.b32.xlu0 %v502_v43, %s3291_s2  ;;  %v501_v12 = vld.sshfl [vmem:[#allocation1] sm:$0xff pattern:$0x73625140]  ;;  %v797_v13 = vld [vmem:[#allocation2 + $0xa] sm:$0x3f] }
 0x28e   :  { %509 = vrot.lane.b32.xlu1 %v501_v12, %s3291_s2  ;;  %v508_v44 = vld.sshfl [vmem:[#allocation1 + $0x30] sm:$0xff pattern:$0x73625140]  ;;  %v507_v46 = vld.sshfl [vmem:[#allocation1 + $0x28] sm:$0xff pattern:$0x73625140] }
 0x28f   :  { %v506_v47 = vld.sshfl [vmem:[#allocation1 + $0x20] sm:$0xff pattern:$0x73625140]  ;;  %550 = vst [vmem:[#allocation1] ss:$4 sm:$0xff] %v546_v49 }
 0x290   :  { %555 = vst [vmem:[#allocation1 + $0x20] ss:$4 sm:$0xff] %v547_v34  ;;  %v1258_v40 = vld [vmem:[#allocation2 + $0x8] sm:$0x3f]  ;;  %v1357_v35 = vld [vmem:[#allocation2] sm:$0x3f] }
 0x295   :  { %519 = vrot.lane.b32.xlu2 %v508_v44, %s3291_s2  ;;  %517 = vrot.lane.b32.xlu0 %v507_v46, %s3291_s2  ;;  %v848_v44 = vld [vmem:[#allocation2] sm:$0x3f] }
 0x296   :  { %515 = vrot.lane.b32.xlu1 %v506_v47, %s3291_s2  ;;  %v553_v2 = vld.sshfl [vmem:[#allocation1 + $0x10] sm:$0xff pattern:$0x73625140]  ;;  %v552_v51 = vld.sshfl [vmem:[#allocation1 + $0x8] sm:$0xff pattern:$0x73625140] }
 0x297   :  { %v551_v54 = vld.sshfl [vmem:[#allocation1] sm:$0xff pattern:$0x73625140]  ;;  %v558_v55 = vld.sshfl [vmem:[#allocation1 + $0x30] sm:$0xff pattern:$0x73625140] }
 0x298   :  { %v557_v56 = vld.sshfl [vmem:[#allocation1 + $0x28] sm:$0xff pattern:$0x73625140]  ;;  %v556_v57 = vld.sshfl [vmem:[#allocation1 + $0x20] sm:$0xff pattern:$0x73625140] }
 0x299   :  { %600 = vst [vmem:[#allocation1] ss:$4 sm:$0xff] %v596_v53  ;;  %s3308_s2 = smov 1  }
 0x29a   :  { %605 = vst [vmem:[#allocation1 + $0x20] ss:$4 sm:$0xff] %v597_v9 }
 0x29d   :  { %563 = vrot.lane.b32.xlu2 %v553_v2, %s3292_s11  ;;  %561 = vrot.lane.b32.xlu0 %v552_v51, %s3292_s11  ;;  %v849_v2 = vld [vmem:[#allocation2 + $0x8] sm:$0x3f] }
 0x29e   :  { %559 = vrot.lane.b32.xlu1 %v551_v54, %s3292_s11  ;;  %v902_v54 = vld [vmem:[#allocation2] sm:$0x3f] }
 0x2a0   :  { %v603_v10 = vld.sshfl [vmem:[#allocation1 + $0x10] sm:$0xff pattern:$0x73625140]  ;;  %v602_v58 = vld.sshfl [vmem:[#allocation1 + $0x8] sm:$0xff pattern:$0x73625140] }
 0x2a1   :  { %v601_v1 = vld.sshfl [vmem:[#allocation1] sm:$0xff pattern:$0x73625140]  ;;  %v608_v59 = vld.sshfl [vmem:[#allocation1 + $0x30] sm:$0xff pattern:$0x73625140] }
 0x2a2   :  { %v607_v62 = vld.sshfl [vmem:[#allocation1 + $0x28] sm:$0xff pattern:$0x73625140]  ;;  %v606_v63 = vld.sshfl [vmem:[#allocation1 + $0x20] sm:$0xff pattern:$0x73625140] }
 0x2a3   :  { %650 = vst [vmem:[#allocation1] ss:$4 sm:$0xff] %v646_v0 }
 0x2a4   :  { %655 = vst [vmem:[#allocation1 + $0x20] ss:$4 sm:$0xff] %v647_v8 }
 0x2a5   :  { %569 = vrot.lane.b32.xlu2 %v558_v55, %s3292_s11  ;;  %567 = vrot.lane.b32.xlu0 %v557_v56, %s3292_s11 }
 0x2a6   :  { %565 = vrot.lane.b32.xlu1 %v556_v57, %s3292_s11  ;;  %s3083_s11 = sld [smem:[#allocation8 + $0x26]] }
 0x2aa   :  { %v653_v15 = vld.sshfl [vmem:[#allocation1 + $0x10] sm:$0xff pattern:$0x73625140]  ;;  %v652_v16 = vld.sshfl [vmem:[#allocation1 + $0x8] sm:$0xff pattern:$0x73625140] }
 0x2ab   :  { %v651_v45 = vld.sshfl [vmem:[#allocation1] sm:$0xff pattern:$0x73625140]  ;;  %v658_v17 = vld.sshfl [vmem:[#allocation1 + $0x30] sm:$0xff pattern:$0x73625140] }
 0x2ac   :  { %v657_v22 = vld.sshfl [vmem:[#allocation1 + $0x28] sm:$0xff pattern:$0x73625140]  ;;  %v656_v18 = vld.sshfl [vmem:[#allocation1 + $0x20] sm:$0xff pattern:$0x73625140] }
 0x2ad   :  { %613 = vrot.lane.b32.xlu2 %v603_v10, %s3293_s12  ;;  %611 = vrot.lane.b32.xlu0 %v602_v58, %s3293_s12  ;;  %700 = vst [vmem:[#allocation1] ss:$4 sm:$0xff] %v696_v21  ;;  %v903_v10 = vld [vmem:[#allocation2 + $0x8] sm:$0x3f]  ;;  %v1002_v21 = vld [vmem:[#allocation2] sm:$0x3f] }
 0x2ae   :  { %609 = vrot.lane.b32.xlu1 %v601_v1, %s3293_s12  ;;  %705 = vst [vmem:[#allocation1 + $0x20] ss:$4 sm:$0xff] %v697_v26  ;;  %v952_v1 = vld [vmem:[#allocation2] sm:$0x3f] }
 0x2b4   :  { %v703_v19 = vld.sshfl [vmem:[#allocation1 + $0x10] sm:$0xff pattern:$0x73625140]  ;;  %v702_v27 = vld.sshfl [vmem:[#allocation1 + $0x8] sm:$0xff pattern:$0x73625140] }
 0x2b5   :  { %619 = vrot.lane.b32.xlu2 %v608_v59, %s3293_s12  ;;  %617 = vrot.lane.b32.xlu0 %v607_v62, %s3293_s12  ;;  %v701_v23 = vld.sshfl [vmem:[#allocation1] sm:$0xff pattern:$0x73625140]  ;;  %v708_v24 = vld.sshfl [vmem:[#allocation1 + $0x30] sm:$0xff pattern:$0x73625140] }
 0x2b6   :  { %615 = vrot.lane.b32.xlu1 %v606_v63, %s3293_s12  ;;  %v707_v25 = vld.sshfl [vmem:[#allocation1 + $0x28] sm:$0xff pattern:$0x73625140]  ;;  %v706_v30 = vld.sshfl [vmem:[#allocation1 + $0x20] sm:$0xff pattern:$0x73625140] }
 0x2b7   :  { %750 = vst [vmem:[#allocation1] ss:$4 sm:$0xff] %v746_v20  ;;  %v953_v62 = vld [vmem:[#allocation2 + $0x8] sm:$0x3f]  ;;  %s3084_s12 = sld [smem:[#allocation8 + $0x57]] }
 0x2b8   :  { %755 = vst [vmem:[#allocation1 + $0x20] ss:$4 sm:$0xff] %v747_v31 }
 0x2bd   :  { %663 = vrot.lane.b32.xlu2 %v653_v15, %s3294_s13  ;;  %661 = vrot.lane.b32.xlu0 %v652_v16, %s3294_s13 }
 0x2be   :  { %659 = vrot.lane.b32.xlu1 %v651_v45, %s3294_s13  ;;  %v753_v36 = vld.sshfl [vmem:[#allocation1 + $0x10] sm:$0xff pattern:$0x73625140]  ;;  %v752_v37 = vld.sshfl [vmem:[#allocation1 + $0x8] sm:$0xff pattern:$0x73625140] }
 0x2bf   :  { %v751_v41 = vld.sshfl [vmem:[#allocation1] sm:$0xff pattern:$0x73625140]  ;;  %v758_v4 = vld.sshfl [vmem:[#allocation1 + $0x30] sm:$0xff pattern:$0x73625140] }
 0x2c0   :  { %v757_v5 = vld.sshfl [vmem:[#allocation1 + $0x28] sm:$0xff pattern:$0x73625140]  ;;  %v756_v33 = vld.sshfl [vmem:[#allocation1 + $0x20] sm:$0xff pattern:$0x73625140] }
 0x2c1   :  { %800 = vst [vmem:[#allocation1] ss:$4 sm:$0xff] %v796_v14 }
 0x2c2   :  { %805 = vst [vmem:[#allocation1 + $0x20] ss:$4 sm:$0xff] %v797_v13 }
 0x2c5   :  { %669 = vrot.lane.b32.xlu2 %v658_v17, %s3294_s13  ;;  %667 = vrot.lane.b32.xlu0 %v657_v22, %s3294_s13 }
 0x2c6   :  { %665 = vrot.lane.b32.xlu1 %v656_v18, %s3294_s13  ;;  %s3309_s13 = smov 113  }
 0x2c8   :  { %v803_v43 = vld.sshfl [vmem:[#allocation1 + $0x10] sm:$0xff pattern:$0x73625140]  ;;  %v802_v12 = vld.sshfl [vmem:[#allocation1 + $0x8] sm:$0xff pattern:$0x73625140] }
 0x2c9   :  { %v801_v46 = vld.sshfl [vmem:[#allocation1] sm:$0xff pattern:$0x73625140]  ;;  %v808_v47 = vld.sshfl [vmem:[#allocation1 + $0x30] sm:$0xff pattern:$0x73625140] }
 0x2ca   :  { %v807_v49 = vld.sshfl [vmem:[#allocation1 + $0x28] sm:$0xff pattern:$0x73625140]  ;;  %v806_v34 = vld.sshfl [vmem:[#allocation1 + $0x20] sm:$0xff pattern:$0x73625140] }
 0x2cb   :  { %856 = vst [vmem:[#allocation1] ss:$4 sm:$0xff] %v848_v44 }
 0x2cc   :  { %861 = vst [vmem:[#allocation1 + $0x20] ss:$4 sm:$0xff] %v849_v2 }
 0x2cd   :  { %713 = vrot.lane.b32.xlu2 %v703_v19, %s3295_s14  ;;  %711 = vrot.lane.b32.xlu0 %v702_v27, %s3295_s14  ;;  %v1003_v19 = vld [vmem:[#allocation2 + $0x8] sm:$0x3f] }
 0x2ce   :  { %709 = vrot.lane.b32.xlu1 %v701_v23, %s3295_s14  ;;  %v1051_v23 = vld [vmem:[#allocation2 + $0x2] sm:$0x3f] }
 0x2d2   :  { %v859_v51 = vld.sshfl [vmem:[#allocation1 + $0x10] sm:$0xff pattern:$0x73625140]  ;;  %v858_v53 = vld.sshfl [vmem:[#allocation1 + $0x8] sm:$0xff pattern:$0x73625140] }
 0x2d3   :  { %v857_v55 = vld.sshfl [vmem:[#allocation1] sm:$0xff pattern:$0x73625140]  ;;  %v3578_v56 = vld.sshfl [vmem:[#allocation1 + $0x30] sm:$0xff pattern:$0x73625140] }
 0x2d4   :  { %v3580_v57 = vld.sshfl [vmem:[#allocation1 + $0x28] sm:$0xff pattern:$0x73625140]  ;;  %v3582_v9 = vld.sshfl [vmem:[#allocation1 + $0x20] sm:$0xff pattern:$0x73625140] }
 0x2d5   :  { %719 = vrot.lane.b32.xlu2 %v708_v24, %s3295_s14  ;;  %717 = vrot.lane.b32.xlu0 %v707_v25, %s3295_s14  ;;  %906 = vst [vmem:[#allocation1] ss:$4 sm:$0xff] %v902_v54 }
 0x2d6   :  { %715 = vrot.lane.b32.xlu1 %v706_v30, %s3295_s14  ;;  %911 = vst [vmem:[#allocation1 + $0x20] ss:$4 sm:$0xff] %v903_v10  ;;  %v1052_v30 = vld [vmem:[#allocation2 + $0xa] sm:$0x3f]  ;;  %s3085_s14 = sld [smem:[#allocation8 + $0x2d]] }
 0x2dc   :  { %v3584_v58 = vld.sshfl [vmem:[#allocation1 + $0x10] sm:$0xff pattern:$0x73625140]  ;;  %v3586_v0 = vld.sshfl [vmem:[#allocation1 + $0x8] sm:$0xff pattern:$0x73625140] }
 0x2dd   :  { %763 = vrot.lane.b32.xlu2 %v753_v36, %s3296_s15  ;;  %761 = vrot.lane.b32.xlu0 %v752_v37, %s3296_s15  ;;  %v3588_v59 = vld.sshfl [vmem:[#allocation1] sm:$0xff pattern:$0x73625140]  ;;  %v3590_v63 = vld.sshfl [vmem:[#allocation1 + $0x30] sm:$0xff pattern:$0x73625140] }
 0x2de   :  { %759 = vrot.lane.b32.xlu1 %v751_v41, %s3296_s15  ;;  %v3592_v8 = vld.sshfl [vmem:[#allocation1 + $0x28] sm:$0xff pattern:$0x73625140]  ;;  %v3594_v15 = vld.sshfl [vmem:[#allocation1 + $0x20] sm:$0xff pattern:$0x73625140] }
 0x2df   :  { %956 = vst [vmem:[#allocation1] ss:$4 sm:$0xff] %v952_v1 }
 0x2e0   :  { %961 = vst [vmem:[#allocation1 + $0x20] ss:$4 sm:$0xff] %v953_v62  ;;  %v1152_v62 = vld [vmem:[#allocation2 + $0xa] sm:$0x3f] }
 0x2e5   :  { %769 = vrot.lane.b32.xlu2 %v758_v4, %s3296_s15  ;;  %767 = vrot.lane.b32.xlu0 %v757_v5, %s3296_s15  ;;  %v1101_v4 = vld [vmem:[#allocation2 + $0x2] sm:$0x3f] }
 0x2e6   :  { %765 = vrot.lane.b32.xlu1 %v756_v33, %s3296_s15  ;;  %v3598_v45 = vld.sshfl [vmem:[#allocation1 + $0x10] sm:$0xff pattern:$0x73625140]  ;;  %v3600_v17 = vld.sshfl [vmem:[#allocation1 + $0x8] sm:$0xff pattern:$0x73625140] }
 0x2e7   :  { %v3596_v16 = vpop.permute.xlu2 %513  ;;  %v3602_v22 = vld.sshfl [vmem:[#allocation1] sm:$0xff pattern:$0x73625140]  ;;  %v3604_v18 = vld.sshfl [vmem:[#allocation1 + $0x30] sm:$0xff pattern:$0x73625140] }
 0x2e8   :  { %5885 = vst [vmem:[#allocation30_spill] sm:$0xff] %v3596_v16  ;;  %v3606_v26 = vld.sshfl [vmem:[#allocation1 + $0x28] sm:$0xff pattern:$0x73625140]  ;;  %v1623_v16 = vstv %s3076_s0  ;;  %s3086_s15 = sld [smem:[#allocation8 + $0x5e]] }
 0x2e9   :  { %1006 = vst [vmem:[#allocation1] ss:$4 sm:$0xff] %v1002_v21  ;;  %v3610_v20 = vld.sshfl [vmem:[#allocation1 + $0x20] sm:$0xff pattern:$0x73625140]  ;;  %s4348_s0 = sld [smem:[#allocation8 + $0x38]] }
 0x2ea   :  { %1011 = vst [vmem:[#allocation1 + $0x20] ss:$4 sm:$0xff] %v1003_v19 }
 0x2ed   :  { %813 = vrot.lane.b32.xlu2 %v803_v43, %s3297_s16  ;;  %811 = vrot.lane.b32.xlu0 %v802_v12, %s3297_s16 }
 0x2ee   :  { %809 = vrot.lane.b32.xlu1 %v801_v46, %s3297_s16 }
 0x2ef   :  { %v3608_v27 = vpop.permute.xlu2 %519 }
 0x2f0   :  { %5886 = vst [vmem:[#allocation31_spill] sm:$0xff] %v3608_v27  ;;  %v3612_v24 = vld.sshfl [vmem:[#allocation1 + $0x10] sm:$0xff pattern:$0x73625140] }
 0x2f1   :  { %v3614_v25 = vld.sshfl [vmem:[#allocation1 + $0x8] sm:$0xff pattern:$0x73625140]  ;;  %v3616_v31 = vld.sshfl [vmem:[#allocation1] sm:$0xff pattern:$0x73625140] }
 0x2f2   :  { %1055 = vst [vmem:[#allocation1] ss:$4 sm:$0xff] %v1051_v23  ;;  %v3620_v37 = vld.sshfl [vmem:[#allocation1 + $0x30] sm:$0xff pattern:$0x73625140] }
 0x2f3   :  { %v3622_v14 = vld.sshfl [vmem:[#allocation1 + $0x28] sm:$0xff pattern:$0x73625140]  ;;  %v3624_v41 = vld.sshfl [vmem:[#allocation1 + $0x20] sm:$0xff pattern:$0x73625140] }
 0x2f4   :  { %1060 = vst [vmem:[#allocation1 + $0x20] ss:$4 sm:$0xff] %v1052_v30 }
 0x2f5   :  { %819 = vrot.lane.b32.xlu2 %v808_v47, %s3297_s16  ;;  %817 = vrot.lane.b32.xlu0 %v807_v49, %s3297_s16  ;;  %v1102_v49 = vld [vmem:[#allocation2 + $0xa] sm:$0x3f] }
 0x2f6   :  { %815 = vrot.lane.b32.xlu1 %v806_v34, %s3297_s16  ;;  %s3310_s16 = smov 97  }
 0x2f7   :  { %v3618_v36 = vpop.permute.xlu2 %563 }
 0x2f8   :  { %5887 = vst [vmem:[#allocation32_spill] sm:$0xff] %v3618_v36 }
 0x2f9   :  { %v3626_v5 = vld.sshfl [vmem:[#allocation1 + $0x10] sm:$0xff pattern:$0x73625140]  ;;  %v3632_v43 = vld.sshfl [vmem:[#allocation1 + $0x8] sm:$0xff pattern:$0x73625140] }
 0x2fa   :  { %v3634_v12 = vld.sshfl [vmem:[#allocation1] sm:$0xff pattern:$0x73625140] }
 0x2fb   :  { %1105 = vst [vmem:[#allocation1] ss:$4 sm:$0xff] %v1101_v4  ;;  %v3638_v46 = vld.sshfl [vmem:[#allocation1 + $0x30] sm:$0xff pattern:$0x73625140] }
 0x2fc   :  { %v3640_v47 = vld.sshfl [vmem:[#allocation1 + $0x28] sm:$0xff pattern:$0x73625140]  ;;  %v3642_v34 = vld.sshfl [vmem:[#allocation1 + $0x20] sm:$0xff pattern:$0x73625140] }
 0x2fd   :  { %869 = vrot.lane.b32.xlu2 %v859_v51, %s3298_s17  ;;  %867 = vrot.lane.b32.xlu0 %v858_v53, %s3298_s17  ;;  %1110 = vst [vmem:[#allocation1 + $0x20] ss:$4 sm:$0xff] %v1102_v49  ;;  %v1203_v49 = vld [vmem:[#allocation2] sm:$0x3f] }
 0x2fe   :  { %865 = vrot.lane.b32.xlu1 %v857_v55, %s3298_s17  ;;  %v1151_v55 = vld [vmem:[#allocation2 + $0x2] sm:$0x3f] }
 0x2ff   :  { %v3628_v33 = vpop.permute.xlu0 %511  ;;  %v3630_v13 = vpop.permute.xlu2 %569 }
 0x300   :  { %5888 = vst [vmem:[#allocation33_spill] sm:$0xff] %v3628_v33  ;;  %v3636_v44 = vpop.permute.xlu1 %509 }
 0x301   :  { %5889 = vst [vmem:[#allocation34_spill] sm:$0xff] %v3630_v13 }
 0x302   :  { %5890 = vst [vmem:[#allocation35_spill] sm:$0xff] %v3636_v44  ;;  %v3651_v53 = vld.sshfl [vmem:[#allocation1 + $0x10] sm:$0xff pattern:$0x73625140] }
 0x303   :  { %v3653_v54 = vld.sshfl [vmem:[#allocation1 + $0x8] sm:$0xff pattern:$0x73625140]  ;;  %v3657_v1 = vld.sshfl [vmem:[#allocation1] sm:$0xff pattern:$0x73625140] }
 0x304   :  { %1155 = vst [vmem:[#allocation1] ss:$4 sm:$0xff] %v1151_v55 }
 0x305   :  { %875 = vrot.lane.b32.xlu2 %v3578_v56, %s3298_s17  ;;  %873 = vrot.lane.b32.xlu0 %v3580_v57, %s3298_s17  ;;  %v3659_v56 = vld.sshfl [vmem:[#allocation1 + $0x30] sm:$0xff pattern:$0x73625140]  ;;  %v3661_v57 = vld.sshfl [vmem:[#allocation1 + $0x28] sm:$0xff pattern:$0x73625140] }
 0x306   :  { %871 = vrot.lane.b32.xlu1 %v3582_v9, %s3298_s17  ;;  %v3663_v9 = vld.sshfl [vmem:[#allocation1 + $0x20] sm:$0xff pattern:$0x73625140]  ;;  %s3311_s17 = smov 81  }
 0x307   :  { %v3647_v2 = vpop.permute.xlu0 %517  ;;  %v3649_v51 = vpop.permute.xlu2 %613  ;;  %1160 = vst [vmem:[#allocation1 + $0x20] ss:$4 sm:$0xff] %v1152_v62 }
 0x308   :  { %5891 = vst [vmem:[#allocation36_spill] sm:$0xff] %v3647_v2  ;;  %v3655_v10 = vpop.permute.xlu1 %515 }
 0x309   :  { %5892 = vst [vmem:[#allocation37_spill] sm:$0xff] %v3649_v51 }
 0x30a   :  { %5893 = vst [vmem:[#allocation38_spill] sm:$0xff] %v3655_v10 }
 0x30b   :  { %v3674_v30 = vld.sshfl [vmem:[#allocation1 + $0x10] sm:$0xff pattern:$0x73625140]  ;;  %v3676_v4 = vld.sshfl [vmem:[#allocation1 + $0x8] sm:$0xff pattern:$0x73625140] }
 0x30c   :  { %v3678_v55 = vld.sshfl [vmem:[#allocation1] sm:$0xff pattern:$0x73625140] }
 0x30d   :  { %919 = vrot.lane.b32.xlu2 %v3584_v58, %s3299_s18  ;;  %917 = vrot.lane.b32.xlu0 %v3586_v0, %s3299_s18  ;;  %1211 = vst [vmem:[#allocation1] ss:$4 sm:$0xff] %v1203_v49  ;;  %v1204_v0 = vld [vmem:[#allocation2 + $0x8] sm:$0x3f] }
 0x30e   :  { %915 = vrot.lane.b32.xlu1 %v3588_v59, %s3299_s18  ;;  %v3680_v62 = vld.sshfl [vmem:[#allocation1 + $0x30] sm:$0xff pattern:$0x73625140]  ;;  %v3682_v58 = vld.sshfl [vmem:[#allocation1 + $0x28] sm:$0xff pattern:$0x73625140] }
 0x30f   :  { %v3668_v21 = vpop.permute.xlu0 %561  ;;  %v3670_v19 = vpop.permute.xlu2 %619  ;;  %v3684_v59 = vld.sshfl [vmem:[#allocation1 + $0x20] sm:$0xff pattern:$0x73625140] }
 0x310   :  { %5894 = vst [vmem:[#allocation39_spill] sm:$0xff] %v3668_v21  ;;  %v3672_v23 = vpop.permute.xlu1 %559 }
 0x311   :  { %5895 = vst [vmem:[#allocation40_spill] sm:$0xff] %v3670_v19 }
 0x312   :  { %5896 = vst [vmem:[#allocation41_spill] sm:$0xff] %v3672_v23 }
 0x313   :  { %1216 = vst [vmem:[#allocation1 + $0x20] ss:$4 sm:$0xff] %v1204_v0 }
 0x314   :  { %v3695_v49 = vld.sshfl [vmem:[#allocation1 + $0x10] sm:$0xff pattern:$0x73625140]  ;;  %v3697_v50 = vld.sshfl [vmem:[#allocation1 + $0x8] sm:$0xff pattern:$0x73625140] }
 0x315   :  { %925 = vrot.lane.b32.xlu2 %v3590_v63, %s3299_s18  ;;  %923 = vrot.lane.b32.xlu0 %v3592_v8, %s3299_s18  ;;  %v3699_v11 = vld.sshfl [vmem:[#allocation1] sm:$0xff pattern:$0x73625140] }
 0x316   :  { %921 = vrot.lane.b32.xlu1 %v3594_v15, %s3299_s18  ;;  %1261 = vst [vmem:[#allocation1] ss:$4 sm:$0xff] %v1257_v60  ;;  %v1307_v60 = vld [vmem:[#allocation2] sm:$0x3f]  ;;  %s3312_s18 = smov 48  }
 0x317   :  { %v3689_v7 = vpop.permute.xlu0 %567  ;;  %v3691_v3 = vpop.permute.xlu2 %663 }
 0x318   :  { %5897 = vst [vmem:[#allocation42_spill] sm:$0xff] %v3689_v7  ;;  %v3693_v61 = vpop.permute.xlu1 %565 }
 0x319   :  { %5898 = vst [vmem:[#allocation43_spill] sm:$0xff] %v3691_v3 }
 0x31a   :  { %5899 = vst [vmem:[#allocation44_spill] sm:$0xff] %v3693_v61  ;;  %v3701_v63 = vld.sshfl [vmem:[#allocation1 + $0x30] sm:$0xff pattern:$0x73625140] }
 0x31b   :  { %v3705_v8 = vld.sshfl [vmem:[#allocation1 + $0x28] sm:$0xff pattern:$0x73625140]  ;;  %v3707_v15 = vld.sshfl [vmem:[#allocation1 + $0x20] sm:$0xff pattern:$0x73625140] }
 0x31c   :  { %1266 = vst [vmem:[#allocation1 + $0x20] ss:$4 sm:$0xff] %v1258_v40 }
 0x31d   :  { %969 = vrot.lane.b32.xlu2 %v3598_v45, %s3300_s19  ;;  %967 = vrot.lane.b32.xlu0 %v3600_v17, %s3300_s19  ;;  %v3716_v39 = vld.sshfl [vmem:[#allocation1 + $0x10] sm:$0xff pattern:$0x73625140]  ;;  %v3718_v32 = vld.sshfl [vmem:[#allocation1 + $0x8] sm:$0xff pattern:$0x73625140] }
 0x31e   :  { %965 = vrot.lane.b32.xlu1 %v3602_v22, %s3300_s19  ;;  %v1308_v45 = vld [vmem:[#allocation2 + $0x8] sm:$0x3f]  ;;  %v3720_v17 = vld.sshfl [vmem:[#allocation1] sm:$0xff pattern:$0x73625140] }
 0x31f   :  { %v3710_v0 = vpop.permute.xlu0 %611  ;;  %v3712_v52 = vpop.permute.xlu2 %669  ;;  %1311 = vst [vmem:[#allocation1] ss:$4 sm:$0xff] %v1307_v60  ;;  %v1358_v60 = vld [vmem:[#allocation2 + $0x8] sm:$0x3f] }
 0x320   :  { %5900 = vst [vmem:[#allocation45_spill] sm:$0xff] %v3710_v0  ;;  %v3714_v38 = vpop.permute.xlu1 %609 }
 0x321   :  { %5901 = vst [vmem:[#allocation46_spill] sm:$0xff] %v3712_v52 }
 0x322   :  { %5902 = vst [vmem:[#allocation47_spill] sm:$0xff] %v3714_v38 }
 0x323   :  { %v3724_v40 = vld.sshfl [vmem:[#allocation1 + $0x30] sm:$0xff pattern:$0x73625140]  ;;  %v3727_v22 = vld.sshfl [vmem:[#allocation1 + $0x28] sm:$0xff pattern:$0x73625140] }
 0x324   :  { %v3729_v42 = vld.sshfl [vmem:[#allocation1 + $0x20] sm:$0xff pattern:$0x73625140] }
 0x325   :  { %975 = vrot.lane.b32.xlu2 %v3604_v18, %s3300_s19  ;;  %973 = vrot.lane.b32.xlu0 %v3606_v26, %s3300_s19  ;;  %1316 = vst [vmem:[#allocation1 + $0x20] ss:$4 sm:$0xff] %v1308_v45 }
 0x326   :  { %971 = vrot.lane.b32.xlu1 %v3610_v20, %s3300_s19  ;;  %v3737_v18 = vld.sshfl [vmem:[#allocation1 + $0x10] sm:$0xff pattern:$0x73625140]  ;;  %v3739_v26 = vld.sshfl [vmem:[#allocation1 + $0x8] sm:$0xff pattern:$0x73625140] }
 0x327   :  { %v3731_v29 = vpop.permute.xlu0 %617  ;;  %v3733_v6 = vpop.permute.xlu2 %713  ;;  %v3743_v20 = vld.sshfl [vmem:[#allocation1] sm:$0xff pattern:$0x73625140]  ;;  %s3313_s19 = smov 47  }
 0x328   :  { %5903 = vst [vmem:[#allocation48_spill] sm:$0xff] %v3731_v29  ;;  %v3735_v28 = vpop.permute.xlu1 %615 }
 0x329   :  { %5904 = vst [vmem:[#allocation49_spill] sm:$0xff] %v3733_v6 }
 0x32a   :  { %5905 = vst [vmem:[#allocation50_spill] sm:$0xff] %v3735_v28 }
 0x32b   :  { %1361 = vst [vmem:[#allocation1] ss:$4 sm:$0xff] %v1357_v35 }
 0x32c   :  { %v3746_v6 = vld.sshfl [vmem:[#allocation1 + $0x30] sm:$0xff pattern:$0x73625140]  ;;  %v3752_v3 = vld.sshfl [vmem:[#allocation1 + $0x28] sm:$0xff pattern:$0x73625140] }
 0x32d   :  { %1019 = vrot.lane.b32.xlu2 %v3612_v24, %s3301_s20  ;;  %1017 = vrot.lane.b32.xlu0 %v3614_v25, %s3301_s20  ;;  %v3754_v28 = vld.sshfl [vmem:[#allocation1 + $0x20] sm:$0xff pattern:$0x73625140]  ;;  %v1407_v24 = vld [vmem:[#allocation2 + $0x2] sm:$0x3f] }
 0x32e   :  { %1015 = vrot.lane.b32.xlu1 %v3616_v31, %s3301_s20  ;;  %1366 = vst [vmem:[#allocation1 + $0x20] ss:$4 sm:$0xff] %v1358_v60  ;;  %v1408_v31 = vld [vmem:[#allocation2 + $0xa] sm:$0x3f] }
 0x32f   :  { %v3748_v45 = vpop.permute.xlu0 %661  ;;  %v3750_v52 = vpop.permute.xlu2 %719 }
 0x330   :  { %5906 = vst [vmem:[#allocation51_spill] sm:$0xff] %v3748_v45  ;;  %v3756_v29 = vpop.permute.xlu1 %659 }
 0x331   :  { %5907 = vst [vmem:[#allocation52_spill] sm:$0xff] %v3750_v52 }
 0x332   :  { %5908 = vst [vmem:[#allocation53_spill] sm:$0xff] %v3756_v29  ;;  %v3760_v25 = vld.sshfl [vmem:[#allocation1 + $0x10] sm:$0xff pattern:$0x73625140] }
 0x333   :  { %v3762_v35 = vld.sshfl [vmem:[#allocation1 + $0x8] sm:$0xff pattern:$0x73625140]  ;;  %v3765_v52 = vld.sshfl [vmem:[#allocation1] sm:$0xff pattern:$0x73625140] }
 0x334   :  { %1411 = vst [vmem:[#allocation1] ss:$4 sm:$0xff] %v1407_v24 }
 0x335   :  { %1025 = vrot.lane.b32.xlu2 %v3620_v37, %s3301_s20  ;;  %1023 = vrot.lane.b32.xlu0 %v3622_v14, %s3301_s20  ;;  %v3771_v60 = vld.sshfl [vmem:[#allocation1 + $0x30] sm:$0xff pattern:$0x73625140]  ;;  %v3775_v37 = vld.sshfl [vmem:[#allocation1 + $0x28] sm:$0xff pattern:$0x73625140] }
 0x336   :  { %1021 = vrot.lane.b32.xlu1 %v3624_v41, %s3301_s20  ;;  %v3777_v14 = vld.sshfl [vmem:[#allocation1 + $0x20] sm:$0xff pattern:$0x73625140]  ;;  %v1457_v41 = vld [vmem:[#allocation2 + $0x2] sm:$0x3f]  ;;  %s3314_s20 = smov 31  }
 0x337   :  { %v3767_v45 = vpop.permute.xlu0 %667  ;;  %v3769_v19 = vpop.permute.xlu2 %763  ;;  %1416 = vst [vmem:[#allocation1 + $0x20] ss:$4 sm:$0xff] %v1408_v31 }
 0x338   :  { %5909 = vst [vmem:[#allocation54_spill] sm:$0xff] %v3767_v45  ;;  %v3773_v29 = vpop.permute.xlu1 %665 }
 0x339   :  { %5910 = vst [vmem:[#allocation55_spill] sm:$0xff] %v3769_v19 }
 0x33a   :  { %5911 = vst [vmem:[#allocation56_spill] sm:$0xff] %v3773_v29 }
 0x33b   :  { %v3782_v45 = vld.sshfl [vmem:[#allocation1 + $0x10] sm:$0xff pattern:$0x73625140]  ;;  %v3788_v29 = vld.sshfl [vmem:[#allocation1 + $0x8] sm:$0xff pattern:$0x73625140] }
 0x33c   :  { %v3790_v38 = vld.sshfl [vmem:[#allocation1] sm:$0xff pattern:$0x73625140] }
 0x33d   :  { %1068 = vrot.lane.b32.xlu2 %v3626_v5, %s3302_s21  ;;  %1066 = vrot.lane.b32.xlu0 %v3632_v43, %s3302_s21  ;;  %1461 = vst [vmem:[#allocation1] ss:$4 sm:$0xff] %v1457_v41  ;;  %v1458_v43 = vld [vmem:[#allocation2 + $0xa] sm:$0x3f] }
 0x33e   :  { %1064 = vrot.lane.b32.xlu1 %v3634_v12, %s3302_s21  ;;  %v3794_v31 = vld.sshfl [vmem:[#allocation1 + $0x30] sm:$0xff pattern:$0x73625140]  ;;  %v3796_v5 = vld.sshfl [vmem:[#allocation1 + $0x28] sm:$0xff pattern:$0x73625140] }
 0x33f   :  { %v3784_v24 = vpop.permute.xlu0 %711  ;;  %v3786_v19 = vpop.permute.xlu2 %769  ;;  %v3798_v51 = vld.sshfl [vmem:[#allocation1 + $0x20] sm:$0xff pattern:$0x73625140] }
 0x340   :  { %5912 = vst [vmem:[#allocation57_spill] sm:$0xff] %v3784_v24  ;;  %v3792_v0 = vpop.permute.xlu1 %709  ;;  %v1507_v24 = vld [vmem:[#allocation2 + $0x2] sm:$0x3f] }
 0x341   :  { %5913 = vst [vmem:[#allocation58_spill] sm:$0xff] %v3786_v19 }
 0x342   :  { %5914 = vst [vmem:[#allocation59_spill] sm:$0xff] %v3792_v0 }
 0x343   :  { %1466 = vst [vmem:[#allocation1 + $0x20] ss:$4 sm:$0xff] %v1458_v43  ;;  %v1508_v43 = vld [vmem:[#allocation2 + $0xa] sm:$0x3f] }
 0x344   :  { %v3807_v41 = vld.sshfl [vmem:[#allocation1 + $0x10] sm:$0xff pattern:$0x73625140]  ;;  %v3809_v0 = vld.sshfl [vmem:[#allocation1 + $0x8] sm:$0xff pattern:$0x73625140] }
 0x345   :  { %1074 = vrot.lane.b32.xlu2 %v3638_v46, %s3302_s21  ;;  %1072 = vrot.lane.b32.xlu0 %v3640_v47, %s3302_s21  ;;  %v3813_v7 = vld.sshfl [vmem:[#allocation1] sm:$0xff pattern:$0x73625140] }
 0x346   :  { %1070 = vrot.lane.b32.xlu1 %v3642_v34, %s3302_s21  ;;  %1511 = vst [vmem:[#allocation1] ss:$4 sm:$0xff] %v1507_v24  ;;  %s3315_s21 = smov 32  }
 0x347   :  { %v3803_v12 = vpop.permute.xlu0 %717  ;;  %v3805_v19 = vpop.permute.xlu2 %813 }
 0x348   :  { %5915 = vst [vmem:[#allocation60_spill] sm:$0xff] %v3803_v12  ;;  %v3811_v61 = vpop.permute.xlu1 %715  ;;  %v1557_v12 = vld [vmem:[#allocation2] sm:$0x3f] }
 0x349   :  { %5916 = vst [vmem:[#allocation61_spill] sm:$0xff] %v3805_v19  ;;  %v1560_v19 = vstv %s3073_s22  ;;  %s3316_s22 = smov 15  }
 0x34a   :  { %5917 = vst [vmem:[#allocation62_spill] sm:$0xff] %v3811_v61  ;;  %v3815_v46 = vld.sshfl [vmem:[#allocation1 + $0x30] sm:$0xff pattern:$0x73625140]  ;;  %v1561_v13 = vmul.f32 %v1560_v19, %v1557_v12  ;;  %v1581_v12 = vstv %s3074_s24  ;;  %s4332_s24 = sld [smem:[#allocation8 + $0x31]] }
 0x34b   :  { %v3817_v47 = vld.sshfl [vmem:[#allocation1 + $0x28] sm:$0xff pattern:$0x73625140]  ;;  %v3819_v34 = vld.sshfl [vmem:[#allocation1 + $0x20] sm:$0xff pattern:$0x73625140] }
 0x34c   :  { %1516 = vst [vmem:[#allocation1 + $0x20] ss:$4 sm:$0xff] %v1508_v43  ;;  %v1558_v19 = vld [vmem:[#allocation2 + $0x8] sm:$0x3f] }
 0x34d   :  { %1118 = vrot.lane.b32.xlu2 %v3651_v53, %s3303_s23  ;;  %1116 = vrot.lane.b32.xlu0 %v3653_v54, %s3303_s23  ;;  %v3830_v21 = vld.sshfl [vmem:[#allocation1 + $0x10] sm:$0xff pattern:$0x73625140]  ;;  %v3832_v43 = vld.sshfl [vmem:[#allocation1 + $0x8] sm:$0xff pattern:$0x73625140]  ;;  %v1582_v2 = vmul.f32 %v1581_v12, %v1558_v19 }
 0x34e   :  { %1114 = vrot.lane.b32.xlu1 %v3657_v1, %s3303_s23  ;;  %v3834_v36 = vld.sshfl [vmem:[#allocation1] sm:$0xff pattern:$0x73625140]  ;;  %v1841_v1 = vld [vmem:[#allocation2 + $0x8] sm:$0x3f] }
 0x34f   :  { %v3824_v61 = vpop.permute.xlu0 %761  ;;  %v3826_v24 = vpop.permute.xlu2 %819  ;;  %1563 = vst [vmem:[#allocation1] ss:$4 sm:$0xff] %v1561_v13 }
 0x350   :  { %5918 = vst [vmem:[#allocation63_spill] sm:$0xff] %v3824_v61  ;;  %v3828_v23 = vpop.permute.xlu1 %759 }
 0x351   :  { %5919 = vst [vmem:[#allocation64_spill] sm:$0xff] %v3826_v24 }
 0x352   :  { %5920 = vst [vmem:[#allocation65_spill] sm:$0xff] %v3828_v23 }
 0x353   :  { %v3836_v53 = vld.sshfl [vmem:[#allocation1 + $0x30] sm:$0xff pattern:$0x73625140]  ;;  %v3838_v54 = vld.sshfl [vmem:[#allocation1 + $0x28] sm:$0xff pattern:$0x73625140] }
 0x354   :  { %v3840_v10 = vld.sshfl [vmem:[#allocation1 + $0x20] sm:$0xff pattern:$0x73625140] }
 0x355   :  { %1124 = vrot.lane.b32.xlu2 %v3659_v56, %s3303_s23  ;;  %1122 = vrot.lane.b32.xlu0 %v3661_v57, %s3303_s23  ;;  %1853 = vst [vmem:[#allocation1 + $0x20] ss:$4 sm:$0xff] %v1841_v1  ;;  %v1895_v1 = vld [vmem:[#allocation2 + $0x8] sm:$0x3f] }
 0x356   :  { %1120 = vrot.lane.b32.xlu1 %v3663_v9, %s3303_s23  ;;  %v3851_v61 = vld.sshfl [vmem:[#allocation1 + $0x10] sm:$0xff pattern:$0x73625140]  ;;  %v3853_v27 = vld.sshfl [vmem:[#allocation1 + $0x8] sm:$0xff pattern:$0x73625140] }
 0x357   :  { %v3845_v24 = vpop.permute.xlu0 %767  ;;  %v3847_v23 = vpop.permute.xlu2 %869  ;;  %v3855_v56 = vld.sshfl [vmem:[#allocation1] sm:$0xff pattern:$0x73625140]  ;;  %s4325_s23 = sld [smem:[#allocation8]] }
 0x358   :  { %5921 = vst [vmem:[#allocation66_spill] sm:$0xff] %v3845_v24  ;;  %v3849_v13 = vpop.permute.xlu1 %765 }
 0x359   :  { %5922 = vst [vmem:[#allocation67_spill] sm:$0xff] %v3847_v23 }
 0x35a   :  { %5923 = vst [vmem:[#allocation68_spill] sm:$0xff] %v3849_v13  ;;  %v1603_v13 = vstv %s3075_s25  ;;  %s4334_s25 = sld [smem:[#allocation8 + $0x7]] }
 0x35b   :  { %1584 = vst [vmem:[#allocation1] ss:$4 sm:$0xff] %v1582_v2  ;;  %v1600_v2 = vld [vmem:[#allocation2] sm:$0x3f] }
 0x35c   :  { %v3857_v57 = vld.sshfl [vmem:[#allocation1 + $0x30] sm:$0xff pattern:$0x73625140]  ;;  %v3861_v9 = vld.sshfl [vmem:[#allocation1 + $0x28] sm:$0xff pattern:$0x73625140] }
 0x35d   :  { %1168 = vrot.lane.b32.xlu2 %v3674_v30, %s3304_s28  ;;  %1166 = vrot.lane.b32.xlu0 %v3676_v4, %s3304_s28  ;;  %v3864_v23 = vld.sshfl [vmem:[#allocation1 + $0x20] sm:$0xff pattern:$0x73625140]  ;;  %v1604_v30 = vmul.f32 %v1603_v13, %v1600_v2 }
 0x35e   :  { %1164 = vrot.lane.b32.xlu1 %v3678_v55, %s3304_s28  ;;  %1903 = vst [vmem:[#allocation1 + $0x20] ss:$4 sm:$0xff] %v1895_v1 }
 0x35f   :  { %v3866_v19 = vpop.permute.xlu0 %811  ;;  %v3868_v12 = vpop.permute.xlu2 %875 }
 0x360   :  { %5924 = vst [vmem:[#allocation69_spill] sm:$0xff] %v3866_v19  ;;  %v3870_v24 = vpop.permute.xlu1 %809 }
 0x361   :  { %5925 = vst [vmem:[#allocation70_spill] sm:$0xff] %v3868_v12  ;;  %v1945_v12 = vld [vmem:[#allocation2 + $0x8] sm:$0x3f] }
 0x362   :  { %5926 = vst [vmem:[#allocation71_spill] sm:$0xff] %v3870_v24  ;;  %v3872_v44 = vld.sshfl [vmem:[#allocation1 + $0x10] sm:$0xff pattern:$0x73625140] }
 0x363   :  { %v3874_v4 = vld.sshfl [vmem:[#allocation1 + $0x8] sm:$0xff pattern:$0x73625140]  ;;  %v3876_v33 = vld.sshfl [vmem:[#allocation1] sm:$0xff pattern:$0x73625140] }
 0x364   :  { %1606 = vst [vmem:[#allocation1] ss:$4 sm:$0xff] %v1604_v30 }
 0x365   :  { %1174 = vrot.lane.b32.xlu2 %v3680_v62, %s3304_s28  ;;  %1172 = vrot.lane.b32.xlu0 %v3682_v58, %s3304_s28  ;;  %v3881_v55 = vld.sshfl [vmem:[#allocation1 + $0x30] sm:$0xff pattern:$0x73625140]  ;;  %v3883_v1 = vld.sshfl [vmem:[#allocation1 + $0x28] sm:$0xff pattern:$0x73625140] }
 0x366   :  { %1170 = vrot.lane.b32.xlu1 %v3684_v59, %s3304_s28  ;;  %v3889_v2 = vld.sshfl [vmem:[#allocation1 + $0x20] sm:$0xff pattern:$0x73625140]  ;;  %v1601_v62 = vld [vmem:[#allocation2 + $0x8] sm:$0x3f]  ;;  %s3317_s28 = smov 127  }
 0x367   :  { %v3885_v24 = vpop.permute.xlu0 %817  ;;  %v3887_v13 = vpop.permute.xlu2 %919  ;;  %1953 = vst [vmem:[#allocation1 + $0x20] ss:$4 sm:$0xff] %v1945_v12  ;;  %v1624_v58 = vmul.f32 %v1623_v16, %v1601_v62  ;;  %v1995_v62 = vld [vmem:[#allocation2 + $0xa] sm:$0x3f] }
 0x368   :  { %5927 = vst [vmem:[#allocation72_spill] sm:$0xff] %v3885_v24  ;;  %v3891_v19 = vpop.permute.xlu1 %815 }
 0x369   :  { %5928 = vst [vmem:[#allocation73_spill] sm:$0xff] %v3887_v13 }
 0x36a   :  { %5929 = vst [vmem:[#allocation74_spill] sm:$0xff] %v3891_v19 }
 0x36b   :  { %v3893_v30 = vld.sshfl [vmem:[#allocation1 + $0x10] sm:$0xff pattern:$0x73625140]  ;;  %v3895_v59 = vld.sshfl [vmem:[#allocation1 + $0x8] sm:$0xff pattern:$0x73625140] }
 0x36c   :  { %5930 = vst [vmem:[#allocation75_spill] sm:$0xff] %v3895_v59  ;;  %v3899_v24 = vld.sshfl [vmem:[#allocation1] sm:$0xff pattern:$0x73625140] }
 0x36d   :  { %1224 = vrot.lane.b32.xlu2 %v3695_v49, %s3305_s29  ;;  %1222 = vrot.lane.b32.xlu0 %v3697_v50, %s3305_s29  ;;  %5931 = vst [vmem:[#allocation76_spill] sm:$0xff] %v3899_v24  ;;  %v1642_v50 = vld [vmem:[#allocation2] sm:$0x3f]  ;;  %v1645_v49 = vstv %s3077_s3  ;;  %s4375_s3 = sld [smem:[#allocation8 + $0xe]] }
 0x36e   :  { %1220 = vrot.lane.b32.xlu1 %v3699_v11, %s3305_s29  ;;  %1626 = vst [vmem:[#allocation1] ss:$4 sm:$0xff] %v1624_v58  ;;  %v3906_v19 = vld.sshfl [vmem:[#allocation1 + $0x30] sm:$0xff pattern:$0x73625140]  ;;  %v1646_v24 = vmul.f32 %v1645_v49, %v1642_v50 }
 0x36f   :  { %v3902_v13 = vpop.permute.xlu0 %867  ;;  %v3904_v12 = vpop.permute.xlu2 %925  ;;  %v3908_v16 = vld.sshfl [vmem:[#allocation1 + $0x28] sm:$0xff pattern:$0x73625140]  ;;  %v3912_v59 = vld.sshfl [vmem:[#allocation1 + $0x20] sm:$0xff pattern:$0x73625140] }
 0x370   :  { %5932 = vst [vmem:[#allocation77_spill] sm:$0xff] %v3902_v13  ;;  %v3910_v48 = vpop.permute.xlu1 %865 }
 0x371   :  { %5933 = vst [vmem:[#allocation78_spill] sm:$0xff] %v3904_v12 }
 0x372   :  { %5934 = vst [vmem:[#allocation79_spill] sm:$0xff] %v3910_v48 }
 0x373   :  { %2003 = vst [vmem:[#allocation1 + $0x20] ss:$4 sm:$0xff] %v1995_v62 }
 0x375   :  { %1230 = vrot.lane.b32.xlu2 %v3701_v63, %s3305_s29  ;;  %1228 = vrot.lane.b32.xlu0 %v3705_v8, %s3305_s29  ;;  %v3916_v11 = vld.sshfl [vmem:[#allocation1 + $0x10] sm:$0xff pattern:$0x73625140]  ;;  %v3919_v58 = vld.sshfl [vmem:[#allocation1 + $0x8] sm:$0xff pattern:$0x73625140] }
 0x376   :  { %5935 = vst [vmem:[#allocation80_spill] sm:$0xff] %v3916_v11  ;;  %1226 = vrot.lane.b32.xlu1 %v3707_v15, %s3305_s29  ;;  %v3921_v12 = vld.sshfl [vmem:[#allocation1] sm:$0xff pattern:$0x73625140]  ;;  %v2045_v8 = vld [vmem:[#allocation2 + $0xa] sm:$0x3f]  ;;  %v1666_v11 = vstv %s3078_s30 }
 0x377   :  { %v3923_v48 = vpop.permute.xlu0 %873  ;;  %v3925_v13 = vpop.permute.xlu2 %969  ;;  %1648 = vst [vmem:[#allocation1] ss:$4 sm:$0xff] %v1646_v24  ;;  %v1643_v15 = vld [vmem:[#allocation2 + $0x8] sm:$0x3f]  ;;  %s4394_s29 = sld [smem:[#allocation8 + $0x3f]] }
 0x378   :  { %5936 = vst [vmem:[#allocation81_spill] sm:$0xff] %v3923_v48  ;;  %v3927_v62 = vpop.permute.xlu1 %871  ;;  %s4740_s30 = sld [smem:[#allocation8 + $0x24]] }
 0x379   :  { %5937 = vst [vmem:[#allocation82_spill] sm:$0xff] %v3925_v13  ;;  %v1667_v13 = vmul.f32 %v1666_v11, %v1643_v15  ;;  %v1688_v15 = vstv %s3079_s6  ;;  %s4745_s6 = sld [smem:[#allocation8 + $0x55]] }
 0x37a   :  { %5938 = vst [vmem:[#allocation83_spill] sm:$0xff] %v3927_v62  ;;  %v3929_v50 = vld.sshfl [vmem:[#allocation1 + $0x30] sm:$0xff pattern:$0x73625140] }
 0x37b   :  { %5939 = vst [vmem:[#allocation84_spill] sm:$0xff] %v3929_v50  ;;  %v3931_v63 = vld.sshfl [vmem:[#allocation1 + $0x28] sm:$0xff pattern:$0x73625140] }
 0x37c   :  { %5940 = vst [vmem:[#allocation85_spill] sm:$0xff] %v3931_v63  ;;  %v3933_v49 = vld.sshfl [vmem:[#allocation1 + $0x20] sm:$0xff pattern:$0x73625140] }
 0x37d   :  { %5941 = vst [vmem:[#allocation86_spill] sm:$0xff] %v3933_v49  ;;  %1274 = vrot.lane.b32.xlu2 %v3716_v39, %s3306_s7  ;;  %1272 = vrot.lane.b32.xlu0 %v3718_v32, %s3306_s7  ;;  %v2095_v32 = vld [vmem:[#allocation2 + $0xa] sm:$0x3f] }
 0x37e   :  { %2053 = vst [vmem:[#allocation1 + $0x20] ss:$4 sm:$0xff] %v2045_v8  ;;  %1270 = vrot.lane.b32.xlu1 %v3720_v17, %s3306_s7  ;;  %v3938_v24 = vld.sshfl [vmem:[#allocation1 + $0x10] sm:$0xff pattern:$0x73625140] }
 0x37f   :  { %v3940_v62 = vld.sshfl [vmem:[#allocation1 + $0x8] sm:$0xff pattern:$0x73625140]  ;;  %v3942_v48 = vpop.permute.xlu0 %917  ;;  %v3944_v63 = vpop.permute.xlu2 %975  ;;  %v3946_v8 = vld.sshfl [vmem:[#allocation1] sm:$0xff pattern:$0x73625140] }
 0x380   :  { %5942 = vst [vmem:[#allocation87_spill] sm:$0xff] %v3942_v48  ;;  %v3948_v49 = vpop.permute.xlu1 %915  ;;  %v1685_v17 = vld [vmem:[#allocation2 + $0x2] sm:$0xf] }
 0x381   :  { %5943 = vst [vmem:[#allocation88_spill] sm:$0xff] %v3944_v63 }
 0x382   :  { %5944 = vst [vmem:[#allocation89_spill] sm:$0xff] %v3946_v8 }
 0x383   :  { %5945 = vst [vmem:[#allocation90_spill] sm:$0xff] %v3948_v49 }
 0x384   :  { %1669 = vst [vmem:[#allocation1] ss:$4 sm:$0xff] %v1667_v13 }
 0x385   :  { %v3950_v50 = vld.sshfl [vmem:[#allocation1 + $0x30] sm:$0xff pattern:$0x73625140]  ;;  %v3952_v39 = vld.sshfl [vmem:[#allocation1 + $0x28] sm:$0xff pattern:$0x73625140]  ;;  %1280 = vrot.lane.b32.xlu2 %v3724_v40, %s3306_s7  ;;  %1278 = vrot.lane.b32.xlu0 %v3727_v22, %s3306_s7 }
 0x386   :  { %5946 = vst [vmem:[#allocation91_spill] sm:$0xff] %v3950_v50  ;;  %v3954_v11 = vld.sshfl [vmem:[#allocation1 + $0x20] sm:$0xff pattern:$0x73625140]  ;;  %1276 = vrot.lane.b32.xlu1 %v3729_v42, %s3306_s7  ;;  %v2145_v40 = vld [vmem:[#allocation2 + $0xa] sm:$0x3f] }
 0x387   :  { %5947 = vst [vmem:[#allocation92_spill] sm:$0xff] %v3952_v39  ;;  %v3959_v63 = vpop.permute.xlu0 %923  ;;  %v3961_v13 = vpop.permute.xlu2 %1019  ;;  %v1689_v39 = vmul.f32 %v1688_v15, %v1685_v17  ;;  %v1686_v42 = vld [vmem:[#allocation2 + $0xa] sm:$0xf]  ;;  %s4408_s7 = sld [smem:[#allocation8 + $0x15]] }
 0x388   :  { %5948 = vst [vmem:[#allocation93_spill] sm:$0xff] %v3954_v11  ;;  %v3967_v11 = vpop.permute.xlu1 %921 }
 0x389   :  { %2103 = vst [vmem:[#allocation1 + $0x20] ss:$4 sm:$0xff] %v2095_v32 }
 0x38a   :  { %5949 = vst [vmem:[#allocation94_spill] sm:$0xff] %v3959_v63  ;;  %v1699_v63 = vstv %s3080_s8  ;;  %s4452_s8 = sld [smem:[#allocation8 + $0x1c]] }
 0x38b   :  { %5950 = vst [vmem:[#allocation95_spill] sm:$0xff] %v3961_v13  ;;  %v3963_v49 = vld.sshfl [vmem:[#allocation1 + $0x10] sm:$0xff pattern:$0x73625140]  ;;  %v1700_v15 = vmul.f32 %v1699_v63, %v1686_v42 }
 0x38c   :  { %v3965_v48 = vld.sshfl [vmem:[#allocation1 + $0x8] sm:$0xff pattern:$0x73625140]  ;;  %5951 = vst [vmem:[#allocation96_spill] sm:$0xff] %v3967_v11 }
 0x38d   :  { %v3969_v32 = vld.sshfl [vmem:[#allocation1] sm:$0xff pattern:$0x73625140]  ;;  %1324 = vrot.lane.b32.xlu2 %v3737_v18, %s3307_s1  ;;  %1322 = vrot.lane.b32.xlu0 %v3739_v26, %s3307_s1  ;;  %v1712_v18 = vstv %s3081_s9  ;;  %s3318_s9 = smov 111  }
 0x38e   :  { %1691 = vst [vmem:[#allocation1] ss:$4 sm:$0xff] %v1689_v39  ;;  %1320 = vrot.lane.b32.xlu1 %v3743_v20, %s3307_s1 }
 0x38f   :  { %v3980_v17 = vpop.permute.xlu0 %967  ;;  %v3982_v39 = vpop.permute.xlu2 %1025 }
 0x390   :  { %v3971_v50 = vld.sshfl [vmem:[#allocation1 + $0x30] sm:$0xff pattern:$0x73625140]  ;;  %v3973_v22 = vld.sshfl [vmem:[#allocation1 + $0x28] sm:$0xff pattern:$0x73625140]  ;;  %v3984_v13 = vpop.permute.xlu1 %965 }
 0x391   :  { %5952 = vst [vmem:[#allocation97_spill] sm:$0xff] %v3973_v22  ;;  %v3975_v8 = vld.sshfl [vmem:[#allocation1 + $0x20] sm:$0xff pattern:$0x73625140] }
 0x392   :  { %5953 = vst [vmem:[#allocation98_spill] sm:$0xff] %v3975_v8  ;;  %v1709_v8 = vld [vmem:[#allocation2 + $0x2] sm:$0x3f] }
 0x393   :  { %2153 = vst [vmem:[#allocation1 + $0x20] ss:$4 sm:$0xff] %v2145_v40  ;;  %v2197_v40 = vld [vmem:[#allocation2 + $0x8] sm:$0x3f]  ;;  %v1713_v42 = vmul.f32 %v1712_v18, %v1709_v8 }
 0x394   :  { %5954 = vst [vmem:[#allocation99_spill] sm:$0xff] %v3980_v17  ;;  %v1733_v17 = vstv %s3990_s10  ;;  %v2251_v8 = vld [vmem:[#allocation2 + $0x8] sm:$0x3f]  ;;  %s4487_s10 = sld [smem:[#allocation8 + $0x23]] }
 0x395   :  { %5955 = vst [vmem:[#allocation100_spill] sm:$0xff] %v3982_v39  ;;  %v3986_v11 = vld.sshfl [vmem:[#allocation1] sm:$0xff pattern:$0x73625140]  ;;  %1330 = vrot.lane.b32.xlu2 %v3746_v6, %s3307_s1  ;;  %1328 = vrot.lane.b32.xlu0 %v3752_v3, %s3307_s1  ;;  %v1710_v6 = vld [vmem:[#allocation2 + $0xa] sm:$0x3f] }
 0x396   :  { %5956 = vst [vmem:[#allocation101_spill] sm:$0xff] %v3984_v13  ;;  %v3988_v22 = vld.sshfl [vmem:[#allocation1 + $0x8] sm:$0xff pattern:$0x73625140]  ;;  %1326 = vrot.lane.b32.xlu1 %v3754_v28, %s3307_s1  ;;  %s4470_s1 = sld [smem:[#allocation8 + $0x4d]] }
 0x397   :  { %5957 = vst [vmem:[#allocation102_spill] sm:$0xff] %v3986_v11  ;;  %v4003_v11 = vpop.permute.xlu2 %1068 }
 0x398   :  { %5958 = vst [vmem:[#allocation103_spill] sm:$0xff] %v3988_v22  ;;  %v4005_v22 = vpop.permute.xlu1 %971 }
 0x399   :  { %1702 = vst [vmem:[#allocation1] ss:$4 sm:$0xff] %v1700_v15  ;;  %v4001_v15 = vpop.permute.xlu0 %973 }
 0x39a   :  { %v3992_v26 = vld.sshfl [vmem:[#allocation1 + $0x30] sm:$0xff pattern:$0x73625140]  ;;  %v3994_v20 = vld.sshfl [vmem:[#allocation1 + $0x28] sm:$0xff pattern:$0x73625140] }
 0x39b   :  { %v3998_v63 = vld.sshfl [vmem:[#allocation1 + $0x20] sm:$0xff pattern:$0x73625140]  ;;  %5959 = vst [vmem:[#allocation104_spill] sm:$0xff] %v4003_v11 }
 0x39c   :  { %2209 = vst [vmem:[#allocation1 + $0x20] ss:$4 sm:$0xff] %v2197_v40 }
 0x39d   :  { %5960 = vst [vmem:[#allocation105_spill] sm:$0xff] %v4005_v22  ;;  %1374 = vrot.lane.b32.xlu2 %v3760_v25, %s3308_s2  ;;  %1372 = vrot.lane.b32.xlu0 %v3762_v35, %s3308_s2  ;;  %v2301_v22 = vld [vmem:[#allocation2 + $0x8] sm:$0x3f] }
 0x39e   :  { %1370 = vrot.lane.b32.xlu1 %v3765_v52, %s3308_s2 }
 0x3a0   :  { %v4007_v39 = vld.sshfl [vmem:[#allocation1] sm:$0xff pattern:$0x73625140]  ;;  %v4009_v13 = vld.sshfl [vmem:[#allocation1 + $0x8] sm:$0xff pattern:$0x73625140] }
 0x3a1   :  { %5961 = vst [vmem:[#allocation106_spill] sm:$0xff] %v4007_v39  ;;  %v4021_v40 = vpop.permute.xlu0 %1017  ;;  %v1734_v39 = vmul.f32 %v1733_v17, %v1710_v6  ;;  %v1752_v17 = vld [vmem:[#allocation2 + $0x2] sm:$0x3f]  ;;  %v1755_v6 = vstv %s3083_s11  ;;  %s4508_s11 = sld [smem:[#allocation8 + $0x2a]] }
 0x3a2   :  { %5962 = vst [vmem:[#allocation107_spill] sm:$0xff] %v4009_v13  ;;  %v4025_v13 = vpop.permute.xlu1 %1015 }
 0x3a3   :  { %1715 = vst [vmem:[#allocation1] ss:$4 sm:$0xff] %v1713_v42  ;;  %v4014_v28 = vld.sshfl [vmem:[#allocation1 + $0x30] sm:$0xff pattern:$0x73625140]  ;;  %v4023_v42 = vpop.permute.xlu2 %1074 }
 0x3a4   :  { %v4016_v3 = vld.sshfl [vmem:[#allocation1 + $0x28] sm:$0xff pattern:$0x73625140]  ;;  %v4019_v18 = vld.sshfl [vmem:[#allocation1 + $0x20] sm:$0xff pattern:$0x73625140] }
 0x3a5   :  { %5963 = vst [vmem:[#allocation108_spill] sm:$0xff] %v4023_v42  ;;  %1380 = vrot.lane.b32.xlu2 %v3771_v60, %s3308_s2  ;;  %1378 = vrot.lane.b32.xlu0 %v3775_v37, %s3308_s2  ;;  %v1756_v37 = vmul.f32 %v1755_v6, %v1752_v17  ;;  %v1776_v6 = vstv %s3084_s12  ;;  %s4521_s12 = sld [smem:[#allocation8 + $0x5b]] }
 0x3a6   :  { %2259 = vst [vmem:[#allocation1 + $0x20] ss:$4 sm:$0xff] %v2251_v8  ;;  %1376 = vrot.lane.b32.xlu1 %v3777_v14, %s3308_s2  ;;  %s4494_s2 = sld [smem:[#allocation8 + $0x54]] }
 0x3a9   :  { %v4040_v42 = vpop.permute.xlu0 %1023 }
 0x3aa   :  { %v4027_v25 = vld.sshfl [vmem:[#allocation1 + $0x10] sm:$0xff pattern:$0x73625140]  ;;  %v4029_v35 = vld.sshfl [vmem:[#allocation1 + $0x8] sm:$0xff pattern:$0x73625140] }
 0x3ab   :  { %5964 = vst [vmem:[#allocation109_spill] sm:$0xff] %v4027_v25  ;;  %v4031_v11 = vld.sshfl [vmem:[#allocation1] sm:$0xff pattern:$0x73625140]  ;;  %v4042_v25 = vpop.permute.xlu2 %1118 }
 0x3ac   :  { %5965 = vst [vmem:[#allocation110_spill] sm:$0xff] %v4029_v35 }
 0x3ad   :  { %1736 = vst [vmem:[#allocation1] ss:$4 sm:$0xff] %v1734_v39  ;;  %v4036_v52 = vld.sshfl [vmem:[#allocation1 + $0x30] sm:$0xff pattern:$0x73625140]  ;;  %v4046_v39 = vpop.permute.xlu1 %1021  ;;  %1424 = vrot.lane.b32.xlu2 %v3782_v45, %s3309_s13  ;;  %1422 = vrot.lane.b32.xlu0 %v3788_v29, %s3309_s13 }
 0x3ae   :  { %5966 = vst [vmem:[#allocation111_spill] sm:$0xff] %v4036_v52  ;;  %v4038_v8 = vld.sshfl [vmem:[#allocation1 + $0x28] sm:$0xff pattern:$0x73625140]  ;;  %1420 = vrot.lane.b32.xlu1 %v3790_v38, %s3309_s13 }
 0x3af   :  { %5967 = vst [vmem:[#allocation112_spill] sm:$0xff] %v4038_v8  ;;  %v4044_v35 = vld.sshfl [vmem:[#allocation1 + $0x20] sm:$0xff pattern:$0x73625140]  ;;  %v1753_v8 = vld [vmem:[#allocation2 + $0xa] sm:$0x3f] }
 0x3b0   :  { %5968 = vst [vmem:[#allocation113_spill] sm:$0xff] %v4042_v25  ;;  %v1777_v29 = vmul.f32 %v1776_v6, %v1753_v8 }
 0x3b1   :  { %5969 = vst [vmem:[#allocation114_spill] sm:$0xff] %v4044_v35  ;;  %v4057_v35 = vpop.permute.xlu0 %1066 }
 0x3b2   :  { %2309 = vst [vmem:[#allocation1 + $0x20] ss:$4 sm:$0xff] %v2301_v22 }
 0x3b3   :  { %v4059_v25 = vpop.permute.xlu2 %1124 }
 0x3b4   :  { %v4048_v60 = vld.sshfl [vmem:[#allocation1 + $0x10] sm:$0xff pattern:$0x73625140]  ;;  %v4050_v14 = vld.sshfl [vmem:[#allocation1 + $0x8] sm:$0xff pattern:$0x73625140] }
 0x3b5   :  { %5970 = vst [vmem:[#allocation115_spill] sm:$0xff] %v4048_v60  ;;  %v4052_v52 = vld.sshfl [vmem:[#allocation1] sm:$0xff pattern:$0x73625140]  ;;  %1430 = vrot.lane.b32.xlu2 %v3794_v31, %s3309_s13  ;;  %1428 = vrot.lane.b32.xlu0 %v3796_v5, %s3309_s13 }
 0x3b6   :  { %5971 = vst [vmem:[#allocation116_spill] sm:$0xff] %v4050_v14  ;;  %v2351_v14 = vld [vmem:[#allocation2 + $0xa] sm:$0x3f]  ;;  %1426 = vrot.lane.b32.xlu1 %v3798_v51, %s3309_s13  ;;  %s4549_s13 = sld [smem:[#allocation8 + $0x1]] }
 0x3b7   :  { %5972 = vst [vmem:[#allocation117_spill] sm:$0xff] %v4052_v52  ;;  %v4065_v52 = vpop.permute.xlu1 %1064 }
 0x3b8   :  { %1758 = vst [vmem:[#allocation1] ss:$4 sm:$0xff] %v1756_v37 }
 0x3b9   :  { %v4061_v22 = vld.sshfl [vmem:[#allocation1 + $0x30] sm:$0xff pattern:$0x73625140]  ;;  %v4063_v17 = vld.sshfl [vmem:[#allocation1 + $0x28] sm:$0xff pattern:$0x73625140] }
 0x3ba   :  { %5973 = vst [vmem:[#allocation118_spill] sm:$0xff] %v4061_v22  ;;  %v4067_v37 = vld.sshfl [vmem:[#allocation1 + $0x20] sm:$0xff pattern:$0x73625140]  ;;  %v4078_v22 = vpop.permute.xlu0 %1072 }
 0x3bb   :  { %5974 = vst [vmem:[#allocation119_spill] sm:$0xff] %v4063_v17  ;;  %v1795_v17 = vld [vmem:[#allocation2 + $0x2] sm:$0x3f] }
 0x3bc   :  { %5975 = vst [vmem:[#allocation120_spill] sm:$0xff] %v4067_v37  ;;  %v4080_v37 = vpop.permute.xlu2 %1168 }
 0x3bd   :  { %2359 = vst [vmem:[#allocation1 + $0x20] ss:$4 sm:$0xff] %v2351_v14  ;;  %1474 = vrot.lane.b32.xlu2 %v3807_v41, %s3310_s16  ;;  %1472 = vrot.lane.b32.xlu0 %v3809_v0, %s3310_s16 }
 0x3be   :  { %1470 = vrot.lane.b32.xlu1 %v3813_v7, %s3310_s16 }
 0x3bf   :  { %v4069_v45 = vld.sshfl [vmem:[#allocation1 + $0x10] sm:$0xff pattern:$0x73625140]  ;;  %v4071_v38 = vld.sshfl [vmem:[#allocation1 + $0x8] sm:$0xff pattern:$0x73625140]  ;;  %v4082_v14 = vpop.permute.xlu1 %1070 }
 0x3c0   :  { %5976 = vst [vmem:[#allocation121_spill] sm:$0xff] %v4069_v45  ;;  %v4073_v60 = vld.sshfl [vmem:[#allocation1] sm:$0xff pattern:$0x73625140] }
 0x3c1   :  { %5977 = vst [vmem:[#allocation122_spill] sm:$0xff] %v4071_v38  ;;  %v1798_v38 = vstv %s3085_s14  ;;  %s3319_s14 = smov 95  }
 0x3c2   :  { %5978 = vst [vmem:[#allocation123_spill] sm:$0xff] %v4073_v60  ;;  %v2401_v60 = vld [vmem:[#allocation2 + $0xa] sm:$0x3f]  ;;  %v1799_v31 = vmul.f32 %v1798_v38, %v1795_v17  ;;  %v1819_v38 = vstv %s3086_s15  ;;  %s4581_s15 = sld [smem:[#allocation8 + $0x32]] }
 0x3c3   :  { %1779 = vst [vmem:[#allocation1] ss:$4 sm:$0xff] %v1777_v29  ;;  %v1796_v17 = vld [vmem:[#allocation2 + $0xa] sm:$0x3f] }
 0x3c4   :  { %v4084_v8 = vld.sshfl [vmem:[#allocation1 + $0x30] sm:$0xff pattern:$0x73625140]  ;;  %v4086_v6 = vld.sshfl [vmem:[#allocation1 + $0x28] sm:$0xff pattern:$0x73625140]  ;;  %v1820_v0 = vmul.f32 %v1819_v38, %v1796_v17 }
 0x3c5   :  { %5979 = vst [vmem:[#allocation124_spill] sm:$0xff] %v4084_v8  ;;  %v4088_v45 = vld.sshfl [vmem:[#allocation1 + $0x20] sm:$0xff pattern:$0x73625140]  ;;  %1480 = vrot.lane.b32.xlu2 %v3815_v46, %s3310_s16  ;;  %1478 = vrot.lane.b32.xlu0 %v3817_v47, %s3310_s16 }
 0x3c6   :  { %5980 = vst [vmem:[#allocation125_spill] sm:$0xff] %v4086_v6  ;;  %v4099_v6 = vpop.permute.xlu0 %1116  ;;  %1476 = vrot.lane.b32.xlu1 %v3819_v34, %s3310_s16  ;;  %v1840_v34 = vld [vmem:[#allocation2] sm:$0x3f]  ;;  %s4609_s16 = sld [smem:[#allocation8 + $0x8]] }
 0x3c7   :  { %5981 = vst [vmem:[#allocation126_spill] sm:$0xff] %v4088_v45  ;;  %v4101_v45 = vpop.permute.xlu2 %1174 }
 0x3c8   :  { %2409 = vst [vmem:[#allocation1 + $0x20] ss:$4 sm:$0xff] %v2401_v60  ;;  %v4103_v60 = vpop.permute.xlu1 %1114 }
 0x3c9   :  { %5985 = vst [vmem:[#allocation130_spill] sm:$0xff] %v4101_v45 }
 0x3ca   :  { %v4090_v5 = vld.sshfl [vmem:[#allocation1 + $0x10] sm:$0xff pattern:$0x73625140]  ;;  %v4092_v51 = vld.sshfl [vmem:[#allocation1 + $0x8] sm:$0xff pattern:$0x73625140] }
 0x3cb   :  { %5982 = vst [vmem:[#allocation127_spill] sm:$0xff] %v4090_v5  ;;  %v4096_v29 = vld.sshfl [vmem:[#allocation1] sm:$0xff pattern:$0x73625140]  ;;  %v2451_v5 = vld [vmem:[#allocation2 + $0xa] sm:$0x3f] }
 0x3cc   :  { %5983 = vst [vmem:[#allocation128_spill] sm:$0xff] %v4092_v51 }
 0x3cd   :  { %5984 = vst [vmem:[#allocation129_spill] sm:$0xff] %v4096_v29  ;;  %1524 = vrot.lane.b32.xlu2 %v3830_v21, %s3311_s17  ;;  %1522 = vrot.lane.b32.xlu0 %v3832_v43, %s3311_s17 }
 0x3ce   :  { %1801 = vst [vmem:[#allocation1] ss:$4 sm:$0xff] %v1799_v31  ;;  %v4120_v45 = vpop.permute.xlu0 %1122  ;;  %1520 = vrot.lane.b32.xlu1 %v3834_v36, %s3311_s17 }
 0x3cf   :  { %v4105_v51 = vld.sshfl [vmem:[#allocation1 + $0x30] sm:$0xff pattern:$0x73625140]  ;;  %v4107_v8 = vld.sshfl [vmem:[#allocation1 + $0x28] sm:$0xff pattern:$0x73625140] }
 0x3d0   :  { %5986 = vst [vmem:[#allocation131_spill] sm:$0xff] %v4105_v51  ;;  %v4109_v41 = vld.sshfl [vmem:[#allocation1 + $0x20] sm:$0xff pattern:$0x73625140]  ;;  %v4122_v51 = vpop.permute.xlu2 %1224 }
 0x3d1   :  { %5987 = vst [vmem:[#allocation132_spill] sm:$0xff] %v4107_v8 }
 0x3d2   :  { %5988 = vst [vmem:[#allocation133_spill] sm:$0xff] %v4109_v41  ;;  %v4124_v41 = vpop.permute.xlu1 %1120 }
 0x3d3   :  { %2459 = vst [vmem:[#allocation1 + $0x20] ss:$4 sm:$0xff] %v2451_v5  ;;  %v2501_v5 = vld [vmem:[#allocation2 + $0xa] sm:$0x3f] }
 0x3d5   :  { %v4113_v7 = vld.sshfl [vmem:[#allocation1 + $0x10] sm:$0xff pattern:$0x73625140]  ;;  %v4116_v31 = vld.sshfl [vmem:[#allocation1 + $0x8] sm:$0xff pattern:$0x73625140]  ;;  %1530 = vrot.lane.b32.xlu2 %v3836_v53, %s3311_s17  ;;  %1528 = vrot.lane.b32.xlu0 %v3838_v54, %s3311_s17 }
 0x3d6   :  { %5989 = vst [vmem:[#allocation134_spill] sm:$0xff] %v4113_v7  ;;  %v4118_v29 = vld.sshfl [vmem:[#allocation1] sm:$0xff pattern:$0x73625140]  ;;  %1526 = vrot.lane.b32.xlu1 %v3840_v10, %s3311_s17  ;;  %v2607_v54 = vld [vmem:[#allocation2 + $0x8] sm:$0x3f] }
 0x3d7   :  { %5990 = vst [vmem:[#allocation135_spill] sm:$0xff] %v4116_v31  ;;  %s4615_s17 = sld [smem:[#allocation8 + $0x39]] }
 0x3d8   :  { %5991 = vst [vmem:[#allocation136_spill] sm:$0xff] %v4118_v29  ;;  %v4139_v29 = vpop.permute.xlu2 %1230 }
 0x3d9   :  { %1822 = vst [vmem:[#allocation1] ss:$4 sm:$0xff] %v1820_v0  ;;  %v4137_v0 = vpop.permute.xlu0 %1166 }
 0x3da   :  { %v4126_v17 = vld.sshfl [vmem:[#allocation1 + $0x30] sm:$0xff pattern:$0x73625140]  ;;  %v4128_v46 = vld.sshfl [vmem:[#allocation1 + $0x28] sm:$0xff pattern:$0x73625140] }
 0x3db   :  { %5992 = vst [vmem:[#allocation137_spill] sm:$0xff] %v4126_v17  ;;  %v4130_v47 = vld.sshfl [vmem:[#allocation1 + $0x20] sm:$0xff pattern:$0x73625140] }
 0x3dc   :  { %5993 = vst [vmem:[#allocation138_spill] sm:$0xff] %v4128_v46 }
 0x3dd   :  { %5994 = vst [vmem:[#allocation139_spill] sm:$0xff] %v4130_v47  ;;  %v4145_v47 = vpop.permute.xlu1 %1164  ;;  %1571 = vrot.lane.b32.xlu2 %v3851_v61, %s3312_s18  ;;  %1569 = vrot.lane.b32.xlu0 %v3853_v27, %s3312_s18 }
 0x3de   :  { %2509 = vst [vmem:[#allocation1 + $0x20] ss:$4 sm:$0xff] %v2501_v5  ;;  %v2553_v5 = vld [vmem:[#allocation2 + $0x8] sm:$0x3f]  ;;  %1567 = vrot.lane.b32.xlu1 %v3855_v56, %s3312_s18 }
 0x3e0   :  { %v4135_v38 = vld.sshfl [vmem:[#allocation1 + $0x10] sm:$0xff pattern:$0x73625140]  ;;  %v4141_v17 = vld.sshfl [vmem:[#allocation1 + $0x8] sm:$0xff pattern:$0x73625140] }
 0x3e1   :  { %5995 = vst [vmem:[#allocation140_spill] sm:$0xff] %v4135_v38  ;;  %v4143_v46 = vld.sshfl [vmem:[#allocation1] sm:$0xff pattern:$0x73625140] }
 0x3e2   :  { %5996 = vst [vmem:[#allocation141_spill] sm:$0xff] %v4141_v17  ;;  %v4156_v17 = vpop.permute.xlu0 %1172 }
 0x3e3   :  { %5997 = vst [vmem:[#allocation142_spill] sm:$0xff] %v4143_v46  ;;  %v4158_v46 = vpop.permute.xlu2 %1274 }
 0x3e4   :  { %1848 = vst [vmem:[#allocation1] ss:$4 sm:$0xff] %v1840_v34 }
 0x3e5   :  { %v4147_v21 = vld.sshfl [vmem:[#allocation1 + $0x30] sm:$0xff pattern:$0x73625140]  ;;  %v4149_v43 = vld.sshfl [vmem:[#allocation1 + $0x28] sm:$0xff pattern:$0x73625140]  ;;  %1867 = vrot.lane.b32.xlu2 %v3857_v57, %s3313_s19  ;;  %1865 = vrot.lane.b32.xlu0 %v3861_v9, %s3313_s19 }
 0x3e6   :  { %5998 = vst [vmem:[#allocation143_spill] sm:$0xff] %v4147_v21  ;;  %v4153_v36 = vld.sshfl [vmem:[#allocation1 + $0x20] sm:$0xff pattern:$0x73625140]  ;;  %v1894_v21 = vld [vmem:[#allocation2] sm:$0x3f]  ;;  %1863 = vrot.lane.b32.xlu1 %v3864_v23, %s3313_s19 }
 0x3e7   :  { %5999 = vst [vmem:[#allocation144_spill] sm:$0xff] %v4149_v43  ;;  %v4164_v43 = vpop.permute.xlu1 %1170 }
 0x3e8   :  { %6000 = vst [vmem:[#allocation145_spill] sm:$0xff] %v4153_v36 }
 0x3e9   :  { %2565 = vst [vmem:[#allocation1 + $0x20] ss:$4 sm:$0xff] %v2553_v5 }
 0x3ea   :  { %6001 = vst [vmem:[#allocation146_spill] sm:$0xff] %v4158_v46  ;;  %v6092_v46 = vld [vmem:[#allocation40_spill] sm:$0xff] }
 0x3eb   :  { %v4160_v38 = vld.sshfl [vmem:[#allocation1 + $0x10] sm:$0xff pattern:$0x73625140]  ;;  %v4162_v34 = vld.sshfl [vmem:[#allocation1 + $0x8] sm:$0xff pattern:$0x73625140] }
 0x3ec   :  { %6002 = vst [vmem:[#allocation147_spill] sm:$0xff] %v4160_v38  ;;  %v4166_v31 = vld.sshfl [vmem:[#allocation1] sm:$0xff pattern:$0x73625140] }
 0x3ed   :  { %6003 = vst [vmem:[#allocation148_spill] sm:$0xff] %v4162_v34  ;;  %v4180_v34 = vpop.permute.xlu0 %1222  ;;  %1592 = vrot.lane.b32.xlu2 %v3872_v44, %s3312_s18  ;;  %1590 = vrot.lane.b32.xlu0 %v3874_v4, %s3312_s18 }
 0x3ee   :  { %6004 = vst [vmem:[#allocation149_spill] sm:$0xff] %v4166_v31  ;;  %1588 = vrot.lane.b32.xlu1 %v3876_v33, %s3312_s18  ;;  %s4627_s18 = sld [smem:[#allocation8 + $0xf]] }
 0x3ef   :  { %1898 = vst [vmem:[#allocation1] ss:$4 sm:$0xff] %v1894_v21  ;;  %v4182_v21 = vpop.permute.xlu2 %1280  ;;  %v4184_v31 = vpop.permute.xlu1 %1220 }
 0x3f0   :  { %v4172_v10 = vld.sshfl [vmem:[#allocation1 + $0x30] sm:$0xff pattern:$0x73625140]  ;;  %v4174_v53 = vld.sshfl [vmem:[#allocation1 + $0x28] sm:$0xff pattern:$0x73625140] }
 0x3f1   :  { %6005 = vst [vmem:[#allocation150_spill] sm:$0xff] %v4172_v10  ;;  %v4178_v5 = vld.sshfl [vmem:[#allocation1 + $0x20] sm:$0xff pattern:$0x73625140]  ;;  %v1944_v10 = vld [vmem:[#allocation2] sm:$0x3f] }
 0x3f2   :  { %6006 = vst [vmem:[#allocation151_spill] sm:$0xff] %v4174_v53  ;;  %v1994_v53 = vld [vmem:[#allocation2 + $0x2] sm:$0x3f] }
 0x3f3   :  { %6007 = vst [vmem:[#allocation152_spill] sm:$0xff] %v4178_v5 }
 0x3f4   :  { %6008 = vst [vmem:[#allocation153_spill] sm:$0xff] %v4182_v21 }
 0x3f5   :  { %2615 = vst [vmem:[#allocation1 + $0x20] ss:$4 sm:$0xff] %v2607_v54  ;;  %1917 = vrot.lane.b32.xlu2 %v3881_v55, %s3314_s20  ;;  %1915 = vrot.lane.b32.xlu0 %v3883_v1, %s3314_s20 }
 0x3f6   :  { %v4186_v61 = vld.sshfl [vmem:[#allocation1 + $0x10] sm:$0xff pattern:$0x73625140]  ;;  %v4188_v27 = vld.sshfl [vmem:[#allocation1 + $0x8] sm:$0xff pattern:$0x73625140]  ;;  %1913 = vrot.lane.b32.xlu1 %v3889_v2, %s3314_s20 }
 0x3f7   :  { %6009 = vst [vmem:[#allocation154_spill] sm:$0xff] %v4186_v61  ;;  %v4190_v38 = vld.sshfl [vmem:[#allocation1] sm:$0xff pattern:$0x73625140]  ;;  %v2657_v61 = vld [vmem:[#allocation2 + $0x8] sm:$0x3f]  ;;  %v4204_v5 = vpop.permute.xlu2 %1324 }
 0x3f8   :  { %6010 = vst [vmem:[#allocation155_spill] sm:$0xff] %v4188_v27  ;;  %v4202_v27 = vpop.permute.xlu0 %1228  ;;  %v6036_v2 = vld [vmem:[#allocation75_spill] sm:$0xff] }
 0x3f9   :  { %6011 = vst [vmem:[#allocation156_spill] sm:$0xff] %v4190_v38  ;;  %v4208_v38 = vpop.permute.xlu1 %1226 }
 0x3fa   :  { %1948 = vst [vmem:[#allocation1] ss:$4 sm:$0xff] %v1944_v10 }
 0x3fb   :  { %6014 = vst [vmem:[#allocation159_spill] sm:$0xff] %v4204_v5  ;;  %v6081_v5 = vld [vmem:[#allocation42_spill] sm:$0xff] }
 0x3fc   :  { %v4198_v56 = vld.sshfl [vmem:[#allocation1 + $0x20] sm:$0xff pattern:$0x73625140]  ;;  %v4200_v54 = vld.sshfl [vmem:[#allocation1 + $0x30] sm:$0xff pattern:$0x73625140] }
 0x3fd   :  { %6012 = vst [vmem:[#allocation157_spill] sm:$0xff] %v4198_v56  ;;  %v4206_v10 = vld.sshfl [vmem:[#allocation1 + $0x28] sm:$0xff pattern:$0x73625140]  ;;  %1614 = vrot.lane.b32.xlu2 %v3893_v30, %s3315_s21  ;;  %1612 = vrot.lane.b32.xlu0 %v6036_v2, %s3315_s21  ;;  %v2807_v30 = vld [vmem:[#allocation2 + $0xa] sm:$0x3f] }
 0x3fe   :  { %6013 = vst [vmem:[#allocation158_spill] sm:$0xff] %v4200_v54  ;;  %v2707_v54 = vld [vmem:[#allocation2 + $0xa] sm:$0x3f]  ;;  %v2044_v56 = vld [vmem:[#allocation2 + $0x2] sm:$0x3f] }
 0x3ff   :  { %6015 = vst [vmem:[#allocation160_spill] sm:$0xff] %v4206_v10  ;;  %v2144_v2 = vld [vmem:[#allocation2 + $0x2] sm:$0x3f] }
 0x400   :  { %2665 = vst [vmem:[#allocation1 + $0x20] ss:$4 sm:$0xff] %v2657_v61  ;;  %v4222_v10 = vpop.permute.xlu0 %1272  ;;  %v4224_v61 = vpop.permute.xlu2 %1330 }
 0x401   :  { %v4210_v57 = vld.sshfl [vmem:[#allocation1 + $0x10] sm:$0xff pattern:$0x73625140]  ;;  %v4212_v9 = vld.sshfl [vmem:[#allocation1 + $0x8] sm:$0xff pattern:$0x73625140] }
 0x402   :  { %6016 = vst [vmem:[#allocation161_spill] sm:$0xff] %v4210_v57  ;;  %v4214_v23 = vld.sshfl [vmem:[#allocation1] sm:$0xff pattern:$0x73625140] }
 0x403   :  { %6017 = vst [vmem:[#allocation162_spill] sm:$0xff] %v4212_v9 }
 0x404   :  { %6018 = vst [vmem:[#allocation163_spill] sm:$0xff] %v4214_v23  ;;  %v4230_v23 = vpop.permute.xlu1 %1270 }
 0x405   :  { %1998 = vst [vmem:[#allocation1] ss:$4 sm:$0xff] %v1994_v53  ;;  %1967 = vrot.lane.b32.xlu2 %v3906_v19, %s3316_s22  ;;  %1965 = vrot.lane.b32.xlu0 %v3908_v16, %s3316_s22  ;;  %v2857_v19 = vld [vmem:[#allocation2 + $0xa] sm:$0x3f] }
 0x406   :  { %6019 = vst [vmem:[#allocation164_spill] sm:$0xff] %v4222_v10 }
 0x407   :  { %6020 = vst [vmem:[#allocation165_spill] sm:$0xff] %v4224_v61  ;;  %v4226_v57 = vld.sshfl [vmem:[#allocation1 + $0x20] sm:$0xff pattern:$0x73625140] }
 0x408   :  { %6021 = vst [vmem:[#allocation166_spill] sm:$0xff] %v4226_v57  ;;  %v4228_v9 = vld.sshfl [vmem:[#allocation1 + $0x30] sm:$0xff pattern:$0x73625140] }
 0x409   :  { %6022 = vst [vmem:[#allocation167_spill] sm:$0xff] %v4228_v9  ;;  %v4232_v53 = vld.sshfl [vmem:[#allocation1 + $0x28] sm:$0xff pattern:$0x73625140]  ;;  %v2757_v9 = vld [vmem:[#allocation2 + $0xa] sm:$0x3f] }
 0x40a   :  { %6023 = vst [vmem:[#allocation168_spill] sm:$0xff] %v4230_v23 }
 0x40b   :  { %6024 = vst [vmem:[#allocation169_spill] sm:$0xff] %v4232_v53  ;;  %v4246_v53 = vpop.permute.xlu0 %1278 }
 0x40c   :  { %2715 = vst [vmem:[#allocation1 + $0x20] ss:$4 sm:$0xff] %v2707_v54  ;;  %v4234_v44 = vld.sshfl [vmem:[#allocation1 + $0x10] sm:$0xff pattern:$0x73625140]  ;;  %v4248_v54 = vpop.permute.xlu2 %1374 }
 0x40d   :  { %6025 = vst [vmem:[#allocation170_spill] sm:$0xff] %v4234_v44  ;;  %v4236_v4 = vld.sshfl [vmem:[#allocation1 + $0x8] sm:$0xff pattern:$0x73625140]  ;;  %v4250_v44 = vpop.permute.xlu1 %1276  ;;  %1632 = vrot.lane.b32.xlu0 %v3919_v58, %s3315_s21 }
 0x40e   :  { %6026 = vst [vmem:[#allocation171_spill] sm:$0xff] %v4236_v4  ;;  %v4238_v33 = vld.sshfl [vmem:[#allocation1] sm:$0xff pattern:$0x73625140] }
 0x40f   :  { %6027 = vst [vmem:[#allocation172_spill] sm:$0xff] %v4238_v33 }
 0x410   :  { %2048 = vst [vmem:[#allocation1] ss:$4 sm:$0xff] %v2044_v56  ;;  %v2094_v56 = vld [vmem:[#allocation2 + $0x2] sm:$0x3f] }
 0x411   :  { %6028 = vst [vmem:[#allocation173_spill] sm:$0xff] %v4246_v53 }
 0x412   :  { %6029 = vst [vmem:[#allocation174_spill] sm:$0xff] %v4248_v54  ;;  %v6073_v54 = vld [vmem:[#allocation36_spill] sm:$0xff] }
 0x413   :  { %6030 = vst [vmem:[#allocation175_spill] sm:$0xff] %v4250_v44  ;;  %v4252_v4 = vld.sshfl [vmem:[#allocation1 + $0x20] sm:$0xff pattern:$0x73625140]  ;;  %v6082_v44 = vld [vmem:[#allocation44_spill] sm:$0xff] }
 0x414   :  { %6031 = vst [vmem:[#allocation176_spill] sm:$0xff] %v4252_v4  ;;  %v4254_v33 = vld.sshfl [vmem:[#allocation1 + $0x30] sm:$0xff pattern:$0x73625140] }
 0x415   :  { %6032 = vst [vmem:[#allocation177_spill] sm:$0xff] %v4254_v33  ;;  %v4256_v57 = vld.sshfl [vmem:[#allocation1 + $0x28] sm:$0xff pattern:$0x73625140]  ;;  %v6038_v33 = vld [vmem:[#allocation76_spill] sm:$0xff] }
 0x416   :  { %6033 = vst [vmem:[#allocation178_spill] sm:$0xff] %v4256_v57  ;;  %1610 = vrot.lane.b32.xlu1 %v6038_v33, %s3315_s21  ;;  %v4270_v57 = vpop.permute.xlu0 %1322 }
 0x417   :  { %2765 = vst [vmem:[#allocation1 + $0x20] ss:$4 sm:$0xff] %v2757_v9  ;;  %v4258_v55 = vld.sshfl [vmem:[#allocation1 + $0x10] sm:$0xff pattern:$0x73625140]  ;;  %v4272_v9 = vpop.permute.xlu2 %1380 }
 0x418   :  { %6034 = vst [vmem:[#allocation179_spill] sm:$0xff] %v4258_v55  ;;  %v4260_v1 = vld.sshfl [vmem:[#allocation1 + $0x8] sm:$0xff pattern:$0x73625140]  ;;  %v4274_v55 = vpop.permute.xlu1 %1320 }
 0x419   :  { %6035 = vst [vmem:[#allocation180_spill] sm:$0xff] %v4260_v1  ;;  %v4266_v36 = vld.sshfl [vmem:[#allocation1] sm:$0xff pattern:$0x73625140] }
 0x41a   :  { %6037 = vst [vmem:[#allocation75_spill] sm:$0xff] %v4266_v36 }
 0x41b   :  { %2098 = vst [vmem:[#allocation1] ss:$4 sm:$0xff] %v2094_v56 }
 0x41c   :  { %6039 = vst [vmem:[#allocation76_spill] sm:$0xff] %v4270_v57  ;;  %v6080_v57 = vld [vmem:[#allocation34_spill] sm:$0xff] }
 0x41d   :  { %6040 = vst [vmem:[#allocation181_spill] sm:$0xff] %v4272_v9 }
 0x41e   :  { %6041 = vst [vmem:[#allocation182_spill] sm:$0xff] %v4274_v55  ;;  %v4276_v1 = vld.sshfl [vmem:[#allocation1 + $0x20] sm:$0xff pattern:$0x73625140]  ;;  %1963 = vrot.lane.b32.xlu1 %v3912_v59, %s3316_s22  ;;  %v2196_v59 = vld [vmem:[#allocation2] sm:$0x3f] }
 0x41f   :  { %6042 = vst [vmem:[#allocation183_spill] sm:$0xff] %v4276_v1  ;;  %v4278_v4 = vld.sshfl [vmem:[#allocation1 + $0x30] sm:$0xff pattern:$0x73625140]  ;;  %v4294_v1 = vpop.permute.xlu0 %1328 }
 0x420   :  { %6043 = vst [vmem:[#allocation184_spill] sm:$0xff] %v4278_v4  ;;  %v4280_v7 = vld.sshfl [vmem:[#allocation1 + $0x28] sm:$0xff pattern:$0x73625140] }
 0x421   :  { %6044 = vst [vmem:[#allocation185_spill] sm:$0xff] %v4280_v7  ;;  %v4298_v7 = vpop.permute.xlu1 %1326 }
 0x422   :  { %2815 = vst [vmem:[#allocation1 + $0x20] ss:$4 sm:$0xff] %v2807_v30  ;;  %v4286_v33 = vld.sshfl [vmem:[#allocation1 + $0x10] sm:$0xff pattern:$0x73625140]  ;;  %v4296_v30 = vpop.permute.xlu2 %1424 }
 0x423   :  { %6045 = vst [vmem:[#allocation186_spill] sm:$0xff] %v4286_v33  ;;  %v4288_v56 = vld.sshfl [vmem:[#allocation1 + $0x8] sm:$0xff pattern:$0x73625140] }
 0x424   :  { %6046 = vst [vmem:[#allocation187_spill] sm:$0xff] %v4288_v56  ;;  %v4292_v4 = vld.sshfl [vmem:[#allocation1] sm:$0xff pattern:$0x73625140]  ;;  %v6054_v56 = vld [vmem:[#allocation80_spill] sm:$0xff] }
 0x425   :  { %6047 = vst [vmem:[#allocation188_spill] sm:$0xff] %v4292_v4  ;;  %1634 = vrot.lane.b32.xlu2 %v6054_v56, %s3315_s21  ;;  %v6055_v4 = vld [vmem:[#allocation13_spill] sm:$0xff] }
 0x426   :  { %6048 = vst [vmem:[#allocation189_spill] sm:$0xff] %v4294_v1  ;;  %v463_v8 = vadd.s32 128, %v6055_v4  ;;  %1630 = vrot.lane.b32.xlu1 %v3921_v12, %s3315_s21  ;;  %v6062_v12 = vld [vmem:[#allocation84_spill] sm:$0xff]  ;;  %s3320_s21 = smov 79  }
 0x427   :  { %6049 = vst [vmem:[#allocation190_spill] sm:$0xff] %v4296_v30 }
 0x428   :  { %2148 = vst [vmem:[#allocation1] ss:$4 sm:$0xff] %v2144_v2  ;;  %v4327_v58 = vand.u32 15, %v463_v8  ;;  %v6065_v8 = vld [vmem:[#allocation33_spill] sm:$0xff] }
 0x429   :  { %6050 = vst [vmem:[#allocation191_spill] sm:$0xff] %v4298_v7  ;;  %v4300_v36 = vld.sshfl [vmem:[#allocation1 + $0x20] sm:$0xff pattern:$0x73625140]  ;;  %v4323_v56 = vpop.permute.xlu1 %1370 }
 0x42a   :  { %6051 = vst [vmem:[#allocation192_spill] sm:$0xff] %v4300_v36  ;;  %v4302_v16 = vld.sshfl [vmem:[#allocation1 + $0x30] sm:$0xff pattern:$0x73625140]  ;;  %v4315_v36 = vpop.permute.xlu0 %1372  ;;  %vm491_vm15 = vcmp.ge.s32.totalorder %v4327_v58, 3  ;;  %vm847_vm11 = vcmp.ge.s32.totalorder %v4327_v58, 2 }
 0x42b   :  { %6052 = vst [vmem:[#allocation193_spill] sm:$0xff] %v4302_v16  ;;  %v4304_v33 = vld.sshfl [vmem:[#allocation1 + $0x28] sm:$0xff pattern:$0x73625140]  ;;  %v4317_v16 = vpop.permute.xlu2 %1430 }
 0x42c   :  { %6053 = vst [vmem:[#allocation194_spill] sm:$0xff] %v4304_v33 }
 0x42d   :  { %2865 = vst [vmem:[#allocation1 + $0x20] ss:$4 sm:$0xff] %v2857_v19  ;;  %v4330_v19 = vand.u32 15, %v6055_v4  ;;  %2017 = vrot.lane.b32.xlu2 %v6062_v12, %s3317_s28  ;;  %v6066_v4 = vld [vmem:[#allocation35_spill] sm:$0xff]  ;;  %v6067_v12 = vld [vmem:[#allocation86_spill] sm:$0xff] }
 0x42e   :  { %6057 = vst [vmem:[#allocation13_spill] sm:$0xff] %v4315_v36  ;;  %2013 = vrot.lane.b32.xlu1 %v6067_v12, %s3317_s28  ;;  %v6072_v36 = vld [vmem:[#allocation31_spill] sm:$0xff] }
 0x42f   :  { %v4313_v2 = vld.sshfl [vmem:[#allocation1 + $0x10] sm:$0xff pattern:$0x73625140]  ;;  %6058 = vst [vmem:[#allocation195_spill] sm:$0xff] %v4317_v16  ;;  %vm490_vm0 = vcmp.ge.s32.totalorder %v4330_v19, 3  ;;  %v525_v7 = vsel %vm521_vm14, %v6073_v54, %v6072_v36  ;;  %v541_v36 = vstv %s4332_s24  ;;  %vm846_vm12 = vcmp.ge.s32.totalorder %v4330_v19, 2 }
 0x430   :  { %6056 = vst [vmem:[#allocation80_spill] sm:$0xff] %v4313_v2  ;;  %v4319_v33 = vld.sshfl [vmem:[#allocation1 + $0x8] sm:$0xff pattern:$0x73625140]  ;;  %v522_v2 = vsel %vm521_vm14, %v6066_v4, %v6065_v8  ;;  %s4664_s24 = sld [smem:[#allocation8 + $0x16]] }
 0x431   :  { %6059 = vst [vmem:[#allocation196_spill] sm:$0xff] %v4319_v33  ;;  %v4321_v30 = vld.sshfl [vmem:[#allocation1] sm:$0xff pattern:$0x73625140]  ;;  %v4366_v12 = vpop.permute.xlu1 %1376 }
 0x432   :  { %6060 = vst [vmem:[#allocation197_spill] sm:$0xff] %v4321_v30  ;;  %v6063_v30 = vld [vmem:[#allocation85_spill] sm:$0xff] }
 0x433   :  { %6061 = vst [vmem:[#allocation198_spill] sm:$0xff] %v4323_v56  ;;  %2015 = vrot.lane.b32.xlu0 %v6063_v30, %s3317_s28  ;;  %v4352_v30 = vpop.permute.xlu0 %1378  ;;  %v4354_v16 = vpop.permute.xlu2 %1474  ;;  %v2250_v56 = vld [vmem:[#allocation2] sm:$0x3f] }
 0x434   :  { %2204 = vst [vmem:[#allocation1] ss:$4 sm:$0xff] %v2196_v59  ;;  %v6064_v59 = vld [vmem:[#allocation30_spill] sm:$0xff] }
 0x435   :  { %v523_v33 = vsel %vm521_vm14, %v6065_v8, %v6064_v59  ;;  %6068 = vst [vmem:[#allocation84_spill] sm:$0xff] %v4352_v30  ;;  %v6074_v8 = vld [vmem:[#allocation38_spill] sm:$0xff]  ;;  %1656 = vrot.lane.b32.xlu2 %v3938_v24, %s3288_s27 }
 0x436   :  { %6069 = vst [vmem:[#allocation85_spill] sm:$0xff] %v4354_v16  ;;  %v524_v4 = vsel %vm521_vm14, %v6074_v8, %v6073_v54  ;;  %v531_v16 = vsel %vm491_vm15, %v523_v33, 0.0  ;;  %v533_v54 = vsel %vm491_vm15, %v525_v7, 0.0  ;;  %v6079_v33 = vld [vmem:[#allocation41_spill] sm:$0xff]  ;;  %v574_v7 = vsel %vm571_vm1, %v6082_v44, %v6081_v5 }
 0x437   :  { %6075 = vst [vmem:[#allocation35_spill] sm:$0xff] %v4366_v12  ;;  %v532_v8 = vsel %vm490_vm0, %v524_v4, 0.0  ;;  %v6077_v12 = vld [vmem:[#allocation32_spill] sm:$0xff]  ;;  %v489_v4 = vstv %s5818_s4  ;;  %v6083_v44 = vld [vmem:[#allocation89_spill] sm:$0xff]  ;;  %s4434_s4 = sld [smem:[#allocation8 + $0x46]]  ;;  %vm977_vm14 = vcmask 146432  }
 0x438   :  { %1652 = vrot.lane.b32.xlu1 %v6083_v44, %s3288_s27  ;;  %v6088_v44 = vld [vmem:[#allocation47_spill] sm:$0xff] }
 0x439   :  { %v4427_v23 = vpop.permute.xlu1 %1420 }
 0x43b   :  { %v4356_v9 = vld.sshfl [vmem:[#allocation1 + $0x10] sm:$0xff pattern:$0x73625140]  ;;  %v4358_v59 = vld.sshfl [vmem:[#allocation1 + $0x8] sm:$0xff pattern:$0x73625140]  ;;  %1654 = vrot.lane.b32.xlu0 %v3940_v62, %s3288_s27 }
 0x43c   :  { %6070 = vst [vmem:[#allocation30_spill] sm:$0xff] %v4356_v9  ;;  %v4368_v1 = vld.sshfl [vmem:[#allocation1] sm:$0xff pattern:$0x73625140]  ;;  %v535_v9 = vstv %s4325_s23  ;;  %v582_v62 = vsel %vm490_vm0, %v574_v7, 0.0  ;;  %s4655_s23 = sld [smem:[#allocation8 + $0x40]] }
 0x43d   :  { %6071 = vst [vmem:[#allocation33_spill] sm:$0xff] %v4358_v59  ;;  %v530_v59 = vsel %vm490_vm0, %v522_v2, 0.0  ;;  %v537_v55 = vmul.f32 %v535_v9, %v531_v16  ;;  %v2300_v16 = vld [vmem:[#allocation2] sm:$0x3f] }
 0x43e   :  { %6076 = vst [vmem:[#allocation86_spill] sm:$0xff] %v4368_v1  ;;  %v6078_v1 = vld [vmem:[#allocation39_spill] sm:$0xff]  ;;  %v536_v2 = vmul.f32 %v535_v9, %v530_v59  ;;  %v591_v59 = vstv %s4348_s0  ;;  %s3321_s0 = smov 46  }
 0x43f   :  { %2254 = vst [vmem:[#allocation1] ss:$4 sm:$0xff] %v2250_v56  ;;  %v573_v30 = vsel %vm571_vm1, %v6078_v1, %v6077_v12  ;;  %v572_v61 = vsel %vm571_vm1, %v6079_v33, %v6078_v1  ;;  %v575_v56 = vsel %vm571_vm1, %v6081_v5, %v6080_v57  ;;  %v585_v12 = vstv %s4334_s25  ;;  %v6087_v33 = vld [vmem:[#allocation45_spill] sm:$0xff]  ;;  %s4680_s25 = sld [smem:[#allocation8 + $0x47]] }
 0x440   :  { %v543_v57 = vmul.f32 %v541_v36, %v533_v54  ;;  %v542_v1 = vmul.f32 %v541_v36, %v532_v8  ;;  %v581_v9 = vsel %vm491_vm15, %v573_v30, 0.0  ;;  %v580_v5 = vsel %vm490_vm0, %v572_v61, 0.0  ;;  %v4417_v36 = vpop.permute.xlu0 %1422  ;;  %v4419_v30 = vpop.permute.xlu2 %1480  ;;  %v6086_v8 = vld [vmem:[#allocation37_spill] sm:$0xff] }
 0x441   :  { %v583_v24 = vsel %vm491_vm15, %v575_v56, 0.0  ;;  %6084 = vst [vmem:[#allocation31_spill] sm:$0xff] %v4417_v36  ;;  %v539_v54 = vadd.f32 %v537_v55, %v489_v4  ;;  %v538_v61 = vadd.f32 %v536_v2, %v489_v4  ;;  %v623_v53 = vsel %vm621_vm2, %v6087_v33, %v6086_v8 }
 0x442   :  { %6085 = vst [vmem:[#allocation36_spill] sm:$0xff] %v4419_v30  ;;  %v622_v21 = vsel %vm621_vm2, %v6088_v44, %v6087_v33  ;;  %v587_v7 = vmul.f32 %v585_v12, %v581_v9  ;;  %v586_v36 = vmul.f32 %v585_v12, %v580_v5  ;;  %v635_v30 = vstv %s4375_s3  ;;  %v6093_v33 = vld [vmem:[#allocation48_spill] sm:$0xff]  ;;  %v6094_v9 = vld [vmem:[#allocation50_spill] sm:$0xff]  ;;  %s4713_s3 = sld [smem:[#allocation8 + $0x1d]] }
 0x443   :  { %v545_v2 = vadd.f32 %v543_v57, %v539_v54  ;;  %v544_v4 = vadd.f32 %v542_v1, %v538_v61  ;;  %v593_v8 = vmul.f32 %v591_v59, %v583_v24  ;;  %v625_v44 = vsel %vm621_vm2, %v6093_v33, %v6092_v46  ;;  %v6095_v1 = vld [vmem:[#allocation43_spill] sm:$0xff]  ;;  %v6099_v61 = vld [vmem:[#allocation92_spill] sm:$0xff] }
 0x444   :  { %v630_v12 = vsel %vm490_vm0, %v622_v21, 0.0  ;;  %v624_v5 = vsel %vm621_vm2, %v6094_v9, %v6093_v33  ;;  %v641_v57 = vstv %s4394_s29  ;;  %v6096_v24 = vld [vmem:[#allocation51_spill] sm:$0xff]  ;;  %2065 = vrot.lane.b32.xlu0 %v6099_v61, %s3318_s9  ;;  %v691_v61 = vstv %s4434_s4  ;;  %s4730_s29 = sld [smem:[#allocation8 + $0x4e]] }
 0x445   :  { %v673_v54 = vsel %vm671_vm5, %v6096_v24, %v6095_v1  ;;  %v589_v46 = vadd.f32 %v587_v7, %v545_v2  ;;  %v636_v9 = vmul.f32 %v635_v30, %v630_v12  ;;  %v632_v7 = vsel %vm490_vm0, %v624_v5, 0.0  ;;  %v6100_v2 = vld [vmem:[#allocation93_spill] sm:$0xff]  ;;  %v6103_v5 = vld [vmem:[#allocation46_spill] sm:$0xff]  ;;  %s4774_s4 = sld [smem:[#allocation8 + $0x2b]] }
 0x446   :  { %v4429_v56 = vld.sshfl [vmem:[#allocation1 + $0x10] sm:$0xff pattern:$0x73625140]  ;;  %v4431_v10 = vld.sshfl [vmem:[#allocation1 + $0x8] sm:$0xff pattern:$0x73625140]  ;;  %2063 = vrot.lane.b32.xlu1 %v6100_v2, %s3318_s9 }
 0x447   :  { %6089 = vst [vmem:[#allocation38_spill] sm:$0xff] %v4429_v56  ;;  %v4436_v55 = vld.sshfl [vmem:[#allocation1] sm:$0xff pattern:$0x73625140]  ;;  %v592_v56 = vmul.f32 %v591_v59, %v582_v62  ;;  %v6097_v59 = vld [vmem:[#allocation53_spill] sm:$0xff]  ;;  %v6098_v62 = vld [vmem:[#allocation91_spill] sm:$0xff] }
 0x448   :  { %6090 = vst [vmem:[#allocation32_spill] sm:$0xff] %v4431_v10  ;;  %v631_v10 = vsel %vm491_vm15, %v623_v53, 0.0  ;;  %v633_v53 = vsel %vm491_vm15, %v625_v44, 0.0  ;;  %v672_v21 = vsel %vm671_vm5, %v6097_v59, %v6096_v24  ;;  %2067 = vrot.lane.b32.xlu2 %v6098_v62, %s3318_s9  ;;  %v681_v1 = vsel %vm491_vm15, %v673_v54, 0.0  ;;  %v4472_v24 = vpop.permute.xlu0 %1428  ;;  %v6104_v59 = vld [vmem:[#allocation54_spill] sm:$0xff]  ;;  %v4484_v54 = vpop.permute.xlu1 %1426 }
 0x449   :  { %6091 = vst [vmem:[#allocation39_spill] sm:$0xff] %v4436_v55  ;;  %v637_v33 = vmul.f32 %v635_v30, %v631_v10  ;;  %v4474_v10 = vpop.permute.xlu2 %1524  ;;  %v643_v30 = vmul.f32 %v641_v57, %v633_v53  ;;  %v680_v12 = vsel %vm490_vm0, %v672_v21, 0.0  ;;  %v675_v62 = vsel %vm671_vm5, %v6104_v59, %v6103_v5 }
 0x44a   :  { %2304 = vst [vmem:[#allocation1] ss:$4 sm:$0xff] %v2300_v16  ;;  %v588_v16 = vadd.f32 %v586_v36, %v544_v4  ;;  %v685_v36 = vstv %s4408_s7  ;;  %v595_v4 = vadd.f32 %v593_v8, %v589_v46  ;;  %v2350_v46 = vld [vmem:[#allocation2 + $0x2] sm:$0x3f]  ;;  %s3322_s7 = smov 112   ;;  %vm1232_vm1 = vcmask 400384  }
 0x44b   :  { %6101 = vst [vmem:[#allocation41_spill] sm:$0xff] %v4472_v24  ;;  %v687_v55 = vmul.f32 %v685_v36, %v681_v1  ;;  %v6108_v24 = vld [vmem:[#allocation57_spill] sm:$0xff]  ;;  %vm1202_vm2 = vcmp.ge.s32.totalorder %v4327_v58, 1 }
 0x44c   :  { %v594_v44 = vadd.f32 %v592_v56, %v588_v16  ;;  %6102 = vst [vmem:[#allocation34_spill] sm:$0xff] %v4474_v10  ;;  %v6105_v56 = vld [vmem:[#allocation56_spill] sm:$0xff]  ;;  %v642_v16 = vmul.f32 %v641_v57, %v632_v7  ;;  %v639_v2 = vadd.f32 %v637_v33, %v595_v4  ;;  %v6107_v10 = vld [vmem:[#allocation49_spill] sm:$0xff]  ;;  %v683_v57 = vsel %vm491_vm15, %v675_v62, 0.0  ;;  %1675 = vrot.lane.b32.xlu0 %v3965_v48, %s3288_s27 }
 0x44d   :  { %v674_v8 = vsel %vm671_vm5, %v6105_v56, %v6104_v59  ;;  %v723_v5 = vsel %vm721_vm7, %v6108_v24, %v6107_v10  ;;  %v686_v56 = vmul.f32 %v685_v36, %v680_v12  ;;  %v6112_v10 = vld [vmem:[#allocation52_spill] sm:$0xff]  ;;  %vm1201_vm5 = vcmp.ge.s32.totalorder %v4330_v19, 1 }
 0x44e   :  { %v638_v21 = vadd.f32 %v636_v9, %v594_v44  ;;  %v682_v7 = vsel %vm490_vm0, %v674_v8, 0.0  ;;  %v645_v4 = vadd.f32 %v643_v30, %v639_v2  ;;  %v735_v44 = vstv %s4452_s8  ;;  %v6113_v12 = vld [vmem:[#allocation60_spill] sm:$0xff]  ;;  %1673 = vrot.lane.b32.xlu1 %v3969_v32, %s3288_s27  ;;  %v6114_v2 = vld [vmem:[#allocation62_spill] sm:$0xff]  ;;  %v6119_v32 = vld [vmem:[#allocation65_spill] sm:$0xff]  ;;  %s4788_s8 = sld [smem:[#allocation8 + $0x5c]] }
 0x44f   :  { %v731_v36 = vsel %vm491_vm15, %v723_v5, 0.0  ;;  %v725_v62 = vsel %vm721_vm7, %v6113_v12, %v6112_v10  ;;  %v692_v30 = vmul.f32 %v691_v61, %v682_v7  ;;  %v6118_v7 = vld [vmem:[#allocation63_spill] sm:$0xff] }
 0x450   :  { %v644_v1 = vadd.f32 %v642_v16, %v638_v21  ;;  %1677 = vrot.lane.b32.xlu2 %v3963_v49, %s3288_s27  ;;  %v724_v49 = vsel %vm721_vm7, %v6114_v2, %v6113_v12  ;;  %v4529_v21 = vpop.permute.xlu0 %1472  ;;  %v733_v5 = vsel %vm491_vm15, %v725_v62, 0.0  ;;  %v2400_v10 = vld [vmem:[#allocation2 + $0x2] sm:$0x3f]  ;;  %v6121_v2 = vld [vmem:[#allocation58_spill] sm:$0xff] }
 0x451   :  { %v4489_v53 = vld.sshfl [vmem:[#allocation1 + $0x10] sm:$0xff pattern:$0x73625140]  ;;  %v4496_v59 = vld.sshfl [vmem:[#allocation1 + $0x8] sm:$0xff pattern:$0x73625140]  ;;  %v4531_v48 = vpop.permute.xlu2 %1530 }
 0x452   :  { %6106 = vst [vmem:[#allocation42_spill] sm:$0xff] %v4489_v53  ;;  %v6110_v53 = vld [vmem:[#allocation59_spill] sm:$0xff]  ;;  %v4505_v9 = vld.sshfl [vmem:[#allocation1] sm:$0xff pattern:$0x73625140]  ;;  %v688_v16 = vadd.f32 %v686_v56, %v644_v1  ;;  %v4541_v56 = vpop.permute.xlu1 %1470  ;;  %v785_v1 = vstv %s4487_s10  ;;  %v732_v62 = vsel %vm490_vm0, %v724_v49, 0.0 }
 0x453   :  { %6109 = vst [vmem:[#allocation44_spill] sm:$0xff] %v4496_v59  ;;  %v722_v33 = vsel %vm721_vm7, %v6110_v53, %v6108_v24  ;;  %v693_v24 = vmul.f32 %v691_v61, %v683_v57  ;;  %v741_v53 = vstv %s4470_s1  ;;  %v737_v61 = vmul.f32 %v735_v44, %v731_v36  ;;  %v6117_v57 = vld [vmem:[#allocation55_spill] sm:$0xff]  ;;  %v6125_v49 = vld [vmem:[#allocation61_spill] sm:$0xff]  ;;  %s3323_s1 = smov 30   ;;  %s4810_s10 = sld [smem:[#allocation8 + $0x2]] }
 0x454   :  { %6111 = vst [vmem:[#allocation89_spill] sm:$0xff] %v4505_v9  ;;  %v730_v8 = vsel %vm490_vm0, %v722_v33, 0.0  ;;  %v773_v33 = vsel %vm771_vm8, %v6118_v7, %v6117_v57  ;;  %v694_v12 = vadd.f32 %v692_v30, %v688_v16  ;;  %v6122_v9 = vld [vmem:[#allocation66_spill] sm:$0xff]  ;;  %v791_v16 = vstv %s4494_s2  ;;  %v6126_v59 = vld [vmem:[#allocation69_spill] sm:$0xff]  ;;  %s4833_s2 = sld [smem:[#allocation8 + $0x33]] }
 0x455   :  { %2354 = vst [vmem:[#allocation1] ss:$4 sm:$0xff] %v2350_v46  ;;  %v689_v46 = vadd.f32 %v687_v55, %v645_v4  ;;  %v772_v55 = vsel %vm771_vm8, %v6119_v32, %v6118_v7  ;;  %v736_v4 = vmul.f32 %v735_v44, %v730_v8  ;;  %v775_v57 = vsel %vm771_vm8, %v6122_v9, %v6121_v2  ;;  %v6123_v8 = vld [vmem:[#allocation68_spill] sm:$0xff] }
 0x456   :  { %6115 = vst [vmem:[#allocation37_spill] sm:$0xff] %v4529_v21  ;;  %v743_v7 = vmul.f32 %v741_v53, %v733_v5  ;;  %v781_v32 = vsel %vm491_vm15, %v773_v33, 0.0  ;;  %v780_v44 = vsel %vm490_vm0, %v772_v55, 0.0  ;;  %v823_v2 = vsel %vm821_vm9, %v6126_v59, %v6125_v49 }
 0x457   :  { %6116 = vst [vmem:[#allocation45_spill] sm:$0xff] %v4531_v48  ;;  %v695_v36 = vadd.f32 %v693_v24, %v689_v46  ;;  %v774_v24 = vsel %vm771_vm8, %v6123_v8, %v6122_v9  ;;  %v835_v5 = vstv %s4508_s11  ;;  %v742_v55 = vmul.f32 %v741_v53, %v732_v62  ;;  %v6129_v9 = vld [vmem:[#allocation97_spill] sm:$0xff]  ;;  %v6130_v8 = vld [vmem:[#allocation71_spill] sm:$0xff]  ;;  %s4847_s11 = sld [smem:[#allocation8 + $0x9]] }
 0x458   :  { %6120 = vst [vmem:[#allocation47_spill] sm:$0xff] %v4541_v56  ;;  %v738_v56 = vadd.f32 %v736_v4, %v694_v12  ;;  %v783_v21 = vsel %vm491_vm15, %v775_v57, 0.0  ;;  %2117 = vrot.lane.b32.xlu2 %v3971_v50, %s3319_s14  ;;  %2115 = vrot.lane.b32.xlu0 %v6129_v9, %s3319_s14  ;;  %v822_v53 = vsel %vm821_vm9, %v6130_v8, %v6126_v59  ;;  %v841_v4 = vstv %s4521_s12  ;;  %v6131_v12 = vld [vmem:[#allocation98_spill] sm:$0xff]  ;;  %v4590_v49 = vpop.permute.xlu0 %1478  ;;  %s4863_s12 = sld [smem:[#allocation8 + $0x3a]] }
 0x459   :  { %v739_v46 = vadd.f32 %v737_v61, %v695_v36  ;;  %v787_v61 = vmul.f32 %v785_v1, %v781_v32  ;;  %v782_v36 = vsel %vm490_vm0, %v774_v24, 0.0  ;;  %2113 = vrot.lane.b32.xlu1 %v6131_v12, %s3319_s14  ;;  %v786_v50 = vmul.f32 %v785_v1, %v780_v44  ;;  %v6133_v32 = vld [vmem:[#allocation72_spill] sm:$0xff]  ;;  %v4592_v9 = vpop.permute.xlu2 %1571  ;;  %v6135_v8 = vld [vmem:[#allocation74_spill] sm:$0xff]  ;;  %v6136_v1 = vld [vmem:[#allocation67_spill] sm:$0xff] }
 0x45a   :  { %v831_v57 = vsel %vm491_vm15, %v823_v2, 0.0  ;;  %6134 = vst [vmem:[#allocation43_spill] sm:$0xff] %v4592_v9  ;;  %v793_v59 = vmul.f32 %v791_v16, %v783_v21  ;;  %v744_v2 = vadd.f32 %v742_v55, %v738_v56  ;;  %v792_v12 = vmul.f32 %v791_v16, %v782_v36 }
 0x45b   :  { %v745_v62 = vadd.f32 %v743_v7, %v739_v46  ;;  %v6137_v7 = vld [vmem:[#allocation77_spill] sm:$0xff]  ;;  %v4601_v46 = vpop.permute.xlu1 %1476  ;;  %vm1282_vm7 = vcmask 269312   ;;  %vm1332_vm8 = vcmask 138240  }
 0x45c   :  { %v4558_v30 = vld.sshfl [vmem:[#allocation1 + $0x10] sm:$0xff pattern:$0x73625140]  ;;  %v4565_v48 = vld.sshfl [vmem:[#allocation1 + $0x8] sm:$0xff pattern:$0x73625140]  ;;  %v879_v44 = vsel %vm877_vm10, %v6137_v7, %v6136_v1  ;;  %v788_v9 = vadd.f32 %v786_v50, %v744_v2  ;;  %v897_v2 = vstv %s4581_s15 }
 0x45d   :  { %6124 = vst [vmem:[#allocation40_spill] sm:$0xff] %v4558_v30  ;;  %v4567_v33 = vld.sshfl [vmem:[#allocation1] sm:$0xff pattern:$0x73625140]  ;;  %v789_v21 = vadd.f32 %v787_v61, %v745_v62  ;;  %v2450_v30 = vld [vmem:[#allocation2 + $0x2] sm:$0x3f] }
 0x45e   :  { %6127 = vst [vmem:[#allocation48_spill] sm:$0xff] %v4565_v48  ;;  %v837_v48 = vmul.f32 %v835_v5, %v831_v57  ;;  %v887_v56 = vsel %vm847_vm11, %v879_v44, 0.0  ;;  %v6138_v61 = vld [vmem:[#allocation79_spill] sm:$0xff]  ;;  %v6140_v62 = vld [vmem:[#allocation81_spill] sm:$0xff]  ;;  %s4906_s15 = sld [smem:[#allocation8 + $0x41]] }
 0x45f   :  { %6128 = vst [vmem:[#allocation50_spill] sm:$0xff] %v4567_v33  ;;  %v824_v33 = vsel %vm821_vm9, %v6135_v8, %v6133_v32  ;;  %v891_v8 = vstv %s4549_s13  ;;  %v795_v16 = vadd.f32 %v793_v59, %v789_v21  ;;  %v878_v36 = vsel %vm877_vm10, %v6138_v61, %v6137_v7  ;;  %s4872_s13 = sld [smem:[#allocation8 + $0x10]] }
 0x460   :  { %2404 = vst [vmem:[#allocation1] ss:$4 sm:$0xff] %v2400_v10  ;;  %v6132_v10 = vld [vmem:[#allocation64_spill] sm:$0xff]  ;;  %v832_v1 = vsel %vm490_vm0, %v824_v33, 0.0  ;;  %2167 = vrot.lane.b32.xlu2 %v3992_v26, %s3320_s21  ;;  %2165 = vrot.lane.b32.xlu0 %v3994_v20, %s3320_s21  ;;  %v886_v26 = vsel %vm846_vm12, %v878_v36, 0.0 }
 0x461   :  { %v825_v24 = vsel %vm821_vm9, %v6133_v32, %v6132_v10  ;;  %v830_v10 = vsel %vm490_vm0, %v822_v53, 0.0  ;;  %v6139_v53 = vld [vmem:[#allocation70_spill] sm:$0xff]  ;;  %v839_v59 = vadd.f32 %v837_v48, %v795_v16  ;;  %v842_v7 = vmul.f32 %v841_v4, %v832_v1  ;;  %2163 = vrot.lane.b32.xlu1 %v3998_v63, %s3320_s21  ;;  %v4650_v1 = vpop.permute.xlu2 %1867 }
 0x462   :  { %v833_v32 = vsel %vm491_vm15, %v825_v24, 0.0  ;;  %v836_v55 = vmul.f32 %v835_v5, %v830_v10  ;;  %v881_v50 = vsel %vm877_vm10, %v6140_v62, %v6139_v53  ;;  %v794_v24 = vadd.f32 %v792_v12, %v788_v9  ;;  %v6143_v10 = vld [vmem:[#allocation83_spill] sm:$0xff]  ;;  %v6144_v12 = vld [vmem:[#allocation73_spill] sm:$0xff]  ;;  %v6146_v63 = vld [vmem:[#allocation90_spill] sm:$0xff] }
 0x463   :  { %v843_v44 = vmul.f32 %v841_v4, %v833_v32  ;;  %v880_v21 = vsel %vm877_vm10, %v6143_v10, %v6140_v62  ;;  %v893_v9 = vmul.f32 %v891_v8, %v887_v56  ;;  %v889_v20 = vsel %vm847_vm11, %v881_v50, 0.0  ;;  %v6145_v32 = vld [vmem:[#allocation87_spill] sm:$0xff]  ;;  %v4648_v4 = vpop.permute.xlu0 %1522  ;;  %v4657_v56 = vpop.permute.xlu1 %1520  ;;  %v6147_v53 = vld [vmem:[#allocation78_spill] sm:$0xff] }
 0x464   :  { %v929_v48 = vsel %vm927_vm13, %v6145_v32, %v6144_v12  ;;  %v838_v16 = vadd.f32 %v836_v55, %v794_v24  ;;  %v888_v36 = vsel %vm846_vm12, %v880_v21, 0.0  ;;  %v6148_v62 = vld [vmem:[#allocation94_spill] sm:$0xff]  ;;  %v892_v55 = vmul.f32 %v891_v8, %v886_v26  ;;  %v6151_v26 = vld [vmem:[#allocation99_spill] sm:$0xff] }
 0x465   :  { %v845_v61 = vadd.f32 %v843_v44, %v839_v59  ;;  %v931_v50 = vsel %vm927_vm13, %v6148_v62, %v6147_v53  ;;  %v899_v24 = vmul.f32 %v897_v2, %v889_v20  ;;  %v937_v10 = vsel %vm847_vm11, %v929_v48, 0.0  ;;  %v6150_v8 = vld [vmem:[#allocation82_spill] sm:$0xff] }
 0x466   :  { %v941_v12 = vstv %s4609_s16  ;;  %v947_v59 = vstv %s4615_s17  ;;  %v898_v21 = vmul.f32 %v897_v2, %v888_v36  ;;  %v939_v53 = vsel %vm847_vm11, %v931_v50, 0.0  ;;  %v6152_v36 = vld [vmem:[#allocation101_spill] sm:$0xff]  ;;  %s3324_s16 = smov 14   ;;  %s4932_s17 = sld [smem:[#allocation8 + $0x17]] }
 0x467   :  { %v4623_v57 = vld.sshfl [vmem:[#allocation1 + $0x10] sm:$0xff pattern:$0x73625140]  ;;  %v4625_v33 = vld.sshfl [vmem:[#allocation1 + $0x8] sm:$0xff pattern:$0x73625140]  ;;  %v979_v20 = vsel %vm977_vm14, %v6151_v26, %v6150_v8 }
 0x468   :  { %6141 = vst [vmem:[#allocation51_spill] sm:$0xff] %v4625_v33  ;;  %v4633_v5 = vld.sshfl [vmem:[#allocation1] sm:$0xff pattern:$0x73625140]  ;;  %2223 = vrot.lane.b32.xlu2 %v4014_v28, %s3321_s0  ;;  %2221 = vrot.lane.b32.xlu0 %v4016_v3, %s3321_s0  ;;  %v949_v3 = vmul.f32 %v947_v59, %v939_v53  ;;  %vm1076_vm15 = vcmask 932864   ;;  %vm1176_vm0 = vcmask 670720  }
 0x469   :  { %6142 = vst [vmem:[#allocation53_spill] sm:$0xff] %v4633_v5  ;;  %v6149_v5 = vld [vmem:[#allocation96_spill] sm:$0xff]  ;;  %2219 = vrot.lane.b32.xlu1 %v4019_v18, %s3321_s0  ;;  %vm1382_vm9 = vcmask 7168   ;;  %vm1432_vm10 = vcmask 924672  }
 0x46a   :  { %2454 = vst [vmem:[#allocation1] ss:$4 sm:$0xff] %v2450_v30  ;;  %v928_v30 = vsel %vm927_vm13, %v6146_v63, %v6145_v32  ;;  %v844_v32 = vadd.f32 %v842_v7, %v838_v16  ;;  %v895_v63 = vadd.f32 %v893_v9, %v845_v61  ;;  %v930_v33 = vsel %vm927_vm13, %v6149_v5, %v6148_v62  ;;  %v2500_v5 = vld [vmem:[#allocation2 + $0x2] sm:$0x3f] }
 0x46b   :  { %v936_v44 = vsel %vm846_vm12, %v928_v30, 0.0  ;;  %v943_v7 = vmul.f32 %v941_v12, %v937_v10  ;;  %v991_v9 = vstv %s4627_s18  ;;  %v978_v62 = vsel %vm977_vm14, %v6152_v36, %v6151_v26  ;;  %s4950_s18 = sld [smem:[#allocation8 + $0x48]] }
 0x46c   :  { %v894_v16 = vadd.f32 %v892_v55, %v844_v32  ;;  %v901_v30 = vadd.f32 %v899_v24, %v895_v63  ;;  %v942_v61 = vmul.f32 %v941_v12, %v936_v44  ;;  %v938_v50 = vsel %vm846_vm12, %v930_v33, 0.0  ;;  %v6153_v55 = vld [vmem:[#allocation88_spill] sm:$0xff]  ;;  %v4705_v12 = vpop.permute.xlu0 %1528  ;;  %v4707_v32 = vpop.permute.xlu2 %1592  ;;  %v6154_v44 = vld [vmem:[#allocation105_spill] sm:$0xff] }
 0x46d   :  { %v987_v10 = vsel %vm847_vm11, %v979_v20, 0.0  ;;  %v981_v24 = vsel %vm977_vm14, %v4001_v15, %v6153_v55  ;;  %v997_v63 = vstv %s4655_s23  ;;  %v980_v53 = vsel %vm977_vm14, %v6154_v44, %v4001_v15  ;;  %v4715_v33 = vpop.permute.xlu1 %1526  ;;  %v6155_v20 = vld [vmem:[#allocation95_spill] sm:$0xff]  ;;  %s4959_s23 = sld [smem:[#allocation8 + $0x1e]] }
 0x46e   :  { %v900_v18 = vadd.f32 %v898_v21, %v894_v16  ;;  %v945_v8 = vadd.f32 %v943_v7, %v901_v30  ;;  %v986_v26 = vsel %vm846_vm12, %v978_v62, 0.0  ;;  %v1028_v36 = vsel %vm231_vm6, %v4021_v40, %v6155_v20 }
 0x46f   :  { %v1040_v55 = vstv %s4664_s24  ;;  %v993_v21 = vmul.f32 %v991_v9, %v987_v10  ;;  %v989_v16 = vsel %vm847_vm11, %v981_v24, 0.0  ;;  %v1027_v15 = vsel %vm231_vm6, %v4025_v13, %v4021_v40  ;;  %v2552_v40 = vld [vmem:[#allocation2] sm:$0x3f]  ;;  %s4976_s24 = sld [smem:[#allocation8 + $0x4f]] }
 0x470   :  { %v944_v44 = vadd.f32 %v942_v61, %v900_v18  ;;  %v951_v7 = vadd.f32 %v949_v3, %v945_v8  ;;  %v988_v30 = vsel %vm846_vm12, %v980_v53, 0.0  ;;  %v992_v62 = vmul.f32 %v991_v9, %v986_v26  ;;  %v6157_v9 = vld [vmem:[#allocation109_spill] sm:$0xff]  ;;  %v6158_v18 = vld [vmem:[#allocation110_spill] sm:$0xff]  ;;  %v6159_v8 = vld [vmem:[#allocation104_spill] sm:$0xff] }
 0x471   :  { %v4687_v2 = vld.sshfl [vmem:[#allocation1 + $0x10] sm:$0xff pattern:$0x73625140]  ;;  %v4689_v48 = vld.sshfl [vmem:[#allocation1 + $0x8] sm:$0xff pattern:$0x73625140]  ;;  %v1029_v13 = vsel %vm231_vm6, %v4046_v39, %v4040_v42  ;;  %v999_v61 = vmul.f32 %v997_v63, %v989_v16  ;;  %v1046_v24 = vstv %s4680_s25  ;;  %1723 = vrot.lane.b32.xlu2 %v6157_v9, %s3322_s7  ;;  %1721 = vrot.lane.b32.xlu0 %v6158_v18, %s3322_s7  ;;  %v998_v39 = vmul.f32 %v997_v63, %v988_v30 }
 0x472   :  { %v4696_v28 = vld.sshfl [vmem:[#allocation1] sm:$0xff pattern:$0x73625140]  ;;  %v1035_v3 = vsel %vm846_vm12, %v1027_v15, 0.0  ;;  %v1078_v26 = vsel %vm1076_vm15, %v4057_v35, %v6159_v8  ;;  %1719 = vrot.lane.b32.xlu1 %v4031_v11, %s3322_s7  ;;  %v1077_v63 = vsel %vm1076_vm15, %v4065_v52, %v4057_v35  ;;  %v6160_v52 = vld [vmem:[#allocation108_spill] sm:$0xff]  ;;  %s4987_s25 = sld [smem:[#allocation8 + $0x25]] }
 0x473   :  { %2504 = vst [vmem:[#allocation1] ss:$4 sm:$0xff] %v2500_v5  ;;  %v948_v5 = vmul.f32 %v947_v59, %v938_v50  ;;  %v1036_v59 = vsel %vm847_vm11, %v1028_v36, 0.0  ;;  %v6156_v50 = vld [vmem:[#allocation100_spill] sm:$0xff]  ;;  %v1041_v30 = vmul.f32 %v1040_v55, %v1035_v3  ;;  %v1086_v35 = vsel %vm847_vm11, %v1078_v26, 0.0 }
 0x474   :  { %v1030_v10 = vsel %vm231_vm6, %v4040_v42, %v6156_v50  ;;  %v995_v42 = vadd.f32 %v993_v21, %v951_v7  ;;  %v1042_v16 = vmul.f32 %v1040_v55, %v1036_v59  ;;  %v4767_v21 = vpop.permute.xlu0 %1569  ;;  %v1090_v59 = vstv %s4713_s3  ;;  %s3325_s3 = smov 96  }
 0x475   :  { %v950_v53 = vadd.f32 %v948_v5, %v944_v44  ;;  %v1038_v15 = vsel %vm847_vm11, %v1030_v10, 0.0  ;;  %v1037_v5 = vsel %vm846_vm12, %v1029_v13, 0.0  ;;  %v4769_v44 = vpop.permute.xlu2 %1917  ;;  %vm1126_vm6 = vcmask 801792   ;;  %v4776_v50 = vpop.permute.xlu1 %1567 }
 0x476   :  { %v1001_v10 = vadd.f32 %v999_v61, %v995_v42  ;;  %v1080_v13 = vsel %vm1076_vm15, %v4078_v22, %v6160_v52  ;;  %v1079_v55 = vsel %vm1076_vm15, %v4082_v14, %v4078_v22  ;;  %v1048_v3 = vmul.f32 %v1046_v24, %v1038_v15 }
 0x477   :  { %v994_v7 = vadd.f32 %v992_v62, %v950_v53  ;;  %v1047_v9 = vmul.f32 %v1046_v24, %v1037_v5  ;;  %v1085_v18 = vsel %vm846_vm12, %v1077_v63, 0.0  ;;  %v1096_v61 = vstv %s4730_s29  ;;  %v6161_v53 = vld [vmem:[#allocation113_spill] sm:$0xff]  ;;  %v6163_v5 = vld [vmem:[#allocation112_spill] sm:$0xff]  ;;  %v2606_v63 = vld [vmem:[#allocation2] sm:$0x3f]  ;;  %s5012_s29 = sld [smem:[#allocation8 + $0x56]] }
 0x478   :  { %v1128_v42 = vsel %vm1126_vm6, %v4099_v6, %v6161_v53  ;;  %v1127_v8 = vsel %vm1126_vm6, %v4103_v60, %v4099_v6  ;;  %v1092_v22 = vmul.f32 %v1090_v59, %v1086_v35  ;;  %v1088_v14 = vsel %vm847_vm11, %v1080_v13, 0.0 }
 0x479   :  { %v1000_v62 = vadd.f32 %v998_v39, %v994_v7  ;;  %v1087_v24 = vsel %vm846_vm12, %v1079_v55, 0.0  ;;  %v1091_v39 = vmul.f32 %v1090_v59, %v1085_v18  ;;  %v1140_v15 = vstv %s4740_s30  ;;  %2271 = vrot.lane.b32.xlu0 %v6163_v5, %s3323_s1  ;;  %v6164_v59 = vld [vmem:[#allocation114_spill] sm:$0xff]  ;;  %s5017_s30 = sld [smem:[#allocation8 + $0x2c]] }
 0x47a   :  { %v4756_v20 = vld.sshfl [vmem:[#allocation1 + $0x10] sm:$0xff pattern:$0x73625140]  ;;  %v4758_v36 = vld.sshfl [vmem:[#allocation1 + $0x8] sm:$0xff pattern:$0x73625140]  ;;  %2269 = vrot.lane.b32.xlu1 %v6164_v59, %s3323_s1  ;;  %v1097_v35 = vmul.f32 %v1096_v61, %v1087_v24  ;;  %v1130_v52 = vsel %vm1126_vm6, %v4120_v45, %v4059_v25  ;;  %v1129_v13 = vsel %vm1126_vm6, %v4124_v41, %v4120_v45  ;;  %v1190_v25 = vstv %s4774_s4 }
 0x47b   :  { %v4771_v11 = vld.sshfl [vmem:[#allocation1] sm:$0xff pattern:$0x73625140]  ;;  %v1043_v26 = vadd.f32 %v1041_v30, %v1000_v62  ;;  %v1136_v7 = vsel %vm847_vm11, %v1128_v42, 0.0  ;;  %v1135_v30 = vsel %vm846_vm12, %v1127_v8, 0.0  ;;  %v1177_v8 = vsel %vm1176_vm0, %v4145_v47, %v4137_v0  ;;  %s3327_s4 = smov 110  }
 0x47c   :  { %2560 = vst [vmem:[#allocation1] ss:$4 sm:$0xff] %v2552_v40  ;;  %v1044_v40 = vadd.f32 %v1042_v16, %v1001_v10  ;;  %v6162_v16 = vld [vmem:[#allocation111_spill] sm:$0xff]  ;;  %v1098_v10 = vmul.f32 %v1096_v61, %v1088_v14  ;;  %v4820_v55 = vpop.permute.xlu0 %1865  ;;  %v1178_v61 = vsel %vm1176_vm0, %v4137_v0, %v4080_v37  ;;  %v1142_v42 = vmul.f32 %v1140_v15, %v1136_v7  ;;  %v6165_v5 = vld [vmem:[#allocation130_spill] sm:$0xff] }
 0x47d   :  { %2273 = vrot.lane.b32.xlu2 %v6162_v16, %s3323_s1  ;;  %v1049_v60 = vadd.f32 %v1047_v9, %v1043_v26  ;;  %v4822_v62 = vpop.permute.xlu2 %1614  ;;  %v4835_v53 = vpop.permute.xlu1 %1863  ;;  %v1141_v26 = vmul.f32 %v1140_v15, %v1135_v30  ;;  %v1137_v37 = vsel %vm846_vm12, %v1129_v13, 0.0  ;;  %v1196_v14 = vstv %s4788_s8  ;;  %v6166_v30 = vld [vmem:[#allocation115_spill] sm:$0xff]  ;;  %s3328_s8 = smov 80  }
 0x47e   :  { %v1050_v6 = vadd.f32 %v1048_v3, %v1044_v40  ;;  %v1146_v40 = vstv %s4745_s6  ;;  %v1180_v47 = vsel %vm1176_vm0, %v4156_v17, %v6165_v5  ;;  %v1185_v0 = vsel %vm846_vm12, %v1177_v8, 0.0  ;;  %s3326_s6 = smov 126  }
 0x47f   :  { %v1093_v41 = vadd.f32 %v1091_v39, %v1049_v60  ;;  %v1186_v39 = vsel %vm847_vm11, %v1178_v61, 0.0  ;;  %v1179_v15 = vsel %vm1176_vm0, %v4164_v43, %v4156_v17  ;;  %v1147_v7 = vmul.f32 %v1146_v40, %v1137_v37  ;;  %v6167_v17 = vld [vmem:[#allocation116_spill] sm:$0xff] }
 0x480   :  { %v1094_v18 = vadd.f32 %v1092_v22, %v1050_v6  ;;  %v1138_v22 = vsel %vm847_vm11, %v1130_v52, 0.0  ;;  %v1192_v59 = vmul.f32 %v1190_v25, %v1186_v39  ;;  %v1187_v52 = vsel %vm846_vm12, %v1179_v15, 0.0 }
 0x481   :  { %v1099_v16 = vadd.f32 %v1097_v35, %v1093_v41  ;;  %v1148_v60 = vmul.f32 %v1146_v40, %v1138_v22  ;;  %1742 = vrot.lane.b32.xlu0 %v6167_v17, %s3322_s7  ;;  %v1191_v35 = vmul.f32 %v1190_v25, %v1185_v0  ;;  %v1246_v41 = vstv %s4810_s10  ;;  %v2656_v22 = vld [vmem:[#allocation2] sm:$0x3f]  ;;  %s3329_s10 = smov 94  }
 0x482   :  { %v1100_v24 = vadd.f32 %v1098_v10, %v1094_v18  ;;  %v6168_v10 = vld [vmem:[#allocation117_spill] sm:$0xff]  ;;  %v1233_v18 = vsel %vm1232_vm1, %v4184_v31, %v4180_v34  ;;  %v1236_v31 = vsel %vm1232_vm1, %v4202_v27, %v4139_v29  ;;  %v1197_v39 = vmul.f32 %v1196_v14, %v1187_v52  ;;  %v6175_v52 = vld [vmem:[#allocation118_spill] sm:$0xff] }
 0x483   :  { %v4824_v3 = vld.sshfl [vmem:[#allocation1 + $0x10] sm:$0xff pattern:$0x73625140]  ;;  %v4826_v9 = vld.sshfl [vmem:[#allocation1 + $0x8] sm:$0xff pattern:$0x73625140]  ;;  %v1143_v43 = vadd.f32 %v1141_v26, %v1099_v16  ;;  %1740 = vrot.lane.b32.xlu1 %v6168_v10, %s3322_s7  ;;  %v1296_v0 = vstv %s4847_s11 }
 0x484   :  { %v4837_v45 = vld.sshfl [vmem:[#allocation1] sm:$0xff pattern:$0x73625140]  ;;  %v1144_v6 = vadd.f32 %v1142_v42, %v1100_v24  ;;  %v4883_v40 = vpop.permute.xlu0 %1590  ;;  %v1252_v42 = vstv %s4833_s2  ;;  %v1241_v5 = vsel %vm1201_vm5, %v1233_v18, 0.0  ;;  %v6174_v10 = vld [vmem:[#allocation173_spill] sm:$0xff]  ;;  %vm1969_vm12 = vcmask 121856  }
 0x485   :  { %2610 = vst [vmem:[#allocation1] ss:$4 sm:$0xff] %v2606_v63  ;;  %v1234_v63 = vsel %vm1232_vm1, %v4180_v34, %v4122_v51  ;;  %1744 = vrot.lane.b32.xlu2 %v6166_v30, %s3322_s7  ;;  %v1188_v51 = vsel %vm847_vm11, %v1180_v47, 0.0  ;;  %v4885_v61 = vpop.permute.xlu2 %1967  ;;  %v4889_v8 = vpop.permute.xlu1 %1588  ;;  %v1149_v24 = vadd.f32 %v1147_v7, %v1143_v43  ;;  %v1235_v47 = vsel %vm1232_vm1, %v4208_v38, %v4202_v27  ;;  %v6171_v7 = vld [vmem:[#allocation164_spill] sm:$0xff]  ;;  %s5055_s7 = sld [smem:[#allocation8 + $0x5d]]  ;;  %s3330_s2 = smov 78  }
 0x486   :  { %v1242_v13 = vsel %vm1202_vm2, %v1234_v63, 0.0  ;;  %v1150_v37 = vadd.f32 %v1148_v60, %v1144_v6  ;;  %v1198_v16 = vmul.f32 %v1196_v14, %v1188_v51  ;;  %v6170_v60 = vld [vmem:[#allocation146_spill] sm:$0xff]  ;;  %v1244_v14 = vsel %vm1202_vm2, %v1236_v31, 0.0  ;;  %v6172_v30 = vld [vmem:[#allocation168_spill] sm:$0xff]  ;;  %v6173_v51 = vld [vmem:[#allocation153_spill] sm:$0xff]  ;;  %s3331_s11 = smov 45  }
 0x487   :  { %v1193_v63 = vadd.f32 %v1191_v35, %v1149_v24  ;;  %v1248_v6 = vmul.f32 %v1246_v41, %v1242_v13  ;;  %v1284_v29 = vsel %vm1282_vm7, %v6171_v7, %v6170_v60  ;;  %v1283_v17 = vsel %vm1282_vm7, %v6172_v30, %v6171_v7  ;;  %v6176_v13 = vld [vmem:[#allocation119_spill] sm:$0xff] }
 0x488   :  { %v1194_v15 = vadd.f32 %v1192_v59, %v1150_v37  ;;  %v1302_v38 = vstv %s4863_s12  ;;  %v1247_v43 = vmul.f32 %v1246_v41, %v1241_v5  ;;  %v1243_v59 = vsel %vm1201_vm5, %v1235_v47, 0.0  ;;  %v6177_v41 = vld [vmem:[#allocation175_spill] sm:$0xff]  ;;  %s3091_s12 = sld [smem:[#allocation8 + $0x12]] }
 0x489   :  { %v1286_v35 = vsel %vm1282_vm7, %v6174_v10, %v6173_v51  ;;  %2321 = vrot.lane.b32.xlu0 %v6176_v13, %s3324_s16  ;;  %v1199_v18 = vadd.f32 %v1197_v39, %v1193_v63  ;;  %v1285_v37 = vsel %vm1282_vm7, %v6177_v41, %v6174_v10  ;;  %v1346_v24 = vstv %s4872_s13  ;;  %v6180_v39 = vld [vmem:[#allocation76_spill] sm:$0xff]  ;;  %v6181_v51 = vld [vmem:[#allocation182_spill] sm:$0xff]  ;;  %v6182_v13 = vld [vmem:[#allocation165_spill] sm:$0xff]  ;;  %s5404_s13 = sld [smem:[#allocation8 + $0x43]] }
 0x48a   :  { %v1200_v27 = vadd.f32 %v1198_v16, %v1194_v15  ;;  %v6178_v16 = vld [vmem:[#allocation120_spill] sm:$0xff]  ;;  %v1254_v5 = vmul.f32 %v1252_v42, %v1244_v14  ;;  %v1291_v47 = vsel %vm1201_vm5, %v1283_v17, 0.0  ;;  %v6179_v15 = vld [vmem:[#allocation159_spill] sm:$0xff]  ;;  %v1294_v30 = vsel %vm1202_vm2, %v1286_v35, 0.0 }
 0x48b   :  { %2319 = vrot.lane.b32.xlu1 %v6178_v16, %s3324_s16  ;;  %v1334_v63 = vsel %vm1332_vm8, %v6180_v39, %v6179_v15  ;;  %v2706_v17 = vld [vmem:[#allocation2 + $0x2] sm:$0x3f]  ;;  %v1297_v41 = vmul.f32 %v1296_v0, %v1291_v47  ;;  %v1352_v15 = vstv %s4906_s15  ;;  %vm1482_vm11 = vcmask 793600   ;;  %s3093_s15 = sld [smem:[#allocation8 + $0x19]] }
 0x48c   :  { %v4891_v25 = vld.sshfl [vmem:[#allocation1 + $0x10] sm:$0xff pattern:$0x73625140]  ;;  %v4893_v26 = vld.sshfl [vmem:[#allocation1 + $0x8] sm:$0xff pattern:$0x73625140]  ;;  %v1250_v31 = vadd.f32 %v1248_v6, %v1200_v27  ;;  %v4941_v60 = vpop.permute.xlu0 %1915  ;;  %v1333_v6 = vsel %vm1332_vm8, %v6181_v51, %v6180_v39  ;;  %v1249_v27 = vadd.f32 %v1247_v43, %v1199_v18 }
 0x48d   :  { %v4898_v34 = vld.sshfl [vmem:[#allocation1] sm:$0xff pattern:$0x73625140]  ;;  %2323 = vrot.lane.b32.xlu2 %v6175_v52, %s3324_s16  ;;  %v4943_v7 = vpop.permute.xlu2 %1634  ;;  %v4952_v14 = vpop.permute.xlu1 %1913  ;;  %v1293_v52 = vsel %vm1201_vm5, %v1285_v37, 0.0  ;;  %v1342_v16 = vsel %vm1202_vm2, %v1334_v63, 0.0  ;;  %v6185_v39 = vld [vmem:[#allocation191_spill] sm:$0xff]  ;;  %v1304_v37 = vmul.f32 %v1302_v38, %v1294_v30 }
 0x48e   :  { %6169 = vst [vmem:[#allocation91_spill] sm:$0xff] %v4898_v34  ;;  %v1341_v51 = vsel %vm1201_vm5, %v1333_v6, 0.0  ;;  %v6188_v34 = vld [vmem:[#allocation13_spill] sm:$0xff]  ;;  %v1303_v63 = vmul.f32 %v1302_v38, %v1293_v52  ;;  %v1348_v6 = vmul.f32 %v1346_v24, %v1342_v16  ;;  %v6192_v38 = vld [vmem:[#allocation122_spill] sm:$0xff]  ;;  %vm1532_vm13 = vcmask 662528  }
 0x48f   :  { %2660 = vst [vmem:[#allocation1] ss:$4 sm:$0xff] %v2656_v22  ;;  %v1292_v22 = vsel %vm1202_vm2, %v1284_v29, 0.0  ;;  %v1253_v29 = vmul.f32 %v1252_v42, %v1243_v59  ;;  %v6183_v42 = vld [vmem:[#allocation189_spill] sm:$0xff]  ;;  %vm1573_vm14 = vcmask 392192   ;;  %vm2019_vm15 = vcmask 1039360  }
 0x490   :  { %v1298_v10 = vmul.f32 %v1296_v0, %v1292_v22  ;;  %v1336_v59 = vsel %vm1332_vm8, %v6183_v42, %v6182_v13  ;;  %v1335_v43 = vsel %vm1332_vm8, %v6185_v39, %v6183_v42  ;;  %v1256_v22 = vadd.f32 %v1254_v5, %v1250_v31  ;;  %v6187_v13 = vld [vmem:[#allocation174_spill] sm:$0xff] }
 0x491   :  { %v1255_v47 = vadd.f32 %v1253_v29, %v1249_v27  ;;  %v1344_v42 = vsel %vm1202_vm2, %v1336_v59, 0.0  ;;  %v6190_v31 = vld [vmem:[#allocation198_spill] sm:$0xff]  ;;  %v1343_v39 = vsel %vm1201_vm5, %v1335_v43, 0.0  ;;  %1764 = vrot.lane.b32.xlu0 %v6192_v38, %s3325_s3  ;;  %v1347_v27 = vmul.f32 %v1346_v24, %v1341_v51  ;;  %v6194_v43 = vld [vmem:[#allocation181_spill] sm:$0xff] }
 0x492   :  { %v1383_v5 = vsel %vm1382_vm9, %v6190_v31, %v6188_v34  ;;  %v1300_v30 = vadd.f32 %v1298_v10, %v1256_v22  ;;  %v6193_v10 = vld [vmem:[#allocation123_spill] sm:$0xff]  ;;  %v1354_v59 = vmul.f32 %v1352_v15, %v1344_v42  ;;  %v6195_v22 = vld [vmem:[#allocation84_spill] sm:$0xff]  ;;  %vm1658_vm6 = vcmask 130048  }
 0x493   :  { %v1299_v29 = vadd.f32 %v1297_v41, %v1255_v47  ;;  %1762 = vrot.lane.b32.xlu1 %v6193_v10, %s3325_s3  ;;  %v1391_v16 = vsel %vm1201_vm5, %v1383_v5, 0.0  ;;  %v1386_v31 = vsel %vm1382_vm9, %v6195_v22, %v6194_v43  ;;  %v6196_v42 = vld [vmem:[#allocation35_spill] sm:$0xff]  ;;  %v1452_v43 = vstv %s4976_s24  ;;  %s3098_s24 = sld [smem:[#allocation8 + $0x58]] }
 0x494   :  { %v1306_v52 = vadd.f32 %v1304_v37, %v1300_v30  ;;  %v1385_v5 = vsel %vm1382_vm9, %v6196_v42, %v6195_v22  ;;  %v2756_v30 = vld [vmem:[#allocation2 + $0x2] sm:$0x3f]  ;;  %vm2119_vm0 = vcmask 777216   ;;  %vm2169_vm1 = vcmask 646144  }
 0x495   :  { %v5005_v24 = vpop.permute.xlu2 %2017  ;;  %v1305_v41 = vadd.f32 %v1303_v63, %v1299_v29  ;;  %v5007_v51 = vpop.permute.xlu1 %1610  ;;  %v1394_v63 = vsel %vm1202_vm2, %v1386_v31, 0.0  ;;  %v6197_v29 = vld [vmem:[#allocation190_spill] sm:$0xff]  ;;  %vm2275_vm7 = vcmask 244736   ;;  %vm2325_vm8 = vcmask 113664  }
 0x496   :  { %v4961_v35 = vld.sshfl [vmem:[#allocation1 + $0x10] sm:$0xff pattern:$0x73625140]  ;;  %v4969_v18 = vld.sshfl [vmem:[#allocation1 + $0x8] sm:$0xff pattern:$0x73625140]  ;;  %v1350_v37 = vadd.f32 %v1348_v6, %v1306_v52  ;;  %v1446_v52 = vstv %s4959_s23 }
 0x497   :  { %6184 = vst [vmem:[#allocation92_spill] sm:$0xff] %v4961_v35  ;;  %v1384_v35 = vsel %vm1382_vm9, %v6188_v34, %v6187_v13  ;;  %v4978_v0 = vld.sshfl [vmem:[#allocation1] sm:$0xff pattern:$0x73625140]  ;;  %v6191_v13 = vld [vmem:[#allocation121_spill] sm:$0xff]  ;;  %v1349_v38 = vadd.f32 %v1347_v27, %v1305_v41  ;;  %v6198_v6 = vld [vmem:[#allocation31_spill] sm:$0xff] }
 0x498   :  { %6186 = vst [vmem:[#allocation93_spill] sm:$0xff] %v4969_v18  ;;  %1766 = vrot.lane.b32.xlu2 %v6191_v13, %s3325_s3  ;;  %v1392_v34 = vsel %vm1202_vm2, %v1384_v35, 0.0  ;;  %v5003_v13 = vpop.permute.xlu0 %1612  ;;  %v1353_v35 = vmul.f32 %v1352_v15, %v1343_v39  ;;  %v1402_v15 = vstv %s4950_s18  ;;  %v1356_v39 = vadd.f32 %v1354_v59, %v1350_v37  ;;  %v6202_v41 = vld [vmem:[#allocation195_spill] sm:$0xff]  ;;  %v6203_v37 = vld [vmem:[#allocation41_spill] sm:$0xff]  ;;  %s3096_s18 = sld [smem:[#allocation8 + $0x51]] }
 0x499   :  { %6189 = vst [vmem:[#allocation46_spill] sm:$0xff] %v4978_v0  ;;  %v1496_v18 = vstv %s4987_s25  ;;  %v6211_v0 = vld [vmem:[#allocation34_spill] sm:$0xff]  ;;  %vm1768_vm9 = vcmask 785408   ;;  %s3097_s23 = sld [smem:[#allocation8 + $0x27]] }
 0x49a   :  { %2710 = vst [vmem:[#allocation1] ss:$4 sm:$0xff] %v2706_v17  ;;  %v1396_v17 = vstv %s4932_s17  ;;  %v1355_v27 = vadd.f32 %v1353_v35, %v1349_v38  ;;  %v6205_v35 = vld [vmem:[#allocation125_spill] sm:$0xff]  ;;  %s3095_s17 = sld [smem:[#allocation8 + $0x20]] }
 0x49b   :  { %v1398_v47 = vmul.f32 %v1396_v17, %v1392_v34  ;;  %v1397_v10 = vmul.f32 %v1396_v17, %v1391_v16  ;;  %v1434_v34 = vsel %vm1432_vm10, %v6198_v6, %v6197_v29  ;;  %v1393_v17 = vsel %vm1201_vm5, %v1385_v5, 0.0  ;;  %2371 = vrot.lane.b32.xlu0 %v6205_v35, %s3326_s6  ;;  %v6208_v35 = vld [vmem:[#allocation37_spill] sm:$0xff]  ;;  %s3099_s25 = sld [smem:[#allocation8 + $0x2e]] }
 0x49c   :  { %v1433_v16 = vsel %vm1432_vm10, %v4427_v23, %v6198_v6  ;;  %v1436_v29 = vsel %vm1432_vm10, %v6203_v37, %v6202_v41  ;;  %v1404_v23 = vmul.f32 %v1402_v15, %v1394_v63  ;;  %v1442_v38 = vsel %vm1202_vm2, %v1434_v34, 0.0  ;;  %v6207_v41 = vld [vmem:[#allocation85_spill] sm:$0xff]  ;;  %v6209_v34 = vld [vmem:[#allocation47_spill] sm:$0xff] }
 0x49d   :  { %v1400_v31 = vadd.f32 %v1398_v47, %v1356_v39  ;;  %v1399_v5 = vadd.f32 %v1397_v10, %v1355_v27  ;;  %v1435_v47 = vsel %vm1432_vm10, %v4484_v54, %v6203_v37  ;;  %v6206_v39 = vld [vmem:[#allocation126_spill] sm:$0xff]  ;;  %v1403_v6 = vmul.f32 %v1402_v15, %v1393_v17  ;;  %v5057_v63 = vpop.permute.xlu2 %1656  ;;  %v6210_v27 = vld [vmem:[#allocation36_spill] sm:$0xff]  ;;  %v1964_v37 = vpop.permute.xlu1 %1963 }
 0x49e   :  { %2369 = vrot.lane.b32.xlu1 %v6206_v39, %s3326_s6  ;;  %v1444_v54 = vsel %vm1202_vm2, %v1436_v29, 0.0  ;;  %v1483_v15 = vsel %vm1482_vm11, %v6209_v34, %v6208_v35  ;;  %v1486_v17 = vsel %vm1482_vm11, %v4590_v49, %v6210_v27  ;;  %v1448_v39 = vmul.f32 %v1446_v52, %v1442_v38 }
 0x49f   :  { %v1454_v27 = vmul.f32 %v1452_v43, %v1444_v54  ;;  %v1491_v38 = vsel %vm1201_vm5, %v1483_v15, 0.0  ;;  %vm2375_vm10 = vcmask 1031168  }
 0x4a0   :  { %v1966_v10 = vpop.permute.xlu0 %1965 }
 0x4a1   :  { %v5024_v22 = vld.sshfl [vmem:[#allocation1 + $0x10] sm:$0xff pattern:$0x73625140]  ;;  %v5026_v42 = vld.sshfl [vmem:[#allocation1 + $0x8] sm:$0xff pattern:$0x73625140]  ;;  %v5075_v29 = vsel %vm1969_vm12, %v1964_v37, %v1966_v10 }
 0x4a2   :  { %6199 = vst [vmem:[#allocation54_spill] sm:$0xff] %v5024_v22  ;;  %v5033_v59 = vld.sshfl [vmem:[#allocation1] sm:$0xff pattern:$0x73625140]  ;;  %v1406_v22 = vadd.f32 %v1404_v23, %v1400_v31  ;;  %v1405_v31 = vadd.f32 %v1403_v6, %v1399_v5  ;;  %v1546_v23 = vstv %s5017_s30  ;;  %v6213_v37 = vld [vmem:[#allocation45_spill] sm:$0xff]  ;;  %v1497_v6 = vmul.f32 %v1496_v18, %v1491_v38  ;;  %s5551_s30 = sld [smem:[#allocation8 + $0x5]] }
 0x4a3   :  { %6200 = vst [vmem:[#allocation56_spill] sm:$0xff] %v5026_v42  ;;  %v6204_v42 = vld [vmem:[#allocation124_spill] sm:$0xff] }
 0x4a4   :  { %6201 = vst [vmem:[#allocation49_spill] sm:$0xff] %v5033_v59  ;;  %2373 = vrot.lane.b32.xlu2 %v6204_v42, %s3326_s6  ;;  %v1441_v42 = vsel %vm1201_vm5, %v1433_v16, 0.0  ;;  %v5069_v16 = vsel %vm1969_vm12, %v1966_v10, %v4885_v61  ;;  %v1502_v59 = vstv %s5012_s29  ;;  %v1485_v61 = vsel %vm1482_vm11, %v4601_v46, %v4590_v49  ;;  %v2806_v46 = vld [vmem:[#allocation2 + $0x2] sm:$0x3f]  ;;  %s3337_s29 = smov 77  }
 0x4a5   :  { %2760 = vst [vmem:[#allocation1] ss:$4 sm:$0xff] %v2756_v30  ;;  %v1484_v30 = vsel %vm1482_vm11, %v6208_v35, %v6207_v41  ;;  %v1443_v41 = vsel %vm1201_vm5, %v1435_v47, 0.0  ;;  %v1447_v35 = vmul.f32 %v1446_v52, %v1441_v42  ;;  %v1494_v47 = vsel %vm1202_vm2, %v1486_v17, 0.0 }
 0x4a6   :  { %v1492_v34 = vsel %vm1202_vm2, %v1484_v30, 0.0  ;;  %v1534_v10 = vsel %vm1532_vm13, %v4648_v4, %v6211_v0  ;;  %v1453_v52 = vmul.f32 %v1452_v43, %v1443_v41  ;;  %v1533_v42 = vsel %vm1532_vm13, %v4657_v56, %v4648_v4  ;;  %v6214_v43 = vld [vmem:[#allocation127_spill] sm:$0xff]  ;;  %v6215_v4 = vld [vmem:[#allocation128_spill] sm:$0xff]  ;;  %v6216_v41 = vld [vmem:[#allocation129_spill] sm:$0xff] }
 0x4a7   :  { %v1450_v54 = vadd.f32 %v1448_v39, %v1406_v22  ;;  %v1498_v15 = vmul.f32 %v1496_v18, %v1492_v34  ;;  %v1493_v17 = vsel %vm1201_vm5, %v1485_v61, 0.0  ;;  %v1536_v0 = vsel %vm1532_vm13, %v4705_v12, %v6213_v37  ;;  %1785 = vrot.lane.b32.xlu0 %v6215_v4, %s3325_s3  ;;  %1783 = vrot.lane.b32.xlu1 %v6216_v41, %s3325_s3 }
 0x4a8   :  { %v1449_v5 = vadd.f32 %v1447_v35, %v1405_v31  ;;  %v1542_v22 = vsel %vm1202_vm2, %v1534_v10, 0.0  ;;  %v1535_v39 = vsel %vm1532_vm13, %v4715_v33, %v4705_v12  ;;  %v1504_v61 = vmul.f32 %v1502_v59, %v1494_v47  ;;  %v1633_v4 = vpop.permute.xlu0 %1632  ;;  %v5118_v35 = vpop.permute.xlu2 %2067 }
 0x4a9   :  { %v1456_v34 = vadd.f32 %v1454_v27, %v1450_v54  ;;  %v1541_v37 = vsel %vm1201_vm5, %v1533_v42, 0.0  ;;  %v1503_v38 = vmul.f32 %v1502_v59, %v1493_v17  ;;  %v1544_v10 = vsel %vm1202_vm2, %v1536_v0, 0.0  ;;  %v1631_v33 = vpop.permute.xlu1 %1630 }
 0x4aa   :  { %v1455_v18 = vadd.f32 %v1453_v52, %v1449_v5  ;;  %v1637_v12 = vsel %vm160_vm4, %v1633_v4, %v4943_v7  ;;  %v1543_v27 = vsel %vm1201_vm5, %v1535_v39, 0.0  ;;  %v1636_v47 = vsel %vm160_vm4, %v1631_v33, %v1633_v4  ;;  %v6217_v7 = vld [vmem:[#allocation131_spill] sm:$0xff] }
 0x4ab   :  { %v1500_v31 = vadd.f32 %v1498_v15, %v1456_v34  ;;  %v1547_v54 = vmul.f32 %v1546_v23, %v1541_v37  ;;  %v6218_v15 = vld [vmem:[#allocation132_spill] sm:$0xff]  ;;  %v6220_v34 = vld [vmem:[#allocation133_spill] sm:$0xff]  ;;  %vm2225_vm2 = vcmask 375808   ;;  %vm1725_vm5 = vcmask 916480  }
 0x4ac   :  { %v5093_v30 = vld.sshfl [vmem:[#allocation1 + $0x10] sm:$0xff pattern:$0x73625140]  ;;  %v5095_v49 = vld.sshfl [vmem:[#allocation1 + $0x8] sm:$0xff pattern:$0x73625140]  ;;  %1787 = vrot.lane.b32.xlu2 %v6214_v43, %s3325_s3  ;;  %v1552_v43 = vstv %s5055_s7  ;;  %v1499_v42 = vadd.f32 %v1497_v6, %v1455_v18 }
 0x4ad   :  { %6212 = vst [vmem:[#allocation57_spill] sm:$0xff] %v5095_v49  ;;  %v5106_v56 = vld.sshfl [vmem:[#allocation1] sm:$0xff pattern:$0x73625140]  ;;  %v1506_v41 = vadd.f32 %v1504_v61, %v1500_v31  ;;  %v1554_v49 = vmul.f32 %v1552_v43, %v1544_v10  ;;  %v1553_v52 = vmul.f32 %v1552_v43, %v1543_v27  ;;  %v2856_v6 = vld [vmem:[#allocation2 + $0x2] sm:$0x3f]  ;;  %v1574_v43 = vsel %vm1573_vm14, %v4776_v50, %v4767_v21 }
 0x4ae   :  { %2810 = vst [vmem:[#allocation1] ss:$4 sm:$0xff] %v2806_v46  ;;  %v1548_v46 = vmul.f32 %v1546_v23, %v1542_v22  ;;  %v1505_v59 = vadd.f32 %v1503_v38, %v1499_v42  ;;  %v6219_v22 = vld [vmem:[#allocation43_spill] sm:$0xff]  ;;  %v1595_v10 = vsel %vm1573_vm14, %v4883_v40, %v4707_v32  ;;  %v1617_v27 = vsel %vm160_vm4, %v5003_v13, %v4822_v62  ;;  %s3100_s3 = sld [smem:[#allocation8 + $0x5f]] }
 0x4af   :  { %2421 = vrot.lane.b32.xlu0 %v6218_v15, %s3327_s4  ;;  %v1575_v39 = vsel %vm1573_vm14, %v4767_v21, %v6219_v22  ;;  %2419 = vrot.lane.b32.xlu1 %v6220_v34, %s3327_s4  ;;  %v1616_v32 = vsel %vm160_vm4, %v5007_v51, %v5003_v13  ;;  %v6224_v22 = vld [vmem:[#allocation137_spill] sm:$0xff]  ;;  %vm2069_vm4 = vcmask 908288   ;;  %vm2425_vm11 = vcmask 900096   ;;  %s5572_s7 = sld [smem:[#allocation8 + $0xc]] }
 0x4b0   :  { %v1550_v17 = vadd.f32 %v1548_v46, %v1506_v41  ;;  %v1549_v23 = vadd.f32 %v1547_v54, %v1505_v59  ;;  %v2016_v4 = vpop.permute.xlu0 %2015  ;;  %v1678_v18 = vpop.permute.xlu2 %1677  ;;  %v6221_v41 = vld [vmem:[#allocation134_spill] sm:$0xff]  ;;  %v6222_v59 = vld [vmem:[#allocation135_spill] sm:$0xff]  ;;  %vm1811_vm13 = vcmask 654336  }
 0x4b1   :  { %v5150_v33 = vsel %vm2019_vm15, %v2016_v4, %v5005_v24  ;;  %v2014_v31 = vpop.permute.xlu1 %2013 }
 0x4b2   :  { %v1556_v37 = vadd.f32 %v1554_v49, %v1550_v17  ;;  %v1555_v38 = vadd.f32 %v1553_v52, %v1549_v23  ;;  %v1594_v49 = vsel %vm1573_vm14, %v4889_v8, %v4883_v40  ;;  %v5156_v21 = vsel %vm2019_vm15, %v2014_v31, %v2016_v4  ;;  %v6223_v8 = vld [vmem:[#allocation136_spill] sm:$0xff] }
 0x4b3   :  { %v6227_v4 = vld [vmem:[#allocation140_spill] sm:$0xff]  ;;  %vm2475_vm14 = vcmask 769024  }
 0x4b4   :  { %2423 = vrot.lane.b32.xlu2 %v6217_v7, %s3327_s4  ;;  %v1579_v46 = vadd.f32 %v1575_v39, %v1556_v37  ;;  %v1578_v50 = vadd.f32 %v1574_v43, %v1555_v38  ;;  %v6225_v39 = vld [vmem:[#allocation138_spill] sm:$0xff]  ;;  %v6228_v38 = vld [vmem:[#allocation141_spill] sm:$0xff] }
 0x4b5   :  { %v5131_v0 = vld.sshfl [vmem:[#allocation1 + $0x10] sm:$0xff pattern:$0x73625140]  ;;  %v5133_v5 = vld.sshfl [vmem:[#allocation1 + $0x8] sm:$0xff pattern:$0x73625140] }
 0x4b6   :  { %v5140_v61 = vld.sshfl [vmem:[#allocation1] sm:$0xff pattern:$0x73625140]  ;;  %v1599_v42 = vadd.f32 %v1595_v10, %v1579_v46  ;;  %v1598_v24 = vadd.f32 %v1594_v49, %v1578_v50 }
 0x4b7   :  { %2860 = vst [vmem:[#allocation1] ss:$4 sm:$0xff] %v2856_v6  ;;  %1807 = vrot.lane.b32.xlu0 %v6222_v59, %s3328_s8  ;;  %1805 = vrot.lane.b32.xlu1 %v6223_v8, %s3328_s8  ;;  %v6229_v10 = vld [vmem:[#allocation142_spill] sm:$0xff] }
 0x4b8   :  { %v1621_v54 = vadd.f32 %v1617_v27, %v1599_v42  ;;  %v1620_v40 = vadd.f32 %v1616_v32, %v1598_v24  ;;  %v1655_v17 = vpop.permute.xlu0 %1654  ;;  %v2118_v7 = vpop.permute.xlu2 %2117  ;;  %v6230_v32 = vld [vmem:[#allocation143_spill] sm:$0xff]  ;;  %v6231_v24 = vld [vmem:[#allocation144_spill] sm:$0xff] }
 0x4b9   :  { %v1660_v15 = vsel %vm1658_vm6, %v1655_v17, %v5057_v63  ;;  %v1653_v6 = vpop.permute.xlu1 %1652 }
 0x4ba   :  { %v1641_v52 = vadd.f32 %v1637_v12, %v1621_v54  ;;  %v1640_v62 = vadd.f32 %v1636_v47, %v1620_v40  ;;  %v1659_v51 = vsel %vm1658_vm6, %v1653_v6, %v1655_v17  ;;  %v6226_v12 = vld [vmem:[#allocation139_spill] sm:$0xff]  ;;  %v6232_v54 = vld [vmem:[#allocation145_spill] sm:$0xff]  ;;  %v6234_v17 = vld [vmem:[#allocation148_spill] sm:$0xff] }
 0x4bc   :  { %1809 = vrot.lane.b32.xlu2 %v6221_v41, %s3328_s8  ;;  %v1664_v13 = vadd.f32 %v1660_v15, %v1641_v52  ;;  %v1663_v23 = vadd.f32 %v1659_v51, %v1640_v62  ;;  %v6233_v52 = vld [vmem:[#allocation147_spill] sm:$0xff]  ;;  %v6235_v62 = vld [vmem:[#allocation149_spill] sm:$0xff] }
 0x4bf   :  { %2471 = vrot.lane.b32.xlu0 %v6225_v39, %s3329_s10  ;;  %2469 = vrot.lane.b32.xlu1 %v6226_v12, %s3329_s10  ;;  %v6238_v39 = vld [vmem:[#allocation152_spill] sm:$0xff] }
 0x4c0   :  { %v2066_v47 = vpop.permute.xlu0 %2065  ;;  %v2168_v34 = vpop.permute.xlu2 %2167 }
 0x4c1   :  { %v5178_v63 = vsel %vm2069_vm4, %v2066_v47, %v5118_v35  ;;  %v2064_v37 = vpop.permute.xlu1 %2063 }
 0x4c2   :  { %v5181_v43 = vsel %vm2069_vm4, %v2064_v37, %v2066_v47 }
 0x4c4   :  { %2473 = vrot.lane.b32.xlu2 %v6224_v22, %s3329_s10  ;;  %v6237_v22 = vld [vmem:[#allocation151_spill] sm:$0xff] }
 0x4c7   :  { %1828 = vrot.lane.b32.xlu0 %v6228_v38, %s3328_s8  ;;  %1826 = vrot.lane.b32.xlu1 %v6229_v10, %s3328_s8  ;;  %v6239_v38 = vld [vmem:[#allocation103_spill] sm:$0xff] }
 0x4c8   :  { %v2224_v31 = vpop.permute.xlu2 %2223  ;;  %v1676_v46 = vpop.permute.xlu0 %1675 }
 0x4c9   :  { %v1680_v49 = vsel %vm1658_vm6, %v1676_v46, %v1678_v18  ;;  %v1674_v50 = vpop.permute.xlu1 %1673 }
 0x4ca   :  { %v1684_v27 = vadd.f32 %v1680_v49, %v1664_v13  ;;  %v1679_v42 = vsel %vm1658_vm6, %v1674_v50, %v1676_v46  ;;  %v6240_v46 = vld [vmem:[#allocation102_spill] sm:$0xff]  ;;  %vm2525_vm6 = vcmask 637952  }
 0x4cb   :  { %v1683_v35 = vadd.f32 %v1679_v42, %v1663_v23  ;;  %v6236_v23 = vld [vmem:[#allocation150_spill] sm:$0xff]  ;;  %v6242_v42 = vld [vmem:[#allocation155_spill] sm:$0xff] }
 0x4cc   :  { %1830 = vrot.lane.b32.xlu2 %v6227_v4, %s3328_s8  ;;  %v1697_v10 = vadd.f32 %v6239_v38, %v1684_v27  ;;  %v6241_v50 = vld [vmem:[#allocation154_spill] sm:$0xff]  ;;  %s5591_s8 = sld [smem:[#allocation8 + $0x13]] }
 0x4cd   :  { %v1696_v49 = vadd.f32 %v6240_v46, %v1683_v35  ;;  %v6245_v27 = vld [vmem:[#allocation106_spill] sm:$0xff] }
 0x4ce   :  { %v6250_v46 = vld [vmem:[#allocation162_spill] sm:$0xff] }
 0x4cf   :  { %2521 = vrot.lane.b32.xlu0 %v6231_v24, %s3330_s2  ;;  %2519 = vrot.lane.b32.xlu1 %v6232_v54, %s3330_s2 }
 0x4d0   :  { %v2116_v41 = vpop.permute.xlu0 %2115  ;;  %v1724_v59 = vpop.permute.xlu2 %1723 }
 0x4d1   :  { %v5195_v18 = vsel %vm2119_vm0, %v2116_v41, %v2118_v7  ;;  %v2114_v40 = vpop.permute.xlu1 %2113 }
 0x4d2   :  { %v5198_v8 = vsel %vm2119_vm0, %v2114_v40, %v2116_v41 }
 0x4d4   :  { %2523 = vrot.lane.b32.xlu2 %v6230_v32, %s3330_s2  ;;  %v6243_v32 = vld [vmem:[#allocation156_spill] sm:$0xff] }
 0x4d7   :  { %1859 = vrot.lane.b32.xlu0 %v6234_v17, %s3313_s19  ;;  %1857 = vrot.lane.b32.xlu1 %v6235_v62, %s3313_s19  ;;  %v1707_v17 = vadd.f32 %v6245_v27, %v1696_v49  ;;  %v6251_v49 = vld [vmem:[#allocation163_spill] sm:$0xff]  ;;  %v6254_v27 = vld [vmem:[#allocation169_spill] sm:$0xff] }
 0x4d8   :  { %v2166_v15 = vpop.permute.xlu0 %2165  ;;  %v2274_v6 = vpop.permute.xlu2 %2273 }
 0x4d9   :  { %v5207_v13 = vsel %vm2169_vm1, %v2166_v15, %v2168_v34  ;;  %v2164_v7 = vpop.permute.xlu1 %2163 }
 0x4da   :  { %v5210_v51 = vsel %vm2169_vm1, %v2164_v7, %v2166_v15  ;;  %v6246_v7 = vld [vmem:[#allocation157_spill] sm:$0xff] }
 0x4dc   :  { %1861 = vrot.lane.b32.xlu2 %v6233_v52, %s3313_s19  ;;  %s3332_s19 = smov 29  }
 0x4df   :  { %2577 = vrot.lane.b32.xlu0 %v6237_v22, %s3331_s11  ;;  %2575 = vrot.lane.b32.xlu1 %v6238_v39, %s3331_s11  ;;  %v6248_v22 = vld [vmem:[#allocation160_spill] sm:$0xff] }
 0x4e0   :  { %v2222_v12 = vpop.permute.xlu0 %2221  ;;  %v1745_v47 = vpop.permute.xlu2 %1744 }
 0x4e1   :  { %v5219_v34 = vsel %vm2225_vm2, %v2222_v12, %v2224_v31  ;;  %v2220_v37 = vpop.permute.xlu1 %2219  ;;  %v6244_v31 = vld [vmem:[#allocation107_spill] sm:$0xff] }
 0x4e2   :  { %v5222_v4 = vsel %vm2225_vm2, %v2220_v37, %v2222_v12  ;;  %v1708_v24 = vadd.f32 %v6244_v31, %v1697_v10  ;;  %v6249_v10 = vld [vmem:[#allocation161_spill] sm:$0xff] }
 0x4e4   :  { %2579 = vrot.lane.b32.xlu2 %v6236_v23, %s3331_s11  ;;  %v6247_v23 = vld [vmem:[#allocation158_spill] sm:$0xff] }
 0x4e7   :  { %1909 = vrot.lane.b32.xlu0 %v6242_v42, %s3314_s20  ;;  %1907 = vrot.lane.b32.xlu1 %v6243_v32, %s3314_s20 }
 0x4e8   :  { %v1722_v54 = vpop.permute.xlu0 %1721  ;;  %v2324_v41 = vpop.permute.xlu2 %2323 }
 0x4e9   :  { %v1727_v40 = vsel %vm1725_vm5, %v1722_v54, %v1724_v59  ;;  %v1720_v52 = vpop.permute.xlu1 %1719 }
 0x4ea   :  { %v1731_v35 = vadd.f32 %v1727_v40, %v1708_v24  ;;  %v1726_v62 = vsel %vm1725_vm5, %v1720_v52, %v1722_v54  ;;  %v6252_v40 = vld [vmem:[#allocation166_spill] sm:$0xff]  ;;  %v6253_v52 = vld [vmem:[#allocation167_spill] sm:$0xff] }
 0x4eb   :  { %v1730_v15 = vadd.f32 %v1726_v62, %v1707_v17 }
 0x4ec   :  { %1911 = vrot.lane.b32.xlu2 %v6241_v50, %s3314_s20  ;;  %s3333_s20 = smov 13  }
 0x4ef   :  { %2629 = vrot.lane.b32.xlu0 %v6247_v23, %s3332_s19  ;;  %2627 = vrot.lane.b32.xlu1 %v6248_v22, %s3332_s19  ;;  %v6256_v23 = vld [vmem:[#allocation171_spill] sm:$0xff]  ;;  %v6257_v22 = vld [vmem:[#allocation172_spill] sm:$0xff] }
 0x4f0   :  { %v2272_v39 = vpop.permute.xlu0 %2271 }
 0x4f1   :  { %v5243_v12 = vsel %vm2275_vm7, %v2272_v39, %v2274_v6  ;;  %v2270_v37 = vpop.permute.xlu1 %2269 }
 0x4f2   :  { %v1767_v59 = vpop.permute.xlu2 %1766  ;;  %v5246_v38 = vsel %vm2275_vm7, %v2270_v37, %v2272_v39 }
 0x4f4   :  { %2625 = vrot.lane.b32.xlu2 %v6246_v7, %s3332_s19 }
 0x4f7   :  { %1959 = vrot.lane.b32.xlu0 %v6250_v46, %s3316_s22  ;;  %1957 = vrot.lane.b32.xlu1 %v6251_v49, %s3316_s22 }
 0x4f8   :  { %v1743_v50 = vpop.permute.xlu0 %1742 }
 0x4f9   :  { %v1747_v32 = vsel %vm1725_vm5, %v1743_v50, %v1745_v47  ;;  %v1741_v31 = vpop.permute.xlu1 %1740 }
 0x4fa   :  { %v1751_v6 = vadd.f32 %v1747_v32, %v1731_v35  ;;  %v1746_v24 = vsel %vm1725_vm5, %v1741_v31, %v1743_v50  ;;  %v6258_v32 = vld [vmem:[#allocation176_spill] sm:$0xff]  ;;  %v6259_v31 = vld [vmem:[#allocation177_spill] sm:$0xff]  ;;  %vm1869_vm5 = vcmask 384000  }
 0x4fb   :  { %v1750_v54 = vadd.f32 %v1746_v24, %v1730_v15  ;;  %v6255_v15 = vld [vmem:[#allocation170_spill] sm:$0xff] }
 0x4fc   :  { %1961 = vrot.lane.b32.xlu2 %v6249_v10, %s3316_s22  ;;  %s3334_s22 = smov 125   ;;  %v6260_v24 = vld [vmem:[#allocation178_spill] sm:$0xff] }
 0x4fe   :  { %v2374_v42 = vpop.permute.xlu2 %2373 }
 0x4ff   :  { %2679 = vrot.lane.b32.xlu0 %v6253_v52, %s3333_s20  ;;  %2677 = vrot.lane.b32.xlu1 %v6254_v27, %s3333_s20 }
 0x500   :  { %v2322_v17 = vpop.permute.xlu0 %2321 }
 0x501   :  { %v5263_v47 = vsel %vm2325_vm8, %v2322_v17, %v2324_v41  ;;  %v2320_v35 = vpop.permute.xlu1 %2319 }
 0x502   :  { %v5266_v7 = vsel %vm2325_vm8, %v2320_v35, %v2322_v17  ;;  %v6262_v17 = vld [vmem:[#allocation180_spill] sm:$0xff]  ;;  %v6263_v35 = vld [vmem:[#allocation75_spill] sm:$0xff] }
 0x504   :  { %2675 = vrot.lane.b32.xlu2 %v6252_v40, %s3333_s20 }
 0x506   :  { %v1788_v62 = vpop.permute.xlu2 %1787 }
 0x507   :  { %2009 = vrot.lane.b32.xlu0 %v6256_v23, %s3317_s28  ;;  %2007 = vrot.lane.b32.xlu1 %v6257_v22, %s3317_s28 }
 0x508   :  { %v1765_v39 = vpop.permute.xlu0 %1764 }
 0x509   :  { %v1770_v10 = vsel %vm1768_vm9, %v1765_v39, %v1767_v59  ;;  %v1763_v41 = vpop.permute.xlu1 %1762 }
 0x50a   :  { %v1774_v46 = vadd.f32 %v1770_v10, %v1751_v6  ;;  %v1769_v49 = vsel %vm1768_vm9, %v1763_v41, %v1765_v39 }
 0x50b   :  { %v1773_v50 = vadd.f32 %v1769_v49, %v1750_v54  ;;  %v6261_v54 = vld [vmem:[#allocation179_spill] sm:$0xff] }
 0x50c   :  { %2011 = vrot.lane.b32.xlu2 %v6255_v15, %s3317_s28  ;;  %s3335_s28 = smov 109   ;;  %v6264_v49 = vld [vmem:[#allocation183_spill] sm:$0xff] }
 0x50e   :  { %v2424_v37 = vpop.permute.xlu2 %2423 }
 0x50f   :  { %2729 = vrot.lane.b32.xlu0 %v6259_v31, %s3334_s22  ;;  %2727 = vrot.lane.b32.xlu1 %v6260_v24, %s3334_s22  ;;  %v6266_v31 = vld [vmem:[#allocation185_spill] sm:$0xff] }
 0x510   :  { %v2372_v40 = vpop.permute.xlu0 %2371 }
 0x511   :  { %v5283_v59 = vsel %vm2375_vm10, %v2372_v40, %v2374_v42  ;;  %v2370_v6 = vpop.permute.xlu1 %2369 }
 0x512   :  { %v5286_v27 = vsel %vm2375_vm10, %v2370_v6, %v2372_v40 }
 0x514   :  { %2725 = vrot.lane.b32.xlu2 %v6258_v32, %s3334_s22  ;;  %v6265_v32 = vld [vmem:[#allocation184_spill] sm:$0xff] }
 0x516   :  { %v1810_v52 = vpop.permute.xlu2 %1809 }
 0x517   :  { %2059 = vrot.lane.b32.xlu0 %v6262_v17, %s3318_s9  ;;  %2057 = vrot.lane.b32.xlu1 %v6263_v35, %s3318_s9  ;;  %v6271_v17 = vld [vmem:[#allocation188_spill] sm:$0xff] }
 0x519   :  { %v1786_v15 = vpop.permute.xlu0 %1785  ;;  %v1784_v39 = vpop.permute.xlu1 %1783 }
 0x51a   :  { %v1790_v22 = vsel %vm1768_vm9, %v1786_v15, %v1788_v62  ;;  %v1789_v10 = vsel %vm1768_vm9, %v1784_v39, %v1786_v15  ;;  %vm1839_vm9 = vcmp.lt.s32.totalorder %v4327_v58, 15 }
 0x51b   :  { %v1794_v42 = vadd.f32 %v1790_v22, %v1774_v46  ;;  %v1793_v41 = vadd.f32 %v1789_v10, %v1773_v50  ;;  %v6269_v50 = vld [vmem:[#allocation186_spill] sm:$0xff] }
 0x51c   :  { %2061 = vrot.lane.b32.xlu2 %v6261_v54, %s3318_s9  ;;  %v6270_v54 = vld [vmem:[#allocation187_spill] sm:$0xff]  ;;  %s3336_s9 = smov 93  }
 0x51e   :  { %v2474_v23 = vpop.permute.xlu2 %2473 }
 0x51f   :  { %2779 = vrot.lane.b32.xlu0 %v6265_v32, %s3335_s28  ;;  %2777 = vrot.lane.b32.xlu1 %v6266_v31, %s3335_s28  ;;  %v6272_v32 = vld [vmem:[#allocation192_spill] sm:$0xff]  ;;  %v6273_v31 = vld [vmem:[#allocation193_spill] sm:$0xff] }
 0x521   :  { %v2422_v24 = vpop.permute.xlu0 %2421  ;;  %v2420_v46 = vpop.permute.xlu1 %2419 }
 0x522   :  { %v5303_v62 = vsel %vm2425_vm11, %v2422_v24, %v2424_v37  ;;  %v5306_v6 = vsel %vm2425_vm11, %v2420_v46, %v2422_v24  ;;  %v6274_v24 = vld [vmem:[#allocation194_spill] sm:$0xff] }
 0x523   :  { %6267 = vst [vmem:[#allocation59_spill] sm:$0xff] %v5303_v62 }
 0x524   :  { %2775 = vrot.lane.b32.xlu2 %v6264_v49, %s3335_s28  ;;  %6268 = vst [vmem:[#allocation52_spill] sm:$0xff] %v5306_v6 }
 0x526   :  { %v1831_v40 = vpop.permute.xlu2 %1830 }
 0x527   :  { %2109 = vrot.lane.b32.xlu0 %v6270_v54, %s3319_s14  ;;  %2107 = vrot.lane.b32.xlu1 %v6271_v17, %s3319_s14  ;;  %v6278_v17 = vld [vmem:[#allocation196_spill] sm:$0xff] }
 0x529   :  { %v1808_v35 = vpop.permute.xlu0 %1807  ;;  %v1806_v37 = vpop.permute.xlu1 %1805 }
 0x52a   :  { %v1813_v22 = vsel %vm1811_vm13, %v1808_v35, %v1810_v52  ;;  %v1812_v10 = vsel %vm1811_vm13, %v1806_v37, %v1808_v35  ;;  %v6279_v35 = vld [vmem:[#allocation197_spill] sm:$0xff] }
 0x52b   :  { %v1817_v39 = vadd.f32 %v1813_v22, %v1794_v42  ;;  %v1816_v49 = vadd.f32 %v1812_v10, %v1793_v41  ;;  %v6277_v41 = vld [vmem:[#allocation80_spill] sm:$0xff] }
 0x52c   :  { %2111 = vrot.lane.b32.xlu2 %v6269_v50, %s3319_s14  ;;  %s3087_s14 = sld [smem:[#allocation8 + $0x4]] }
 0x52e   :  { %v2524_v15 = vpop.permute.xlu2 %2523 }
 0x52f   :  { %2829 = vrot.lane.b32.xlu0 %v6273_v31, %s3336_s9  ;;  %2827 = vrot.lane.b32.xlu1 %v6274_v24, %s3336_s9 }
 0x531   :  { %v2472_v46 = vpop.permute.xlu0 %2471  ;;  %v2470_v42 = vpop.permute.xlu1 %2469 }
 0x532   :  { %v5323_v52 = vsel %vm2475_vm14, %v2472_v46, %v2474_v23  ;;  %v5326_v54 = vsel %vm2475_vm14, %v2470_v42, %v2472_v46  ;;  %v6280_v46 = vld [vmem:[#allocation30_spill] sm:$0xff]  ;;  %v6281_v42 = vld [vmem:[#allocation33_spill] sm:$0xff] }
 0x533   :  { %6275 = vst [vmem:[#allocation60_spill] sm:$0xff] %v5323_v52  ;;  %v6290_v52 = vld [vmem:[#allocation89_spill] sm:$0xff] }
 0x534   :  { %2825 = vrot.lane.b32.xlu2 %v6272_v32, %s3336_s9  ;;  %6276 = vst [vmem:[#allocation62_spill] sm:$0xff] %v5326_v54  ;;  %v6288_v54 = vld [vmem:[#allocation42_spill] sm:$0xff] }
 0x536   :  { %v1862_v50 = vpop.permute.xlu2 %1861 }
 0x537   :  { %2159 = vrot.lane.b32.xlu0 %v6278_v17, %s3320_s21  ;;  %2157 = vrot.lane.b32.xlu1 %v6279_v35, %s3320_s21 }
 0x539   :  { %v1829_v22 = vpop.permute.xlu0 %1828  ;;  %v1827_v32 = vpop.permute.xlu1 %1826 }
 0x53a   :  { %v1833_v10 = vsel %vm1811_vm13, %v1829_v22, %v1831_v40  ;;  %v1832_v31 = vsel %vm1811_vm13, %v1827_v32, %v1829_v22  ;;  %v6287_v32 = vld [vmem:[#allocation39_spill] sm:$0xff]  ;;  %vm1838_vm13 = vcmp.lt.s32.totalorder %v4330_v19, 15 }
 0x53b   :  { %v1837_v23 = vadd.f32 %v1833_v10, %v1817_v39  ;;  %v1836_v24 = vadd.f32 %v1832_v31, %v1816_v49  ;;  %v6285_v49 = vld [vmem:[#allocation38_spill] sm:$0xff]  ;;  %v6286_v10 = vld [vmem:[#allocation32_spill] sm:$0xff]  ;;  %v1883_v31 = vstv %s3087_s14  ;;  %s5660_s14 = sld [smem:[#allocation8 + $0x60]] }
 0x53c   :  { %2161 = vrot.lane.b32.xlu2 %v6277_v41, %s3320_s21  ;;  %v6282_v41 = vld [vmem:[#allocation86_spill] sm:$0xff]  ;;  %s3088_s21 = sld [smem:[#allocation8 + $0x35]] }
 0x53e   :  { %v2580_v37 = vpop.permute.xlu2 %2579 }
 0x53f   :  { %2215 = vrot.lane.b32.xlu0 %v6281_v42, %s3321_s0  ;;  %2213 = vrot.lane.b32.xlu1 %v6282_v41, %s3321_s0 }
 0x541   :  { %v2522_v17 = vpop.permute.xlu0 %2521  ;;  %v2520_v39 = vpop.permute.xlu1 %2519 }
 0x542   :  { %v5343_v40 = vsel %vm2525_vm6, %v2522_v17, %v2524_v15  ;;  %v5346_v22 = vsel %vm2525_vm6, %v2520_v39, %v2522_v17 }
 0x543   :  { %6283 = vst [vmem:[#allocation55_spill] sm:$0xff] %v5343_v40 }
 0x544   :  { %2217 = vrot.lane.b32.xlu2 %v6280_v46, %s3321_s0  ;;  %6284 = vst [vmem:[#allocation63_spill] sm:$0xff] %v5346_v22  ;;  %s3089_s0 = sld [smem:[#allocation8 + $0xb]] }
 0x546   :  { %v1912_v35 = vpop.permute.xlu2 %1911 }
 0x547   :  { %2265 = vrot.lane.b32.xlu0 %v6286_v10, %s3323_s1  ;;  %2263 = vrot.lane.b32.xlu1 %v6287_v32, %s3323_s1 }
 0x549   :  { %v1860_v46 = vpop.permute.xlu0 %1859  ;;  %v1858_v41 = vpop.permute.xlu1 %1857 }
 0x54a   :  { %v1871_v15 = vsel %vm1869_vm5, %v1860_v46, %v1862_v50  ;;  %v1870_v39 = vsel %vm1869_vm5, %v1858_v41, %v1860_v46  ;;  %v6289_v50 = vld [vmem:[#allocation44_spill] sm:$0xff] }
 0x54b   :  { %v1879_v17 = vsel %vm1839_vm9, %v1871_v15, 0.0  ;;  %v1878_v10 = vsel %vm1838_vm13, %v1870_v39, 0.0  ;;  %v6293_v39 = vld [vmem:[#allocation40_spill] sm:$0xff] }
 0x54c   :  { %2267 = vrot.lane.b32.xlu2 %v6285_v49, %s3323_s1  ;;  %v1885_v49 = vmul.f32 %v1883_v31, %v1879_v17  ;;  %v1884_v32 = vmul.f32 %v1883_v31, %v1878_v10  ;;  %v1889_v17 = vstv %s3088_s21  ;;  %v6295_v10 = vld [vmem:[#allocation50_spill] sm:$0xff]  ;;  %s3090_s1 = sld [smem:[#allocation8 + $0x3c]] }
 0x54d   :  { %s5671_s21 = sld [smem:[#allocation8 + $0x6]] }
 0x54e   :  { %v2626_v42 = vpop.permute.xlu2 %2625  ;;  %v1887_v22 = vadd.f32 %v1885_v49, %v1837_v23  ;;  %v1886_v40 = vadd.f32 %v1884_v32, %v1836_v24  ;;  %v1872_v24 = vsel %vm1869_vm5, %v4835_v53, %v4820_v55 }
 0x54f   :  { %2315 = vrot.lane.b32.xlu0 %v6289_v50, %s3324_s16  ;;  %2313 = vrot.lane.b32.xlu1 %v6290_v52, %s3324_s16  ;;  %v1880_v49 = vsel %vm1838_vm13, %v1872_v24, 0.0 }
 0x551   :  { %v2578_v15 = vpop.permute.xlu0 %2577  ;;  %v2576_v31 = vpop.permute.xlu1 %2575 }
 0x552   :  { %v5369_v41 = vsel %vm5867_vm3, %v2578_v15, %v2580_v37  ;;  %v5372_v23 = vsel %vm5867_vm3, %v2576_v31, %v2578_v15  ;;  %v6294_v37 = vld [vmem:[#allocation48_spill] sm:$0xff]  ;;  %vm1919_vm3 = vcmask 252928   ;;  %v1890_v31 = vmul.f32 %v1889_v17, %v1880_v49 }
 0x553   :  { %6291 = vst [vmem:[#allocation65_spill] sm:$0xff] %v5369_v41 }
 0x554   :  { %2317 = vrot.lane.b32.xlu2 %v6288_v54, %s3324_s16  ;;  %6292 = vst [vmem:[#allocation58_spill] sm:$0xff] %v5372_v23  ;;  %v1873_v54 = vsel %vm1869_vm5, %v4820_v55, %v4650_v1  ;;  %v1933_v1 = vstv %s3089_s0  ;;  %v1892_v23 = vadd.f32 %v1890_v31, %v1886_v40  ;;  %vm2631_vm5 = vcmask 236544   ;;  %s3094_s16 = sld [smem:[#allocation8 + $0x4a]] }
 0x555   :  { %v1881_v52 = vsel %vm1839_vm9, %v1873_v54, 0.0  ;;  %s5678_s0 = sld [smem:[#allocation8 + $0x37]] }
 0x556   :  { %v1962_v46 = vpop.permute.xlu2 %1961  ;;  %v1891_v53 = vmul.f32 %v1889_v17, %v1881_v52  ;;  %v6297_v52 = vld [vmem:[#allocation53_spill] sm:$0xff] }
 0x557   :  { %2365 = vrot.lane.b32.xlu0 %v6294_v37, %s3326_s6  ;;  %2363 = vrot.lane.b32.xlu1 %v6295_v10, %s3326_s6 }
 0x558   :  { %v1893_v37 = vadd.f32 %v1891_v53, %v1887_v22 }
 0x559   :  { %v1910_v32 = vpop.permute.xlu0 %1909  ;;  %v1908_v15 = vpop.permute.xlu1 %1907 }
 0x55a   :  { %v1921_v50 = vsel %vm1919_vm3, %v1910_v32, %v1912_v35  ;;  %v6296_v35 = vld [vmem:[#allocation51_spill] sm:$0xff] }
 0x55b   :  { %v1929_v54 = vsel %vm1839_vm9, %v1921_v50, 0.0 }
 0x55c   :  { %2367 = vrot.lane.b32.xlu2 %v6293_v39, %s3326_s6  ;;  %v1920_v39 = vsel %vm1919_vm3, %v1908_v15, %v1910_v32  ;;  %v1935_v24 = vmul.f32 %v1933_v1, %v1929_v54  ;;  %v1939_v32 = vstv %s3090_s1  ;;  %s5559_s6 = sld [smem:[#allocation8 + $0x36]] }
 0x55d   :  { %v1928_v10 = vsel %vm1838_vm13, %v1920_v39, 0.0  ;;  %s5691_s1 = sld [smem:[#allocation8 + $0xd]] }
 0x55e   :  { %v5390_v55 = vpop.permute.xlu2 %2675  ;;  %v1934_v41 = vmul.f32 %v1933_v1, %v1928_v10  ;;  %v1937_v6 = vadd.f32 %v1935_v24, %v1893_v37 }
 0x55f   :  { %2415 = vrot.lane.b32.xlu0 %v6296_v35, %s3327_s4  ;;  %2413 = vrot.lane.b32.xlu1 %v6297_v52, %s3327_s4 }
 0x560   :  { %v1936_v62 = vadd.f32 %v1934_v41, %v1892_v23  ;;  %v1922_v23 = vsel %vm1919_vm3, %v4952_v14, %v4941_v60  ;;  %v1989_v14 = vstv %s5404_s13  ;;  %s3119_s13 = sld [smem:[#allocation8 + $0x14]] }
 0x561   :  { %v2630_v22 = vpop.permute.xlu0 %2629  ;;  %v2628_v40 = vpop.permute.xlu1 %2627 }
 0x562   :  { %v5407_v49 = vsel %vm2631_vm5, %v2626_v42, %v2628_v40  ;;  %v5410_v41 = vsel %vm2631_vm5, %v2628_v40, %v2630_v22  ;;  %v1930_v42 = vsel %vm1838_vm13, %v1922_v23, 0.0 }
 0x563   :  { %v1940_v54 = vmul.f32 %v1939_v32, %v1930_v42 }
 0x564   :  { %2417 = vrot.lane.b32.xlu2 %v4623_v57, %s3327_s4  ;;  %v1923_v57 = vsel %vm1919_vm3, %v4941_v60, %v4769_v44  ;;  %v1983_v44 = vstv %s3091_s12  ;;  %vm2681_vm3 = vcmask 105472   ;;  %s5580_s4 = sld [smem:[#allocation8 + $0x3d]] }
 0x565   :  { %v1931_v1 = vsel %vm1839_vm9, %v1923_v57, 0.0  ;;  %v1942_v10 = vadd.f32 %v1940_v54, %v1936_v62  ;;  %s3118_s12 = sld [smem:[#allocation8 + $0x3e]] }
 0x566   :  { %v2012_v17 = vpop.permute.xlu2 %2011  ;;  %v1941_v60 = vmul.f32 %v1939_v32, %v1931_v1 }
 0x567   :  { %2465 = vrot.lane.b32.xlu0 %v4689_v48, %s3329_s10  ;;  %2463 = vrot.lane.b32.xlu1 %v4696_v28, %s3329_s10  ;;  %v1980_v28 = vsel %vm1838_vm13, %v5075_v29, 0.0 }
 0x568   :  { %v1943_v37 = vadd.f32 %v1941_v60, %v1937_v6  ;;  %v1990_v40 = vmul.f32 %v1989_v14, %v1980_v28 }
 0x569   :  { %v1960_v53 = vpop.permute.xlu0 %1959  ;;  %v1958_v31 = vpop.permute.xlu1 %1957 }
 0x56a   :  { %v1971_v15 = vsel %vm1969_vm12, %v1960_v53, %v1962_v46  ;;  %v1970_v39 = vsel %vm1969_vm12, %v1958_v31, %v1960_v53  ;;  %v2031_v53 = vsel %vm1839_vm9, %v5150_v33, 0.0  ;;  %v6298_v33 = vld [vmem:[#allocation91_spill] sm:$0xff]  ;;  %vm2731_vm12 = vcmask 1022976  }
 0x56b   :  { %v1979_v48 = vsel %vm1839_vm9, %v1971_v15, 0.0  ;;  %v1978_v46 = vsel %vm1838_vm13, %v1970_v39, 0.0 }
 0x56c   :  { %2467 = vrot.lane.b32.xlu2 %v4687_v2, %s3329_s10  ;;  %v1981_v2 = vsel %vm1839_vm9, %v5069_v16, 0.0  ;;  %v1985_v24 = vmul.f32 %v1983_v44, %v1979_v48  ;;  %v1984_v35 = vmul.f32 %v1983_v44, %v1978_v46  ;;  %v6300_v46 = vld [vmem:[#allocation46_spill] sm:$0xff]  ;;  %s3106_s10 = sld [smem:[#allocation8 + $0x44]] }
 0x56d   :  { %v1991_v52 = vmul.f32 %v1989_v14, %v1981_v2 }
 0x56e   :  { %v5428_v50 = vpop.permute.xlu2 %2725  ;;  %v1987_v22 = vadd.f32 %v1985_v24, %v1943_v37  ;;  %v1986_v16 = vadd.f32 %v1984_v35, %v1942_v10  ;;  %v6301_v10 = vld [vmem:[#allocation93_spill] sm:$0xff]  ;;  %v2083_v35 = vstv %s3095_s17  ;;  %s5721_s17 = sld [smem:[#allocation8 + $0x4c]] }
 0x56f   :  { %2515 = vrot.lane.b32.xlu0 %v4758_v36, %s3330_s2  ;;  %2513 = vrot.lane.b32.xlu1 %v4771_v11, %s3330_s2  ;;  %v2033_v36 = vstv %s3093_s15  ;;  %s3120_s15 = sld [smem:[#allocation8 + $0x45]] }
 0x570   :  { %v1993_v29 = vadd.f32 %v1991_v52, %v1987_v22  ;;  %v1992_v62 = vadd.f32 %v1990_v40, %v1986_v16 }
 0x571   :  { %v2680_v6 = vpop.permute.xlu0 %2679  ;;  %v2678_v23 = vpop.permute.xlu1 %2677 }
 0x572   :  { %v5451_v1 = vsel %vm2681_vm3, %v5390_v55, %v2678_v23  ;;  %v2039_v55 = vstv %s3094_s16  ;;  %s5719_s16 = sld [smem:[#allocation8 + $0x1b]] }
 0x573   :  { %v2041_v15 = vmul.f32 %v2039_v55, %v2031_v53 }
 0x574   :  { %2517 = vrot.lane.b32.xlu2 %v4756_v20, %s3330_s2  ;;  %v5454_v20 = vsel %vm2681_vm3, %v2678_v23, %v2680_v6  ;;  %v2080_v23 = vsel %vm1838_vm13, %v5181_v43, 0.0  ;;  %s5608_s2 = sld [smem:[#allocation8 + $0x1a]] }
 0x576   :  { %v2062_v57 = vpop.permute.xlu2 %2061 }
 0x577   :  { %2571 = vrot.lane.b32.xlu0 %v4826_v9, %s3331_s11  ;;  %2569 = vrot.lane.b32.xlu1 %v4837_v45, %s3331_s11  ;;  %v2030_v9 = vsel %vm1838_vm13, %v5156_v21, 0.0 }
 0x578   :  { %v2040_v54 = vmul.f32 %v2039_v55, %v2030_v9 }
 0x579   :  { %v2010_v11 = vpop.permute.xlu0 %2009  ;;  %v2008_v44 = vpop.permute.xlu1 %2007 }
 0x57a   :  { %v2021_v42 = vsel %vm2019_vm15, %v2010_v11, %v2012_v17  ;;  %v2020_v60 = vsel %vm2019_vm15, %v2008_v44, %v2010_v11  ;;  %vm2781_vm15 = vcmask 891904  }
 0x57b   :  { %v2028_v14 = vsel %vm1838_vm13, %v2020_v60, 0.0  ;;  %v6304_v60 = vld [vmem:[#allocation56_spill] sm:$0xff] }
 0x57c   :  { %2573 = vrot.lane.b32.xlu2 %v4824_v3, %s3331_s11  ;;  %v2029_v3 = vsel %vm1839_vm9, %v2021_v42, 0.0  ;;  %v2034_v17 = vmul.f32 %v2033_v36, %v2028_v14  ;;  %s3108_s11 = sld [smem:[#allocation8 + $0x4b]] }
 0x57d   :  { %v2035_v45 = vmul.f32 %v2033_v36, %v2029_v3  ;;  %v6303_v3 = vld [vmem:[#allocation49_spill] sm:$0xff] }
 0x57e   :  { %v2776_v32 = vpop.permute.xlu2 %2775  ;;  %v2036_v2 = vadd.f32 %v2034_v17, %v1992_v62 }
 0x57f   :  { %v2037_v31 = vadd.f32 %v2035_v45, %v1993_v29  ;;  %2621 = vrot.lane.b32.xlu0 %v4893_v26, %s3332_s19  ;;  %2619 = vrot.lane.b32.xlu1 %v6298_v33, %s3332_s19  ;;  %v6299_v26 = vld [vmem:[#allocation92_spill] sm:$0xff]  ;;  %v2081_v29 = vsel %vm1839_vm9, %v5178_v63, 0.0  ;;  %v6302_v63 = vld [vmem:[#allocation54_spill] sm:$0xff] }
 0x580   :  { %v2042_v28 = vadd.f32 %v2040_v54, %v2036_v2  ;;  %v6305_v54 = vld [vmem:[#allocation57_spill] sm:$0xff]  ;;  %v2133_v2 = vstv %s3097_s23  ;;  %s5739_s23 = sld [smem:[#allocation8 + $0x53]] }
 0x581   :  { %v2043_v21 = vadd.f32 %v2041_v15, %v2037_v31  ;;  %v2730_v48 = vpop.permute.xlu0 %2729  ;;  %v2728_v37 = vpop.permute.xlu1 %2727 }
 0x582   :  { %v5482_v24 = vsel %vm2731_vm12, %v5428_v50, %v2728_v37  ;;  %v2089_v50 = vstv %s3096_s18  ;;  %s5736_s18 = sld [smem:[#allocation8 + $0x22]] }
 0x583   :  { %v2091_v42 = vmul.f32 %v2089_v50, %v2081_v29  ;;  %v2090_v55 = vmul.f32 %v2089_v50, %v2080_v23  ;;  %v2863_v23 = vld.sshfl [vmem:[#allocation1 + $0x10] sm:$0xff pattern:$0x73625140] }
 0x584   :  { %2623 = vrot.lane.b32.xlu2 %v4891_v25, %s3332_s19  ;;  %v5485_v25 = vsel %vm2731_vm12, %v2728_v37, %v2730_v48  ;;  %v2131_v37 = vsel %vm1839_vm9, %v5195_v18, 0.0  ;;  %s5624_s19 = sld [smem:[#allocation8 + $0x21]] }
 0x586   :  { %v2112_v39 = vpop.permute.xlu2 %2111 }
 0x587   :  { %2673 = vrot.lane.b32.xlu0 %v6299_v26, %s3333_s20  ;;  %2671 = vrot.lane.b32.xlu1 %v6301_v10, %s3333_s20  ;;  %v2130_v26 = vsel %vm1838_vm13, %v5198_v8, 0.0 }
 0x589   :  { %v2060_v52 = vpop.permute.xlu0 %2059  ;;  %v2058_v16 = vpop.permute.xlu1 %2057 }
 0x58a   :  { %v2071_v40 = vsel %vm2069_vm4, %v2060_v52, %v2062_v57  ;;  %v2070_v62 = vsel %vm2069_vm4, %v2058_v16, %v2060_v52  ;;  %vm2831_vm4 = vcmask 760832  }
 0x58b   :  { %v2079_v6 = vsel %vm1839_vm9, %v2071_v40, 0.0  ;;  %v2078_v11 = vsel %vm1838_vm13, %v2070_v62, 0.0 }
 0x58c   :  { %2669 = vrot.lane.b32.xlu2 %v6300_v46, %s3333_s20  ;;  %v2085_v36 = vmul.f32 %v2083_v35, %v2079_v6  ;;  %v2084_v57 = vmul.f32 %v2083_v35, %v2078_v11  ;;  %s3110_s20 = sld [smem:[#allocation8 + $0x52]] }
 0x58e   :  { %v2826_v22 = vpop.permute.xlu2 %2825  ;;  %v2087_v44 = vadd.f32 %v2085_v36, %v2043_v21  ;;  %v2086_v53 = vadd.f32 %v2084_v57, %v2042_v28  ;;  %v2139_v28 = vstv %s3098_s24  ;;  %v2183_v36 = vstv %s3099_s25  ;;  %s3125_s24 = sld [smem:[#allocation8 + $0x29]] }
 0x58f   :  { %2723 = vrot.lane.b32.xlu0 %v6302_v63, %s3334_s22  ;;  %2721 = vrot.lane.b32.xlu1 %v6304_v60, %s3334_s22  ;;  %v2141_v35 = vmul.f32 %v2139_v28, %v2131_v37  ;;  %v2140_v40 = vmul.f32 %v2139_v28, %v2130_v26  ;;  %s3126_s25 = sld [smem:[#allocation8 + $0x5a]] }
 0x590   :  { %v2093_v43 = vadd.f32 %v2091_v42, %v2087_v44  ;;  %v2092_v14 = vadd.f32 %v2090_v55, %v2086_v53  ;;  %v2181_v55 = vsel %vm1839_vm9, %v5207_v13, 0.0  ;;  %v2868_v13 = vld.sshfl [vmem:[#allocation1 + $0x30] sm:$0xff pattern:$0x73625140] }
 0x591   :  { %v2780_v9 = vpop.permute.xlu0 %2779  ;;  %v2778_v17 = vpop.permute.xlu1 %2777 }
 0x592   :  { %v5512_v15 = vsel %vm2781_vm15, %v2776_v32, %v2778_v17  ;;  %v5515_v31 = vsel %vm2781_vm15, %v2778_v17, %v2780_v9  ;;  %v2866_v17 = vld.sshfl [vmem:[#allocation1 + $0x20] sm:$0xff pattern:$0x73625140] }
 0x594   :  { %2719 = vrot.lane.b32.xlu2 %v6303_v3, %s3334_s22  ;;  %v2180_v3 = vsel %vm1838_vm13, %v5210_v51, 0.0  ;;  %s5639_s22 = sld [smem:[#allocation8 + $0x28]] }
 0x596   :  { %v2162_v45 = vpop.permute.xlu2 %2161 }
 0x597   :  { %2773 = vrot.lane.b32.xlu0 %v5093_v30, %s3335_s28  ;;  %2771 = vrot.lane.b32.xlu1 %v6305_v54, %s3335_s28 }
 0x599   :  { %v2110_v33 = vpop.permute.xlu0 %2109  ;;  %v2108_v32 = vpop.permute.xlu1 %2107 }
 0x59a   :  { %v2121_v48 = vsel %vm2119_vm0, %v2110_v33, %v2112_v39 }
 0x59b   :  { %v2129_v30 = vsel %vm1839_vm9, %v2121_v48, 0.0  ;;  %v2239_v48 = vstv %s5551_s30  ;;  %s3338_s30 = smov [#allocation9]  }
 0x59c   :  { %2769 = vrot.lane.b32.xlu2 %v5106_v56, %s3335_s28  ;;  %v2120_v56 = vsel %vm2119_vm0, %v2108_v32, %v2110_v33  ;;  %v2135_v46 = vmul.f32 %v2133_v2, %v2129_v30  ;;  %v2867_v33 = vld.sshfl [vmem:[#allocation1 + $0x28] sm:$0xff pattern:$0x73625140]  ;;  %vm2195_vm0 = vcmp.lt.s32.totalorder %v4327_v58, 14  ;;  %s3112_s28 = sld [smem:[#allocation8 + $0x59]] }
 0x59d   :  { %v2128_v10 = vsel %vm1838_vm13, %v2120_v56, 0.0  ;;  %v2245_v56 = vstv %s5559_s6  ;;  %v2237_v26 = vsel %vm2195_vm0, %v5219_v34, 0.0  ;;  %s3011_s6 = sshll.u32 %s3338_s30, 4  ;;  %s3012_s6 = int_to_ptr.vmem [resolvable:$true] %s3011_s6 }
 0x59e   :  { %v5523_v21 = vpop.permute.xlu2 %2217  ;;  %v2134_v39 = vmul.f32 %v2133_v2, %v2128_v10  ;;  %v2137_v52 = vadd.f32 %v2135_v46, %v2093_v43 }
 0x59f   :  { %2823 = vrot.lane.b32.xlu0 %v5131_v0, %s3336_s9  ;;  %2821 = vrot.lane.b32.xlu1 %v5133_v5, %s3336_s9  ;;  %v2862_v5 = vld.sshfl [vmem:[#allocation1 + $0x8] sm:$0xff pattern:$0x73625140] }
 0x5a0   :  { %v2136_v16 = vadd.f32 %v2134_v39, %v2092_v14  ;;  %v2143_v18 = vadd.f32 %v2141_v35, %v2137_v52 }
 0x5a1   :  { %v2830_v8 = vpop.permute.xlu0 %2829  ;;  %v2828_v6 = vpop.permute.xlu1 %2827 }
 0x5a2   :  { %v2142_v29 = vadd.f32 %v2140_v40, %v2136_v16  ;;  %v5546_v62 = vsel %vm2831_vm4, %v2826_v22, %v2828_v6  ;;  %v5549_v0 = vsel %vm2831_vm4, %v2828_v6, %v2830_v8  ;;  %v2189_v22 = vstv %s3100_s3  ;;  %s3127_s3 = sld [smem:[#allocation8 + $0x30]] }
 0x5a3   :  { %v2190_v54 = vmul.f32 %v2189_v22, %v2180_v3  ;;  %v2247_v16 = vmul.f32 %v2245_v56, %v2237_v26  ;;  %v2289_v6 = vstv %s5572_s7 }
 0x5a4   :  { %2819 = vrot.lane.b32.xlu2 %v5140_v61, %s3336_s9  ;;  %v2861_v61 = vld.sshfl [vmem:[#allocation1] sm:$0xff pattern:$0x73625140]  ;;  %s5654_s9 = sld [smem:[#allocation8 + $0x2f]] }
 0x5a6   :  { %v5543_v50 = vpop.permute.xlu2 %2267 }
 0x5a7   :  { %2873 = vrot.lane.b32.xlu0 %v2863_v23, %s3337_s29  ;;  %2871 = vrot.lane.b32.xlu1 %v2862_v5, %s3337_s29 }
 0x5a9   :  { %v2160_v11 = vpop.permute.xlu0 %2159  ;;  %v2158_v42 = vpop.permute.xlu1 %2157 }
 0x5aa   :  { %v2171_v57 = vsel %vm2169_vm1, %v2160_v11, %v2162_v45  ;;  %v2170_v63 = vsel %vm2169_vm1, %v2158_v42, %v2160_v11  ;;  %v2191_v45 = vmul.f32 %v2189_v22, %v2181_v55  ;;  %vm2194_vm1 = vcmp.lt.s32.totalorder %v4330_v19, 14 }
 0x5ab   :  { %v2179_v53 = vsel %vm1839_vm9, %v2171_v57, 0.0  ;;  %v2178_v43 = vsel %vm1838_vm13, %v2170_v63, 0.0  ;;  %v2236_v39 = vsel %vm2194_vm1, %v5222_v4, 0.0  ;;  %v2287_v11 = vsel %vm2195_vm0, %v5243_v12, 0.0 }
 0x5ac   :  { %2869 = vrot.lane.b32.xlu2 %v2861_v61, %s3337_s29  ;;  %v2185_v60 = vmul.f32 %v2183_v36, %v2179_v53  ;;  %v2184_v9 = vmul.f32 %v2183_v36, %v2178_v43  ;;  %v2295_v36 = vstv %s5580_s4  ;;  %v2286_v22 = vsel %vm2194_vm1, %v5246_v38, 0.0 }
 0x5ad   :  { %v2297_v63 = vmul.f32 %v2295_v36, %v2287_v11  ;;  %v2296_v43 = vmul.f32 %v2295_v36, %v2286_v22  ;;  %v2439_v36 = vstv %s5624_s19 }
 0x5ae   :  { %v5554_v44 = vpop.permute.xlu2 %2317  ;;  %v2187_v14 = vadd.f32 %v2185_v60, %v2143_v18  ;;  %v2186_v2 = vadd.f32 %v2184_v9, %v2142_v29  ;;  %v2246_v18 = vmul.f32 %v2245_v56, %v2236_v39 }
 0x5af   :  { %2879 = vrot.lane.b32.xlu0 %v2868_v13, %s3337_s29  ;;  %2877 = vrot.lane.b32.xlu1 %v2867_v33, %s3337_s29 }
 0x5b0   :  { %v2193_v51 = vadd.f32 %v2191_v45, %v2187_v14  ;;  %v2192_v28 = vadd.f32 %v2190_v54, %v2186_v2  ;;  %v2339_v45 = vstv %s5591_s8  ;;  %v2345_v54 = vstv %s3106_s10  ;;  %s3013_s8 = sshll.u32 %s5819_s5, 4  ;;  %s3014_s8 = int_to_ptr.hbm [resolvable:$true] %s3013_s8 }
 0x5b1   :  { %v2216_v32 = vpop.permute.xlu0 %2215  ;;  %v2214_v30 = vpop.permute.xlu1 %2213  ;;  %v2337_v2 = vsel %vm2195_vm0, %v5263_v47, 0.0 }
 0x5b2   :  { %v2227_v37 = vsel %vm2225_vm2, %v2216_v32, %v5523_v21  ;;  %v2226_v10 = vsel %vm2225_vm2, %v2214_v30, %v2216_v32  ;;  %vm2551_vm2 = vcmp.lt.s32.totalorder %v4327_v58, 13 }
 0x5b3   :  { %v2235_v46 = vsel %vm2195_vm0, %v2227_v37, 0.0  ;;  %v2234_v35 = vsel %vm2194_vm1, %v2226_v10, 0.0  ;;  %v2347_v37 = vmul.f32 %v2345_v54, %v2337_v2  ;;  %v2389_v10 = vstv %s5608_s2 }
 0x5b4   :  { %2875 = vrot.lane.b32.xlu2 %v2866_v17, %s3337_s29  ;;  %v2241_v21 = vmul.f32 %v2239_v48, %v2235_v46  ;;  %v2240_v40 = vmul.f32 %v2239_v48, %v2234_v35  ;;  %v2336_v48 = vsel %vm2194_vm1, %v5266_v7, 0.0  ;;  %v2489_v2 = vstv %s5639_s22  ;;  %s3128_s29 = sld [smem:[#allocation8 + $0x61]] }
 0x5b5   :  { %v2346_v56 = vmul.f32 %v2345_v54, %v2336_v48 }
 0x5b6   :  { %v2368_v52 = vpop.permute.xlu2 %2367  ;;  %v2243_v34 = vadd.f32 %v2241_v21, %v2193_v51  ;;  %v2242_v8 = vadd.f32 %v2240_v40, %v2192_v28  ;;  %v2395_v40 = vstv %s3108_s11 }
 0x5b8   :  { %v2249_v29 = vadd.f32 %v2247_v16, %v2243_v34  ;;  %v2248_v61 = vadd.f32 %v2246_v18, %v2242_v8  ;;  %v2387_v16 = vsel %vm2195_vm0, %v5283_v59, 0.0  ;;  %v2386_v8 = vsel %vm2194_vm1, %v5286_v27, 0.0 }
 0x5b9   :  { %v2266_v23 = vpop.permute.xlu0 %2265  ;;  %v2264_v5 = vpop.permute.xlu1 %2263 }
 0x5ba   :  { %v2277_v4 = vsel %vm2275_vm7, %v2266_v23, %v5543_v50  ;;  %v2276_v42 = vsel %vm2275_vm7, %v2264_v5, %v2266_v23  ;;  %v2397_v23 = vmul.f32 %v2395_v40, %v2387_v16  ;;  %vm2550_vm7 = vcmp.lt.s32.totalorder %v4330_v19, 13 }
 0x5bb   :  { %v2285_v57 = vsel %vm2195_vm0, %v2277_v4, 0.0  ;;  %v2284_v50 = vsel %vm2194_vm1, %v2276_v42, 0.0  ;;  %v2396_v4 = vmul.f32 %v2395_v40, %v2386_v8 }
 0x5bc   :  { %v2291_v55 = vmul.f32 %v2289_v6, %v2285_v57  ;;  %v2290_v53 = vmul.f32 %v2289_v6, %v2284_v50  ;;  %v6306_v50 = vld [vmem:[#allocation59_spill] sm:$0xff] }
 0x5be   :  { %v2293_v3 = vadd.f32 %v2291_v55, %v2249_v29  ;;  %v2418_v60 = vpop.permute.xlu2 %2417  ;;  %v2292_v12 = vadd.f32 %v2290_v53, %v2248_v61  ;;  %v2445_v55 = vstv %s3110_s20  ;;  %v2437_v53 = vsel %vm2195_vm0, %v6306_v50, 0.0 }
 0x5c0   :  { %v2299_v9 = vadd.f32 %v2297_v63, %v2293_v3  ;;  %v2298_v13 = vadd.f32 %v2296_v43, %v2292_v12  ;;  %v6307_v43 = vld [vmem:[#allocation52_spill] sm:$0xff] }
 0x5c1   :  { %v2316_v14 = vpop.permute.xlu0 %2315  ;;  %v2314_v38 = vpop.permute.xlu1 %2313  ;;  %v2436_v12 = vsel %vm2194_vm1, %v6307_v43, 0.0  ;;  %v2595_v43 = vstv %s5671_s21 }
 0x5c2   :  { %v2327_v17 = vsel %vm2325_vm8, %v2316_v14, %v5554_v44  ;;  %v2326_v51 = vsel %vm2325_vm8, %v2314_v38, %v2316_v14  ;;  %v2447_v14 = vmul.f32 %v2445_v55, %v2437_v53  ;;  %vm6312_vm8 = vcmask 367616  }
 0x5c3   :  { %v2335_v33 = vsel %vm2195_vm0, %v2327_v17, 0.0  ;;  %v2334_v44 = vsel %vm2194_vm1, %v2326_v51, 0.0  ;;  %v2446_v17 = vmul.f32 %v2445_v55, %v2436_v12 }
 0x5c4   :  { %v2341_v32 = vmul.f32 %v2339_v45, %v2335_v33  ;;  %v2340_v28 = vmul.f32 %v2339_v45, %v2334_v44  ;;  %v2495_v44 = vstv %s3112_s28 }
 0x5c6   :  { %v2343_v30 = vadd.f32 %v2341_v32, %v2299_v9  ;;  %v2342_v26 = vadd.f32 %v2340_v28, %v2298_v13  ;;  %v2468_v47 = vpop.permute.xlu2 %2467  ;;  %v6308_v28 = vld [vmem:[#allocation60_spill] sm:$0xff] }
 0x5c8   :  { %v2349_v46 = vadd.f32 %v2347_v37, %v2343_v30  ;;  %v2348_v21 = vadd.f32 %v2346_v56, %v2342_v26  ;;  %v2487_v37 = vsel %vm2195_vm0, %v6308_v28, 0.0  ;;  %v6309_v26 = vld [vmem:[#allocation62_spill] sm:$0xff] }
 0x5c9   :  { %v2366_v39 = vpop.permute.xlu0 %2365  ;;  %v2364_v7 = vpop.permute.xlu1 %2363 }
 0x5ca   :  { %v2377_v35 = vsel %vm2375_vm10, %v2366_v39, %v2368_v52  ;;  %v2376_v18 = vsel %vm2375_vm10, %v2364_v7, %v2366_v39  ;;  %vm6314_vm10 = vmmov %vm6312_vm8 }
 0x5cb   :  { %v2385_v34 = vsel %vm2195_vm0, %v2377_v35, 0.0  ;;  %v2384_v52 = vsel %vm2194_vm1, %v2376_v18, 0.0  ;;  %v2497_v35 = vmul.f32 %v2495_v44, %v2487_v37  ;;  %v2539_v18 = vstv %s5654_s9 }
 0x5cc   :  { %v2391_v29 = vmul.f32 %v2389_v10, %v2385_v34  ;;  %v2390_v6 = vmul.f32 %v2389_v10, %v2384_v52 }
 0x5ce   :  { %v2393_v61 = vadd.f32 %v2391_v29, %v2349_v46  ;;  %v2392_v5 = vadd.f32 %v2390_v6, %v2348_v21  ;;  %v2518_v42 = vpop.permute.xlu2 %2517  ;;  %v2486_v46 = vsel %vm2194_vm1, %v6309_v26, 0.0 }
 0x5cf   :  { %v2496_v40 = vmul.f32 %v2495_v44, %v2486_v46  ;;  %v2645_v46 = vstv %s5691_s1 }
 0x5d0   :  { %v2399_v59 = vadd.f32 %v2397_v23, %v2393_v61  ;;  %v2398_v57 = vadd.f32 %v2396_v4, %v2392_v5  ;;  %v2545_v23 = vstv %s5660_s14  ;;  %v6310_v61 = vld [vmem:[#allocation55_spill] sm:$0xff] }
 0x5d1   :  { %v2416_v11 = vpop.permute.xlu0 %2415  ;;  %v2414_v27 = vpop.permute.xlu1 %2413  ;;  %v2537_v4 = vsel %vm2195_vm0, %v6310_v61, 0.0 }
 0x5d2   :  { %v2427_v22 = vsel %vm2425_vm11, %v2416_v11, %v2418_v60  ;;  %v2426_v3 = vsel %vm2425_vm11, %v2414_v27, %v2416_v11  ;;  %v2547_v27 = vmul.f32 %v2545_v23, %v2537_v4  ;;  %vm2881_vm11 = vcmask 629760  }
 0x5d3   :  { %v2435_v63 = vsel %vm2195_vm0, %v2427_v22, 0.0  ;;  %v2434_v60 = vsel %vm2194_vm1, %v2426_v3, 0.0 }
 0x5d4   :  { %v2441_v9 = vmul.f32 %v2439_v36, %v2435_v63  ;;  %v2440_v45 = vmul.f32 %v2439_v36, %v2434_v60  ;;  %v6311_v36 = vld [vmem:[#allocation63_spill] sm:$0xff] }
 0x5d5   :  { %v2536_v11 = vsel %vm2194_vm1, %v6311_v36, 0.0  ;;  %v2695_v36 = vstv %s3119_s13 }
 0x5d6   :  { %v2443_v13 = vadd.f32 %v2441_v9, %v2399_v59  ;;  %v2442_v38 = vadd.f32 %v2440_v45, %v2398_v57  ;;  %v2546_v53 = vmul.f32 %v2545_v23, %v2536_v11 }
 0x5d8   :  { %v2449_v54 = vadd.f32 %v2447_v14, %v2443_v13  ;;  %v2448_v51 = vadd.f32 %v2446_v17, %v2442_v38  ;;  %v2601_v14 = vstv %s5678_s0  ;;  %v6313_v13 = vld [vmem:[#allocation65_spill] sm:$0xff] }
 0x5d9   :  { %v2466_v33 = vpop.permute.xlu0 %2465  ;;  %v2464_v32 = vpop.permute.xlu1 %2463  ;;  %v2593_v17 = vsel %vm2551_vm2, %v6313_v13, 0.0 }
 0x5da   :  { %v2477_v48 = vsel %vm2475_vm14, %v2466_v33, %v2468_v47  ;;  %v2476_v56 = vsel %vm2475_vm14, %v2464_v32, %v2466_v33  ;;  %v2574_v47 = vpop.permute.xlu2 %2573  ;;  %v2603_v44 = vmul.f32 %v2601_v14, %v2593_v17 }
 0x5db   :  { %v2485_v30 = vsel %vm2195_vm0, %v2477_v48, 0.0  ;;  %v2484_v39 = vsel %vm2194_vm1, %v2476_v56, 0.0 }
 0x5dc   :  { %v2491_v10 = vmul.f32 %v2489_v2, %v2485_v30  ;;  %v2490_v21 = vmul.f32 %v2489_v2, %v2484_v39  ;;  %v6315_v2 = vld [vmem:[#allocation58_spill] sm:$0xff] }
 0x5dd   :  { %v2592_v33 = vsel %vm2550_vm7, %v6315_v2, 0.0  ;;  %v2743_v2 = vsel %vm2551_vm2, %v5485_v25, 0.0  ;;  %v2801_v25 = vstv %s5739_s23 }
 0x5de   :  { %v2493_v7 = vadd.f32 %v2491_v10, %v2449_v54  ;;  %v2492_v16 = vadd.f32 %v2490_v21, %v2448_v51  ;;  %v2602_v37 = vmul.f32 %v2601_v14, %v2592_v33  ;;  %v2745_v14 = vstv %s5719_s16 }
 0x5e0   :  { %v2499_v34 = vadd.f32 %v2497_v35, %v2493_v7  ;;  %v2498_v29 = vadd.f32 %v2496_v40, %v2492_v16  ;;  %v2651_v35 = vstv %s3118_s12  ;;  %v2643_v7 = vsel %vm2551_vm2, %v5410_v41, 0.0 }
 0x5e1   :  { %v2516_v8 = vpop.permute.xlu0 %2515  ;;  %v2514_v6 = vpop.permute.xlu1 %2513 }
 0x5e2   :  { %v2527_v52 = vsel %vm2525_vm6, %v2516_v8, %v2518_v42  ;;  %v2526_v59 = vsel %vm2525_vm6, %v2514_v6, %v2516_v8  ;;  %v2624_v55 = vpop.permute.xlu2 %2623 }
 0x5e3   :  { %v2535_v5 = vsel %vm2195_vm0, %v2527_v52, 0.0  ;;  %v2534_v42 = vsel %vm2194_vm1, %v2526_v59, 0.0  ;;  %v2653_v52 = vmul.f32 %v2651_v35, %v2643_v7  ;;  %v2793_v7 = vsel %vm2551_vm2, %v5515_v31, 0.0 }
 0x5e4   :  { %v2541_v57 = vmul.f32 %v2539_v18, %v2535_v5  ;;  %v2540_v22 = vmul.f32 %v2539_v18, %v2534_v42  ;;  %vm6316_vm0 = vcmask 1041409  }
 0x5e6   :  { %v2543_v50 = vadd.f32 %v2541_v57, %v2499_v34  ;;  %v2542_v63 = vadd.f32 %v2540_v22, %v2498_v29  ;;  %v2642_v34 = vsel %vm2550_vm7, %v5407_v49, 0.0  ;;  %v2701_v57 = vstv %s3120_s15 }
 0x5e7   :  { %v2652_v23 = vmul.f32 %v2651_v35, %v2642_v34  ;;  %v2692_v22 = vsel %vm2550_vm7, %v5451_v1, 0.0  ;;  %v2792_v35 = vsel %vm2550_vm7, %v5512_v15, 0.0 }
 0x5e8   :  { %v2549_v3 = vadd.f32 %v2547_v27, %v2543_v50  ;;  %v2548_v9 = vadd.f32 %v2546_v53, %v2542_v63  ;;  %v2693_v27 = vsel %vm2551_vm2, %v5454_v20, 0.0  ;;  %v2751_v20 = vstv %s5721_s17 }
 0x5e9   :  { %v2572_v12 = vpop.permute.xlu0 %2571  ;;  %v2570_v45 = vpop.permute.xlu1 %2569 }
 0x5ea   :  { %v2583_v60 = vsel %vm6312_vm8, %v2572_v12, %v2574_v47  ;;  %v2582_v54 = vsel %vm6314_vm10, %v2570_v45, %v2572_v12  ;;  %v2670_v56 = vpop.permute.xlu2 %2669 }
 0x5eb   :  { %v2591_v38 = vsel %vm2551_vm2, %v2583_v60, 0.0  ;;  %v2590_v48 = vsel %vm2550_vm7, %v2582_v54, 0.0  ;;  %v2742_v54 = vsel %vm2550_vm7, %v5482_v24, 0.0 }
 0x5ec   :  { %v2597_v51 = vmul.f32 %v2595_v43, %v2591_v38  ;;  %v2596_v32 = vmul.f32 %v2595_v43, %v2590_v48  ;;  %v2703_v43 = vmul.f32 %v2701_v57, %v2693_v27 }
 0x5ee   :  { %v2599_v28 = vadd.f32 %v2597_v51, %v2549_v3  ;;  %v2598_v30 = vadd.f32 %v2596_v32, %v2548_v9  ;;  %v2702_v3 = vmul.f32 %v2701_v57, %v2692_v22  ;;  %v2843_v57 = vsel %vm2551_vm2, %v5549_v0, 0.0 }
 0x5f0   :  { %v2605_v26 = vadd.f32 %v2603_v44, %v2599_v28  ;;  %v2604_v10 = vadd.f32 %v2602_v37, %v2598_v30  ;;  %v2752_v28 = vmul.f32 %v2751_v20, %v2742_v54  ;;  %v2753_v37 = vmul.f32 %v2751_v20, %v2743_v2 }
 0x5f1   :  { %v2622_v47 = vpop.permute.xlu0 %2621  ;;  %v2620_v21 = vpop.permute.xlu1 %2619  ;;  %v2901_v54 = vstv %s3128_s29 }
 0x5f2   :  { %v2633_v39 = vsel %vm2631_vm5, %v2622_v47, %v2624_v55  ;;  %v2632_v16 = vsel %vm2631_vm5, %v2620_v21, %v2622_v47  ;;  %v2720_v59 = vpop.permute.xlu2 %2719  ;;  %v2795_v47 = vstv %s5736_s18 }
 0x5f3   :  { %v2641_v40 = vsel %vm2551_vm2, %v2633_v39, 0.0  ;;  %v2640_v8 = vsel %vm2550_vm7, %v2632_v16, 0.0 }
 0x5f4   :  { %v2647_v18 = vmul.f32 %v2645_v46, %v2641_v40  ;;  %v2646_v29 = vmul.f32 %v2645_v46, %v2640_v8 }
 0x5f6   :  { %v2649_v6 = vadd.f32 %v2647_v18, %v2605_v26  ;;  %v2648_v61 = vadd.f32 %v2646_v29, %v2604_v10  ;;  %v2802_v29 = vmul.f32 %v2801_v25, %v2792_v35 }
 0x5f8   :  { %v2655_v41 = vadd.f32 %v2653_v52, %v2649_v6  ;;  %v2654_v5 = vadd.f32 %v2652_v23, %v2648_v61  ;;  %v2803_v52 = vmul.f32 %v2801_v25, %v2793_v7 }
 0x5f9   :  { %v2674_v4 = vpop.permute.xlu0 %2673  ;;  %v2672_v11 = vpop.permute.xlu1 %2671 }
 0x5fa   :  { %v2682_v49 = vsel %vm2681_vm3, %v2670_v56, %v2672_v11  ;;  %v2683_v42 = vsel %vm2681_vm3, %v2672_v11, %v2674_v4  ;;  %v2770_v33 = vpop.permute.xlu2 %2769  ;;  %v2845_v4 = vstv %s3125_s24  ;;  %v2842_v11 = vsel %vm2550_vm7, %v5546_v62, 0.0 }
 0x5fb   :  { %v2690_v55 = vsel %vm2550_vm7, %v2682_v49, 0.0  ;;  %v2691_v50 = vsel %vm2551_vm2, %v2683_v42, 0.0 }
 0x5fc   :  { %v2696_v53 = vmul.f32 %v2695_v36, %v2690_v55  ;;  %v2697_v63 = vmul.f32 %v2695_v36, %v2691_v50 }
 0x5fe   :  { %v2698_v12 = vadd.f32 %v2696_v53, %v2654_v5  ;;  %v2699_v9 = vadd.f32 %v2697_v63, %v2655_v41 }
 0x600   :  { %v2705_v45 = vadd.f32 %v2703_v43, %v2699_v9  ;;  %v2704_v1 = vadd.f32 %v2702_v3, %v2698_v12 }
 0x601   :  { %v2724_v60 = vpop.permute.xlu0 %2723  ;;  %v2722_v13 = vpop.permute.xlu1 %2721 }
 0x602   :  { %v2732_v17 = vsel %vm2731_vm12, %v2720_v59, %v2722_v13  ;;  %v2733_v38 = vsel %vm2731_vm12, %v2722_v13, %v2724_v60  ;;  %v2820_v8 = vpop.permute.xlu2 %2819  ;;  %v2851_v59 = vstv %s3126_s25 }
 0x603   :  { %v2740_v51 = vsel %vm2550_vm7, %v2732_v17, 0.0  ;;  %v2741_v48 = vsel %vm2551_vm2, %v2733_v38, 0.0  ;;  %v2852_v55 = vmul.f32 %v2851_v59, %v2842_v11  ;;  %v2853_v50 = vmul.f32 %v2851_v59, %v2843_v57 }
 0x604   :  { %v2746_v32 = vmul.f32 %v2745_v14, %v2740_v51  ;;  %v2747_v44 = vmul.f32 %v2745_v14, %v2741_v48 }
 0x606   :  { %v2748_v30 = vadd.f32 %v2746_v32, %v2704_v1  ;;  %v2749_v56 = vadd.f32 %v2747_v44, %v2705_v45  ;;  %v2895_v45 = vstv %s3127_s3 }
 0x608   :  { %v2755_v24 = vadd.f32 %v2753_v37, %v2749_v56  ;;  %v2754_v46 = vadd.f32 %v2752_v28, %v2748_v30 }
 0x609   :  { %v2774_v26 = vpop.permute.xlu0 %2773  ;;  %v2772_v10 = vpop.permute.xlu1 %2771 }
 0x60a   :  { %v2782_v39 = vsel %vm2781_vm15, %v2770_v33, %v2772_v10  ;;  %v2783_v21 = vsel %vm2781_vm15, %v2772_v10, %v2774_v26  ;;  %v2870_v3 = vpop.permute.xlu2 %2869  ;;  %vm2947_vm15 = vcmask 1040384  }
 0x60b   :  { %v2790_v40 = vsel %vm2550_vm7, %v2782_v39, 0.0  ;;  %v2791_v16 = vsel %vm2551_vm2, %v2783_v21, 0.0 }
 0x60c   :  { %v2796_v34 = vmul.f32 %v2795_v47, %v2790_v40  ;;  %v2797_v18 = vmul.f32 %v2795_v47, %v2791_v16 }
 0x60e   :  { %v2798_v6 = vadd.f32 %v2796_v34, %v2754_v46  ;;  %v2799_v23 = vadd.f32 %v2797_v18, %v2755_v24 }
 0x610   :  { %v2805_v41 = vadd.f32 %v2803_v52, %v2799_v23  ;;  %v2804_v15 = vadd.f32 %v2802_v29, %v2798_v6 }
 0x611   :  { %v2824_v61 = vpop.permute.xlu0 %2823  ;;  %v2822_v5 = vpop.permute.xlu1 %2821 }
 0x612   :  { %v2832_v31 = vsel %vm2831_vm4, %v2820_v8, %v2822_v5  ;;  %v2833_v36 = vsel %vm2831_vm4, %v2822_v5, %v2824_v61  ;;  %v2876_v38 = vpop.permute.xlu2 %2875 }
 0x613   :  { %v2840_v49 = vsel %vm2550_vm7, %v2832_v31, 0.0  ;;  %v2841_v42 = vsel %vm2551_vm2, %v2833_v36, 0.0 }
 0x614   :  { %v2846_v22 = vmul.f32 %v2845_v4, %v2840_v49  ;;  %v2847_v27 = vmul.f32 %v2845_v4, %v2841_v42 }
 0x616   :  { %v2848_v53 = vadd.f32 %v2846_v22, %v2804_v15  ;;  %v2849_v63 = vadd.f32 %v2847_v27, %v2805_v41  ;;  %v6317_v22 = vld [vmem:[#allocation17_spill] sm:$0xff] }
 0x618   :  { %v2855_v43 = vadd.f32 %v2853_v50, %v2849_v63  ;;  %v2854_v12 = vadd.f32 %v2852_v55, %v2848_v53  ;;  %v6318_v55 = vld [vmem:[#allocation14_spill] sm:$0xff] }
 0x619   :  { %v2874_v62 = vpop.permute.xlu0 %2873  ;;  %v2872_v9 = vpop.permute.xlu1 %2871  ;;  %v6319_v53 = vld [vmem:[#allocation18_spill] sm:$0xff] }
 0x61a   :  { %v2882_v0 = vsel %vm2881_vm11, %v2870_v3, %v2872_v9  ;;  %v2883_v60 = vsel %vm2881_vm11, %v2872_v9, %v2874_v62  ;;  %v6320_v3 = vld [vmem:[#allocation15_spill] sm:$0xff] }
 0x61b   :  { %v2890_v1 = vsel %vm2550_vm7, %v2882_v0, 0.0  ;;  %v2891_v14 = vsel %vm2551_vm2, %v2883_v60, 0.0  ;;  %v6322_v60 = vld [vmem:[#allocation16_spill] sm:$0xff] }
 0x61c   :  { %v2896_v13 = vmul.f32 %v2895_v45, %v2890_v1  ;;  %v2897_v20 = vmul.f32 %v2895_v45, %v2891_v14  ;;  %v6323_v1 = vld [vmem:[#allocation21_spill] sm:$0xff] }
 0x61e   :  { %v2898_v44 = vadd.f32 %v2896_v13, %v2854_v12  ;;  %v2899_v28 = vadd.f32 %v2897_v20, %v2855_v43  ;;  %v6321_v12 = vld [vmem:[#allocation20_spill] sm:$0xff]  ;;  %v3204_v13 = vld [vmem:[#allocation4] sm:$0xff] }
 0x621   :  { %v2880_v17 = vpop.permute.xlu0 %2879  ;;  %v2878_v2 = vpop.permute.xlu1 %2877 }
 0x622   :  { %v2884_v33 = vsel %vm2881_vm11, %v2876_v38, %v2878_v2  ;;  %v2885_v51 = vsel %vm2881_vm11, %v2878_v2, %v2880_v17  ;;  %v3205_v17 = vld [vmem:[#allocation4 + $0x8] sm:$0xff] }
 0x623   :  { %v2892_v48 = vsel %vm2550_vm7, %v2884_v33, 0.0  ;;  %v2893_v32 = vsel %vm2551_vm2, %v2885_v51, 0.0  ;;  %v3206_v33 = vld [vmem:[#allocation4 + $0x10] sm:$0xff] }
 0x624   :  { %v2902_v37 = vmul.f32 %v2901_v54, %v2892_v48  ;;  %v2903_v30 = vmul.f32 %v2901_v54, %v2893_v32  ;;  %v6324_v54 = vld [vmem:[#allocation19_spill] sm:$0xff]  ;;  %v3207_v48 = vld [vmem:[#allocation4 + $0x18] sm:$0xff] }
 0x626   :  { %v2904_v56 = vadd.f32 %v2902_v37, %v2898_v44  ;;  %v2905_v26 = vadd.f32 %v2903_v30, %v2899_v28  ;;  %v6325_v44 = vld [vmem:[#allocation24_spill] sm:$0xff]  ;;  %v3208_v37 = vld [vmem:[#allocation4 + $0x20] sm:$0xff] }
 0x628   :  { %v3129_v24 = vmul.f32 -1.442695, %v2904_v56  ;;  %v3130_v46 = vmul.f32 -1.442695, %v2905_v26  ;;  %v6326_v56 = vld [vmem:[#allocation25_spill] sm:$0xff] }
 0x62a   :  { %3196 = vpow2.f32 %v3129_v24  ;;  %v3209_v24 = vld [vmem:[#allocation4 + $0x28] sm:$0xff] }
 0x62b   :  { %3198 = vpow2.f32 %v3130_v46 }
 0x630   :  { %v3197_v47 = vpop.eup %3196 }
 0x631   :  { %v3199_v10 = vpop.eup %3198  ;;  %v2912_v25 = vadd.f32 1.0, %v3197_v47  ;;  %v6327_v47 = vld [vmem:[#allocation22_spill] sm:$0xff] }
 0x632   :  { %v2913_v39 = vadd.f32 1.0, %v3199_v10 }
 0x633   :  { %3200 = vrcp.f32 %v2912_v25  ;;  %vm2919_vm9 = vweird.f32 %v2912_v25  ;;  %v2925_v52 = vand.u32 2147483648, %v2912_v25  ;;  %v2923_v6 = vand.u32 2147483647, %v2912_v25 }
 0x634   :  { %3202 = vrcp.f32 %v2913_v39  ;;  %v2940_v34 = vand.u32 2147483648, %v2913_v39  ;;  %v2938_v8 = vand.u32 2147483647, %v2913_v39  ;;  %vm2934_vm5 = vweird.f32 %v2913_v39 }
 0x635   :  { %v2926_v4 = vor.u32 1.1754944e-38, %v2925_v52  ;;  %vm2924_vm4 = vcmp.eq.f32.partialorder %v2923_v6, 8.507059e+37  ;;  %v6331_v6 = vld [vmem:[#allocation28_spill] sm:$0xff] }
 0x636   :  { %v2941_v61 = vor.u32 1.1754944e-38, %v2940_v34  ;;  %vm2939_vm12 = vcmp.eq.f32.partialorder %v2938_v8, 8.507059e+37 }
 0x639   :  { %v3201_v19 = vpop.eup %3200 }
 0x63a   :  { %v3203_v21 = vpop.eup %3202  ;;  %v2915_v58 = vmul.f32 %v3201_v19, %v2912_v25  ;;  %vm2920_vm14 = vweird.f32 %v3201_v19  ;;  %v3210_v25 = vld [vmem:[#allocation4 + $0x30] sm:$0xff] }
 0x63b   :  { %v2930_v35 = vmul.f32 %v3203_v21, %v2913_v39  ;;  %vm2935_vm6 = vweird.f32 %v3203_v21  ;;  %vm2921_vm13 = vmor %vm2919_vm9, %vm2920_vm14 }
 0x63c   :  { %v2916_v7 = vsub.f32 1.0, %v2915_v58  ;;  %vm2936_vm3 = vmor %vm2934_vm5, %vm2935_vm6  ;;  %v3211_v58 = vld [vmem:[#allocation4 + $0x38] sm:$0xff] }
 0x63d   :  { %v2931_v40 = vsub.f32 1.0, %v2930_v35 }
 0x63e   :  { %v2917_v16 = vmul.f32 %v3201_v19, %v2916_v7  ;;  %v6329_v7 = vld [vmem:[#allocation26_spill] sm:$0xff] }
 0x63f   :  { %v2932_v18 = vmul.f32 %v3203_v21, %v2931_v40 }
 0x640   :  { %v2918_v29 = vadd.f32 %v3201_v19, %v2917_v16  ;;  %v3212_v16 = vld [vmem:[#allocation4 + $0x40] sm:$0xff] }
 0x641   :  { %v2933_v23 = vadd.f32 %v3203_v21, %v2932_v18  ;;  %v6330_v18 = vld [vmem:[#allocation27_spill] sm:$0xff] }
 0x642   :  { %v2922_v41 = vsel %vm2921_vm13, %v3201_v19, %v2918_v29  ;;  %v6328_v19 = vld [vmem:[#allocation23_spill] sm:$0xff]  ;;  %v3213_v29 = vld [vmem:[#allocation4 + $0x48] sm:$0xff] }
 0x643   :  { %v2937_v15 = vsel %vm2936_vm3, %v3203_v21, %v2933_v23  ;;  %v2927_v31 = vsel %vm2924_vm4, %v2926_v4, %v2922_v41 }
 0x644   :  { %v2942_v5 = vsel %vm2939_vm12, %v2941_v61, %v2937_v15  ;;  %v3214_v61 = vld [vmem:[#allocation4 + $0x50] sm:$0xff]  ;;  %v6332_v15 = vld [vmem:[#allocation29_spill] sm:$0xff] }
 0x645   :  { %v2946_v59 = vrot.slane %v2942_v5, 7  ;;  %v3215_v5 = vld [vmem:[#allocation4 + $0x58] sm:$0xff] }
 0x647   :  { %v2948_v36 = vsel %vm2947_vm15, %v2927_v31, %v2946_v59  ;;  %v2949_v11 = vsel %vm6316_vm0, %v2927_v31, %v2946_v59  ;;  %v3216_v31 = vld [vmem:[#allocation4 + $0x60] sm:$0xff] }
 0x648   :  { %v2950_v57 = vrot.slane %v2949_v11, 1  ;;  %v2951_v49 = vperm.slane %v2948_v36, 0  ;;  %v2952_v42 = vperm.slane %v2948_v36, 1  ;;  %v3217_v11 = vld [vmem:[#allocation4 + $0x68] sm:$0xff] }
 0x64a   :  { %v2959_v27 = vmul.f32 %v2951_v49, %v6317_v22  ;;  %v2960_v50 = vmul.f32 %v2952_v42, %v6318_v55  ;;  %v2961_v63 = vmul.f32 %v2951_v49, %v6319_v53  ;;  %v2962_v62 = vmul.f32 %v2952_v42, %v6320_v3  ;;  %v3219_v22 = vld [vmem:[#allocation4 + $0x78] sm:$0xff] }
 0x64b   :  { %v2953_v43 = vperm.slane %v2950_v57, 0  ;;  %v2963_v9 = vmul.f32 %v2951_v49, %v6321_v12  ;;  %v2954_v0 = vperm.slane %v2950_v57, 1  ;;  %v2964_v45 = vmul.f32 %v2952_v42, %v6322_v60 }
 0x64c   :  { %v2965_v14 = vmul.f32 %v2951_v49, %v6323_v1  ;;  %v2975_v20 = vadd.f32 %v3204_v13, %v2959_v27  ;;  %v2976_v38 = vadd.f32 %v3205_v17, %v2960_v50  ;;  %v2966_v2 = vmul.f32 %v2952_v42, %v6324_v54  ;;  %v3218_v49 = vld [vmem:[#allocation4 + $0x70] sm:$0xff] }
 0x64d   :  { %v2977_v51 = vadd.f32 %v3206_v33, %v2961_v63  ;;  %v2978_v32 = vadd.f32 %v3207_v48, %v2962_v62  ;;  %v2967_v28 = vmul.f32 %v2953_v43, %v6325_v44  ;;  %v2979_v30 = vadd.f32 %v3208_v37, %v2963_v9 }
 0x64e   :  { %2991 = vst [vmem:[#allocation9] sm:$0xff] %v2975_v20  ;;  %v2968_v26 = vmul.f32 %v2954_v0, %v6326_v56  ;;  %v2980_v46 = vadd.f32 %v3209_v24, %v2964_v45  ;;  %v2969_v10 = vmul.f32 %v2953_v43, %v6327_v47  ;;  %v2981_v39 = vadd.f32 %v3210_v25, %v2965_v14 }
 0x64f   :  { %2992 = vst [vmem:[#allocation9 + $0x8] sm:$0xff] %v2976_v38  ;;  %v2970_v21 = vmul.f32 %v2954_v0, %v6328_v19  ;;  %v2982_v35 = vadd.f32 %v3211_v58, %v2966_v2  ;;  %v2971_v40 = vmul.f32 %v2953_v43, %v6329_v7  ;;  %v2983_v34 = vadd.f32 %v3212_v16, %v2967_v28 }
 0x650   :  { %2993 = vst [vmem:[#allocation9 + $0x10] sm:$0xff] %v2977_v51  ;;  %v2972_v8 = vmul.f32 %v2954_v0, %v6330_v18  ;;  %v2984_v52 = vadd.f32 %v3213_v29, %v2968_v26  ;;  %v2973_v23 = vmul.f32 %v2953_v43, %v6331_v6  ;;  %v2985_v41 = vadd.f32 %v3214_v61, %v2969_v10 }
 0x651   :  { %2994 = vst [vmem:[#allocation9 + $0x18] sm:$0xff] %v2978_v32  ;;  %v2974_v4 = vmul.f32 %v2954_v0, %v6332_v15  ;;  %v2986_v59 = vadd.f32 %v3215_v5, %v2970_v21  ;;  %v2987_v36 = vadd.f32 %v3216_v31, %v2971_v40 }
 0x652   :  { %2995 = vst [vmem:[#allocation9 + $0x20] sm:$0xff] %v2979_v30  ;;  %v2988_v57 = vadd.f32 %v3217_v11, %v2972_v8  ;;  %v2989_v42 = vadd.f32 %v3218_v49, %v2973_v23 }
 0x653   :  { %2996 = vst [vmem:[#allocation9 + $0x28] sm:$0xff] %v2980_v46  ;;  %v2990_v27 = vadd.f32 %v3219_v22, %v2974_v4 }
 0x654   :  { %2997 = vst [vmem:[#allocation9 + $0x30] sm:$0xff] %v2981_v39 }
 0x655   :  { %2998 = vst [vmem:[#allocation9 + $0x38] sm:$0xff] %v2982_v35 }
 0x656   :  { %2999 = vst [vmem:[#allocation9 + $0x40] sm:$0xff] %v2983_v34 }
 0x657   :  { %3000 = vst [vmem:[#allocation9 + $0x48] sm:$0xff] %v2984_v52 }
 0x658   :  { %3001 = vst [vmem:[#allocation9 + $0x50] sm:$0xff] %v2985_v41 }
 0x659   :  { %3002 = vst [vmem:[#allocation9 + $0x58] sm:$0xff] %v2986_v59 }
 0x65a   :  { %3003 = vst [vmem:[#allocation9 + $0x60] sm:$0xff] %v2987_v36 }
 0x65b   :  { %3004 = vst [vmem:[#allocation9 + $0x68] sm:$0xff] %v2988_v57 }
 0x65c   :  { %3005 = vst [vmem:[#allocation9 + $0x70] sm:$0xff] %v2989_v42 }
 0x65d   :  { %3006 = vst [vmem:[#allocation9 + $0x78] sm:$0xff] %v2990_v27 }
 0x65e   :  { %3019 = dma.vmem_to_hbm [thread:$0]  %s3012_s6, 2048, %s3014_s8, [#allocation6], %s3287_s26, %s3287_s26, %s3288_s27  }
 0x65f   :  { %3284 = dma.done.wait [#allocation6], 2048  }
 0x660   :  { %3285 = vsyncadd [#allocation6], 4294965248 }
 0x661   :  { %3024 = vsyncpa [#allocation5], 1 }
 0x662   :  { %3025 = vsyncpa [#allocation6], 1 }
 0x663   :  { %3026 = vsyncpa [#allocation7], 1 }

</bundles_post_ra>
